<compile_context>
chip_gen: v6e
topology: v6e:2x2x1
jax: 0.10.0
libtpu: 0.0.40
codegen_flags: <defaults>
</compile_context>

<pallas_src>
import functools
import math

import jax
import jax.numpy as jnp
from jax import lax
from jax.experimental import pallas as pl
from jax.experimental.pallas import tpu as pltpu


# ---------------------------------------------------------------------------
# Roll helpers (jnp.roll convention: out[i] = in[(i - shift) % n])
# ---------------------------------------------------------------------------
def _roll_rows(v, shift):
    """Circular roll of the rows (axis 0) of a rank-2 (R, C) array by +shift."""
    rows, cols = v.shape
    shift = shift % rows
    if shift == 0:
        return v
    if rows % 8 == 0 and cols % 128 == 0:
        # XLU sublane rotate: separate VLIW slot from the VPU minima, no VMEM copy.
        return pltpu.roll(v, shift, 0)
    # Fallback for vreg-unaligned shapes (Mosaic rotate wants (8,128)-aligned tiles).
    hi = lax.slice_in_dim(v, rows - shift, rows, axis=0)
    lo = lax.slice_in_dim(v, 0, rows - shift, axis=0)
    return lax.concatenate([hi, lo], dimension=0)


def _roll_w(v, shift):
    """Circular roll along axis 1 (W) of a rank-3 (H, W, C) array by +shift."""
    # TODO(synk): switch to an XLU sublane rotate (pltpu.roll axis=1) once rank-3
    # rotates for this shape are supported by Mosaic; slice+concat is always legal.
    w = v.shape[1]
    shift = shift % w
    if shift == 0:
        return v
    hi = lax.slice_in_dim(v, w - shift, w, axis=1)
    lo = lax.slice_in_dim(v, 0, w - shift, axis=1)
    return lax.concatenate([hi, lo], dimension=1)


def _min_over_rolls(v, n_shifts, hop, roll_fn):
    """min over {roll_fn(v, j*hop) : j = 0..n_shifts-1} via a log-doubling tree.

    Rolls commute with elementwise min, so ~log2(n_shifts) roll+min steps cover the
    whole shift set instead of one roll+min per shift.  All intermediate shifts stay
    strictly below the axis period, so circular rolls never alias.
    """
    m = v
    covered = 1
    while covered < n_shifts:
        step = min(covered, n_shifts - covered)
        m = jnp.minimum(m, roll_fn(m, step * hop))
        covered += step
    return m


# ---------------------------------------------------------------------------
# Exact (erf-based) GELU with VPU/EUP-only ops
# ---------------------------------------------------------------------------
def _erf(z):
    # Abramowitz & Stegun 7.1.26 polynomial, |err| < 1.5e-7.
    a1, a2, a3, a4, a5 = (0.254829592, -0.284496736, 1.421413741,
                          -1.453152027, 1.061405429)
    p = 0.3275911
    za = jnp.abs(z)
    # EUP approximate reciprocal co-issues with the VPU polynomial (no VALU divide).
    t = pl.reciprocal(1.0 + p * za, approx=True)
    poly = ((((a5 * t + a4) * t + a3) * t + a2) * t + a1) * t
    pos = 1.0 - poly * jnp.exp(-za * za)
    return jnp.where(z >= 0, pos, -pos)


def _gelu_exact(y):
    return 0.5 * y * (1.0 + _erf(y * (1.0 / math.sqrt(2.0))))


# ---------------------------------------------------------------------------
# Fused kernel: aggregation + concat + folded 1x1 conv/BN + GELU
# ---------------------------------------------------------------------------
def _mrconv4d_kernel(x_ref, w_ref, b_ref, y_ref, g_ref, *, K):
    """x_ref: (Nb,H,W,C) f32.  w_ref: (2C,Co) bf16 (BN folded, IO layout).
    b_ref: (1,Co) f32.  y_ref: (Nb,H,W,Co) f32.  g_ref: (Nb,H,W,2C) f32."""
    Nb, H, W, C = x_ref.shape
    HW = H * W
    Co = y_ref.shape[-1]
    n_h = (H - 1) // K + 1          # shift set {0, K, 2K, ...} along H
    n_w = (W - 1) // K + 1          # shift set {0, K, 2K, ...} along W

    cat_blocks = []
    for nb in range(Nb):            # small static unroll (Nb capped by wrapper)
        x3 = x_ref[nb]                          # (H, W, C)
        flat = x3.reshape(HW, C)                # free relayout when W % 8 == 0

        # min over H-hop rolls: on the flat view an H roll by i is a row roll by i*W,
        # executed as an XLU sublane rotate (log-doubling tree).
        m_h = _min_over_rolls(flat, n_h, K * W, _roll_rows)
        # min over W-hop rolls: per-row circular roll on the (H, W, C) view.
        m_w = _min_over_rolls(x3, n_w, K, _roll_w).reshape(HW, C)

        # x_j = max(0, max_s (x - roll_s x)) == x - min over all rolls (incl. shift 0)
        x_j = flat - jnp.minimum(m_h, m_w)

        cat = jnp.concatenate([flat, x_j], axis=-1)                 # (HW, 2C) f32
        g_ref[nb] = cat.reshape(H, W, 2 * C).astype(g_ref.dtype)    # lane-dense store
        cat_blocks.append(cat.astype(jnp.bfloat16))                 # bf16 MXU operand

    big = cat_blocks[0] if Nb == 1 else jnp.concatenate(cat_blocks, axis=0)
    # 1x1 conv with BN + conv-bias folded: single bf16 MXU matmul, f32 accumulation.
    y = jnp.dot(big, w_ref[...], preferred_element_type=jnp.float32)   # (Nb*HW, Co)
    y = _gelu_exact(y + b_ref[...])
    y_ref[...] = y.reshape(Nb, H, W, Co).astype(y_ref.dtype)


# ---------------------------------------------------------------------------
# pallas_call wrapper
# ---------------------------------------------------------------------------
def _pick_batch_block(N, H, W, C, Co, budget_bytes=6 * 1024 * 1024, max_nb=8):
    """Largest divisor of N whose per-step working set fits a conservative VMEM budget
    (keeps the double-buffered footprint well under v5e's 16 MiB default and v7x's
    64 MiB physical VMEM) while amortizing the ~0.35us per-grid-step overhead."""
    per_elem = 4 * H * W * (8 * C + 2 * Co)     # x, min/x_j/cat temporaries, graphs, y
    nb = 1
    for cand in range(2, min(N, max_nb) + 1):
        if N % cand == 0 and cand * per_elem <= budget_bytes:
            nb = cand
    return nb
    # TODO(synk): for very large planes (e.g. 56x56 with C >= 512) add channel/row tile
    # grid axes; this wrapper keeps a full plane per step, which scales with H*W*C.


def mrconv4d_pallas(x, w_folded, b_folded, K, *, batch_block=None,
                    vmem_limit_bytes=32 * 1024 * 1024):
    """x: (N,H,W,C) f32 NHWC.  w_folded: (2C,Co) bf16.  b_folded: (1,Co) f32."""
    N, H, W, C = x.shape
    C2, Co = w_folded.shape
    assert C2 == 2 * C, "folded weight must have 2*in_channels input features"

    Nb = batch_block if batch_block is not None else _pick_batch_block(N, H, W, C, Co)
    assert N % Nb == 0
    grid = (N // Nb,)

    kernel = functools.partial(_mrconv4d_kernel, K=K)
    cost = pl.CostEstimate(
        flops=2 * N * H * W * C2 * Co,
        transcendentals=2 * N * H * W * Co,          # exp + approx reciprocal in GELU
        bytes_accessed=(x.size * 4 + w_folded.size * 2 + b_folded.size * 4
                        + N * H * W * (Co + C2) * 4),
    )

    y, graphs = pl.pallas_call(
        kernel,
        out_shape=(jax.ShapeDtypeStruct((N, H, W, Co), x.dtype),
                   jax.ShapeDtypeStruct((N, H, W, C2), x.dtype)),
        grid_spec=pltpu.PrefetchScalarGridSpec(
            num_scalar_prefetch=0,
            grid=grid,
            in_specs=[
                pl.BlockSpec((Nb, H, W, C), lambda n: (n, 0, 0, 0)),
                pl.BlockSpec((C2, Co), lambda n: (0, 0)),
                pl.BlockSpec((1, Co), lambda n: (0, 0)),
            ],
            out_specs=(
                pl.BlockSpec((Nb, H, W, Co), lambda n: (n, 0, 0, 0)),
                pl.BlockSpec((Nb, H, W, C2), lambda n: (n, 0, 0, 0)),
            ),
        ),
        compiler_params=pltpu.CompilerParams(
            dimension_semantics=("parallel",),       # batch steps independent (megacore)
            vmem_limit_bytes=vmem_limit_bytes),
        cost_estimate=cost,
    )(x, w_folded, b_folded)
    return y, graphs


# ---------------------------------------------------------------------------
# Parameter handling (PyTorch layouts), BN folding, forward, pure-JAX reference
# ---------------------------------------------------------------------------
def init_mrconv4d_params(key, in_channels, out_channels):
    """Deterministic synthetic params.  The module's BatchNorm2d(in_channels*2) on the
    conv output requires out_channels == 2*in_channels."""
    c2 = in_channels * 2
    k1, k2, k3, k4, k5, k6 = jax.random.split(key, 6)
    return dict(
        w=0.1 * jax.random.normal(k1, (out_channels, c2, 1, 1), jnp.float32),  # OIHW
        b=0.1 * jax.random.normal(k2, (out_channels,), jnp.float32),
        gamma=1.0 + 0.1 * jax.random.normal(k3, (c2,), jnp.float32),
        beta=0.1 * jax.random.normal(k4, (c2,), jnp.float32),
        mean=0.1 * jax.random.normal(k5, (c2,), jnp.float32),
        var=jnp.abs(jax.random.normal(k6, (c2,), jnp.float32)) + 0.5,
    )


def fold_bn_conv_params(params, eps=1e-5):
    """Fold eval-mode BatchNorm + conv bias into the 1x1 weight (bf16) / bias (f32)."""
    w_io = jnp.transpose(params['w'][:, :, 0, 0], (1, 0))          # OI -> IO, (2C, Co)
    scale = params['gamma'] * lax.rsqrt(params['var'] + eps)       # (Co,)
    w_folded = (w_io * scale[None, :]).astype(jnp.bfloat16)        # bf16 MXU operand
    b_folded = (params['b'] - params['mean']) * scale + params['beta']
    return w_folded, b_folded.reshape(1, -1).astype(jnp.float32)


def mrconv4d_forward(x, params, K, eps=1e-5):
    """NHWC MRConv4d forward; returns (GELU(BN(Conv1x1(graphs))), graphs)."""
    # TODO(synk): train-mode BatchNorm2d batch statistics are not computed in-kernel;
    # eval-mode running-stat folding is used (inference forward).
    C = x.shape[-1]
    Co = params['w'].shape[0]
    assert Co == 2 * C and params['gamma'].shape[0] == Co, (
        "MRConv4d requires out_channels == 2 * in_channels (BatchNorm2d(in_channels*2))")
    w_folded, b_folded = fold_bn_conv_params(params, eps)
    return mrconv4d_pallas(x, w_folded, b_folded, K)


def mrconv4d_reference(x, params, K, eps=1e-5):
    """Pure-JAX NHWC mirror of the PyTorch forward (f32, eval-mode BN, exact GELU)."""
    H, W = x.shape[1], x.shape[2]
    x_j = jnp.zeros_like(x)
    for i in range(K, H, K):
        x_c = x - jnp.concatenate([x[:, -i:, :, :], x[:, :-i, :, :]], axis=1)
        x_j = jnp.maximum(x_j, x_c)
    for i in range(K, W, K):
        x_r = x - jnp.concatenate([x[:, :, -i:, :], x[:, :, :-i, :]], axis=2)
        x_j = jnp.maximum(x_j, x_r)
    graphs = jnp.concatenate([x, x_j], axis=-1)
    w_io = jnp.transpose(params['w'][:, :, 0, 0], (1, 0))
    y = jnp.einsum('nhwc,co->nhwo', graphs, w_io) + params['b']
    scale = params['gamma'] * lax.rsqrt(params['var'] + eps)
    y = (y - params['mean']) * scale + params['beta']
    y = 0.5 * y * (1.0 + jax.scipy.special.erf(y / jnp.sqrt(2.0)))
    return y, graphs


if __name__ == "__main__":
    # MRConv4d(in_channels=128, out_channels=256, K=2) on a 16x16 plane, batch 2.
    # 128 input channels give full 128-wide lanes and exercise the XLU-rotate fast path
    # (other widths fall back to the slice+concat roll and remain correct).
    in_channels, K = 128, 2
    out_channels = 2 * in_channels
    N, H, W = 2, 16, 16

    key = jax.random.PRNGKey(0)
    kx, kp = jax.random.split(key)
    # NHWC activations (channels on TPU lanes); equivalent to torch NCHW (2,128,16,16).
    x = jax.random.normal(kx, (N, H, W, in_channels), jnp.float32)
    params = init_mrconv4d_params(kp, in_channels, out_channels)

    y, graphs = mrconv4d_forward(x, params, K)
    y, graphs = jax.block_until_ready((y, graphs))

    y_ref, g_ref = mrconv4d_reference(x, params, K)
    assert y.shape == (N, H, W, out_channels)
    assert graphs.shape == (N, H, W, 2 * in_channels)

    # Aggregation + concat are computed exactly in f32 -> graphs must match tightly.
    g_err = float(jnp.max(jnp.abs(graphs - g_ref)))
    assert g_err <= 1e-6, f"graphs max abs err {g_err}"

    # y uses bf16 MXU operands in-kernel -> compare to the f32 reference with a
    # bf16-appropriate tolerance (|err| <= atol + rtol*|ref| with atol=rtol=4e-2).
    y_err = float(jnp.max(jnp.abs(y - y_ref) - 4e-2 * jnp.abs(y_ref)))
    assert y_err <= 4e-2, f"y (vs f32 ref) excess err {y_err}"

    # Tight check of the conv/BN/GELU path against a matched bf16-operand reference
    # (isolates the erf polynomial / approx reciprocal / MXU from bf16 quantization).
    w_f, b_f = fold_bn_conv_params(params)
    pre = jnp.dot(g_ref.reshape(-1, 2 * in_channels).astype(jnp.bfloat16), w_f,
                  preferred_element_type=jnp.float32) + b_f
    y_bf16_ref = (0.5 * pre * (1.0 + jax.scipy.special.erf(pre / jnp.sqrt(2.0)))
                  ).reshape(y.shape)
    t_err = float(jnp.max(jnp.abs(y - y_bf16_ref) - 1e-2 * jnp.abs(y_bf16_ref)))
    assert t_err <= 1e-2, f"y (vs bf16-matched ref) excess err {t_err}"

    print("KERNEL_OK")
</pallas_src>

<mosaic_0001>
module attributes {stable_mosaic.version = 11 : i64} {
  func.func @_mrconv4d_kernel(%arg0: i32, %arg1: memref<2x16x16x128xf32, #tpu.memory_space<vmem>>, %arg2: memref<256x256xbf16, #tpu.memory_space<vmem>>, %arg3: memref<1x256xf32, #tpu.memory_space<vmem>>, %arg4: memref<2x16x16x256xf32, #tpu.memory_space<vmem>>, %arg5: memref<2x16x16x256xf32, #tpu.memory_space<vmem>>) attributes {dimension_semantics = [#tpu.dimension_semantics<parallel>], iteration_bounds = array<i64: 1>, scalar_prefetch = 0 : i64, scratch_operands = 0 : i64, tpu.core_type = #tpu.core_type<tc>, window_params = [{transform_indices = @transform_0, window_bounds = array<i64: 2, 16, 16, 128>}, {pipeline_mode = #tpu.pipeline_mode<synchronous>, transform_indices = @transform_1, window_bounds = array<i64: 256, 256>}, {pipeline_mode = #tpu.pipeline_mode<synchronous>, transform_indices = @transform_2, window_bounds = array<i64: 1, 256>}, {transform_indices = @transform_3, window_bounds = array<i64: 2, 16, 16, 256>}, {transform_indices = @transform_4, window_bounds = array<i64: 2, 16, 16, 256>}]} {
    %c0 = arith.constant 0 : index
    %c0_0 = arith.constant 0 : index
    %c0_1 = arith.constant 0 : index
    %c0_2 = arith.constant 0 : index
    %0 = vector.load %arg1[%c0, %c0_0, %c0_1, %c0_2] : memref<2x16x16x128xf32, #tpu.memory_space<vmem>>, vector<1x16x16x128xf32>
    %1 = vector.shape_cast %0 : vector<1x16x16x128xf32> to vector<16x16x128xf32>
    %2 = vector.shape_cast %1 : vector<16x16x128xf32> to vector<256x128xf32>
    %c32_i32 = arith.constant 32 : i32
    %3 = tpu.dynamic_rotate %2 by %c32_i32 dim 0 : vector<256x128xf32>, i32 -> vector<256x128xf32>
    %4 = arith.minimumf %2, %3 : vector<256x128xf32>
    %c64_i32 = arith.constant 64 : i32
    %5 = tpu.dynamic_rotate %4 by %c64_i32 dim 0 : vector<256x128xf32>, i32 -> vector<256x128xf32>
    %6 = arith.minimumf %4, %5 : vector<256x128xf32>
    %c128_i32 = arith.constant 128 : i32
    %7 = tpu.dynamic_rotate %6 by %c128_i32 dim 0 : vector<256x128xf32>, i32 -> vector<256x128xf32>
    %8 = arith.minimumf %6, %7 : vector<256x128xf32>
    %9 = vector.extract_strided_slice %1 {offsets = [0, 14, 0], sizes = [16, 2, 128], strides = [1, 1, 1]} : vector<16x16x128xf32> to vector<16x2x128xf32>
    %10 = vector.extract_strided_slice %1 {offsets = [0, 0, 0], sizes = [16, 14, 128], strides = [1, 1, 1]} : vector<16x16x128xf32> to vector<16x14x128xf32>
    %11 = tpu.concatenate %9, %10 in 1 : vector<16x2x128xf32>, vector<16x14x128xf32> -> vector<16x16x128xf32>
    %12 = arith.minimumf %1, %11 : vector<16x16x128xf32>
    %13 = vector.extract_strided_slice %12 {offsets = [0, 12, 0], sizes = [16, 4, 128], strides = [1, 1, 1]} : vector<16x16x128xf32> to vector<16x4x128xf32>
    %14 = vector.extract_strided_slice %12 {offsets = [0, 0, 0], sizes = [16, 12, 128], strides = [1, 1, 1]} : vector<16x16x128xf32> to vector<16x12x128xf32>
    %15 = tpu.concatenate %13, %14 in 1 : vector<16x4x128xf32>, vector<16x12x128xf32> -> vector<16x16x128xf32>
    %16 = arith.minimumf %12, %15 : vector<16x16x128xf32>
    %17 = vector.extract_strided_slice %16 {offsets = [0, 8, 0], sizes = [16, 8, 128], strides = [1, 1, 1]} : vector<16x16x128xf32> to vector<16x8x128xf32>
    %18 = vector.extract_strided_slice %16 {offsets = [0, 0, 0], sizes = [16, 8, 128], strides = [1, 1, 1]} : vector<16x16x128xf32> to vector<16x8x128xf32>
    %19 = tpu.concatenate %17, %18 in 1 : vector<16x8x128xf32>, vector<16x8x128xf32> -> vector<16x16x128xf32>
    %20 = arith.minimumf %16, %19 : vector<16x16x128xf32>
    %21 = vector.shape_cast %20 : vector<16x16x128xf32> to vector<256x128xf32>
    %22 = arith.minimumf %8, %21 : vector<256x128xf32>
    %23 = arith.subf %2, %22 : vector<256x128xf32>
    %24 = tpu.concatenate %2, %23 in 1 : vector<256x128xf32>, vector<256x128xf32> -> vector<256x256xf32>
    %25 = vector.shape_cast %24 : vector<256x256xf32> to vector<16x16x256xf32>
    %c0_3 = arith.constant 0 : index
    %c0_4 = arith.constant 0 : index
    %c0_5 = arith.constant 0 : index
    %c0_6 = arith.constant 0 : index
    %26 = vector.load %arg5[%c0_3, %c0_4, %c0_5, %c0_6] : memref<2x16x16x256xf32, #tpu.memory_space<vmem>>, vector<1x16x16x256xf32>
    %27 = vector.shape_cast %26 : vector<1x16x16x256xf32> to vector<16x16x256xf32>
    %28 = vector.shape_cast %25 : vector<16x16x256xf32> to vector<1x16x16x256xf32>
    tpu.vector_store %arg5[%c0_3, %c0_4, %c0_5, %c0_6], %28 {strides = array<i32>} : memref<2x16x16x256xf32, #tpu.memory_space<vmem>>, vector<1x16x16x256xf32>,
    %29 = arith.truncf %24 : vector<256x256xf32> to vector<256x256xbf16>
    %c1 = arith.constant 1 : index
    %c0_7 = arith.constant 0 : index
    %c0_8 = arith.constant 0 : index
    %c0_9 = arith.constant 0 : index
    %30 = vector.load %arg1[%c1, %c0_7, %c0_8, %c0_9] : memref<2x16x16x128xf32, #tpu.memory_space<vmem>>, vector<1x16x16x128xf32>
    %31 = vector.shape_cast %30 : vector<1x16x16x128xf32> to vector<16x16x128xf32>
    %32 = vector.shape_cast %31 : vector<16x16x128xf32> to vector<256x128xf32>
    %c32_i32_10 = arith.constant 32 : i32
    %33 = tpu.dynamic_rotate %32 by %c32_i32_10 dim 0 : vector<256x128xf32>, i32 -> vector<256x128xf32>
    %34 = arith.minimumf %32, %33 : vector<256x128xf32>
    %c64_i32_11 = arith.constant 64 : i32
    %35 = tpu.dynamic_rotate %34 by %c64_i32_11 dim 0 : vector<256x128xf32>, i32 -> vector<256x128xf32>
    %36 = arith.minimumf %34, %35 : vector<256x128xf32>
    %c128_i32_12 = arith.constant 128 : i32
    %37 = tpu.dynamic_rotate %36 by %c128_i32_12 dim 0 : vector<256x128xf32>, i32 -> vector<256x128xf32>
    %38 = arith.minimumf %36, %37 : vector<256x128xf32>
    %39 = vector.extract_strided_slice %31 {offsets = [0, 14, 0], sizes = [16, 2, 128], strides = [1, 1, 1]} : vector<16x16x128xf32> to vector<16x2x128xf32>
    %40 = vector.extract_strided_slice %31 {offsets = [0, 0, 0], sizes = [16, 14, 128], strides = [1, 1, 1]} : vector<16x16x128xf32> to vector<16x14x128xf32>
    %41 = tpu.concatenate %39, %40 in 1 : vector<16x2x128xf32>, vector<16x14x128xf32> -> vector<16x16x128xf32>
    %42 = arith.minimumf %31, %41 : vector<16x16x128xf32>
    %43 = vector.extract_strided_slice %42 {offsets = [0, 12, 0], sizes = [16, 4, 128], strides = [1, 1, 1]} : vector<16x16x128xf32> to vector<16x4x128xf32>
    %44 = vector.extract_strided_slice %42 {offsets = [0, 0, 0], sizes = [16, 12, 128], strides = [1, 1, 1]} : vector<16x16x128xf32> to vector<16x12x128xf32>
    %45 = tpu.concatenate %43, %44 in 1 : vector<16x4x128xf32>, vector<16x12x128xf32> -> vector<16x16x128xf32>
    %46 = arith.minimumf %42, %45 : vector<16x16x128xf32>
    %47 = vector.extract_strided_slice %46 {offsets = [0, 8, 0], sizes = [16, 8, 128], strides = [1, 1, 1]} : vector<16x16x128xf32> to vector<16x8x128xf32>
    %48 = vector.extract_strided_slice %46 {offsets = [0, 0, 0], sizes = [16, 8, 128], strides = [1, 1, 1]} : vector<16x16x128xf32> to vector<16x8x128xf32>
    %49 = tpu.concatenate %47, %48 in 1 : vector<16x8x128xf32>, vector<16x8x128xf32> -> vector<16x16x128xf32>
    %50 = arith.minimumf %46, %49 : vector<16x16x128xf32>
    %51 = vector.shape_cast %50 : vector<16x16x128xf32> to vector<256x128xf32>
    %52 = arith.minimumf %38, %51 : vector<256x128xf32>
    %53 = arith.subf %32, %52 : vector<256x128xf32>
    %54 = tpu.concatenate %32, %53 in 1 : vector<256x128xf32>, vector<256x128xf32> -> vector<256x256xf32>
    %55 = vector.shape_cast %54 : vector<256x256xf32> to vector<16x16x256xf32>
    %c1_13 = arith.constant 1 : index
    %c0_14 = arith.constant 0 : index
    %c0_15 = arith.constant 0 : index
    %c0_16 = arith.constant 0 : index
    %56 = vector.load %arg5[%c1_13, %c0_14, %c0_15, %c0_16] : memref<2x16x16x256xf32, #tpu.memory_space<vmem>>, vector<1x16x16x256xf32>
    %57 = vector.shape_cast %56 : vector<1x16x16x256xf32> to vector<16x16x256xf32>
    %58 = vector.shape_cast %55 : vector<16x16x256xf32> to vector<1x16x16x256xf32>
    tpu.vector_store %arg5[%c1_13, %c0_14, %c0_15, %c0_16], %58 {strides = array<i32>} : memref<2x16x16x256xf32, #tpu.memory_space<vmem>>, vector<1x16x16x256xf32>,
    %59 = arith.truncf %54 : vector<256x256xf32> to vector<256x256xbf16>
    %60 = tpu.concatenate %29, %59 in 0 : vector<256x256xbf16>, vector<256x256xbf16> -> vector<512x256xbf16>
    %c0_17 = arith.constant 0 : index
    %c0_18 = arith.constant 0 : index
    %61 = vector.load %arg2[%c0_17, %c0_18] : memref<256x256xbf16, #tpu.memory_space<vmem>>, vector<256x256xbf16>
    %cst = arith.constant dense<0.000000e+00> : vector<512x256xf32>
    %62 = tpu.matmul %60, %61, %cst {dimension_numbers = #tpu.dot_dimension_numbers<[1], [0], [0], [1], [0, 0, 1, 1], [], []>} : vector<512x256xbf16>, vector<256x256xbf16>, vector<512x256xf32> -> vector<512x256xf32>
    %c0_19 = arith.constant 0 : index
    %c0_20 = arith.constant 0 : index
    %63 = vector.load %arg3[%c0_19, %c0_20] : memref<1x256xf32, #tpu.memory_space<vmem>>, vector<1x256xf32>
    %64 = vector.broadcast %63 : vector<1x256xf32> to vector<512x256xf32>
    %65 = arith.addf %62, %64 : vector<512x256xf32>
    %cst_21 = arith.constant 5.000000e-01 : f32
    %66 = vector.broadcast %cst_21 : f32 to vector<512x256xf32>
    %67 = arith.mulf %66, %65 : vector<512x256xf32>
    %cst_22 = arith.constant 0.707106769 : f32
    %68 = vector.broadcast %cst_22 : f32 to vector<512x256xf32>
    %69 = arith.mulf %65, %68 : vector<512x256xf32>
    %70 = math.absf %69 : vector<512x256xf32>
    %cst_23 = arith.constant 0.327591091 : f32
    %71 = vector.broadcast %cst_23 : f32 to vector<512x256xf32>
    %72 = arith.mulf %71, %70 : vector<512x256xf32>
    %cst_24 = arith.constant 1.000000e+00 : f32
    %73 = vector.broadcast %cst_24 : f32 to vector<512x256xf32>
    %74 = arith.addf %73, %72 : vector<512x256xf32>
    %75 = tpu.reciprocal %74 {approx = true} : vector<512x256xf32> -> vector<512x256xf32>
    %cst_25 = arith.constant 1.06140542 : f32
    %76 = vector.broadcast %cst_25 : f32 to vector<512x256xf32>
    %77 = arith.mulf %76, %75 : vector<512x256xf32>
    %cst_26 = arith.constant -1.45315206 : f32
    %78 = vector.broadcast %cst_26 : f32 to vector<512x256xf32>
    %79 = arith.addf %77, %78 : vector<512x256xf32>
    %80 = arith.mulf %79, %75 : vector<512x256xf32>
    %cst_27 = arith.constant 1.42141378 : f32
    %81 = vector.broadcast %cst_27 : f32 to vector<512x256xf32>
    %82 = arith.addf %80, %81 : vector<512x256xf32>
    %83 = arith.mulf %82, %75 : vector<512x256xf32>
    %cst_28 = arith.constant -0.284496725 : f32
    %84 = vector.broadcast %cst_28 : f32 to vector<512x256xf32>
    %85 = arith.addf %83, %84 : vector<512x256xf32>
    %86 = arith.mulf %85, %75 : vector<512x256xf32>
    %cst_29 = arith.constant 0.254829586 : f32
    %87 = vector.broadcast %cst_29 : f32 to vector<512x256xf32>
    %88 = arith.addf %86, %87 : vector<512x256xf32>
    %89 = arith.mulf %88, %75 : vector<512x256xf32>
    %cst_30 = arith.constant 0.000000e+00 : f32
    %90 = vector.broadcast %cst_30 : f32 to vector<512x256xf32>
    %91 = arith.subf %90, %70 : vector<512x256xf32>
    %92 = arith.mulf %91, %70 : vector<512x256xf32>
    %93 = math.exp %92 : vector<512x256xf32>
    %94 = arith.mulf %89, %93 : vector<512x256xf32>
    %cst_31 = arith.constant 1.000000e+00 : f32
    %95 = vector.broadcast %cst_31 : f32 to vector<512x256xf32>
    %96 = arith.subf %95, %94 : vector<512x256xf32>
    %cst_32 = arith.constant 0.000000e+00 : f32
    %97 = vector.broadcast %cst_32 : f32 to vector<512x256xf32>
    %98 = arith.cmpf oge, %69, %97 : vector<512x256xf32>
    %cst_33 = arith.constant 0.000000e+00 : f32
    %99 = vector.broadcast %cst_33 : f32 to vector<512x256xf32>
    %100 = arith.subf %99, %96 : vector<512x256xf32>
    %101 = arith.select %98, %96, %100 : vector<512x256xi1>, vector<512x256xf32>
    %cst_34 = arith.constant 1.000000e+00 : f32
    %102 = vector.broadcast %cst_34 : f32 to vector<512x256xf32>
    %103 = arith.addf %102, %101 : vector<512x256xf32>
    %104 = arith.mulf %67, %103 : vector<512x256xf32>
    %105 = vector.shape_cast %104 : vector<512x256xf32> to vector<2x16x16x256xf32>
    %c0_35 = arith.constant 0 : index
    %c0_36 = arith.constant 0 : index
    %c0_37 = arith.constant 0 : index
    %c0_38 = arith.constant 0 : index
    %106 = vector.load %arg4[%c0_35, %c0_36, %c0_37, %c0_38] : memref<2x16x16x256xf32, #tpu.memory_space<vmem>>, vector<2x16x16x256xf32>
    tpu.vector_store %arg4[%c0_35, %c0_36, %c0_37, %c0_38], %105 {strides = array<i32>} : memref<2x16x16x256xf32, #tpu.memory_space<vmem>>, vector<2x16x16x256xf32>,
    return
  }
  func.func @transform_0(%arg0: i32) -> (i32, i32, i32, i32) {
    %c0_i32 = arith.constant 0 : i32
    %c0_i32_0 = arith.constant 0 : i32
    %c0_i32_1 = arith.constant 0 : i32
    %c0_i32_2 = arith.constant 0 : i32
    return %arg0, %c0_i32, %c0_i32_0, %c0_i32_1 : i32, i32, i32, i32
  }
  func.func @transform_1(%arg0: i32) -> (i32, i32) {
    %c0_i32 = arith.constant 0 : i32
    %c0_i32_0 = arith.constant 0 : i32
    %c0_i32_1 = arith.constant 0 : i32
    return %c0_i32, %c0_i32_0 : i32, i32
  }
  func.func @transform_2(%arg0: i32) -> (i32, i32) {
    %c0_i32 = arith.constant 0 : i32
    %c0_i32_0 = arith.constant 0 : i32
    %c0_i32_1 = arith.constant 0 : i32
    return %c0_i32, %c0_i32_0 : i32, i32
  }
  func.func @transform_3(%arg0: i32) -> (i32, i32, i32, i32) {
    %c0_i32 = arith.constant 0 : i32
    %c0_i32_0 = arith.constant 0 : i32
    %c0_i32_1 = arith.constant 0 : i32
    %c0_i32_2 = arith.constant 0 : i32
    return %arg0, %c0_i32, %c0_i32_0, %c0_i32_1 : i32, i32, i32, i32
  }
  func.func @transform_4(%arg0: i32) -> (i32, i32, i32, i32) {
    %c0_i32 = arith.constant 0 : i32
    %c0_i32_0 = arith.constant 0 : i32
    %c0_i32_1 = arith.constant 0 : i32
    %c0_i32_2 = arith.constant 0 : i32
    return %arg0, %c0_i32, %c0_i32_0, %c0_i32_1 : i32, i32, i32, i32
  }
}

</mosaic_0001>

<bundles_post_ra>
// kernel: tpu_custom_call.1
= control target key start
LH: loop header
LB: loop body
LE: loop exit
PB: predicated region body
PF: predicated region fallthrough
CT: control target
= control target key end

     0   :  { %10 = vsyncpa [#allocation3], 0  ;;  %s10086_s0 = inlined_call_operand.hbm [shape: f32[2,16,16,128], index: 0, kind: input, shape index: {}]   ;;  %s10087_s1 = inlined_call_operand.hbm [shape: bf16[256,256], index: 1, kind: input, shape index: {}]   ;;  %s10088_s2 = inlined_call_operand.vmem [shape: f32[1,256], index: 2, kind: input, shape index: {}]   ;;  %s10089_s3 = inlined_call_operand.hbm [shape: f32[2,16,16,256], index: 3, kind: output, shape index: {0}]   ;;  %s10090_s4 = inlined_call_operand.hbm [shape: f32[2,16,16,256], index: 4, kind: output, shape index: {1}]  }
   0x1   :  { %11 = vsyncpa [#allocation6], 0 }
   0x2   :  { %12 = vsyncpa [#allocation4], 0 }
   0x3   :  { %13 = vsyncpa [#allocation9], 0  ;;  %s6138_s15 = smov [#allocation2]  }
   0x4   :  { %s19_s16 = sshll.u32 %s6138_s15, 4  ;;  %s20_s16 = int_to_ptr.vmem [resolvable:$true] %s19_s16 }
   0x5   :  { %s6058_s17 = scalar_lea.vmem %s20_s16, 8192  ;;  %p6063_p1 = scmp.lt.s32.totalorder %s20_s16, %s20_s16 }
   0x6   :  { %p6059_p0 = scmp.ne.s32.totalorder %s20_s16, %s6058_s17  ;;  %p6064_p2 = scmp.lt.s32.totalorder %s6058_s17, %s6058_s17 }
   0x8   :  { %p6065_p3 = por %p6064_p2, %p6063_p1 }
   0xa   :  { %p6066_p4 = pnand %p6065_p3, %p6059_p0 }
   0xc   :  { %6069 = shalt.err (!%p6066_p4)
}
   0xd   :  { %s6139_s18 = smov 128   ;;  %s6140_s19 = smov 8  }
   0xe   :  { %25 = dma.hbm_to_vmem [thread:$0]  %s10086_s0, 8192, %s20_s16, [#allocation3], %s6139_s18, %s6139_s18, %s6140_s19  }
   0xf   :  { %s6141_s22 = smov [#allocation5]  }
  0x10   :  { %s31_s23 = sshll.u32 %s6141_s22, 4  ;;  %s32_s23 = int_to_ptr.vmem [resolvable:$true] %s31_s23 }
  0x11   :  { %s6078_s24 = scalar_lea.vmem %s32_s23, 4096  ;;  %p6083_p6 = scmp.lt.s32.totalorder %s32_s23, %s32_s23 }
  0x12   :  { %p6079_p5 = scmp.ne.s32.totalorder %s32_s23, %s6078_s24  ;;  %p6084_p7 = scmp.lt.s32.totalorder %s6078_s24, %s6078_s24 }
  0x14   :  { %p6085_p8 = por %p6084_p7, %p6083_p6 }
  0x16   :  { %p6086_p9 = pnand %p6085_p8, %p6079_p5 }
  0x18   :  { %6089 = shalt.err (!%p6086_p9)
}
  0x19   :  { %37 = dma.hbm_to_vmem [thread:$0]  %s10087_s1, 4096, %s32_s23, [#allocation6], %s6139_s18, %s6139_s18, %s6140_s19  }
  0x1a   :  { %6130 = dma.done.wait [#allocation3], 8192  }
  0x1b   :  { %6131 = vsyncadd [#allocation3], 4294959104 }
  0x1c   :  { %6132 = dma.done.wait [#allocation6], 4096  }
  0x1d   :  { %6133 = vsyncadd [#allocation6], 4294963200  ;;  %v5449_v0 = vld [vmem:[#allocation5 + $0x74] ss:$8 sps:$4 sm:$0xff]   ;;  %v5451_v1 = vld [vmem:[#allocation5 + $0x70] ss:$8 sps:$4 sm:$0xff]  }
  0x1e   :  { %1534 = vmatprep.subr.bf16.mxu0 %v5449_v0  ;;  %5409 = vmatprep.subr.bf16.mxu1 %v5449_v0  ;;  %v5452_v2 = vld [vmem:[#allocation5 + $0x64] ss:$8 sps:$4 sm:$0xff]   ;;  %v5454_v3 = vld [vmem:[#allocation5 + $0x60] ss:$8 sps:$4 sm:$0xff]   ;;  %v5455_v4 = vld [vmem:[#allocation5 + $0x54] ss:$8 sps:$4 sm:$0xff]  }
  0x1f   :  { %1535 = vmatpush1.bf16.msra.mxu0 %v5451_v1  ;;  %5425 = vmatpush1.bf16.msra.mxu1 %v5451_v1  ;;  %v5457_v5 = vld [vmem:[#allocation5 + $0x50] ss:$8 sps:$4 sm:$0xff]   ;;  %v5458_v6 = vld [vmem:[#allocation5 + $0x44] ss:$8 sps:$4 sm:$0xff]   ;;  %v5460_v7 = vld [vmem:[#allocation5 + $0x40] ss:$8 sps:$4 sm:$0xff]  }
  0x20   :  { %1536 = vmatprep.subr.bf16.mxu0 %v5452_v2  ;;  %5410 = vmatprep.subr.bf16.mxu1 %v5452_v2  ;;  %v5461_v8 = vld [vmem:[#allocation5 + $0x34] ss:$8 sps:$4 sm:$0xff]   ;;  %v5463_v9 = vld [vmem:[#allocation5 + $0x30] ss:$8 sps:$4 sm:$0xff]   ;;  %v5464_v10 = vld [vmem:[#allocation5 + $0x24] ss:$8 sps:$4 sm:$0xff]  }
  0x21   :  { %v5466_v11 = vld [vmem:[#allocation5 + $0x20] ss:$8 sps:$4 sm:$0xff]   ;;  %v5467_v12 = vld [vmem:[#allocation5 + $0x14] ss:$8 sps:$4 sm:$0xff]   ;;  %v5469_v13 = vld [vmem:[#allocation5 + $0x10] ss:$8 sps:$4 sm:$0xff]  }
  0x22   :  { %v6177_v14 = vld [vmem:[#allocation2] sm:$0xff]  ;;  %v6179_v15 = vld [vmem:[#allocation2 + $0x8] sm:$0xff]  ;;  %vm222_vm0 = vcmask 1041408   ;;  %vm399_vm1 = vcmask 1043456   ;;  %v6248_v43 = vld [vmem:[#allocation5 + $0xf4] ss:$8 sps:$4 sm:$0xff]  }
  0x23   :  { %1537 = vmatpush1.bf16.msra.mxu0 %v5454_v3  ;;  %5426 = vmatpush1.bf16.msra.mxu1 %v5454_v3  ;;  %10183 = vst [vmem:[#allocation14_spill] sm:$0xff] %v6177_v14  ;;  %10184 = vst [vmem:[#allocation15_spill] sm:$0xff] %v6179_v15  ;;  %v6181_v16 = vld [vmem:[#allocation5 + $0x4] ss:$8 sps:$4 sm:$0xff]   ;;  %v174_v20 = vrot.slane %v6179_v15, 6  ;;  %v223_v21 = vrot.slane %v6177_v14, 6 }
  0x24   :  { %1538 = vmatprep.subr.bf16.mxu0 %v5455_v4  ;;  %5411 = vmatprep.subr.bf16.mxu1 %v5455_v4  ;;  %v6183_v17 = vld [vmem:[#allocation2 + $0x20] sm:$0xff]  ;;  %v6185_v18 = vld [vmem:[#allocation2 + $0x28] sm:$0xff]  ;;  %592 = vst [vmem:[#allocation8] sm:$0xff] %v6177_v14  ;;  %594 = vst [vmem:[#allocation8 + $0x10] sm:$0xff] %v6179_v15 }
  0x25   :  { %v6187_v19 = vld [vmem:[#allocation2 + $0x40] sm:$0xff]  ;;  %v6195_v23 = vld [vmem:[#allocation2 + $0x48] sm:$0xff]  ;;  %600 = vst [vmem:[#allocation8 + $0x40] sm:$0xff] %v6183_v17  ;;  %602 = vst [vmem:[#allocation8 + $0x50] sm:$0xff] %v6185_v18  ;;  %v6206_v27 = vmin.f32 %v6183_v17, %v6177_v14  ;;  %v6210_v28 = vmin.f32 %v6185_v18, %v6179_v15  ;;  %v224_v33 = vsel %vm222_vm0, %v223_v21, %v174_v20 }
  0x26   :  { %v58_v24 = vld [vmem:[#allocation2 + $0x60] sm:$0xff]  ;;  %v59_v25 = vld [vmem:[#allocation2 + $0x68] sm:$0xff]  ;;  %v6199_v26 = vmin.f32 %v6187_v19, %v6183_v17  ;;  %608 = vst [vmem:[#allocation8 + $0x80] sm:$0xff] %v6187_v19  ;;  %v6220_v32 = vmin.f32 %v6195_v23, %v6185_v18  ;;  %v287_v34 = vsel %vm222_vm0, %v174_v20, %v223_v21  ;;  %610 = vst [vmem:[#allocation8 + $0x90] sm:$0xff] %v6195_v23 }
  0x27   :  { %1539 = vmatpush1.bf16.msra.mxu0 %v5457_v5  ;;  %5427 = vmatpush1.bf16.msra.mxu1 %v5457_v5  ;;  %v6212_v29 = vld [vmem:[#allocation2 + $0x80] sm:$0xff]  ;;  %v6214_v30 = vld [vmem:[#allocation2 + $0x88] sm:$0xff]  ;;  %616 = vst [vmem:[#allocation8 + $0xc0] sm:$0xff] %v58_v24  ;;  %618 = vst [vmem:[#allocation8 + $0xd0] sm:$0xff] %v59_v25  ;;  %v6240_v41 = vmin.f32 %v6177_v14, %v287_v34  ;;  %v6243_v42 = vmin.f32 %v6179_v15, %v224_v33 }
  0x28   :  { %1540 = vmatprep.subr.bf16.mxu0 %v5458_v6  ;;  %5412 = vmatprep.subr.bf16.mxu1 %v5458_v6  ;;  %10185 = vst [vmem:[#allocation16_spill] sm:$0xff] %v6199_v26  ;;  %v6216_v31 = vld [vmem:[#allocation2 + $0xa0] sm:$0xff]  ;;  %10186 = vst [vmem:[#allocation17_spill] sm:$0xff] %v6220_v32  ;;  %v6227_v36 = vld [vmem:[#allocation2 + $0xa8] sm:$0xff]  ;;  %v6234_v39 = vmin.f32 %v6212_v29, %v58_v24  ;;  %v6237_v40 = vmin.f32 %v6214_v30, %v59_v25 }
  0x29   :  { %v6225_v35 = vld [vmem:[#allocation5] ss:$8 sps:$4 sm:$0xff]   ;;  %624 = vst [vmem:[#allocation8 + $0x100] sm:$0xff] %v6212_v29  ;;  %626 = vst [vmem:[#allocation8 + $0x110] sm:$0xff] %v6214_v30  ;;  %v6268_v49 = vmin.f32 %v58_v24, %v6187_v19  ;;  %v6271_v50 = vmin.f32 %v59_v25, %v6195_v23  ;;  %v351_v54 = vrot.slane %v6243_v42, 4  ;;  %v400_v59 = vrot.slane %v6240_v41, 4 }
  0x2a   :  { %v6229_v37 = vld [vmem:[#allocation2 + $0xc0] sm:$0xff]  ;;  %v6231_v38 = vld [vmem:[#allocation2 + $0xc8] sm:$0xff]  ;;  %10187 = vst [vmem:[#allocation18_spill] sm:$0xff] %v6234_v39  ;;  %10188 = vst [vmem:[#allocation19_spill] sm:$0xff] %v6237_v40  ;;  %v126_v53 = vmin.f32 %v6234_v39, %v6199_v26  ;;  %v127_v58 = vmin.f32 %v6237_v40, %v6220_v32 }
  0x2b   :  { %1541 = vmatpush1.bf16.msra.mxu0 %v5460_v7  ;;  %5428 = vmatpush1.bf16.msra.mxu1 %v5460_v7  ;;  %632 = vst [vmem:[#allocation8 + $0x140] sm:$0xff] %v6216_v31  ;;  %v6250_v44 = vld [vmem:[#allocation2 + $0xe0] sm:$0xff]  ;;  %v6252_v45 = vld [vmem:[#allocation2 + $0xe8] sm:$0xff]  ;;  %v6256_v46 = vmin.f32 %v6229_v37, %v6216_v31  ;;  %v6260_v47 = vmin.f32 %v6231_v38, %v6227_v36  ;;  %634 = vst [vmem:[#allocation8 + $0x150] sm:$0xff] %v6227_v36 }
  0x2c   :  { %1542 = vmatprep.subr.bf16.mxu0 %v5461_v8  ;;  %5413 = vmatprep.subr.bf16.mxu1 %v5461_v8  ;;  %640 = vst [vmem:[#allocation8 + $0x180] sm:$0xff] %v6229_v37  ;;  %642 = vst [vmem:[#allocation8 + $0x190] sm:$0xff] %v6231_v38  ;;  %v6265_v48 = vld [vmem:[#allocation2 + $0x100] sm:$0xff]  ;;  %v6275_v51 = vmin.f32 %v6177_v14, %v6250_v44  ;;  %v6279_v52 = vmin.f32 %v6179_v15, %v6252_v45  ;;  %v6286_v55 = vld [vmem:[#allocation2 + $0x108] sm:$0xff] }
  0x2d   :  { %10189 = vst [vmem:[#allocation20_spill] sm:$0xff] %v6256_v46  ;;  %10190 = vst [vmem:[#allocation21_spill] sm:$0xff] %v6260_v47  ;;  %v6288_v56 = vld [vmem:[#allocation2 + $0x120] sm:$0xff]  ;;  %v6290_v57 = vld [vmem:[#allocation2 + $0x128] sm:$0xff] }
  0x2e   :  { %10191 = vst [vmem:[#allocation22_spill] sm:$0xff] %v6271_v50  ;;  %10192 = vst [vmem:[#allocation23_spill] sm:$0xff] %v6275_v51  ;;  %v6298_v60 = vld [vmem:[#allocation2 + $0x140] sm:$0xff]  ;;  %v6300_v61 = vld [vmem:[#allocation2 + $0x148] sm:$0xff]  ;;  %v110_v2 = vmin.f32 %v6275_v51, %v6256_v46  ;;  %v111_v3 = vmin.f32 %v6279_v52, %v6260_v47 }
  0x2f   :  { %1543 = vmatpush1.bf16.msra.mxu0 %v5463_v9  ;;  %5429 = vmatpush1.bf16.msra.mxu1 %v5463_v9  ;;  %10193 = vst [vmem:[#allocation24_spill] sm:$0xff] %v6279_v52  ;;  %648 = vst [vmem:[#allocation8 + $0x1c0] sm:$0xff] %v6250_v44  ;;  %v6302_v62 = vld [vmem:[#allocation2 + $0x160] sm:$0xff]  ;;  %v6309_v1 = vld [vmem:[#allocation5 + $0xf0] ss:$8 sps:$4 sm:$0xff]   ;;  %v6323_v7 = vmin.f32 %v6298_v60, %v6288_v56  ;;  %v6327_v8 = vmin.f32 %v6300_v61, %v6290_v57 }
  0x30   :  { %1544 = vmatprep.subr.bf16.mxu0 %v5464_v10  ;;  %5414 = vmatprep.subr.bf16.mxu1 %v5464_v10  ;;  %650 = vst [vmem:[#allocation8 + $0x1d0] sm:$0xff] %v6252_v45  ;;  %1234 = vst [vmem:[#allocation8 + $0x200] sm:$0xff] %v6265_v48  ;;  %v6315_v4 = vld [vmem:[#allocation2 + $0x168] sm:$0xff]  ;;  %v6317_v5 = vld [vmem:[#allocation2 + $0x180] sm:$0xff]  ;;  %v401_v10 = vsel %vm399_vm1, %v400_v59, %v351_v54  ;;  %v6355_v24 = vmin.f32 %v110_v2, %v126_v53 }
  0x31   :  { %10194 = vst [vmem:[#allocation25_spill] sm:$0xff] %v6298_v60  ;;  %10195 = vst [vmem:[#allocation26_spill] sm:$0xff] %v6302_v62  ;;  %v6319_v6 = vld [vmem:[#allocation2 + $0x188] sm:$0xff]  ;;  %v6344_v20 = vmin.f32 %v6317_v5, %v6302_v62  ;;  %v6357_v25 = vmin.f32 %v111_v3, %v127_v58  ;;  %v6384_v2 = vld [vmem:[#allocation2 + $0x10] sm:$0xff] }
  0x32   :  { %1236 = vst [vmem:[#allocation8 + $0x210] sm:$0xff] %v6286_v55  ;;  %1242 = vst [vmem:[#allocation8 + $0x240] sm:$0xff] %v6288_v56  ;;  %v6332_v9 = vld [vmem:[#allocation5 + $0xe4] ss:$8 sps:$4 sm:$0xff]   ;;  %v6348_v21 = vmin.f32 %v6319_v6, %v6315_v4  ;;  %v6386_v3 = vld [vmem:[#allocation2 + $0x18] sm:$0xff] }
  0x33   :  { %1545 = vmatpush1.bf16.msra.mxu0 %v5466_v11  ;;  %5430 = vmatpush1.bf16.msra.mxu1 %v5466_v11  ;;  %1244 = vst [vmem:[#allocation8 + $0x250] sm:$0xff] %v6290_v57  ;;  %10196 = vst [vmem:[#allocation27_spill] sm:$0xff] %v6315_v4  ;;  %v464_v11 = vsel %vm399_vm1, %v351_v54, %v400_v59  ;;  %v6360_v34 = vld [vmem:[#allocation2 + $0x1c8] sm:$0xff]  ;;  %v6362_v54 = vld [vmem:[#allocation2 + $0x1e0] sm:$0xff] }
  0x34   :  { %1546 = vmatprep.subr.bf16.mxu0 %v5467_v12  ;;  %5415 = vmatprep.subr.bf16.mxu1 %v5467_v12  ;;  %10197 = vst [vmem:[#allocation28_spill] sm:$0xff] %v6317_v5  ;;  %10198 = vst [vmem:[#allocation29_spill] sm:$0xff] %v6319_v6  ;;  %v6336_v12 = vld [vmem:[#allocation2 + $0x1a0] sm:$0xff]  ;;  %v480_v33 = vmin.f32 %v6240_v41, %v464_v11  ;;  %v6364_v59 = vld [vmem:[#allocation2 + $0x1e8] sm:$0xff]  ;;  %v481_v41 = vmin.f32 %v6243_v42, %v401_v10 }
  0x35   :  { %10199 = vst [vmem:[#allocation30_spill] sm:$0xff] %v6323_v7  ;;  %10200 = vst [vmem:[#allocation31_spill] sm:$0xff] %v6327_v8  ;;  %v6375_v53 = vmin.f32 %v6265_v48, %v6362_v54  ;;  %v6379_v58 = vmin.f32 %v6286_v55, %v6364_v59  ;;  %v6391_v10 = vld [vmem:[#allocation5 + $0xe0] ss:$8 sps:$4 sm:$0xff]   ;;  %v770_v0 = vmin.f32 %v6348_v21, %v6327_v8  ;;  %v6405_v63 = vld [vmem:[#allocation2 + $0x38] sm:$0xff] }
  0x36   :  { %1250 = vst [vmem:[#allocation8 + $0x280] sm:$0xff] %v6298_v60  ;;  %1252 = vst [vmem:[#allocation8 + $0x290] sm:$0xff] %v6300_v61  ;;  %v6407_v47 = vld [vmem:[#allocation2 + $0x50] sm:$0xff]  ;;  %v6409_v42 = vld [vmem:[#allocation2 + $0x58] sm:$0xff]  ;;  %v512_v46 = vmin.f32 %v480_v33, %v481_v41 }
  0x37   :  { %1547 = vmatpush1.bf16.msra.mxu0 %v5469_v13  ;;  %5431 = vmatpush1.bf16.msra.mxu1 %v5469_v13  ;;  %1258 = vst [vmem:[#allocation8 + $0x2c0] sm:$0xff] %v6302_v62  ;;  %10201 = vst [vmem:[#allocation32_spill] sm:$0xff] %v6336_v12  ;;  %v6338_v13 = vld [vmem:[#allocation2 + $0x1a8] sm:$0xff]  ;;  %v6414_v40 = vld [vmem:[#allocation5 + $0xd4] ss:$8 sps:$4 sm:$0xff]  }
  0x38   :  { %1548 = vmatprep.subr.bf16.mxu0 %v6181_v16  ;;  %5416 = vmatprep.subr.bf16.mxu1 %v6181_v16  ;;  %10202 = vst [vmem:[#allocation33_spill] sm:$0xff] %v6338_v13  ;;  %v6340_v16 = vld [vmem:[#allocation2 + $0x1c0] sm:$0xff]  ;;  %10204 = vst [vmem:[#allocation35_spill] sm:$0xff] %v6344_v20  ;;  %v6399_v22 = vmin.f32 %v6360_v34, %v6338_v13  ;;  %v6428_v26 = vld [vmem:[#allocation2 + $0x70] sm:$0xff] }
  0x39   :  { %10203 = vst [vmem:[#allocation34_spill] sm:$0xff] %v6340_v16  ;;  %10205 = vst [vmem:[#allocation36_spill] sm:$0xff] %v6348_v21  ;;  %v6395_v11 = vmin.f32 %v6340_v16, %v6336_v12  ;;  %v6430_v51 = vld [vmem:[#allocation2 + $0x78] sm:$0xff]  ;;  %v6432_v33 = vld [vmem:[#allocation2 + $0x90] sm:$0xff] }
  0x3a   :  { %1260 = vst [vmem:[#allocation8 + $0x2d0] sm:$0xff] %v6315_v4  ;;  %1266 = vst [vmem:[#allocation8 + $0x300] sm:$0xff] %v6317_v5  ;;  %v6448_v41 = vld [vmem:[#allocation2 + $0xb0] sm:$0xff]  ;;  %v6450_v52 = vld [vmem:[#allocation2 + $0xb8] sm:$0xff] }
  0x3b   :  { %1268 = vst [vmem:[#allocation8 + $0x310] sm:$0xff] %v6319_v6  ;;  %1549 = vmatpush1.bf16.msra.mxu0 %v6225_v35  ;;  %5432 = vmatpush1.bf16.msra.mxu1 %v6225_v35  ;;  %10206 = vst [vmem:[#allocation37_spill] sm:$0xff] %v6355_v24  ;;  %v769_v35 = vmin.f32 %v6344_v20, %v6323_v7  ;;  %v10217_v20 = vrot.slane %v6286_v55, 6  ;;  %v10218_v7 = vrot.slane %v6265_v48, 6  ;;  %v6507_v6 = vld [vmem:[#allocation2 + $0x150] sm:$0xff]  ;;  %v6541_v5 = vld [vmem:[#allocation2 + $0x198] sm:$0xff] }
  0x3c   :  { %10207 = vst [vmem:[#allocation38_spill] sm:$0xff] %v6357_v25  ;;  %10208 = vst [vmem:[#allocation39_spill] sm:$0xff] %v6360_v34  ;;  %1550 = vmatprep.subr.bf16.mxu0 %v6248_v43  ;;  %5417 = vmatprep.subr.bf16.mxu1 %v6248_v43  ;;  %v6388_v43 = vld [vmem:[#allocation2 + $0x30] sm:$0xff]  ;;  %v6563_v60 = vld [vmem:[#allocation2 + $0x1d8] sm:$0xff] }
  0x3d   :  { %10209 = vst [vmem:[#allocation40_spill] sm:$0xff] %v6362_v54  ;;  %10210 = vst [vmem:[#allocation41_spill] sm:$0xff] %v6364_v59  ;;  %v866_v21 = vsel %vm222_vm0, %v10218_v7, %v10217_v20  ;;  %v10219_v8 = vmov %v10218_v7  ;;  %v10220_v39 = vmov %v10217_v20  ;;  %v754_v7 = vmin.f32 %v6379_v58, %v6399_v22  ;;  %v6446_v20 = vld [vmem:[#allocation2 + $0x98] sm:$0xff]  ;;  %v6543_v4 = vld [vmem:[#allocation2 + $0x1b0] sm:$0xff] }
  0x3e   :  { %1274 = vst [vmem:[#allocation8 + $0x340] sm:$0xff] %v6336_v12  ;;  %1276 = vst [vmem:[#allocation8 + $0x350] sm:$0xff] %v6338_v13  ;;  %v929_v32 = vsel %vm222_vm0, %v10220_v39, %v10219_v8  ;;  %v753_v39 = vmin.f32 %v6375_v53, %v6395_v11  ;;  %v6503_v13 = vld [vmem:[#allocation2 + $0x130] sm:$0xff]  ;;  %v6529_v12 = vld [vmem:[#allocation2 + $0x178] sm:$0xff] }
  0x3f   :  { %1282 = vst [vmem:[#allocation8 + $0x380] sm:$0xff] %v6340_v16  ;;  %10211 = vst [vmem:[#allocation42_spill] sm:$0xff] %v6375_v53  ;;  %1551 = vmatpush2.bf16.msra.mxu0 %v6309_v1  ;;  %5433 = vmatpush2.bf16.msra.mxu1 %v6309_v1  ;;  %v6444_v8 = vmin.f32 %v6265_v48, %v929_v32  ;;  %v528_v32 = vmin.f32 %v6355_v24, %v512_v46  ;;  %v6480_v24 = vld [vmem:[#allocation2 + $0xf8] sm:$0xff]  ;;  %v6489_v53 = vld [vmem:[#allocation2 + $0x110] sm:$0xff] }
  0x40   :  { %10212 = vst [vmem:[#allocation43_spill] sm:$0xff] %v6379_v58  ;;  %1284 = vst [vmem:[#allocation8 + $0x390] sm:$0xff] %v6360_v34  ;;  %1552 = vmatprep.subr.bf16.mxu0 %v6332_v9  ;;  %5418 = vmatprep.subr.bf16.mxu1 %v6332_v9  ;;  %v529_v1 = vmin.f32 %v6357_v25, %v512_v46  ;;  %v6463_v58 = vld [vmem:[#allocation2 + $0xd0] sm:$0xff]  ;;  %v6475_v46 = vmin.f32 %v753_v39, %v769_v35  ;;  %v6491_v35 = vld [vmem:[#allocation2 + $0x118] sm:$0xff] }
  0x41   :  { %1290 = vst [vmem:[#allocation8 + $0x3c0] sm:$0xff] %v6362_v54  ;;  %1292 = vst [vmem:[#allocation8 + $0x3d0] sm:$0xff] %v6364_v59  ;;  %v6465_v59 = vld [vmem:[#allocation2 + $0xd8] sm:$0xff]  ;;  %v1041_v25 = vrot.slane %v6444_v8, 4  ;;  %v560_v39 = vsub.f32 %v6177_v14, %v528_v32  ;;  %v6500_v16 = vmin.f32 %v6386_v3, %v6480_v24  ;;  %v6515_v32 = vmin.f32 %v6407_v47, %v6388_v43  ;;  %v6561_v62 = vld [vmem:[#allocation2 + $0x1d0] sm:$0xff] }
  0x42   :  { %10213 = vst [vmem:[#allocation44_spill] sm:$0xff] %v6395_v11  ;;  %10214 = vst [vmem:[#allocation45_spill] sm:$0xff] %v6399_v22  ;;  %v6461_v22 = vmin.f32 %v6286_v55, %v866_v21  ;;  %v6467_v11 = vld [vmem:[#allocation2 + $0xf0] sm:$0xff]  ;;  %v6477_v21 = vmin.f32 %v754_v7, %v770_v0  ;;  %v6493_v0 = vld [vmem:[#allocation5 + $0xc4] ss:$8 sps:$4 sm:$0xff]   ;;  %v561_v7 = vsub.f32 %v6179_v15, %v529_v1 }
  0x43   :  { %10215 = vst [vmem:[#allocation46_spill] sm:$0xff] %v6407_v47  ;;  %10216 = vst [vmem:[#allocation47_spill] sm:$0xff] %v6409_v42  ;;  %v6473_v9 = vld [vmem:[#allocation5 + $0xd0] ss:$8 sps:$4 sm:$0xff]   ;;  %v6484_v34 = vmin.f32 %v6384_v2, %v6467_v11  ;;  %1553 = vmatpush2.bf16.msra.mxu0 %v6391_v10  ;;  %5434 = vmatpush2.bf16.msra.mxu1 %v6391_v10  ;;  %v6519_v1 = vmin.f32 %v6409_v42, %v6405_v63 }
  0x44   :  { %596 = vst [vmem:[#allocation8 + $0x20] sm:$0xff] %v6384_v2  ;;  %598 = vst [vmem:[#allocation8 + $0x30] sm:$0xff] %v6386_v3  ;;  %v993_v54 = vrot.slane %v6461_v22, 4  ;;  %v6525_v14 = vld [vmem:[#allocation2 + $0x158] sm:$0xff]  ;;  %v6527_v15 = vld [vmem:[#allocation2 + $0x170] sm:$0xff]  ;;  %1554 = vmatprep.subr.bf16.mxu0 %v6414_v40  ;;  %5419 = vmatprep.subr.bf16.mxu1 %v6414_v40 }
  0x45   :  { %604 = vst [vmem:[#allocation8 + $0x60] sm:$0xff] %v6388_v43  ;;  %10221 = vst [vmem:[#allocation48_spill] sm:$0xff] %v6428_v26  ;;  %v6559_v10 = vld [vmem:[#allocation2 + $0x1b8] sm:$0xff] }
  0x46   :  { %10222 = vst [vmem:[#allocation49_spill] sm:$0xff] %v6430_v51  ;;  %10223 = vst [vmem:[#allocation50_spill] sm:$0xff] %v6432_v33 }
  0x47   :  { %606 = vst [vmem:[#allocation8 + $0x70] sm:$0xff] %v6405_v63  ;;  %612 = vst [vmem:[#allocation8 + $0xa0] sm:$0xff] %v6407_v47  ;;  %v6539_v47 = vld [vmem:[#allocation2 + $0x190] sm:$0xff]  ;;  %1555 = vmatpush2.bf16.msra.mxu0 %v6473_v9  ;;  %5435 = vmatpush2.bf16.msra.mxu1 %v6473_v9 }
  0x48   :  { %614 = vst [vmem:[#allocation8 + $0xb0] sm:$0xff] %v6409_v42  ;;  %10224 = vst [vmem:[#allocation51_spill] sm:$0xff] %v6446_v20  ;;  %v1042_v42 = vsel %vm399_vm1, %v1041_v25, %v993_v54  ;;  %1556 = vmatprep.subr.bf16.mxu0 %v6493_v0  ;;  %5420 = vmatprep.subr.bf16.mxu1 %v6493_v0 }
  0x49   :  { %10225 = vst [vmem:[#allocation52_spill] sm:$0xff] %v6448_v41  ;;  %10226 = vst [vmem:[#allocation53_spill] sm:$0xff] %v6450_v52 }
  0x4a   :  { %620 = vst [vmem:[#allocation8 + $0xe0] sm:$0xff] %v6428_v26  ;;  %622 = vst [vmem:[#allocation8 + $0xf0] sm:$0xff] %v6430_v51 }
  0x4b   :  { %628 = vst [vmem:[#allocation8 + $0x120] sm:$0xff] %v6432_v33  ;;  %10227 = vst [vmem:[#allocation54_spill] sm:$0xff] %v6463_v58 }
  0x4c   :  { %10228 = vst [vmem:[#allocation55_spill] sm:$0xff] %v6465_v59  ;;  %10229 = vst [vmem:[#allocation56_spill] sm:$0xff] %v6467_v11 }
  0x4d   :  { %630 = vst [vmem:[#allocation8 + $0x130] sm:$0xff] %v6446_v20  ;;  %636 = vst [vmem:[#allocation8 + $0x160] sm:$0xff] %v6448_v41 }
  0x4e   :  { %638 = vst [vmem:[#allocation8 + $0x170] sm:$0xff] %v6450_v52  ;;  %10230 = vst [vmem:[#allocation57_spill] sm:$0xff] %v6475_v46 }
  0x4f   :  { %10231 = vst [vmem:[#allocation58_spill] sm:$0xff] %v6477_v21  ;;  %10232 = vst [vmem:[#allocation59_spill] sm:$0xff] %v6480_v24 }
  0x50   :  { %10233 = vst [vmem:[#allocation60_spill] sm:$0xff] %v6484_v34  ;;  %644 = vst [vmem:[#allocation8 + $0x1a0] sm:$0xff] %v6463_v58 }
  0x51   :  { %646 = vst [vmem:[#allocation8 + $0x1b0] sm:$0xff] %v6465_v59  ;;  %652 = vst [vmem:[#allocation8 + $0x1e0] sm:$0xff] %v6467_v11  ;;  %v6505_v11 = vld [vmem:[#allocation2 + $0x138] sm:$0xff] }
  0x52   :  { %10234 = vst [vmem:[#allocation61_spill] sm:$0xff] %v6500_v16  ;;  %654 = vst [vmem:[#allocation8 + $0x1f0] sm:$0xff] %v6480_v24  ;;  %v6523_v24 = vmin.f32 %v6432_v33, %v6428_v26  ;;  %v657_v33 = vpack.c.bf16 %v561_v7, %v560_v39  ;;  %v1105_v26 = vsel %vm399_vm1, %v993_v54, %v1041_v25 }
  0x53   :  { %1238 = vst [vmem:[#allocation8 + $0x220] sm:$0xff] %v6489_v53  ;;  %1240 = vst [vmem:[#allocation8 + $0x230] sm:$0xff] %v6491_v35  ;;  %v6553_v25 = vmin.f32 %v6446_v20, %v6430_v51  ;;  %v6557_v54 = vmin.f32 %v6463_v58, %v6448_v41  ;;  %v6586_v51 = vld [vmem:[#allocation2 + $0x1f8] sm:$0xff] }
  0x54   :  { %10235 = vst [vmem:[#allocation62_spill] sm:$0xff] %v6515_v32  ;;  %10236 = vst [vmem:[#allocation63_spill] sm:$0xff] %v6519_v1  ;;  %1566 = vmatprep.mubr.bf16.mxu0 %v657_v33  ;;  %v6584_v33 = vld [vmem:[#allocation2 + $0x1f0] sm:$0xff] }
  0x55   :  { %10237 = vst [vmem:[#allocation64_spill] sm:$0xff] %v6523_v24  ;;  %10238 = vst [vmem:[#allocation65_spill] sm:$0xff] %v6527_v15 }
  0x56   :  { %10239 = vst [vmem:[#allocation66_spill] sm:$0xff] %v6529_v12  ;;  %1246 = vst [vmem:[#allocation8 + $0x260] sm:$0xff] %v6503_v13 }
  0x57   :  { %1248 = vst [vmem:[#allocation8 + $0x270] sm:$0xff] %v6505_v11  ;;  %1254 = vst [vmem:[#allocation8 + $0x2a0] sm:$0xff] %v6507_v6 }
  0x58   :  { %593 = vst [vmem:[#allocation8 + $0x8] sm:$0xff] %v560_v39  ;;  %595 = vst [vmem:[#allocation8 + $0x18] sm:$0xff] %v561_v7  ;;  %v1121_v39 = vmin.f32 %v6444_v8, %v1105_v26  ;;  %v1122_v7 = vmin.f32 %v6461_v22, %v1042_v42  ;;  %v6570_v22 = vmin.f32 %v6465_v59, %v6450_v52  ;;  %v10246_v42 = vrot.slane %v6386_v3, 6 }
  0x59   :  { %10240 = vst [vmem:[#allocation67_spill] sm:$0xff] %v6539_v47  ;;  %10241 = vst [vmem:[#allocation68_spill] sm:$0xff] %v6541_v5  ;;  %v128_v26 = vmin.f32 %v6523_v24, %v6515_v32  ;;  %v10247_v8 = vrot.slane %v6384_v2, 6  ;;  %v112_v24 = vmin.f32 %v6484_v34, %v6557_v54  ;;  %v5485_v32 = vld [vmem:[#allocation5 + $0xb4] ss:$8 sps:$4 sm:$0xff]   ;;  %v6613_v59 = vmin.f32 %v6489_v53, %v6584_v33 }
  0x5a   :  { %1256 = vst [vmem:[#allocation8 + $0x2b0] sm:$0xff] %v6525_v14  ;;  %1262 = vst [vmem:[#allocation8 + $0x2e0] sm:$0xff] %v6527_v15  ;;  %v10249_v20 = vmov %v10246_v42  ;;  %v113_v9 = vmin.f32 %v6500_v16, %v6570_v22 }
  0x5b   :  { %1264 = vst [vmem:[#allocation8 + $0x2f0] sm:$0xff] %v6529_v12  ;;  %10242 = vst [vmem:[#allocation69_spill] sm:$0xff] %v6553_v25  ;;  %v226_v40 = vsel %vm222_vm0, %v10247_v8, %v10246_v42  ;;  %v10248_v58 = vmov %v10247_v8  ;;  %v5484_v42 = vld [vmem:[#allocation5 + $0xc0] ss:$8 sps:$4 sm:$0xff]   ;;  %v1153_v8 = vmin.f32 %v1121_v39, %v1122_v7  ;;  %v6609_v34 = vmin.f32 %v112_v24, %v128_v26 }
  0x5c   :  { %10243 = vst [vmem:[#allocation70_spill] sm:$0xff] %v6557_v54  ;;  %10244 = vst [vmem:[#allocation71_spill] sm:$0xff] %v6563_v60  ;;  %v288_v41 = vsel %vm222_vm0, %v10249_v20, %v10248_v58  ;;  %v129_v58 = vmin.f32 %v6553_v25, %v6519_v1  ;;  %v818_v20 = vrot.slane %v6491_v35, 6  ;;  %v306_v7 = vmin.f32 %v6386_v3, %v226_v40  ;;  %v5487_v40 = vld [vmem:[#allocation5 + $0xb0] ss:$8 sps:$4 sm:$0xff]  }
  0x5d   :  { %1270 = vst [vmem:[#allocation8 + $0x320] sm:$0xff] %v6539_v47  ;;  %1272 = vst [vmem:[#allocation8 + $0x330] sm:$0xff] %v6541_v5  ;;  %v305_v39 = vmin.f32 %v6384_v2, %v288_v41  ;;  %v867_v25 = vrot.slane %v6489_v53, 6  ;;  %v1169_v54 = vmin.f32 %v6475_v46, %v1153_v8  ;;  %v1170_v1 = vmin.f32 %v6477_v21, %v1153_v8 }
  0x5e   :  { %1278 = vst [vmem:[#allocation8 + $0x360] sm:$0xff] %v6543_v4  ;;  %10245 = vst [vmem:[#allocation72_spill] sm:$0xff] %v6570_v22  ;;  %v6615_v0 = vmin.f32 %v113_v9, %v129_v58  ;;  %v352_v52 = vrot.slane %v306_v7, 4  ;;  %v6619_v41 = vmin.f32 %v6491_v35, %v6586_v51  ;;  %1557 = vmatpush2.bf16.msra.mxu0 %v5484_v42  ;;  %5436 = vmatpush2.bf16.msra.mxu1 %v5484_v42  ;;  %v5488_v58 = vld [vmem:[#allocation5 + $0xa4] ss:$8 sps:$4 sm:$0xff]  }
  0x5f   :  { %10250 = vst [vmem:[#allocation73_spill] sm:$0xff] %v6584_v33  ;;  %10251 = vst [vmem:[#allocation74_spill] sm:$0xff] %v6586_v51  ;;  %v402_v22 = vrot.slane %v305_v39, 4  ;;  %v1201_v46 = vsub.f32 %v6265_v48, %v1169_v54  ;;  %v1202_v24 = vsub.f32 %v6286_v55, %v1170_v1  ;;  %v6625_v26 = vmin.f32 %v6507_v6, %v6503_v13  ;;  %v5491_v54 = vld [vmem:[#allocation5 + $0x94] ss:$8 sps:$4 sm:$0xff]  }
  0x60   :  { %1280 = vst [vmem:[#allocation8 + $0x370] sm:$0xff] %v6559_v10  ;;  %1286 = vst [vmem:[#allocation8 + $0x3a0] sm:$0xff] %v6561_v62  ;;  %1558 = vmatprep.subr.bf16.mxu0 %v5485_v32  ;;  %5421 = vmatprep.subr.bf16.mxu1 %v5485_v32  ;;  %v6632_v42 = vmin.f32 %v6525_v14, %v6505_v11  ;;  %v6637_v8 = vmin.f32 %v6539_v47, %v6527_v15 }
  0x61   :  { %1288 = vst [vmem:[#allocation8 + $0x3b0] sm:$0xff] %v6563_v60  ;;  %1294 = vst [vmem:[#allocation8 + $0x3e0] sm:$0xff] %v6584_v33  ;;  %v403_v9 = vsel %vm399_vm1, %v402_v22, %v352_v52  ;;  %v465_v21 = vsel %vm399_vm1, %v352_v52, %v402_v22  ;;  %v1299_v1 = vpack.c.bf16 %v1202_v24, %v1201_v46 }
  0x62   :  { %1296 = vst [vmem:[#allocation8 + $0x3f0] sm:$0xff] %v6586_v51  ;;  %10252 = vst [vmem:[#allocation75_spill] sm:$0xff] %v6609_v34  ;;  %v482_v16 = vmin.f32 %v305_v39, %v465_v21  ;;  %v483_v51 = vmin.f32 %v306_v7, %v403_v9  ;;  %v6641_v32 = vmin.f32 %v6541_v5, %v6529_v12  ;;  %1559 = vmatpush2.bf16.msra.mxu0 %v5487_v40  ;;  %v5490_v21 = vld [vmem:[#allocation5 + $0xa0] ss:$8 sps:$4 sm:$0xff]  }
  0x63   :  { %10253 = vst [vmem:[#allocation76_spill] sm:$0xff] %v6615_v0  ;;  %1235 = vst [vmem:[#allocation8 + $0x208] sm:$0xff] %v1201_v46  ;;  %v6645_v52 = vmin.f32 %v6561_v62, %v6543_v4  ;;  %v6649_v22 = vmin.f32 %v6563_v60, %v6559_v10  ;;  %v868_v46 = vsel %vm222_vm0, %v867_v25, %v818_v20  ;;  %5437 = vmatpush2.bf16.msra.mxu1 %v5487_v40 }
  0x64   :  { %1237 = vst [vmem:[#allocation8 + $0x218] sm:$0xff] %v1202_v24  ;;  %10254 = vst [vmem:[#allocation77_spill] sm:$0xff] %v6641_v32  ;;  %v513_v39 = vmin.f32 %v482_v16, %v483_v51  ;;  %v771_v7 = vmin.f32 %v6637_v8, %v6625_v26  ;;  %v930_v24 = vsel %vm222_vm0, %v818_v20, %v867_v25  ;;  %1560 = vmatprep.subr.bf16.mxu0 %v5488_v58 }
  0x65   :  { %10255 = vst [vmem:[#allocation78_spill] sm:$0xff] %v6645_v52  ;;  %10256 = vst [vmem:[#allocation79_spill] sm:$0xff] %v6649_v22  ;;  %5422 = vmatprep.subr.bf16.mxu1 %v5488_v58  ;;  %v755_v60 = vmin.f32 %v6613_v59, %v6645_v52  ;;  %v756_v33 = vmin.f32 %v6619_v41, %v6649_v22  ;;  %v772_v40 = vmin.f32 %v6641_v32, %v6632_v42 }
  0x66   :  { %1726 = vmatprep.mubr.bf16.mxu1 %v1299_v1  ;;  %v530_v16 = vmin.f32 %v6609_v34, %v513_v39  ;;  %v531_v25 = vmin.f32 %v6615_v0, %v513_v39  ;;  %v947_v20 = vmin.f32 %v6489_v53, %v930_v24  ;;  %v948_v58 = vmin.f32 %v6491_v35, %v868_v46  ;;  %v5493_v1 = vld [vmem:[#allocation5 + $0x90] ss:$8 sps:$4 sm:$0xff]   ;;  %v10280_v34 = vld [vmem:[#allocation34_spill] sm:$0xff] }
  0x67   :  { %v6667_v9 = vmin.f32 %v755_v60, %v771_v7  ;;  %v6669_v52 = vmin.f32 %v756_v33, %v772_v40  ;;  %1561 = vmatpush2.bf16.msra.mxu0 %v5490_v21  ;;  %5438 = vmatpush2.bf16.msra.mxu1 %v5490_v21  ;;  %v5494_v33 = vld [vmem:[#allocation5 + $0x84] ss:$8 sps:$4 sm:$0xff]   ;;  %v6683_v7 = vmin.f32 %v6216_v31, %v6212_v29  ;;  %v10275_v40 = vld [vmem:[#allocation32_spill] sm:$0xff]  ;;  %v10278_v0 = vld [vmem:[#allocation33_spill] sm:$0xff] }
  0x68   :  { %v6676_v51 = vsub.f32 %v6384_v2, %v530_v16  ;;  %v6679_v39 = vsub.f32 %v6386_v3, %v531_v25  ;;  %v994_v46 = vrot.slane %v948_v58, 4  ;;  %v1043_v60 = vrot.slane %v947_v20, 4  ;;  %1562 = vmatprep.subr.bf16.mxu0 %v5491_v54  ;;  %5423 = vmatprep.subr.bf16.mxu1 %v5491_v54  ;;  %v5496_v25 = vld [vmem:[#allocation5 + $0x80] ss:$8 sps:$4 sm:$0xff]  }
  0x69   :  { %10257 = vst [vmem:[#allocation80_spill] sm:$0xff] %v6667_v9  ;;  %10258 = vst [vmem:[#allocation81_spill] sm:$0xff] %v6669_v52  ;;  %v6687_v24 = vmin.f32 %v6227_v36, %v6214_v30  ;;  %v6691_v21 = vmin.f32 %v6250_v44, %v6229_v37  ;;  %v6702_v30 = vmin.f32 %v6252_v45, %v6231_v38  ;;  %v10263_v38 = vrot.slane %v6185_v18, 6 }
  0x6a   :  { %10259 = vst [vmem:[#allocation82_spill] sm:$0xff] %v6683_v7  ;;  %597 = vst [vmem:[#allocation8 + $0x28] sm:$0xff] %v6676_v51  ;;  %v659_v54 = vpack.c.bf16 %v6679_v39, %v6676_v51  ;;  %v1044_v29 = vsel %vm399_vm1, %v1043_v60, %v994_v46  ;;  %v1106_v31 = vsel %vm399_vm1, %v994_v46, %v1043_v60  ;;  %v10264_v45 = vrot.slane %v6183_v17, 6 }
  0x6b   :  { %10260 = vst [vmem:[#allocation83_spill] sm:$0xff] %v6687_v24  ;;  %10261 = vst [vmem:[#allocation84_spill] sm:$0xff] %v6691_v21  ;;  %v1123_v36 = vmin.f32 %v947_v20, %v1106_v31  ;;  %v1124_v37 = vmin.f32 %v948_v58, %v1044_v29  ;;  %v114_v44 = vmin.f32 %v6206_v27, %v6691_v21  ;;  %1563 = vmatpush2.bf16.msra.mxu0 %v5493_v1  ;;  %v10283_v21 = vld [vmem:[#allocation39_spill] sm:$0xff] }
  0x6c   :  { %599 = vst [vmem:[#allocation8 + $0x38] sm:$0xff] %v6679_v39  ;;  %10262 = vst [vmem:[#allocation85_spill] sm:$0xff] %v6702_v30  ;;  %v130_v16 = vmin.f32 %v6683_v7, %v6268_v49  ;;  %5439 = vmatpush2.bf16.msra.mxu1 %v5493_v1  ;;  %v115_v51 = vmin.f32 %v6210_v28, %v6702_v30  ;;  %v131_v39 = vmin.f32 %v6687_v24, %v6271_v50  ;;  %v10284_v7 = vld [vmem:[#allocation41_spill] sm:$0xff] }
  0x6d   :  { %v228_v20 = vsel %vm222_vm0, %v10264_v45, %v10263_v38  ;;  %1564 = vmatprep.subr.bf16.mxu0 %v5494_v33  ;;  %5424 = vmatprep.subr.bf16.mxu1 %v5494_v33  ;;  %v1154_v46 = vmin.f32 %v1123_v36, %v1124_v37  ;;  %v10266_v1 = vmov %v10264_v45  ;;  %v10267_v29 = vmov %v10263_v38  ;;  %v10271_v45 = vld [vmem:[#allocation26_spill] sm:$0xff] }
  0x6e   :  { %v6718_v60 = vmin.f32 %v114_v44, %v130_v16  ;;  %v289_v31 = vsel %vm222_vm0, %v10267_v29, %v10266_v1  ;;  %v6726_v32 = vmin.f32 %v115_v51, %v131_v39  ;;  %v308_v38 = vmin.f32 %v6185_v18, %v228_v20  ;;  %v10270_v16 = vld [vmem:[#allocation25_spill] sm:$0xff]  ;;  %v10272_v1 = vld [vmem:[#allocation27_spill] sm:$0xff] }
  0x6f   :  { %v307_v22 = vmin.f32 %v6183_v17, %v289_v31  ;;  %v6732_v33 = vmin.f32 %v6288_v56, %v6265_v48  ;;  %v1171_v36 = vmin.f32 %v6667_v9, %v1154_v46  ;;  %v1172_v37 = vmin.f32 %v6669_v52, %v1154_v46  ;;  %1565 = vmatpush2.bf16.msra.mxu0 %v5496_v25  ;;  %v10274_v31 = vld [vmem:[#allocation28_spill] sm:$0xff]  ;;  %v10277_v9 = vld [vmem:[#allocation29_spill] sm:$0xff] }
  0x70   :  { %10265 = vst [vmem:[#allocation86_spill] sm:$0xff] %v6718_v60  ;;  %10268 = vst [vmem:[#allocation87_spill] sm:$0xff] %v6726_v32  ;;  %v6738_v44 = vmin.f32 %v6290_v57, %v6286_v55  ;;  %v6742_v51 = vmin.f32 %v10271_v45, %v10270_v16  ;;  %5440 = vmatpush2.bf16.msra.mxu1 %v5496_v25  ;;  %v353_v39 = vrot.slane %v308_v38, 4  ;;  %v10281_v25 = vld [vmem:[#allocation40_spill] sm:$0xff] }
  0x71   :  { %v404_v20 = vrot.slane %v307_v22, 4  ;;  %v6746_v29 = vmin.f32 %v10272_v1, %v6300_v61  ;;  %v6750_v58 = vmin.f32 %v10275_v40, %v10274_v31  ;;  %v1203_v46 = vsub.f32 %v6489_v53, %v1171_v36  ;;  %v10287_v31 = vld [vmem:[#allocation14_spill] sm:$0xff] }
  0x72   :  { %10269 = vst [vmem:[#allocation88_spill] sm:$0xff] %v6738_v44  ;;  %v1204_v52 = vsub.f32 %v6491_v35, %v1172_v37  ;;  %v6756_v45 = vmin.f32 %v10278_v0, %v10277_v9  ;;  %v6760_v30 = vmin.f32 %v10281_v25, %v10280_v34  ;;  %v6766_v40 = vmin.f32 %v10284_v7, %v10283_v21  ;;  %v10286_v37 = vld [vmem:[#allocation15_spill] sm:$0xff] }
  0x73   :  { %10273 = vst [vmem:[#allocation25_spill] sm:$0xff] %v6746_v29  ;;  %10276 = vst [vmem:[#allocation26_spill] sm:$0xff] %v6750_v58  ;;  %v405_v24 = vsel %vm399_vm1, %v404_v20, %v353_v39  ;;  %v466_v1 = vsel %vm399_vm1, %v353_v39, %v404_v20  ;;  %v773_v36 = vmin.f32 %v6750_v58, %v6742_v51  ;;  %v10300_v20 = vld [vmem:[#allocation50_spill] sm:$0xff] }
  0x74   :  { %10279 = vst [vmem:[#allocation28_spill] sm:$0xff] %v6756_v45  ;;  %10282 = vst [vmem:[#allocation32_spill] sm:$0xff] %v6760_v30  ;;  %v10288_v50 = vpack.c.bf16 %v10286_v37, %v10287_v31  ;;  %v10289_v0 = vpack.c.bf16 %v6286_v55, %v6265_v48  ;;  %v1301_v34 = vpack.c.bf16 %v1204_v52, %v1203_v46  ;;  %v10290_v48 = vrot.slane %v6290_v57, 6  ;;  %v10304_v58 = vld [vmem:[#allocation54_spill] sm:$0xff] }
  0x75   :  { %10285 = vst [vmem:[#allocation29_spill] sm:$0xff] %v6766_v40  ;;  %1239 = vst [vmem:[#allocation8 + $0x228] sm:$0xff] %v1203_v46  ;;  %v484_v9 = vmin.f32 %v307_v22, %v466_v1  ;;  %v485_v39 = vmin.f32 %v308_v38, %v405_v24  ;;  %v757_v7 = vmin.f32 %v6732_v33, %v6760_v30  ;;  %v10291_v55 = vrot.slane %v6288_v56, 6 }
  0x76   :  { %1567 = vmatmul.mubr.bf16.vlgmr.msra.gmra.mxu0 %v10288_v50  ;;  %1727 = vmatmul.mubr.bf16.vlgmr.msra.gmra.mxu1 %v10289_v0  ;;  %1241 = vst [vmem:[#allocation8 + $0x238] sm:$0xff] %v1204_v52  ;;  %v758_v21 = vmin.f32 %v6738_v44, %v6766_v40  ;;  %v774_v50 = vmin.f32 %v6756_v45, %v6746_v29  ;;  %v10301_v0 = vld [vmem:[#allocation52_spill] sm:$0xff]  ;;  %v10303_v40 = vld [vmem:[#allocation53_spill] sm:$0xff]  ;;  %v10306_v44 = vld [vmem:[#allocation55_spill] sm:$0xff] }
  0x77   :  { %1576 = vmatprep.mubr.bf16.mxu0 %v659_v54  ;;  %v870_v52 = vsel %vm222_vm0, %v10291_v55, %v10290_v48  ;;  %1736 = vmatprep.mubr.bf16.mxu1 %v1301_v34  ;;  %v514_v22 = vmin.f32 %v484_v9, %v485_v39  ;;  %v10292_v24 = vmov %v10291_v55  ;;  %v10293_v54 = vmov %v10290_v48  ;;  %v10305_v29 = vld [vmem:[#allocation56_spill] sm:$0xff] }
  0x78   :  { %v931_v38 = vsel %vm222_vm0, %v10293_v54, %v10292_v24  ;;  %v950_v1 = vmin.f32 %v6290_v57, %v870_v52  ;;  %v660_v46 = vpack.c.bf16 %v6185_v18, %v6183_v17  ;;  %v6796_v25 = vmin.f32 %v757_v7, %v773_v36  ;;  %v10296_v7 = vld [vmem:[#allocation46_spill] sm:$0xff]  ;;  %v10298_v52 = vld [vmem:[#allocation47_spill] sm:$0xff]  ;;  %v10299_v24 = vld [vmem:[#allocation49_spill] sm:$0xff] }
  0x79   :  { %v6798_v37 = vmin.f32 %v758_v21, %v774_v50  ;;  %v949_v31 = vmin.f32 %v6288_v56, %v931_v38  ;;  %v532_v34 = vmin.f32 %v6718_v60, %v514_v22  ;;  %v533_v9 = vmin.f32 %v6726_v32, %v514_v22  ;;  %v10297_v21 = vld [vmem:[#allocation48_spill] sm:$0xff]  ;;  %v10302_v60 = vld [vmem:[#allocation51_spill] sm:$0xff] }
  0x7a   :  { %10294 = vst [vmem:[#allocation33_spill] sm:$0xff] %v6796_v25  ;;  %v995_v39 = vrot.slane %v950_v1, 4  ;;  %v6807_v48 = vmin.f32 %v6388_v43, %v6384_v2  ;;  %v6811_v36 = vmin.f32 %v6405_v63, %v6386_v3  ;;  %v6815_v50 = vmin.f32 %v10297_v21, %v10296_v7 }
  0x7b   :  { %10295 = vst [vmem:[#allocation34_spill] sm:$0xff] %v6798_v37  ;;  %v1045_v55 = vrot.slane %v949_v31, 4  ;;  %v6819_v54 = vmin.f32 %v10299_v24, %v10298_v52  ;;  %v564_v22 = vsub.f32 %v6183_v17, %v532_v34  ;;  %v565_v38 = vsub.f32 %v6185_v18, %v533_v9  ;;  %v10307_v17 = vld [vmem:[#allocation59_spill] sm:$0xff] }
  0x7c   :  { %v6825_v32 = vmin.f32 %v10301_v0, %v10300_v20  ;;  %v6829_v45 = vmin.f32 %v10303_v40, %v10302_v60  ;;  %v6835_v24 = vmin.f32 %v10305_v29, %v10304_v58  ;;  %v6839_v34 = vmin.f32 %v10307_v17, %v10306_v44  ;;  %v10318_v58 = vld [vmem:[#allocation74_spill] sm:$0xff] }
  0x7d   :  { %v1046_v30 = vsel %vm399_vm1, %v1045_v55, %v995_v39  ;;  %v1107_v21 = vsel %vm399_vm1, %v995_v39, %v1045_v55  ;;  %v10308_v18 = vpack.c.bf16 %v6386_v3, %v6384_v2  ;;  %v10309_v60 = vpack.c.bf16 %v6491_v35, %v6489_v53  ;;  %601 = vst [vmem:[#allocation8 + $0x48] sm:$0xff] %v564_v22 }
  0x7e   :  { %603 = vst [vmem:[#allocation8 + $0x58] sm:$0xff] %v565_v38  ;;  %v661_v40 = vpack.c.bf16 %v565_v38, %v564_v22  ;;  %v1125_v20 = vmin.f32 %v949_v31, %v1107_v21  ;;  %v1126_v0 = vmin.f32 %v950_v1, %v1046_v30  ;;  %v116_v29 = vmin.f32 %v6807_v48, %v6835_v24 }
  0x7f   :  { %1577 = vmatmul.mubr.bf16.gmra.mxu0 %v10308_v18  ;;  %1737 = vmatmul.mubr.bf16.gmra.mxu1 %v10309_v60  ;;  %v117_v44 = vmin.f32 %v6811_v36, %v6839_v34  ;;  %v132_v2 = vmin.f32 %v6825_v32, %v6815_v50  ;;  %v133_v3 = vmin.f32 %v6829_v45, %v6819_v54  ;;  %v10310_v39 = vrot.slane %v6405_v63, 6 }
  0x80   :  { %1586 = vmatprep.mubr.bf16.mxu0 %v661_v40  ;;  %v1155_v9 = vmin.f32 %v1125_v20, %v1126_v0  ;;  %v10311_v30 = vrot.slane %v6388_v43, 6  ;;  %v6868_v22 = vmin.f32 %v6503_v13, %v6489_v53  ;;  %v6880_v0 = vmin.f32 %v6505_v11, %v6491_v35 }
  0x81   :  { %v10313_v55 = vmov %v10310_v39  ;;  %v6870_v38 = vmin.f32 %v116_v29, %v132_v2  ;;  %v6872_v17 = vmin.f32 %v117_v44, %v133_v3  ;;  %v6884_v53 = vmin.f32 %v6527_v15, %v6507_v6 }
  0x82   :  { %v230_v1 = vsel %vm222_vm0, %v10311_v30, %v10310_v39  ;;  %v10312_v31 = vmov %v10311_v30  ;;  %v1173_v40 = vmin.f32 %v6796_v25, %v1155_v9  ;;  %v1174_v20 = vmin.f32 %v6798_v37, %v1155_v9  ;;  %v10316_v30 = vld [vmem:[#allocation73_spill] sm:$0xff] }
  0x83   :  { %v290_v21 = vsel %vm222_vm0, %v10313_v55, %v10312_v31  ;;  %10314 = vst [vmem:[#allocation40_spill] sm:$0xff] %v6870_v38  ;;  %10315 = vst [vmem:[#allocation39_spill] sm:$0xff] %v6872_v17  ;;  %v310_v60 = vmin.f32 %v6405_v63, %v230_v1  ;;  %v6888_v44 = vmin.f32 %v6529_v12, %v6525_v14  ;;  %v10332_v15 = vrot.slane %v6195_v23, 6 }
  0x84   :  { %v309_v18 = vmin.f32 %v6388_v43, %v290_v21  ;;  %v6892_v3 = vmin.f32 %v6543_v4, %v6539_v47  ;;  %v1205_v9 = vsub.f32 %v6288_v56, %v1173_v40  ;;  %v1206_v39 = vsub.f32 %v6290_v57, %v1174_v20  ;;  %v10317_v21 = vld [vmem:[#allocation71_spill] sm:$0xff] }
  0x85   :  { %v354_v29 = vrot.slane %v310_v60, 4  ;;  %v6898_v35 = vmin.f32 %v6559_v10, %v6541_v5  ;;  %v6902_v1 = vmin.f32 %v10316_v30, %v6561_v62  ;;  %v6908_v4 = vmin.f32 %v10318_v58, %v10317_v21  ;;  %v10327_v5 = vld [vmem:[#allocation17_spill] sm:$0xff] }
  0x86   :  { %v406_v2 = vrot.slane %v309_v18, 4  ;;  %v775_v40 = vmin.f32 %v6892_v3, %v6884_v53  ;;  %1243 = vst [vmem:[#allocation8 + $0x248] sm:$0xff] %v1205_v9  ;;  %1245 = vst [vmem:[#allocation8 + $0x258] sm:$0xff] %v1206_v39  ;;  %v1303_v20 = vpack.c.bf16 %v1206_v39, %v1205_v9  ;;  %v10319_v58 = vrot.slane %v6505_v11, 6 }
  0x87   :  { %1587 = vmatmul.mubr.bf16.gmra.mxu0 %v660_v46  ;;  %v759_v62 = vmin.f32 %v6868_v22, %v6902_v1  ;;  %v760_v30 = vmin.f32 %v6880_v0, %v6908_v4  ;;  %v10323_v25 = vpack.c.bf16 %v6290_v57, %v6288_v56  ;;  %v10328_v57 = vld [vmem:[#allocation18_spill] sm:$0xff]  ;;  %v10333_v12 = vrot.slane %v6187_v19, 6 }
  0x88   :  { %v407_v31 = vsel %vm399_vm1, %v406_v2, %v354_v29  ;;  %v467_v55 = vsel %vm399_vm1, %v354_v29, %v406_v2  ;;  %v776_v29 = vmin.f32 %v6898_v35, %v6888_v44  ;;  %v10320_v2 = vrot.slane %v6503_v13, 6  ;;  %1746 = vmatprep.mubr.bf16.mxu1 %v1303_v20  ;;  %v10325_v20 = vld [vmem:[#allocation16_spill] sm:$0xff] }
  0x89   :  { %v486_v10 = vmin.f32 %v309_v18, %v467_v55  ;;  %v487_v37 = vmin.f32 %v310_v60, %v407_v31  ;;  %v10322_v46 = vmov %v10319_v58  ;;  %1747 = vmatmul.mubr.bf16.gmra.mxu1 %v10323_v25  ;;  %v6934_v47 = vmin.f32 %v759_v62, %v775_v40  ;;  %v10326_v55 = vld [vmem:[#allocation24_spill] sm:$0xff]  ;;  %v10330_v62 = vld [vmem:[#allocation19_spill] sm:$0xff] }
  0x8a   :  { %v872_v21 = vsel %vm222_vm0, %v10320_v2, %v10319_v58  ;;  %v10321_v9 = vmov %v10320_v2  ;;  %v6936_v58 = vmin.f32 %v760_v30, %v776_v29  ;;  %v662_v2 = vpack.c.bf16 %v6405_v63, %v6388_v43  ;;  %v10329_v25 = vld [vmem:[#allocation20_spill] sm:$0xff]  ;;  %v10331_v30 = vld [vmem:[#allocation21_spill] sm:$0xff] }
  0x8b   :  { %v932_v18 = vsel %vm222_vm0, %v10322_v46, %v10321_v9  ;;  %v515_v60 = vmin.f32 %v486_v10, %v487_v37  ;;  %v952_v31 = vmin.f32 %v6505_v11, %v872_v21  ;;  %v10324_v9 = vld [vmem:[#allocation23_spill] sm:$0xff]  ;;  %v119_v56 = vmin.f32 %v10327_v5, %v10326_v55 }
  0x8c   :  { %v951_v39 = vmin.f32 %v6503_v13, %v932_v18  ;;  %v118_v37 = vmin.f32 %v10325_v20, %v10324_v9  ;;  %v134_v40 = vmin.f32 %v10329_v25, %v10328_v57  ;;  %v135_v29 = vmin.f32 %v10331_v30, %v10330_v62 }
  0x8d   :  { %v534_v10 = vmin.f32 %v6870_v38, %v515_v60  ;;  %v535_v21 = vmin.f32 %v6872_v17, %v515_v60  ;;  %v996_v46 = vrot.slane %v952_v31, 4  ;;  %v232_v9 = vsel %vm222_vm0, %v10333_v12, %v10332_v15 }
  0x8e   :  { %v1047_v18 = vrot.slane %v951_v39, 4  ;;  %v6959_v57 = vmin.f32 %v118_v37, %v134_v40  ;;  %v6961_v25 = vmin.f32 %v119_v56, %v135_v29  ;;  %v10334_v30 = vmov %v10333_v12  ;;  %v10338_v37 = vld [vmem:[#allocation44_spill] sm:$0xff]  ;;  %v10339_v40 = vld [vmem:[#allocation43_spill] sm:$0xff] }
  0x8f   :  { %v566_v20 = vsub.f32 %v6388_v43, %v534_v10  ;;  %v567_v60 = vsub.f32 %v6405_v63, %v535_v21  ;;  %v291_v12 = vsel %vm222_vm0, %v10332_v15, %v10334_v30  ;;  %v312_v63 = vmin.f32 %v6195_v23, %v232_v9  ;;  %v10335_v43 = vld [vmem:[#allocation42_spill] sm:$0xff]  ;;  %v10340_v29 = vld [vmem:[#allocation31_spill] sm:$0xff] }
  0x90   :  { %v1048_v17 = vsel %vm399_vm1, %v1047_v18, %v996_v46  ;;  %v1108_v5 = vsel %vm399_vm1, %v996_v46, %v1047_v18  ;;  %v10336_v10 = vld [vmem:[#allocation30_spill] sm:$0xff]  ;;  %v10342_v9 = vrot.slane %v10270_v16, 6 }
  0x91   :  { %v1127_v55 = vmin.f32 %v951_v39, %v1108_v5  ;;  %v1128_v38 = vmin.f32 %v952_v31, %v1048_v17  ;;  %605 = vst [vmem:[#allocation8 + $0x68] sm:$0xff] %v566_v20  ;;  %607 = vst [vmem:[#allocation8 + $0x78] sm:$0xff] %v567_v60  ;;  %v663_v62 = vpack.c.bf16 %v567_v60, %v566_v20  ;;  %v10337_v31 = vld [vmem:[#allocation35_spill] sm:$0xff]  ;;  %v355_v56 = vrot.slane %v312_v63, 4 }
  0x92   :  { %v761_v21 = vmin.f32 %v10336_v10, %v10335_v43  ;;  %v311_v17 = vmin.f32 %v6187_v19, %v291_v12  ;;  %v777_v46 = vmin.f32 %v10338_v37, %v10337_v31  ;;  %v762_v20 = vmin.f32 %v10340_v29, %v10339_v40  ;;  %v10345_v43 = vld [vmem:[#allocation36_spill] sm:$0xff]  ;;  %v10346_v10 = vld [vmem:[#allocation45_spill] sm:$0xff] }
  0x93   :  { %v1156_v39 = vmin.f32 %v1127_v55, %v1128_v38  ;;  %1596 = vmatprep.mubr.bf16.mxu0 %v663_v62  ;;  %v10341_v60 = vrot.slane %v6300_v61, 6  ;;  %v10343_v38 = vmov %v10342_v9  ;;  %v778_v31 = vmin.f32 %v10346_v10, %v10345_v43 }
  0x94   :  { %1597 = vmatmul.mubr.bf16.gmra.mxu0 %v662_v2  ;;  %v408_v12 = vrot.slane %v311_v17, 4  ;;  %v1304_v37 = vpack.c.bf16 %v6505_v11, %v6503_v13  ;;  %v6993_v40 = vmin.f32 %v761_v21, %v777_v46 }
  0x95   :  { %v874_v5 = vsel %vm222_vm0, %v10342_v9, %v10341_v60  ;;  %v10344_v55 = vmov %v10341_v60  ;;  %v1175_v15 = vmin.f32 %v6934_v47, %v1156_v39  ;;  %v1176_v62 = vmin.f32 %v6936_v58, %v1156_v39 }
  0x96   :  { %v933_v30 = vsel %vm222_vm0, %v10344_v55, %v10343_v38  ;;  %v954_v60 = vmin.f32 %v6300_v61, %v874_v5  ;;  %v409_v39 = vsel %vm399_vm1, %v408_v12, %v355_v56  ;;  %v468_v2 = vsel %vm399_vm1, %v355_v56, %v408_v12 }
  0x97   :  { %v953_v29 = vmin.f32 %v10270_v16, %v933_v30  ;;  %v1207_v9 = vsub.f32 %v6503_v13, %v1175_v15  ;;  %v1208_v38 = vsub.f32 %v6505_v11, %v1176_v62  ;;  %v488_v55 = vmin.f32 %v311_v17, %v468_v2  ;;  %v10347_v17 = vld [vmem:[#allocation60_spill] sm:$0xff] }
  0x98   :  { %v489_v18 = vmin.f32 %v312_v63, %v409_v39  ;;  %v997_v43 = vrot.slane %v954_v60, 4  ;;  %v7001_v46 = vmin.f32 %v762_v20, %v778_v31  ;;  %v664_v5 = vpack.c.bf16 %v6195_v23, %v6187_v19  ;;  %v10348_v63 = vld [vmem:[#allocation62_spill] sm:$0xff]  ;;  %v10350_v20 = vld [vmem:[#allocation63_spill] sm:$0xff] }
  0x99   :  { %v1049_v10 = vrot.slane %v953_v29, 4  ;;  %1247 = vst [vmem:[#allocation8 + $0x268] sm:$0xff] %v1207_v9  ;;  %1249 = vst [vmem:[#allocation8 + $0x278] sm:$0xff] %v1208_v38  ;;  %v1305_v21 = vpack.c.bf16 %v1208_v38, %v1207_v9  ;;  %v1306_v13 = vpack.c.bf16 %v6300_v61, %v10270_v16  ;;  %v120_v15 = vmin.f32 %v10348_v63, %v10347_v17  ;;  %v10349_v9 = vld [vmem:[#allocation61_spill] sm:$0xff]  ;;  %v10358_v17 = vld [vmem:[#allocation72_spill] sm:$0xff] }
  0x9a   :  { %v516_v11 = vmin.f32 %v488_v55, %v489_v18  ;;  %v121_v31 = vmin.f32 %v10350_v20, %v10349_v9  ;;  %v10351_v38 = vrot.slane %v10298_v52, 6  ;;  %v10352_v19 = vrot.slane %v10296_v7, 6  ;;  %v10353_v55 = vld [vmem:[#allocation64_spill] sm:$0xff]  ;;  %v6009_v20 = vld [vmem:[#allocation8 + $0x80] sm:$0xff] }
  0x9b   :  { %v1050_v30 = vsel %vm399_vm1, %v1049_v10, %v997_v43  ;;  %v1109_v56 = vsel %vm399_vm1, %v997_v43, %v1049_v10  ;;  %1756 = vmatprep.mubr.bf16.mxu1 %v1305_v21  ;;  %v10354_v43 = vld [vmem:[#allocation70_spill] sm:$0xff] }
  0x9c   :  { %v1129_v62 = vmin.f32 %v953_v29, %v1109_v56  ;;  %v1130_v12 = vmin.f32 %v954_v60, %v1050_v30  ;;  %v234_v39 = vsel %vm222_vm0, %v10352_v19, %v10351_v38  ;;  %1757 = vmatmul.mubr.bf16.gmra.mxu1 %v1304_v37  ;;  %v536_v18 = vmin.f32 %v6959_v57, %v516_v11  ;;  %v10357_v56 = vld [vmem:[#allocation69_spill] sm:$0xff] }
  0x9d   :  { %v537_v2 = vmin.f32 %v6961_v25, %v516_v11  ;;  %v136_v10 = vmin.f32 %v10354_v43, %v10353_v55  ;;  %v10355_v29 = vmov %v10352_v19  ;;  %v10356_v60 = vmov %v10351_v38 }
  0x9e   :  { %v292_v21 = vsel %vm222_vm0, %v10356_v60, %v10355_v29  ;;  %v1157_v30 = vmin.f32 %v1129_v62, %v1130_v12  ;;  %v137_v63 = vmin.f32 %v10358_v17, %v10357_v56  ;;  %v314_v37 = vmin.f32 %v10298_v52, %v234_v39  ;;  %v10359_v39 = vld [vmem:[#allocation78_spill] sm:$0xff] }
  0x9f   :  { %v313_v9 = vmin.f32 %v10296_v7, %v292_v21  ;;  %v568_v38 = vsub.f32 %v6009_v20, %v536_v18  ;;  %v569_v11 = vsub.f32 %v6195_v23, %v537_v2  ;;  %v763_v19 = vmin.f32 %v6625_v26, %v6613_v59  ;;  %v10360_v21 = vld [vmem:[#allocation77_spill] sm:$0xff]  ;;  %v10361_v23 = vld [vmem:[#allocation79_spill] sm:$0xff] }
  0xa0   :  { %v764_v55 = vmin.f32 %v6632_v42, %v6619_v41  ;;  %v1177_v43 = vmin.f32 %v6993_v40, %v1157_v30  ;;  %v1178_v62 = vmin.f32 %v7001_v46, %v1157_v30  ;;  %v356_v12 = vrot.slane %v314_v37, 4 }
  0xa1   :  { %v410_v29 = vrot.slane %v313_v9, 4  ;;  %609 = vst [vmem:[#allocation8 + $0x88] sm:$0xff] %v568_v38  ;;  %611 = vst [vmem:[#allocation8 + $0x98] sm:$0xff] %v569_v11  ;;  %v665_v60 = vpack.c.bf16 %v569_v11, %v568_v38  ;;  %v779_v18 = vmin.f32 %v10359_v39, %v6637_v8  ;;  %v780_v2 = vmin.f32 %v10361_v23, %v10360_v21  ;;  %v10366_v21 = vld [vmem:[#allocation84_spill] sm:$0xff] }
  0xa2   :  { %v875_v59 = vrot.slane %v6507_v6, 6  ;;  %v1209_v26 = vsub.f32 %v10270_v16, %v1177_v43  ;;  %v1210_v41 = vsub.f32 %v6300_v61, %v1178_v62  ;;  %v7047_v56 = vmin.f32 %v120_v15, %v136_v10 }
  0xa3   :  { %v411_v42 = vsel %vm399_vm1, %v410_v29, %v356_v12  ;;  %v469_v30 = vsel %vm399_vm1, %v356_v12, %v410_v29  ;;  %1606 = vmatprep.mubr.bf16.mxu0 %v665_v60  ;;  %v7049_v17 = vmin.f32 %v121_v31, %v137_v63  ;;  %v7051_v11 = vmin.f32 %v763_v19, %v779_v18  ;;  %v10364_v19 = vld [vmem:[#allocation22_spill] sm:$0xff] }
  0xa4   :  { %v490_v20 = vmin.f32 %v313_v9, %v469_v30  ;;  %v491_v8 = vmin.f32 %v314_v37, %v411_v42  ;;  %1251 = vst [vmem:[#allocation8 + $0x288] sm:$0xff] %v1209_v26  ;;  %1253 = vst [vmem:[#allocation8 + $0x298] sm:$0xff] %v1210_v41  ;;  %v1307_v38 = vpack.c.bf16 %v1210_v41, %v1209_v26  ;;  %1607 = vmatmul.mubr.bf16.gmra.mxu0 %v664_v5  ;;  %v10365_v18 = vld [vmem:[#allocation82_spill] sm:$0xff]  ;;  %v7077_v41 = vld [vmem:[#allocation8 + $0xd0] sm:$0xff] }
  0xa5   :  { %v10362_v16 = vrot.slane %v6525_v14, 6  ;;  %v7059_v10 = vmin.f32 %v764_v55, %v780_v2  ;;  %v666_v5 = vpack.c.bf16 %v10298_v52, %v10296_v7  ;;  %v1308_v9 = vpack.c.bf16 %v6525_v14, %v6507_v6  ;;  %v10367_v2 = vld [vmem:[#allocation83_spill] sm:$0xff] }
  0xa6   :  { %v517_v15 = vmin.f32 %v490_v20, %v491_v8  ;;  %1766 = vmatprep.mubr.bf16.mxu1 %v1307_v38  ;;  %v122_v37 = vmin.f32 %v6268_v49, %v6206_v27  ;;  %v123_v12 = vmin.f32 %v10364_v19, %v6210_v28  ;;  %v138_v23 = vmin.f32 %v10366_v21, %v10365_v18  ;;  %v7080_v49 = vld [vmem:[#allocation8 + $0xc0] sm:$0xff]  ;;  %v10369_v19 = vld [vmem:[#allocation88_spill] sm:$0xff]  ;;  %v10374_v18 = vld [vmem:[#allocation29_spill] sm:$0xff] }
  0xa7   :  { %v876_v61 = vsel %vm222_vm0, %v875_v59, %v10362_v16  ;;  %v10363_v43 = vmov %v10362_v16  ;;  %1767 = vmatmul.mubr.bf16.gmra.mxu1 %v1306_v13  ;;  %v180_v27 = vrot.slane %v7077_v41, 6  ;;  %v235_v28 = vrot.slane %v7080_v49, 6 }
  0xa8   :  { %v934_v62 = vsel %vm222_vm0, %v10363_v43, %v875_v59  ;;  %v956_v63 = vmin.f32 %v6525_v14, %v876_v61  ;;  %v538_v55 = vmin.f32 %v7047_v56, %v517_v15  ;;  %v539_v29 = vmin.f32 %v7049_v17, %v517_v15  ;;  %v10368_v59 = vld [vmem:[#allocation85_spill] sm:$0xff] }
  0xa9   :  { %v955_v31 = vmin.f32 %v6507_v6, %v934_v62  ;;  %v139_v26 = vmin.f32 %v10368_v59, %v10367_v2  ;;  %v236_v16 = vsel %vm222_vm0, %v235_v28, %v180_v27  ;;  %v293_v61 = vsel %vm222_vm0, %v180_v27, %v235_v28  ;;  %v10375_v27 = vld [vmem:[#allocation27_spill] sm:$0xff] }
  0xaa   :  { %v998_v60 = vrot.slane %v956_v63, 4  ;;  %v570_v13 = vsub.f32 %v10296_v7, %v538_v55  ;;  %v571_v42 = vsub.f32 %v10298_v52, %v539_v29  ;;  %v315_v62 = vmin.f32 %v7080_v49, %v293_v61  ;;  %v10370_v55 = vld [vmem:[#allocation25_spill] sm:$0xff] }
  0xab   :  { %v1051_v39 = vrot.slane %v955_v31, 4  ;;  %v316_v15 = vmin.f32 %v7077_v41, %v236_v16  ;;  %v765_v7 = vmin.f32 %v6742_v51, %v6732_v33  ;;  %v766_v29 = vmin.f32 %v10370_v55, %v10369_v19 }
  0xac   :  { %613 = vst [vmem:[#allocation8 + $0xa8] sm:$0xff] %v570_v13  ;;  %615 = vst [vmem:[#allocation8 + $0xb8] sm:$0xff] %v571_v42  ;;  %v667_v43 = vpack.c.bf16 %v571_v42, %v570_v13  ;;  %v412_v59 = vrot.slane %v315_v62, 4  ;;  %v823_v28 = vrot.slane %v10375_v27, 6  ;;  %v7100_v13 = vld [vmem:[#allocation8 + $0x2c0] sm:$0xff]  ;;  %v10377_v27 = vld [vmem:[#allocation48_spill] sm:$0xff] }
  0xad   :  { %v1052_v30 = vsel %vm399_vm1, %v1051_v39, %v998_v60  ;;  %v1110_v20 = vsel %vm399_vm1, %v998_v60, %v1051_v39  ;;  %v10373_v39 = vld [vmem:[#allocation28_spill] sm:$0xff]  ;;  %v357_v2 = vrot.slane %v316_v15, 4  ;;  %v877_v42 = vrot.slane %v7100_v13, 6 }
  0xae   :  { %v1131_v8 = vmin.f32 %v955_v31, %v1110_v20  ;;  %v1132_v38 = vmin.f32 %v956_v63, %v1052_v30  ;;  %v10371_v31 = vld [vmem:[#allocation26_spill] sm:$0xff]  ;;  %v10372_v63 = vld [vmem:[#allocation32_spill] sm:$0xff]  ;;  %v782_v21 = vmin.f32 %v10374_v18, %v10373_v39  ;;  %1616 = vmatprep.mubr.bf16.mxu0 %v667_v43  ;;  %v7105_v30 = vmin.f32 %v122_v37, %v138_v23 }
  0xaf   :  { %v781_v60 = vmin.f32 %v10372_v63, %v10371_v31  ;;  %1617 = vmatmul.mubr.bf16.gmra.mxu0 %v666_v5  ;;  %v7107_v20 = vmin.f32 %v123_v12, %v139_v26  ;;  %v878_v16 = vsel %vm222_vm0, %v877_v42, %v823_v28  ;;  %v935_v61 = vsel %vm222_vm0, %v823_v28, %v877_v42  ;;  %v7120_v12 = vld [vmem:[#allocation8 + $0x2d0] sm:$0xff] }
  0xb0   :  { %v1158_v52 = vmin.f32 %v1131_v8, %v1132_v38  ;;  %v413_v8 = vsel %vm399_vm1, %v412_v59, %v357_v2  ;;  %v470_v38 = vsel %vm399_vm1, %v357_v2, %v412_v59  ;;  %v7117_v5 = vmin.f32 %v766_v29, %v782_v21  ;;  %v10376_v2 = vld [vmem:[#allocation49_spill] sm:$0xff] }
  0xb1   :  { %v492_v55 = vmin.f32 %v315_v62, %v470_v38  ;;  %v493_v31 = vmin.f32 %v316_v15, %v413_v8  ;;  %v957_v37 = vmin.f32 %v7100_v13, %v935_v61  ;;  %v958_v23 = vmin.f32 %v7120_v12, %v878_v16  ;;  %v10378_v16 = vld [vmem:[#allocation66_spill] sm:$0xff] }
  0xb2   :  { %v1179_v33 = vmin.f32 %v7051_v11, %v1158_v52  ;;  %v1180_v51 = vmin.f32 %v7059_v10, %v1158_v52  ;;  %v7115_v52 = vmin.f32 %v765_v7, %v781_v60  ;;  %v668_v39 = vpack.c.bf16 %v7077_v41, %v7080_v49 }
  0xb3   :  { %v518_v63 = vmin.f32 %v492_v55, %v493_v31  ;;  %v1310_v62 = vpack.c.bf16 %v7120_v12, %v7100_v13  ;;  %v999_v15 = vrot.slane %v958_v23, 4  ;;  %v1053_v7 = vrot.slane %v957_v37, 4 }
  0xb4   :  { %v1211_v43 = vsub.f32 %v6507_v6, %v1179_v33  ;;  %v1212_v19 = vsub.f32 %v6525_v14, %v1180_v51  ;;  %v124_v29 = vmin.f32 %v6815_v50, %v6807_v48  ;;  %v125_v60 = vmin.f32 %v6819_v54, %v6811_v36 }
  0xb5   :  { %v540_v18 = vmin.f32 %v7105_v30, %v518_v63  ;;  %v541_v21 = vmin.f32 %v7107_v20, %v518_v63  ;;  %v181_v59 = vrot.slane %v10376_v2, 6  ;;  %v237_v28 = vrot.slane %v10377_v27, 6 }
  0xb6   :  { %1255 = vst [vmem:[#allocation8 + $0x2a8] sm:$0xff] %v1211_v43  ;;  %1257 = vst [vmem:[#allocation8 + $0x2b8] sm:$0xff] %v1212_v19  ;;  %v1309_v26 = vpack.c.bf16 %v1212_v19, %v1211_v43  ;;  %v1054_v42 = vsel %vm399_vm1, %v1053_v7, %v999_v15  ;;  %v1111_v48 = vsel %vm399_vm1, %v999_v15, %v1053_v7  ;;  %v824_v61 = vrot.slane %v10378_v16, 6 }
  0xb7   :  { %v140_v36 = vmin.f32 %v6835_v24, %v6825_v32  ;;  %v141_v50 = vmin.f32 %v6839_v34, %v6829_v45  ;;  %v572_v54 = vsub.f32 %v7080_v49, %v540_v18  ;;  %v573_v33 = vsub.f32 %v7077_v41, %v541_v21  ;;  %v7178_v18 = vld [vmem:[#allocation8 + $0x110] sm:$0xff] }
  0xb8   :  { %1776 = vmatprep.mubr.bf16.mxu1 %v1309_v26  ;;  %v1133_v51 = vmin.f32 %v957_v37, %v1111_v48  ;;  %v1134_v8 = vmin.f32 %v958_v23, %v1054_v42  ;;  %v238_v38 = vsel %vm222_vm0, %v237_v28, %v181_v59  ;;  %v294_v14 = vsel %vm222_vm0, %v181_v59, %v237_v28  ;;  %v7181_v28 = vld [vmem:[#allocation8 + $0x100] sm:$0xff] }
  0xb9   :  { %1777 = vmatmul.mubr.bf16.gmra.mxu1 %v1308_v9  ;;  %v767_v6 = vmin.f32 %v6884_v53, %v6868_v22  ;;  %v768_v9 = vmin.f32 %v6888_v44, %v6880_v0  ;;  %617 = vst [vmem:[#allocation8 + $0xc8] sm:$0xff] %v572_v54  ;;  %619 = vst [vmem:[#allocation8 + $0xd8] sm:$0xff] %v573_v33  ;;  %v669_v32 = vpack.c.bf16 %v573_v33, %v572_v54  ;;  %v10379_v22 = vld [vmem:[#allocation65_spill] sm:$0xff]  ;;  %v6016_v48 = vld [vmem:[#allocation8 + $0xe0] sm:$0xff] }
  0xba   :  { %v1159_v45 = vmin.f32 %v1133_v51, %v1134_v8  ;;  %v317_v24 = vmin.f32 %v10377_v27, %v294_v14  ;;  %v318_v34 = vmin.f32 %v10376_v2, %v238_v38  ;;  %v783_v41 = vmin.f32 %v6902_v1, %v6892_v3  ;;  %v7186_v33 = vld [vmem:[#allocation8 + $0x310] sm:$0xff]  ;;  %v7189_v8 = vld [vmem:[#allocation8 + $0x300] sm:$0xff] }
  0xbb   :  { %v784_v49 = vmin.f32 %v6908_v4, %v6898_v35  ;;  %v879_v53 = vrot.slane %v10379_v22, 6  ;;  %1626 = vmatprep.mubr.bf16.mxu0 %v669_v32  ;;  %v7162_v55 = vmin.f32 %v124_v29, %v140_v36  ;;  %v7164_v31 = vmin.f32 %v125_v60, %v141_v50  ;;  %v6017_v36 = vld [vmem:[#allocation8 + $0xf0] sm:$0xff] }
  0xbc   :  { %v1181_v0 = vmin.f32 %v7115_v52, %v1159_v45  ;;  %v1182_v44 = vmin.f32 %v7117_v5, %v1159_v45  ;;  %v358_v43 = vrot.slane %v318_v34, 4  ;;  %v414_v19 = vrot.slane %v317_v24, 4  ;;  %1627 = vmatmul.mubr.bf16.gmra.mxu0 %v668_v39 }
  0xbd   :  { %v880_v3 = vsel %vm222_vm0, %v879_v53, %v824_v61  ;;  %v936_v35 = vsel %vm222_vm0, %v824_v61, %v879_v53  ;;  %v7174_v29 = vmin.f32 %v767_v6, %v783_v41  ;;  %v7176_v60 = vmin.f32 %v768_v9, %v784_v49 }
  0xbe   :  { %v1213_v1 = vsub.f32 %v7100_v13, %v1181_v0  ;;  %v1214_v4 = vsub.f32 %v7120_v12, %v1182_v44  ;;  %v415_v37 = vsel %vm399_vm1, %v414_v19, %v358_v43  ;;  %v471_v23 = vsel %vm399_vm1, %v358_v43, %v414_v19  ;;  %v7205_v44 = vld [vmem:[#allocation8 + $0x130] sm:$0xff] }
  0xbf   :  { %v494_v26 = vmin.f32 %v317_v24, %v471_v23  ;;  %v495_v63 = vmin.f32 %v318_v34, %v415_v37  ;;  %v959_v39 = vmin.f32 %v10379_v22, %v936_v35  ;;  %v960_v15 = vmin.f32 %v10378_v16, %v880_v3 }
  0xc0   :  { %1259 = vst [vmem:[#allocation8 + $0x2c8] sm:$0xff] %v1213_v1  ;;  %1261 = vst [vmem:[#allocation8 + $0x2d8] sm:$0xff] %v1214_v4  ;;  %v1311_v7 = vpack.c.bf16 %v1214_v4, %v1213_v1  ;;  %v182_v21 = vrot.slane %v7178_v18, 6  ;;  %v239_v42 = vrot.slane %v7181_v28, 6  ;;  %v670_v50 = vpack.c.bf16 %v6017_v36, %v6016_v48 }
  0xc1   :  { %v519_v2 = vmin.f32 %v494_v26, %v495_v63  ;;  %v1000_v59 = vrot.slane %v960_v15, 4  ;;  %v1055_v27 = vrot.slane %v959_v39, 4  ;;  %v1312_v54 = vpack.c.bf16 %v10378_v16, %v10379_v22  ;;  %v7212_v26 = vld [vmem:[#allocation8 + $0x120] sm:$0xff] }
  0xc2   :  { %1786 = vmatprep.mubr.bf16.mxu1 %v1311_v7  ;;  %v825_v51 = vrot.slane %v7186_v33, 6  ;;  %v881_v38 = vrot.slane %v7189_v8, 6  ;;  %v240_v34 = vsel %vm222_vm0, %v239_v42, %v182_v21  ;;  %v295_v41 = vsel %vm222_vm0, %v182_v21, %v239_v42  ;;  %v10380_v21 = vld [vmem:[#allocation68_spill] sm:$0xff] }
  0xc3   :  { %1787 = vmatmul.mubr.bf16.gmra.mxu1 %v1310_v62  ;;  %v542_v14 = vmin.f32 %v7162_v55, %v519_v2  ;;  %v543_v6 = vmin.f32 %v7164_v31, %v519_v2  ;;  %v1056_v9 = vsel %vm399_vm1, %v1055_v27, %v1000_v59  ;;  %v1112_v32 = vsel %vm399_vm1, %v1000_v59, %v1055_v27  ;;  %v6022_v59 = vld [vmem:[#allocation8 + $0x2e0] sm:$0xff]  ;;  %v6023_v42 = vld [vmem:[#allocation8 + $0x2f0] sm:$0xff] }
  0xc4   :  { %v1135_v45 = vmin.f32 %v959_v39, %v1112_v32  ;;  %v1136_v24 = vmin.f32 %v960_v15, %v1056_v9  ;;  %v319_v53 = vmin.f32 %v7181_v28, %v295_v41  ;;  %v320_v13 = vmin.f32 %v7178_v18, %v240_v34  ;;  %v10381_v9 = vld [vmem:[#allocation67_spill] sm:$0xff] }
  0xc5   :  { %v574_v49 = vsub.f32 %v6016_v48, %v542_v14  ;;  %v575_v61 = vsub.f32 %v6017_v36, %v543_v6  ;;  %v882_v62 = vsel %vm222_vm0, %v881_v38, %v825_v51  ;;  %v937_v0 = vsel %vm222_vm0, %v825_v51, %v881_v38 }
  0xc6   :  { %v1160_v12 = vmin.f32 %v1135_v45, %v1136_v24  ;;  %v183_v43 = vrot.slane %v7205_v44, 6  ;;  %v359_v3 = vrot.slane %v320_v13, 4  ;;  %v416_v35 = vrot.slane %v319_v53, 4 }
  0xc7   :  { %621 = vst [vmem:[#allocation8 + $0xe8] sm:$0xff] %v574_v49  ;;  %623 = vst [vmem:[#allocation8 + $0xf8] sm:$0xff] %v575_v61  ;;  %v671_v19 = vpack.c.bf16 %v575_v61, %v574_v49  ;;  %v961_v1 = vmin.f32 %v7189_v8, %v937_v0  ;;  %v962_v23 = vmin.f32 %v7186_v33, %v882_v62  ;;  %v241_v63 = vrot.slane %v7212_v26, 6  ;;  %v10383_v62 = vld [vmem:[#allocation38_spill] sm:$0xff] }
  0xc8   :  { %v1183_v4 = vmin.f32 %v7174_v29, %v1160_v12  ;;  %v1184_v37 = vmin.f32 %v7176_v60, %v1160_v12  ;;  %v417_v39 = vsel %vm399_vm1, %v416_v35, %v359_v3  ;;  %v472_v15 = vsel %vm399_vm1, %v359_v3, %v416_v35 }
  0xc9   :  { %1636 = vmatprep.mubr.bf16.mxu0 %v671_v19  ;;  %v1057_v7 = vrot.slane %v961_v1, 4  ;;  %v826_v2 = vrot.slane %v10380_v21, 6  ;;  %v496_v36 = vmin.f32 %v319_v53, %v472_v15  ;;  %v497_v51 = vmin.f32 %v320_v13, %v417_v39  ;;  %v10382_v13 = vld [vmem:[#allocation37_spill] sm:$0xff] }
  0xca   :  { %v1215_v27 = vsub.f32 %v6022_v59, %v1183_v4  ;;  %v1216_v48 = vsub.f32 %v6023_v42, %v1184_v37  ;;  %1637 = vmatmul.mubr.bf16.gmra.mxu0 %v670_v50  ;;  %v1001_v38 = vrot.slane %v962_v23, 4  ;;  %v242_v14 = vsel %vm222_vm0, %v241_v63, %v183_v43  ;;  %v7232_v4 = vld [vmem:[#allocation8 + $0x320] sm:$0xff]  ;;  %v10384_v59 = vld [vmem:[#allocation57_spill] sm:$0xff] }
  0xcb   :  { %v296_v6 = vsel %vm222_vm0, %v183_v43, %v241_v63  ;;  %v883_v32 = vrot.slane %v10381_v9, 6  ;;  %v520_v24 = vmin.f32 %v496_v36, %v497_v51  ;;  %v322_v41 = vmin.f32 %v7205_v44, %v242_v14  ;;  %v7235_v63 = vld [vmem:[#allocation8 + $0x330] sm:$0xff]  ;;  %v10385_v42 = vld [vmem:[#allocation58_spill] sm:$0xff] }
  0xcc   :  { %1263 = vst [vmem:[#allocation8 + $0x2e8] sm:$0xff] %v1215_v27  ;;  %1265 = vst [vmem:[#allocation8 + $0x2f8] sm:$0xff] %v1216_v48  ;;  %v1313_v45 = vpack.c.bf16 %v1216_v48, %v1215_v27  ;;  %v321_v34 = vmin.f32 %v7212_v26, %v296_v6  ;;  %v1058_v49 = vsel %vm399_vm1, %v1057_v7, %v1001_v38 }
  0xcd   :  { %v1113_v50 = vsel %vm399_vm1, %v1001_v38, %v1057_v7  ;;  %v884_v61 = vsel %vm222_vm0, %v883_v32, %v826_v2  ;;  %v938_v53 = vsel %vm222_vm0, %v826_v2, %v883_v32  ;;  %v544_v12 = vmin.f32 %v10382_v13, %v520_v24  ;;  %v7263_v13 = vld [vmem:[#allocation8 + $0x340] sm:$0xff] }
  0xce   :  { %1796 = vmatprep.mubr.bf16.mxu1 %v1313_v45  ;;  %v545_v0 = vmin.f32 %v10383_v62, %v520_v24  ;;  %v1137_v43 = vmin.f32 %v961_v1, %v1113_v50  ;;  %v1138_v19 = vmin.f32 %v962_v23, %v1058_v49  ;;  %v360_v3 = vrot.slane %v322_v41, 4  ;;  %v7252_v24 = vld [vmem:[#allocation8 + $0x150] sm:$0xff]  ;;  %v7255_v49 = vld [vmem:[#allocation8 + $0x140] sm:$0xff]  ;;  %v10386_v62 = vld [vmem:[#allocation75_spill] sm:$0xff] }
  0xcf   :  { %1797 = vmatmul.mubr.bf16.gmra.mxu1 %v1312_v54  ;;  %v418_v35 = vrot.slane %v321_v34, 4  ;;  %v963_v37 = vmin.f32 %v7232_v4, %v938_v53  ;;  %v964_v39 = vmin.f32 %v7235_v63, %v884_v61  ;;  %v576_v15 = vsub.f32 %v7181_v28, %v544_v12  ;;  %v7258_v50 = vld [vmem:[#allocation8 + $0x350] sm:$0xff] }
  0xd0   :  { %v577_v7 = vsub.f32 %v7178_v18, %v545_v0  ;;  %v1161_v1 = vmin.f32 %v1137_v43, %v1138_v19  ;;  %v672_v23 = vpack.c.bf16 %v7178_v18, %v7181_v28  ;;  %v1314_v51 = vpack.c.bf16 %v7186_v33, %v7189_v8  ;;  %v10387_v43 = vld [vmem:[#allocation76_spill] sm:$0xff] }
  0xd1   :  { %v419_v16 = vsel %vm399_vm1, %v418_v35, %v360_v3  ;;  %v473_v22 = vsel %vm399_vm1, %v360_v3, %v418_v35  ;;  %v1002_v54 = vrot.slane %v964_v39, 4  ;;  %v1059_v21 = vrot.slane %v963_v37, 4  ;;  %625 = vst [vmem:[#allocation8 + $0x108] sm:$0xff] %v576_v15 }
  0xd2   :  { %627 = vst [vmem:[#allocation8 + $0x118] sm:$0xff] %v577_v7  ;;  %v673_v2 = vpack.c.bf16 %v577_v7, %v576_v15  ;;  %v1185_v27 = vmin.f32 %v10384_v59, %v1161_v1  ;;  %v1186_v48 = vmin.f32 %v10385_v42, %v1161_v1  ;;  %v498_v36 = vmin.f32 %v321_v34, %v473_v22  ;;  %v10389_v15 = vld [vmem:[#allocation81_spill] sm:$0xff] }
  0xd3   :  { %v499_v38 = vmin.f32 %v322_v41, %v419_v16  ;;  %v1060_v18 = vsel %vm399_vm1, %v1059_v21, %v1002_v54  ;;  %v1114_v28 = vsel %vm399_vm1, %v1002_v54, %v1059_v21  ;;  %v184_v34 = vrot.slane %v7252_v24, 6 }
  0xd4   :  { %1646 = vmatprep.mubr.bf16.mxu0 %v673_v2  ;;  %v1217_v14 = vsub.f32 %v7189_v8, %v1185_v27  ;;  %v1218_v6 = vsub.f32 %v7186_v33, %v1186_v48  ;;  %v1139_v9 = vmin.f32 %v963_v37, %v1114_v28  ;;  %v1140_v32 = vmin.f32 %v964_v39, %v1060_v18  ;;  %v10388_v37 = vld [vmem:[#allocation80_spill] sm:$0xff] }
  0xd5   :  { %1647 = vmatmul.mubr.bf16.gmra.mxu0 %v672_v23  ;;  %v521_v45 = vmin.f32 %v498_v36, %v499_v38  ;;  %v243_v41 = vrot.slane %v7255_v49, 6  ;;  %v827_v61 = vrot.slane %v7258_v50, 6  ;;  %v674_v53 = vpack.c.bf16 %v7205_v44, %v7212_v26  ;;  %v7286_v28 = vld [vmem:[#allocation8 + $0x170] sm:$0xff] }
  0xd6   :  { %1267 = vst [vmem:[#allocation8 + $0x308] sm:$0xff] %v1217_v14  ;;  %1269 = vst [vmem:[#allocation8 + $0x318] sm:$0xff] %v1218_v6  ;;  %v1315_v8 = vpack.c.bf16 %v1218_v6, %v1217_v14  ;;  %v1162_v33 = vmin.f32 %v1139_v9, %v1140_v32  ;;  %v885_v12 = vrot.slane %v7263_v13, 6  ;;  %v1316_v36 = vpack.c.bf16 %v7235_v63, %v7232_v4 }
  0xd7   :  { %v546_v0 = vmin.f32 %v10386_v62, %v521_v45  ;;  %v547_v19 = vmin.f32 %v10387_v43, %v521_v45  ;;  %v244_v3 = vsel %vm222_vm0, %v243_v41, %v184_v34  ;;  %v297_v35 = vsel %vm222_vm0, %v184_v34, %v243_v41  ;;  %v7291_v45 = vld [vmem:[#allocation8 + $0x160] sm:$0xff]  ;;  %v7294_v41 = vld [vmem:[#allocation8 + $0x370] sm:$0xff] }
  0xd8   :  { %1806 = vmatprep.mubr.bf16.mxu1 %v1315_v8  ;;  %v1187_v39 = vmin.f32 %v10388_v37, %v1162_v33  ;;  %v1188_v7 = vmin.f32 %v10389_v15, %v1162_v33  ;;  %v323_v1 = vmin.f32 %v7255_v49, %v297_v35  ;;  %v324_v23 = vmin.f32 %v7252_v24, %v244_v3  ;;  %v7297_v8 = vld [vmem:[#allocation8 + $0x360] sm:$0xff]  ;;  %v10391_v15 = vld [vmem:[#allocation87_spill] sm:$0xff] }
  0xd9   :  { %1807 = vmatmul.mubr.bf16.gmra.mxu1 %v1314_v51  ;;  %v578_v16 = vsub.f32 %v7212_v26, %v546_v0  ;;  %v579_v22 = vsub.f32 %v7205_v44, %v547_v19  ;;  %v886_v54 = vsel %vm222_vm0, %v885_v12, %v827_v61  ;;  %v939_v21 = vsel %vm222_vm0, %v827_v61, %v885_v12  ;;  %v10390_v37 = vld [vmem:[#allocation86_spill] sm:$0xff] }
  0xda   :  { %v1219_v2 = vsub.f32 %v7232_v4, %v1187_v39  ;;  %v1220_v59 = vsub.f32 %v7235_v63, %v1188_v7  ;;  %v361_v27 = vrot.slane %v324_v23, 4  ;;  %v420_v42 = vrot.slane %v323_v1, 4 }
  0xdb   :  { %629 = vst [vmem:[#allocation8 + $0x128] sm:$0xff] %v578_v16  ;;  %631 = vst [vmem:[#allocation8 + $0x138] sm:$0xff] %v579_v22  ;;  %v675_v48 = vpack.c.bf16 %v579_v22, %v578_v16  ;;  %v965_v26 = vmin.f32 %v7263_v13, %v939_v21  ;;  %v966_v44 = vmin.f32 %v7258_v50, %v886_v54  ;;  %v185_v14 = vrot.slane %v7286_v28, 6  ;;  %v7312_v21 = vld [vmem:[#allocation8 + $0x190] sm:$0xff] }
  0xdc   :  { %1271 = vst [vmem:[#allocation8 + $0x328] sm:$0xff] %v1219_v2  ;;  %1273 = vst [vmem:[#allocation8 + $0x338] sm:$0xff] %v1220_v59  ;;  %v1317_v51 = vpack.c.bf16 %v1220_v59, %v1219_v2  ;;  %v421_v38 = vsel %vm399_vm1, %v420_v42, %v361_v27  ;;  %v474_v18 = vsel %vm399_vm1, %v361_v27, %v420_v42  ;;  %v245_v34 = vrot.slane %v7291_v45, 6 }
  0xdd   :  { %1656 = vmatprep.mubr.bf16.mxu0 %v675_v48  ;;  %v500_v6 = vmin.f32 %v323_v1, %v474_v18  ;;  %v501_v9 = vmin.f32 %v324_v23, %v421_v38  ;;  %v1003_v32 = vrot.slane %v966_v44, 4  ;;  %v1061_v4 = vrot.slane %v965_v26, 4 }
  0xde   :  { %1816 = vmatprep.mubr.bf16.mxu1 %v1317_v51  ;;  %1657 = vmatmul.mubr.bf16.gmra.mxu0 %v674_v53  ;;  %v676_v63 = vpack.c.bf16 %v7252_v24, %v7255_v49  ;;  %v828_v61 = vrot.slane %v7294_v41, 6  ;;  %v887_v33 = vrot.slane %v7297_v8, 6  ;;  %v1318_v0 = vpack.c.bf16 %v7258_v50, %v7263_v13 }
  0xdf   :  { %v522_v12 = vmin.f32 %v500_v6, %v501_v9  ;;  %v1062_v62 = vsel %vm399_vm1, %v1061_v4, %v1003_v32  ;;  %v1115_v53 = vsel %vm399_vm1, %v1003_v32, %v1061_v4  ;;  %v246_v3 = vsel %vm222_vm0, %v245_v34, %v185_v14 }
  0xe0   :  { %v1141_v43 = vmin.f32 %v965_v26, %v1115_v53  ;;  %v1142_v19 = vmin.f32 %v966_v44, %v1062_v62  ;;  %v298_v35 = vsel %vm222_vm0, %v185_v14, %v245_v34  ;;  %v326_v23 = vmin.f32 %v7286_v28, %v246_v3  ;;  %v10393_v44 = vld [vmem:[#allocation34_spill] sm:$0xff] }
  0xe1   :  { %1817 = vmatmul.mubr.bf16.gmra.mxu1 %v1316_v36  ;;  %v548_v39 = vmin.f32 %v10390_v37, %v522_v12  ;;  %v549_v7 = vmin.f32 %v10391_v15, %v522_v12  ;;  %v325_v1 = vmin.f32 %v7291_v45, %v298_v35  ;;  %v888_v22 = vsel %vm222_vm0, %v887_v33, %v828_v61  ;;  %v10392_v36 = vld [vmem:[#allocation33_spill] sm:$0xff]  ;;  %v7334_v37 = vld [vmem:[#allocation8 + $0x390] sm:$0xff]  ;;  %v7337_v15 = vld [vmem:[#allocation8 + $0x380] sm:$0xff] }
  0xe2   :  { %v1163_v16 = vmin.f32 %v1141_v43, %v1142_v19  ;;  %v940_v54 = vsel %vm222_vm0, %v828_v61, %v887_v33  ;;  %v186_v2 = vrot.slane %v7312_v21, 6  ;;  %v362_v42 = vrot.slane %v326_v23, 4 }
  0xe3   :  { %v580_v59 = vsub.f32 %v7255_v49, %v548_v39  ;;  %v581_v27 = vsub.f32 %v7252_v24, %v549_v7  ;;  %v422_v48 = vrot.slane %v325_v1, 4  ;;  %v967_v38 = vmin.f32 %v7297_v8, %v940_v54  ;;  %v7323_v49 = vld [vmem:[#allocation8 + $0x180] sm:$0xff] }
  0xe4   :  { %v1189_v26 = vmin.f32 %v10392_v36, %v1163_v16  ;;  %v1190_v51 = vmin.f32 %v10393_v44, %v1163_v16  ;;  %v968_v18 = vmin.f32 %v7294_v41, %v888_v22  ;;  %v247_v24 = vrot.slane %v7323_v49, 6 }
  0xe5   :  { %633 = vst [vmem:[#allocation8 + $0x148] sm:$0xff] %v580_v59  ;;  %635 = vst [vmem:[#allocation8 + $0x158] sm:$0xff] %v581_v27  ;;  %v677_v14 = vpack.c.bf16 %v581_v27, %v580_v59  ;;  %v423_v6 = vsel %vm399_vm1, %v422_v48, %v362_v42  ;;  %v475_v9 = vsel %vm399_vm1, %v362_v42, %v422_v48  ;;  %v1063_v12 = vrot.slane %v967_v38, 4 }
  0xe6   :  { %v1221_v32 = vsub.f32 %v7263_v13, %v1189_v26  ;;  %v1222_v4 = vsub.f32 %v7258_v50, %v1190_v51  ;;  %v502_v34 = vmin.f32 %v325_v1, %v475_v9  ;;  %v503_v61 = vmin.f32 %v326_v23, %v423_v6  ;;  %v10394_v1 = vld [vmem:[#allocation40_spill] sm:$0xff]  ;;  %v10395_v23 = vld [vmem:[#allocation39_spill] sm:$0xff] }
  0xe7   :  { %1666 = vmatprep.mubr.bf16.mxu0 %v677_v14  ;;  %v1004_v33 = vrot.slane %v968_v18, 4  ;;  %v248_v62 = vsel %vm222_vm0, %v247_v24, %v186_v2  ;;  %v299_v53 = vsel %vm222_vm0, %v186_v2, %v247_v24  ;;  %v829_v39 = vrot.slane %v7334_v37, 6 }
  0xe8   :  { %1275 = vst [vmem:[#allocation8 + $0x348] sm:$0xff] %v1221_v32  ;;  %1277 = vst [vmem:[#allocation8 + $0x358] sm:$0xff] %v1222_v4  ;;  %v1319_v43 = vpack.c.bf16 %v1222_v4, %v1221_v32  ;;  %1667 = vmatmul.mubr.bf16.gmra.mxu0 %v676_v63  ;;  %v523_v19 = vmin.f32 %v502_v34, %v503_v61  ;;  %v327_v3 = vmin.f32 %v7323_v49, %v299_v53 }
  0xe9   :  { %v328_v13 = vmin.f32 %v7312_v21, %v248_v62  ;;  %v1064_v50 = vsel %vm399_vm1, %v1063_v12, %v1004_v33  ;;  %v1116_v35 = vsel %vm399_vm1, %v1004_v33, %v1063_v12  ;;  %v889_v7 = vrot.slane %v7337_v15, 6  ;;  %v7358_v33 = vld [vmem:[#allocation8 + $0x1b0] sm:$0xff]  ;;  %v7361_v62 = vld [vmem:[#allocation8 + $0x1a0] sm:$0xff] }
  0xea   :  { %1826 = vmatprep.mubr.bf16.mxu1 %v1319_v43  ;;  %v550_v63 = vmin.f32 %v10394_v1, %v523_v19  ;;  %v551_v16 = vmin.f32 %v10395_v23, %v523_v19  ;;  %v1143_v22 = vmin.f32 %v967_v38, %v1116_v35  ;;  %v1144_v54 = vmin.f32 %v968_v18, %v1064_v50  ;;  %v7366_v19 = vld [vmem:[#allocation8 + $0x3b0] sm:$0xff] }
  0xeb   :  { %1827 = vmatmul.mubr.bf16.gmra.mxu1 %v1318_v0  ;;  %v363_v2 = vrot.slane %v328_v13, 4  ;;  %v424_v59 = vrot.slane %v327_v3, 4  ;;  %v890_v27 = vsel %vm222_vm0, %v889_v7, %v829_v39  ;;  %v941_v42 = vsel %vm222_vm0, %v829_v39, %v889_v7 }
  0xec   :  { %v582_v48 = vsub.f32 %v7291_v45, %v550_v63  ;;  %v583_v36 = vsub.f32 %v7286_v28, %v551_v16  ;;  %v1164_v26 = vmin.f32 %v1143_v22, %v1144_v54  ;;  %v969_v44 = vmin.f32 %v7337_v15, %v941_v42  ;;  %v7377_v22 = vld [vmem:[#allocation8 + $0x3a0] sm:$0xff] }
  0xed   :  { %v678_v51 = vpack.c.bf16 %v7286_v28, %v7291_v45  ;;  %v425_v38 = vsel %vm399_vm1, %v424_v59, %v363_v2  ;;  %v476_v0 = vsel %vm399_vm1, %v363_v2, %v424_v59  ;;  %v970_v18 = vmin.f32 %v7334_v37, %v890_v27 }
  0xee   :  { %637 = vst [vmem:[#allocation8 + $0x168] sm:$0xff] %v582_v48  ;;  %639 = vst [vmem:[#allocation8 + $0x178] sm:$0xff] %v583_v36  ;;  %v679_v14 = vpack.c.bf16 %v583_v36, %v582_v48  ;;  %v1191_v6 = vmin.f32 %v6934_v47, %v1164_v26  ;;  %v1192_v9 = vmin.f32 %v6936_v58, %v1164_v26  ;;  %v1065_v28 = vrot.slane %v969_v44, 4 }
  0xef   :  { %v504_v24 = vmin.f32 %v327_v3, %v476_v0  ;;  %v1320_v32 = vpack.c.bf16 %v7294_v41, %v7297_v8  ;;  %v505_v4 = vmin.f32 %v328_v13, %v425_v38  ;;  %v1005_v34 = vrot.slane %v970_v18, 4 }
  0xf0   :  { %1676 = vmatprep.mubr.bf16.mxu0 %v679_v14  ;;  %v1223_v45 = vsub.f32 %v7297_v8, %v1191_v6  ;;  %v1224_v61 = vsub.f32 %v7294_v41, %v1192_v9  ;;  %v187_v12 = vrot.slane %v7358_v33, 6  ;;  %v249_v47 = vrot.slane %v7361_v62, 6 }
  0xf1   :  { %1677 = vmatmul.mubr.bf16.gmra.mxu0 %v678_v51  ;;  %v524_v58 = vmin.f32 %v504_v24, %v505_v4  ;;  %v1066_v53 = vsel %vm399_vm1, %v1065_v28, %v1005_v34  ;;  %v1117_v43 = vsel %vm399_vm1, %v1005_v34, %v1065_v28  ;;  %v830_v8 = vrot.slane %v7366_v19, 6  ;;  %v7389_v51 = vld [vmem:[#allocation8 + $0x1d0] sm:$0xff]  ;;  %v7403_v34 = vld [vmem:[#allocation8 + $0x3c0] sm:$0xff] }
  0xf2   :  { %1279 = vst [vmem:[#allocation8 + $0x368] sm:$0xff] %v1223_v45  ;;  %1281 = vst [vmem:[#allocation8 + $0x378] sm:$0xff] %v1224_v61  ;;  %v1321_v41 = vpack.c.bf16 %v1224_v61, %v1223_v45  ;;  %v1145_v3 = vmin.f32 %v969_v44, %v1117_v43  ;;  %v1146_v13 = vmin.f32 %v970_v18, %v1066_v53  ;;  %v891_v54 = vrot.slane %v7377_v22, 6  ;;  %v7400_v4 = vld [vmem:[#allocation8 + $0x3d0] sm:$0xff] }
  0xf3   :  { %v250_v50 = vsel %vm222_vm0, %v249_v47, %v187_v12  ;;  %v552_v35 = vmin.f32 %v6959_v57, %v524_v58  ;;  %v553_v39 = vmin.f32 %v6961_v25, %v524_v58  ;;  %v300_v7 = vsel %vm222_vm0, %v187_v12, %v249_v47 }
  0xf4   :  { %v330_v1 = vmin.f32 %v7358_v33, %v250_v50  ;;  %1836 = vmatprep.mubr.bf16.mxu1 %v1321_v41  ;;  %v1165_v63 = vmin.f32 %v1145_v3, %v1146_v13  ;;  %v680_v23 = vpack.c.bf16 %v7312_v21, %v7323_v49  ;;  %v329_v16 = vmin.f32 %v7361_v62, %v300_v7 }
  0xf5   :  { %1837 = vmatmul.mubr.bf16.gmra.mxu1 %v1320_v32  ;;  %v584_v57 = vsub.f32 %v7323_v49, %v552_v35  ;;  %v585_v25 = vsub.f32 %v7312_v21, %v553_v39  ;;  %v1322_v2 = vpack.c.bf16 %v7334_v37, %v7337_v15  ;;  %v892_v36 = vsel %vm222_vm0, %v891_v54, %v830_v8  ;;  %v7397_v32 = vld [vmem:[#allocation8 + $0x1c0] sm:$0xff] }
  0xf6   :  { %v364_v59 = vrot.slane %v330_v1, 4  ;;  %v1193_v27 = vmin.f32 %v6993_v40, %v1165_v63  ;;  %v1194_v42 = vmin.f32 %v7001_v46, %v1165_v63  ;;  %v426_v48 = vrot.slane %v329_v16, 4 }
  0xf7   :  { %641 = vst [vmem:[#allocation8 + $0x188] sm:$0xff] %v584_v57  ;;  %643 = vst [vmem:[#allocation8 + $0x198] sm:$0xff] %v585_v25  ;;  %v681_v26 = vpack.c.bf16 %v585_v25, %v584_v57  ;;  %v942_v44 = vsel %vm222_vm0, %v830_v8, %v891_v54  ;;  %v972_v49 = vmin.f32 %v7366_v19, %v892_v36  ;;  %v188_v21 = vrot.slane %v7389_v51, 6  ;;  %v7424_v25 = vld [vmem:[#allocation8 + $0x1f0] sm:$0xff] }
  0xf8   :  { %v1225_v38 = vsub.f32 %v7337_v15, %v1193_v27  ;;  %v1226_v40 = vsub.f32 %v7334_v37, %v1194_v42  ;;  %v427_v46 = vsel %vm399_vm1, %v426_v48, %v364_v59  ;;  %v477_v0 = vsel %vm399_vm1, %v364_v59, %v426_v48  ;;  %v7427_v48 = vld [vmem:[#allocation8 + $0x1e0] sm:$0xff] }
  0xf9   :  { %1686 = vmatprep.mubr.bf16.mxu0 %v681_v26  ;;  %v506_v18 = vmin.f32 %v329_v16, %v477_v0  ;;  %v507_v14 = vmin.f32 %v330_v1, %v427_v46  ;;  %v971_v6 = vmin.f32 %v7377_v22, %v942_v44  ;;  %v1006_v9 = vrot.slane %v972_v49, 4 }
  0xfa   :  { %1283 = vst [vmem:[#allocation8 + $0x388] sm:$0xff] %v1225_v38  ;;  %1285 = vst [vmem:[#allocation8 + $0x398] sm:$0xff] %v1226_v40  ;;  %v1323_v24 = vpack.c.bf16 %v1226_v40, %v1225_v38  ;;  %1687 = vmatmul.mubr.bf16.gmra.mxu0 %v680_v23  ;;  %v251_v15 = vrot.slane %v7397_v32, 6  ;;  %v831_v37 = vrot.slane %v7400_v4, 6  ;;  %v893_v28 = vrot.slane %v7403_v34, 6 }
  0xfb   :  { %v525_v45 = vmin.f32 %v506_v18, %v507_v14  ;;  %v1067_v61 = vrot.slane %v971_v6, 4  ;;  %v682_v12 = vpack.c.bf16 %v7358_v33, %v7361_v62  ;;  %v1324_v47 = vpack.c.bf16 %v7366_v19, %v7377_v22 }
  0xfc   :  { %1846 = vmatprep.mubr.bf16.mxu1 %v1323_v24  ;;  %v252_v58 = vsel %vm222_vm0, %v251_v15, %v188_v21  ;;  %v301_v53 = vsel %vm222_vm0, %v188_v21, %v251_v15  ;;  %v894_v43 = vsel %vm222_vm0, %v893_v28, %v831_v37  ;;  %v943_v8 = vsel %vm222_vm0, %v831_v37, %v893_v28 }
  0xfd   :  { %1847 = vmatmul.mubr.bf16.gmra.mxu1 %v1322_v2  ;;  %v554_v41 = vmin.f32 %v7047_v56, %v525_v45  ;;  %v555_v3 = vmin.f32 %v7049_v17, %v525_v45  ;;  %v1068_v13 = vsel %vm399_vm1, %v1067_v61, %v1006_v9  ;;  %v1118_v50 = vsel %vm399_vm1, %v1006_v9, %v1067_v61  ;;  %v7440_v9 = vld [vmem:[#allocation8 + $0x3f0] sm:$0xff] }
  0xfe   :  { %v1147_v35 = vmin.f32 %v971_v6, %v1118_v50  ;;  %v1148_v39 = vmin.f32 %v972_v49, %v1068_v13  ;;  %v331_v7 = vmin.f32 %v7397_v32, %v301_v53  ;;  %v332_v1 = vmin.f32 %v7389_v51, %v252_v58  ;;  %v6049_v53 = vld [vmem:[#allocation8 + $0x3e0] sm:$0xff] }
  0xff   :  { %v586_v63 = vsub.f32 %v7361_v62, %v554_v41  ;;  %v587_v23 = vsub.f32 %v7358_v33, %v555_v3  ;;  %v973_v16 = vmin.f32 %v7403_v34, %v943_v8  ;;  %v974_v56 = vmin.f32 %v7400_v4, %v894_v43 }
 0x100   :  { %v1166_v54 = vmin.f32 %v1147_v35, %v1148_v39  ;;  %v365_v17 = vrot.slane %v332_v1, 4  ;;  %v428_v57 = vrot.slane %v331_v7, 4  ;;  %v189_v2 = vrot.slane %v7424_v25, 6 }
 0x101   :  { %645 = vst [vmem:[#allocation8 + $0x1a8] sm:$0xff] %v586_v63  ;;  %647 = vst [vmem:[#allocation8 + $0x1b8] sm:$0xff] %v587_v23  ;;  %v683_v59 = vpack.c.bf16 %v587_v23, %v586_v63  ;;  %v1007_v27 = vrot.slane %v974_v56, 4  ;;  %v1069_v42 = vrot.slane %v973_v16, 4  ;;  %v253_v33 = vrot.slane %v7427_v48, 6 }
 0x102   :  { %v1195_v62 = vmin.f32 %v7051_v11, %v1166_v54  ;;  %v1196_v36 = vmin.f32 %v7059_v10, %v1166_v54  ;;  %v429_v26 = vsel %vm399_vm1, %v428_v57, %v365_v17  ;;  %v478_v44 = vsel %vm399_vm1, %v365_v17, %v428_v57 }
 0x103   :  { %1696 = vmatprep.mubr.bf16.mxu0 %v683_v59  ;;  %v508_v49 = vmin.f32 %v331_v7, %v478_v44  ;;  %v509_v21 = vmin.f32 %v332_v1, %v429_v26  ;;  %v1070_v38 = vsel %vm399_vm1, %v1069_v42, %v1007_v27  ;;  %v1119_v40 = vsel %vm399_vm1, %v1007_v27, %v1069_v42 }
 0x104   :  { %v1227_v46 = vsub.f32 %v7377_v22, %v1195_v62  ;;  %v1228_v0 = vsub.f32 %v7366_v19, %v1196_v36  ;;  %1697 = vmatmul.mubr.bf16.gmra.mxu0 %v682_v12  ;;  %v1149_v18 = vmin.f32 %v973_v16, %v1119_v40  ;;  %v1150_v11 = vmin.f32 %v974_v56, %v1070_v38 }
 0x105   :  { %v526_v14 = vmin.f32 %v508_v49, %v509_v21  ;;  %v254_v10 = vsel %vm222_vm0, %v253_v33, %v189_v2  ;;  %v302_v6 = vsel %vm222_vm0, %v189_v2, %v253_v33  ;;  %v832_v24 = vrot.slane %v7440_v9, 6 }
 0x106   :  { %1287 = vst [vmem:[#allocation8 + $0x3a8] sm:$0xff] %v1227_v46  ;;  %1289 = vst [vmem:[#allocation8 + $0x3b8] sm:$0xff] %v1228_v0  ;;  %v1325_v15 = vpack.c.bf16 %v1228_v0, %v1227_v46  ;;  %v1167_v37 = vmin.f32 %v1149_v18, %v1150_v11  ;;  %v333_v28 = vmin.f32 %v7427_v48, %v302_v6  ;;  %v895_v43 = vrot.slane %v6049_v53, 6 }
 0x107   :  { %v334_v45 = vmin.f32 %v7424_v25, %v254_v10  ;;  %v556_v61 = vmin.f32 %v7105_v30, %v526_v14  ;;  %v557_v12 = vmin.f32 %v7107_v20, %v526_v14  ;;  %v684_v58 = vpack.c.bf16 %v7389_v51, %v7397_v32 }
 0x108   :  { %1856 = vmatprep.mubr.bf16.mxu1 %v1325_v15  ;;  %v1197_v8 = vmin.f32 %v7115_v52, %v1167_v37  ;;  %v1198_v41 = vmin.f32 %v7117_v5, %v1167_v37  ;;  %v430_v13 = vrot.slane %v333_v28, 4  ;;  %v896_v50 = vsel %vm222_vm0, %v895_v43, %v832_v24 }
 0x109   :  { %v366_v3 = vrot.slane %v334_v45, 4  ;;  %1857 = vmatmul.mubr.bf16.gmra.mxu1 %v1324_v47  ;;  %v588_v30 = vsub.f32 %v7397_v32, %v556_v61  ;;  %v589_v20 = vsub.f32 %v7389_v51, %v557_v12  ;;  %v944_v35 = vsel %vm222_vm0, %v832_v24, %v895_v43 }
 0x10a   :  { %v1229_v39 = vsub.f32 %v7403_v34, %v1197_v8  ;;  %v1230_v52 = vsub.f32 %v7400_v4, %v1198_v41  ;;  %v975_v32 = vmin.f32 %v6049_v53, %v944_v35  ;;  %v976_v1 = vmin.f32 %v7440_v9, %v896_v50 }
 0x10b   :  { %v431_v5 = vsel %vm399_vm1, %v430_v13, %v366_v3  ;;  %v479_v7 = vsel %vm399_vm1, %v366_v3, %v430_v13  ;;  %649 = vst [vmem:[#allocation8 + $0x1c8] sm:$0xff] %v588_v30  ;;  %651 = vst [vmem:[#allocation8 + $0x1d8] sm:$0xff] %v589_v20  ;;  %v685_v19 = vpack.c.bf16 %v589_v20, %v588_v30 }
 0x10c   :  { %v510_v22 = vmin.f32 %v333_v28, %v479_v7  ;;  %v511_v47 = vmin.f32 %v334_v45, %v431_v5  ;;  %1291 = vst [vmem:[#allocation8 + $0x3c8] sm:$0xff] %v1229_v39  ;;  %1293 = vst [vmem:[#allocation8 + $0x3d8] sm:$0xff] %v1230_v52  ;;  %v1327_v51 = vpack.c.bf16 %v1230_v52, %v1229_v39  ;;  %v1071_v16 = vrot.slane %v975_v32, 4 }
 0x10d   :  { %1706 = vmatprep.mubr.bf16.mxu0 %v685_v19  ;;  %v1326_v63 = vpack.c.bf16 %v7400_v4, %v7403_v34  ;;  %v1008_v56 = vrot.slane %v976_v1, 4  ;;  %v686_v34 = vpack.c.bf16 %v7424_v25, %v7427_v48  ;;  %v1328_v44 = vpack.c.bf16 %v7440_v9, %v6049_v53 }
 0x10e   :  { %v527_v23 = vmin.f32 %v510_v22, %v511_v47  ;;  %1866 = vmatprep.mubr.bf16.mxu1 %v1327_v51  ;;  %1707 = vmatmul.mubr.bf16.gmra.mxu0 %v684_v58 }
 0x10f   :  { %v1072_v57 = vsel %vm399_vm1, %v1071_v16, %v1008_v56  ;;  %v1120_v2 = vsel %vm399_vm1, %v1008_v56, %v1071_v16 }
 0x110   :  { %v558_v54 = vmin.f32 %v7162_v55, %v527_v23  ;;  %v559_v17 = vmin.f32 %v7164_v31, %v527_v23  ;;  %v1151_v42 = vmin.f32 %v975_v32, %v1120_v2  ;;  %v1152_v4 = vmin.f32 %v976_v1, %v1072_v57 }
 0x111   :  { %1867 = vmatmul.mubr.bf16.gmra.mxu1 %v1326_v63 }
 0x112   :  { %v590_v59 = vsub.f32 %v7427_v48, %v558_v54  ;;  %v591_v27 = vsub.f32 %v7424_v25, %v559_v17  ;;  %v1168_v55 = vmin.f32 %v1151_v42, %v1152_v4  ;;  %v1364_v25 = vlaneseq }
 0x114   :  { %653 = vst [vmem:[#allocation8 + $0x1e8] sm:$0xff] %v590_v59  ;;  %655 = vst [vmem:[#allocation8 + $0x1f8] sm:$0xff] %v591_v27  ;;  %v687_v33 = vpack.c.bf16 %v591_v27, %v590_v59  ;;  %v1199_v31 = vmin.f32 %v7174_v29, %v1168_v55  ;;  %v1200_v62 = vmin.f32 %v7176_v60, %v1168_v55  ;;  %v1365_v48 = vshrl.u32 %v1364_v25, 7  ;;  %v1362_v29 = vld [vmem:[%s10088_s2] sm:$0x3]  ;;  %s6142_s2 = smov [#allocation8]  }
 0x115   :  { %s5360_s27 = sshll.u32 %s6142_s2, 4  ;;  %s5361_s27 = int_to_ptr.vmem [resolvable:$true] %s5360_s27 }
 0x116   :  { %1716 = vmatprep.mubr.bf16.mxu0 %v687_v33  ;;  %v1231_v36 = vsub.f32 %v6049_v53, %v1199_v31  ;;  %v1232_v26 = vsub.f32 %v7440_v9, %v1200_v62  ;;  %v1366_v21 = vsub.s32 0, %v1365_v48  ;;  %v1370_v38 = vsub.s32 1, %v1365_v48  ;;  %s6090_s28 = scalar_lea.vmem %s5361_s27, 16384  ;;  %p6095_p11 = scmp.lt.s32.totalorder %s5361_s27, %s5361_s27 }
 0x117   :  { %1717 = vmatmul.mubr.bf16.gmra.mxu0 %v686_v34  ;;  %p6091_p10 = scmp.ne.s32.totalorder %s5361_s27, %s6090_s28  ;;  %p6096_p12 = scmp.lt.s32.totalorder %s6090_s28, %s6090_s28 }
 0x118   :  { %1295 = vst [vmem:[#allocation8 + $0x3e8] sm:$0xff] %v1231_v36  ;;  %1297 = vst [vmem:[#allocation8 + $0x3f8] sm:$0xff] %v1232_v26  ;;  %v1329_v49 = vpack.c.bf16 %v1232_v26, %v1231_v36  ;;  %v7480_v60 = vrot.slane %v1362_v29, %v1366_v21  ;;  %v7482_v0 = vrot.slane %v1362_v29, %v1370_v38 }
 0x119   :  { %p6097_p13 = por %p6096_p12, %p6095_p11 }
 0x11a   :  { %1876 = vmatprep.mubr.bf16.mxu1 %v1329_v49 }
 0x11b   :  { %1877 = vmatmul.mubr.bf16.gmra.mxu1 %v1328_v44  ;;  %p6098_p0 = pnand %p6097_p13, %p6091_p10 }
 0x136   :  { %v1568_v40 = vpop.f32.mrf.mxu0  ;;  %v1728_v46 = vpop.f32.mrf.mxu1 }
 0x137   :  { %v1569_v18 = vadd.f32 %v1568_v40, %v7480_v60  ;;  %v1729_v11 = vadd.f32 %v1728_v46, %v7480_v60 }
 0x138   :  { %v1570_v14 = vpop.f32.mrf.mxu0  ;;  %v1730_v10 = vpop.f32.mrf.mxu1 }
 0x139   :  { %v7486_v6 = vmul.f32 0.70710677, %v1569_v18  ;;  %v7488_v9 = vmul.f32 0.70710677, %v1729_v11  ;;  %v7491_v24 = vadd.f32 %v1570_v14, %v7482_v0  ;;  %v7494_v15 = vadd.f32 %v1730_v10, %v7482_v0 }
 0x13a   :  { %v1572_v8 = vpop.f32.mrf.mxu0  ;;  %v1732_v19 = vpop.f32.mrf.mxu1  ;;  %v7519_v2 = vmul.f32 0.5, %v1569_v18  ;;  %v7535_v21 = vmul.f32 0.5, %v1729_v11 }
 0x13b   :  { %v2143_v37 = vand.u32 2147483647, %v7486_v6  ;;  %v2207_v28 = vand.u32 2147483647, %v7488_v9  ;;  %v7499_v45 = vmul.f32 0.70710677, %v7491_v24  ;;  %v7507_v7 = vadd.f32 %v1572_v8, %v7480_v60 }
 0x13c   :  { %v7502_v61 = vmul.f32 0.70710677, %v7494_v15  ;;  %v1574_v22 = vpop.f32.mrf.mxu0  ;;  %v7513_v16 = vadd.f32 %v1732_v19, %v7480_v60  ;;  %v1734_v57 = vpop.f32.mrf.mxu1  ;;  %vm4575_vm2 = vcmp.ge.f32.partialorder %v7486_v6, 0.0  ;;  %vm4639_vm3 = vcmp.ge.f32.partialorder %v7488_v9, 0.0 }
 0x13d   :  { %v2271_v12 = vmul.f32 0.3275911, %v2143_v37  ;;  %v3807_v58 = vsub.f32 0.0, %v2143_v37  ;;  %v2335_v53 = vmul.f32 0.3275911, %v2207_v28  ;;  %v3871_v43 = vsub.f32 0.0, %v2207_v28 }
 0x13e   :  { %v2144_v41 = vand.u32 2147483647, %v7499_v45  ;;  %v2208_v3 = vand.u32 2147483647, %v7502_v61  ;;  %v7510_v1 = vmul.f32 0.70710677, %v7507_v7  ;;  %v7516_v56 = vadd.f32 %v1574_v22, %v7482_v0 }
 0x13f   :  { %v2399_v13 = vadd.f32 1.0, %v2271_v12  ;;  %v3935_v30 = vmul.f32 %v3807_v58, %v2143_v37  ;;  %v2463_v20 = vadd.f32 1.0, %v2335_v53  ;;  %v3999_v5 = vmul.f32 %v3871_v43, %v2207_v28  ;;  %v1578_v48 = vpop.f32.mrf.mxu0  ;;  %v1738_v43 = vpop.f32.mrf.mxu1 }
 0x140   :  { %v2272_v50 = vmul.f32 0.3275911, %v2144_v41  ;;  %v3808_v35 = vsub.f32 0.0, %v2144_v41  ;;  %v2336_v39 = vmul.f32 0.3275911, %v2208_v3  ;;  %v3872_v52 = vsub.f32 0.0, %v2208_v3 }
 0x141   :  { %5497 = vrcp.f32 %v2399_v13  ;;  %v4063_v63 = vmul.f32 1.442695, %v3935_v30  ;;  %v4191_v54 = vmul.f32 1.442695, %v3999_v5  ;;  %v2145_v17 = vand.u32 2147483647, %v7510_v1 }
 0x142   :  { %5499 = vrcp.f32 %v2463_v20  ;;  %v2400_v47 = vadd.f32 1.0, %v2272_v50  ;;  %v3936_v32 = vmul.f32 %v3808_v35, %v2144_v41  ;;  %v2464_v51 = vadd.f32 1.0, %v2336_v39 }
 0x143   :  { %v4000_v23 = vmul.f32 %v3872_v52, %v2208_v3  ;;  %v7522_v27 = vmul.f32 0.70710677, %v7513_v16  ;;  %v2273_v42 = vmul.f32 0.3275911, %v2145_v17  ;;  %v3809_v4 = vsub.f32 0.0, %v2145_v17 }
 0x144   :  { %5501 = vrcp.f32 %v2400_v47  ;;  %v4065_v59 = vmul.f32 1.442695, %v3936_v32  ;;  %v7525_v34 = vmul.f32 0.70710677, %v7516_v56  ;;  %v7529_v31 = vadd.f32 %v1734_v57, %v7482_v0  ;;  %v1580_v47 = vpop.f32.mrf.mxu0 }
 0x145   :  { %5503 = vrcp.f32 %v2464_v51  ;;  %v4193_v33 = vmul.f32 1.442695, %v4000_v23  ;;  %v2209_v55 = vand.u32 2147483647, %v7522_v27  ;;  %v2401_v62 = vadd.f32 1.0, %v2273_v42 }
 0x146   :  { %5505 = vpow2.f32 %v4063_v63  ;;  %v3937_v36 = vmul.f32 %v3809_v4, %v2145_v17  ;;  %v2146_v26 = vand.u32 2147483647, %v7525_v34  ;;  %v7533_v25 = vmul.f32 0.70710677, %v7529_v31 }
 0x147   :  { %5507 = vpow2.f32 %v4191_v54  ;;  %v2337_v44 = vmul.f32 0.3275911, %v2209_v55  ;;  %v3873_v49 = vsub.f32 0.0, %v2209_v55  ;;  %v7539_v28 = vadd.f32 %v1578_v48, %v7480_v60 }
 0x148   :  { %5509 = vpow2.f32 %v4065_v59  ;;  %v2274_v29 = vmul.f32 0.3275911, %v2146_v26  ;;  %v3810_v38 = vsub.f32 0.0, %v2146_v26  ;;  %v2210_v18 = vand.u32 2147483647, %v7533_v25 }
 0x149   :  { %5511 = vrcp.f32 %v2401_v62  ;;  %v2465_v40 = vadd.f32 1.0, %v2337_v44  ;;  %v4001_v46 = vmul.f32 %v3873_v49, %v2209_v55  ;;  %v4067_v14 = vmul.f32 1.442695, %v3937_v36  ;;  %v1740_v55 = vpop.f32.mrf.mxu1 }
 0x14a   :  { %5513 = vpow2.f32 %v4193_v33  ;;  %v2402_v10 = vadd.f32 1.0, %v2274_v29  ;;  %v3938_v37 = vmul.f32 %v3810_v38, %v2146_v26  ;;  %v7544_v58 = vmul.f32 0.5, %v7491_v24 }
 0x14b   :  { %5515 = vrcp.f32 %v2465_v40  ;;  %v2338_v11 = vmul.f32 0.3275911, %v2210_v18  ;;  %v3874_v53 = vsub.f32 0.0, %v2210_v18  ;;  %v7550_v3 = vmul.f32 0.5, %v7494_v15 }
 0x14c   :  { %v4195_v13 = vmul.f32 1.442695, %v4001_v46  ;;  %5517 = vrcp.f32 %v2402_v10  ;;  %v4069_v20 = vmul.f32 1.442695, %v3938_v37  ;;  %v7554_v39 = vmul.f32 0.70710677, %v7539_v28 }
 0x14d   :  { %v2466_v50 = vadd.f32 1.0, %v2338_v11  ;;  %v4002_v35 = vmul.f32 %v3874_v53, %v2210_v18  ;;  %5519 = vpow2.f32 %v4067_v14  ;;  %v7557_v52 = vadd.f32 %v1738_v43, %v7480_v60 }
 0x14e   :  { %v7541_v12 = vpop.eup %5497  ;;  %v7562_v15 = vmul.f32 0.5, %v7507_v7  ;;  %v2147_v63 = vand.u32 2147483647, %v7554_v39  ;;  %v7571_v17 = vmul.f32 0.5, %v7513_v16  ;;  %v7578_v33 = vadd.f32 %v1580_v47, %v7482_v0 }
 0x14f   :  { %v7546_v8 = vpop.eup %5499  ;;  %v2655_v41 = vmul.f32 1.0614054, %v7541_v12  ;;  %5521 = vrcp.f32 %v2466_v50  ;;  %v4197_v22 = vmul.f32 1.442695, %v4002_v35  ;;  %v7574_v7 = vmul.f32 0.70710677, %v7557_v52 }
 0x150   :  { %v2719_v30 = vmul.f32 1.0614054, %v7546_v8  ;;  %5523 = vpow2.f32 %v4195_v13  ;;  %v2275_v26 = vmul.f32 0.3275911, %v2147_v63  ;;  %v3811_v44 = vsub.f32 0.0, %v2147_v63 }
 0x151   :  { %v2783_v24 = vadd.f32 -1.4531521, %v2655_v41  ;;  %v7559_v5 = vpop.eup %5501  ;;  %5525 = vpow2.f32 %v4069_v20  ;;  %v7585_v38 = vand.u32 2147483647, %v7574_v7  ;;  %v7591_v10 = vadd.f32 %v1740_v55, %v7482_v0 }
 0x152   :  { %v2847_v19 = vadd.f32 -1.4531521, %v2719_v30  ;;  %v2656_v51 = vmul.f32 1.0614054, %v7559_v5  ;;  %v7567_v23 = vpop.eup %5503  ;;  %5527 = vpow2.f32 %v4197_v22  ;;  %v2403_v18 = vadd.f32 1.0, %v2275_v26 }
 0x153   :  { %v2911_v32 = vmul.f32 %v7541_v12, %v2783_v24  ;;  %v5506_v57 = vpop.eup %5505  ;;  %v2720_v4 = vmul.f32 1.0614054, %v7567_v23  ;;  %v3939_v14 = vmul.f32 %v3811_v44, %v2147_v63  ;;  %v2339_v20 = vmul.f32 0.3275911, %v7585_v38 }
 0x154   :  { %v2975_v54 = vmul.f32 %v7546_v8, %v2847_v19  ;;  %v2784_v42 = vadd.f32 -1.4531521, %v2656_v51  ;;  %v5508_v62 = vpop.eup %5507  ;;  %5529 = vrcp.f32 %v2403_v18  ;;  %vm4576_vm4 = vcmp.ge.f32.partialorder %v7499_v45, 0.0 }
 0x155   :  { %v3039_v59 = vadd.f32 1.4214138, %v2911_v32  ;;  %v7580_v16 = vpop.eup %5509  ;;  %v2848_v29 = vadd.f32 -1.4531521, %v2720_v4  ;;  %v4071_v30 = vmul.f32 1.442695, %v3939_v14 }
 0x156   :  { %v3103_v36 = vadd.f32 1.4214138, %v2975_v54  ;;  %v2912_v48 = vmul.f32 %v7559_v5, %v2784_v42  ;;  %v7587_v40 = vpop.eup %5511  ;;  %v2467_v63 = vadd.f32 1.0, %v2339_v20  ;;  %vm4640_vm5 = vcmp.ge.f32.partialorder %v7502_v61, 0.0 }
 0x157   :  { %v3167_v49 = vmul.f32 %v7541_v12, %v3039_v59  ;;  %v7593_v37 = vpop.eup %5513  ;;  %v2976_v43 = vmul.f32 %v7567_v23, %v2848_v29  ;;  %v2657_v41 = vmul.f32 1.0614054, %v7587_v40  ;;  %5531 = vpow2.f32 %v4071_v30 }
 0x158   :  { %v3231_v46 = vmul.f32 %v7546_v8, %v3103_v36  ;;  %v3040_v53 = vadd.f32 1.4214138, %v2912_v48  ;;  %v7598_v50 = vpop.eup %5515  ;;  %5533 = vrcp.f32 %v2467_v63  ;;  %vm4577_vm6 = vcmp.ge.f32.partialorder %v7510_v1, 0.0 }
 0x159   :  { %v3295_v11 = vadd.f32 -0.28449672, %v3167_v49  ;;  %v3104_v19 = vadd.f32 1.4214138, %v2976_v43  ;;  %v2785_v22 = vadd.f32 -1.4531521, %v2657_v41  ;;  %v7602_v47 = vpop.eup %5517 }
 0x15a   :  { %v3359_v13 = vadd.f32 -0.28449672, %v3231_v46  ;;  %v3168_v24 = vmul.f32 %v7559_v5, %v3040_v53  ;;  %v2721_v51 = vmul.f32 1.0614054, %v7598_v50  ;;  %v7608_v55 = vpop.eup %5519  ;;  %v2658_v44 = vmul.f32 1.0614054, %v7602_v47 }
 0x15b   :  { %v3423_v35 = vmul.f32 %v7541_v12, %v3295_v11  ;;  %v3232_v42 = vmul.f32 %v7567_v23, %v3104_v19  ;;  %v2913_v4 = vmul.f32 %v7587_v40, %v2785_v22  ;;  %vm4641_vm7 = vcmp.ge.f32.partialorder %v7522_v27, 0.0 }
 0x15c   :  { %v3487_v32 = vmul.f32 %v7546_v8, %v3359_v13  ;;  %v3296_v59 = vadd.f32 -0.28449672, %v3168_v24  ;;  %v2849_v26 = vadd.f32 -1.4531521, %v2721_v51  ;;  %v7612_v49 = vpop.eup %5521  ;;  %v2786_v43 = vadd.f32 -1.4531521, %v2658_v44 }
 0x15d   :  { %v3551_v54 = vadd.f32 0.2548296, %v3423_v35  ;;  %v3360_v46 = vadd.f32 -0.28449672, %v3232_v42  ;;  %v3041_v18 = vadd.f32 1.4214138, %v2913_v4  ;;  %v7617_v14 = vpop.eup %5523 }
 0x15e   :  { %v3615_v36 = vadd.f32 0.2548296, %v3487_v32  ;;  %v3424_v29 = vmul.f32 %v7559_v5, %v3296_v59  ;;  %v2977_v53 = vmul.f32 %v7598_v50, %v2849_v26  ;;  %v2722_v41 = vmul.f32 1.0614054, %v7612_v49  ;;  %v7622_v13 = vpop.eup %5525 }
 0x15f   :  { %v3679_v48 = vmul.f32 %v7541_v12, %v3551_v54  ;;  %v3488_v12 = vmul.f32 %v7567_v23, %v3360_v46  ;;  %v3169_v35 = vmul.f32 %v7587_v40, %v3041_v18  ;;  %v2914_v22 = vmul.f32 %v7602_v47, %v2786_v43  ;;  %v7628_v32 = vpop.eup %5527 }
 0x160   :  { %v3743_v11 = vmul.f32 %v7546_v8, %v3615_v36  ;;  %v3552_v20 = vadd.f32 0.2548296, %v3424_v29  ;;  %v3105_v19 = vadd.f32 1.4214138, %v2977_v53  ;;  %v2850_v8 = vadd.f32 -1.4531521, %v2722_v41 }
 0x161   :  { %v4319_v30 = vmul.f32 %v5506_v57, %v3679_v48  ;;  %v3616_v54 = vadd.f32 0.2548296, %v3488_v12  ;;  %v3297_v59 = vadd.f32 -0.28449672, %v3169_v35  ;;  %v3042_v4 = vadd.f32 1.4214138, %v2914_v22 }
 0x162   :  { %v4383_v24 = vmul.f32 %v5508_v62, %v3743_v11  ;;  %v3680_v63 = vmul.f32 %v7559_v5, %v3552_v20  ;;  %v3233_v42 = vmul.f32 %v7598_v50, %v3105_v19  ;;  %v2978_v62 = vmul.f32 %v7612_v49, %v2850_v8  ;;  %v7638_v11 = vpop.eup %5529 }
 0x163   :  { %v4447_v51 = vsub.f32 1.0, %v4319_v30  ;;  %v3744_v44 = vmul.f32 %v7567_v23, %v3616_v54  ;;  %v3425_v48 = vmul.f32 %v7587_v40, %v3297_v59  ;;  %v3170_v5 = vmul.f32 %v7602_v47, %v3042_v4 }
 0x164   :  { %v4511_v57 = vsub.f32 1.0, %v4383_v24  ;;  %v4320_v26 = vmul.f32 %v7580_v16, %v3680_v63  ;;  %v3361_v46 = vadd.f32 -0.28449672, %v3233_v42  ;;  %v3106_v18 = vadd.f32 1.4214138, %v2978_v62  ;;  %v7647_v35 = vpop.eup %5531 }
 0x165   :  { %v4703_v36 = vsub.f32 0.0, %v4447_v51  ;;  %v4384_v41 = vmul.f32 %v7593_v37, %v3744_v44  ;;  %v3553_v30 = vadd.f32 0.2548296, %v3425_v48  ;;  %v3298_v12 = vadd.f32 -0.28449672, %v3170_v5  ;;  %v7653_v63 = vpop.eup %5533 }
 0x166   :  { %v4767_v29 = vsub.f32 0.0, %v4511_v57  ;;  %v4448_v43 = vsub.f32 1.0, %v4320_v26  ;;  %v3489_v16 = vmul.f32 %v7598_v50, %v3361_v46  ;;  %v3234_v9 = vmul.f32 %v7612_v49, %v3106_v18 }
 0x167   :  { %v4831_v53 = vsel %vm4575_vm2, %v4447_v51, %v4703_v36  ;;  %v4512_v22 = vsub.f32 1.0, %v4384_v41  ;;  %v3681_v6 = vmul.f32 %v7587_v40, %v3553_v30  ;;  %v3426_v51 = vmul.f32 %v7602_v47, %v3298_v12 }
 0x168   :  { %v4959_v20 = vadd.f32 1.0, %v4831_v53  ;;  %v4895_v23 = vsel %vm4639_vm3, %v4511_v57, %v4767_v29  ;;  %v4704_v19 = vsub.f32 0.0, %v4448_v43  ;;  %v3617_v37 = vadd.f32 0.2548296, %v3489_v16 }
 0x169   :  { %v5023_v24 = vadd.f32 1.0, %v4895_v23  ;;  %v4768_v57 = vsub.f32 0.0, %v4512_v22  ;;  %v4321_v42 = vmul.f32 %v7608_v55, %v3681_v6  ;;  %v3554_v4 = vadd.f32 0.2548296, %v3426_v51 }
 0x16a   :  { %v5087_v8 = vmul.f32 %v4959_v20, %v7519_v2  ;;  %v4832_v59 = vsel %vm4576_vm4, %v4448_v43, %v4704_v19  ;;  %v3745_v2 = vmul.f32 %v7598_v50, %v3617_v37  ;;  %v3362_v62 = vadd.f32 -0.28449672, %v3234_v9 }
 0x16b   :  { %v5151_v54 = vmul.f32 %v5023_v24, %v7535_v21  ;;  %v4960_v40 = vadd.f32 1.0, %v4832_v59  ;;  %v4896_v36 = vsel %vm4640_vm5, %v4512_v22, %v4768_v57  ;;  %v4449_v26 = vsub.f32 1.0, %v4321_v42 }
 0x16c   :  { %5215 = vst [vmem:[#allocation7] sm:$0xff] %v5087_v8  ;;  %vm4578_vm8 = vcmp.ge.f32.partialorder %v7525_v34, 0.0  ;;  %v2659_v45 = vmul.f32 1.0614054, %v7638_v11  ;;  %v2723_v21 = vmul.f32 1.0614054, %v7653_v63  ;;  %v4385_v48 = vmul.f32 %v7617_v14, %v3745_v2 }
 0x16d   :  { %5279 = vst [vmem:[#allocation7 + $0x200] sm:$0xff] %v5151_v54  ;;  %v5088_v55 = vmul.f32 %v4960_v40, %v7544_v58  ;;  %v5024_v44 = vadd.f32 1.0, %v4896_v36  ;;  %v3682_v50 = vmul.f32 %v7602_v47, %v3554_v4  ;;  %v4705_v29 = vsub.f32 0.0, %v4449_v26  ;;  %v1582_v40 = vpop.f32.mrf.mxu0 }
 0x16e   :  { %v3490_v46 = vmul.f32 %v7612_v49, %v3362_v62  ;;  %v2787_v5 = vadd.f32 -1.4531521, %v2659_v45  ;;  %v2851_v61 = vadd.f32 -1.4531521, %v2723_v21  ;;  %v4513_v53 = vsub.f32 1.0, %v4385_v48 }
 0x16f   :  { %5216 = vst [vmem:[#allocation7 + $0x8] sm:$0xff] %v5088_v55  ;;  %v5152_v18 = vmul.f32 %v5024_v44, %v7550_v3  ;;  %v4322_v43 = vmul.f32 %v7622_v13, %v3682_v50  ;;  %v3875_v41 = vsub.f32 0.0, %v7585_v38  ;;  %v4833_v58 = vsel %vm4577_vm6, %v4449_v26, %v4705_v29  ;;  %v1742_v29 = vpop.f32.mrf.mxu1 }
 0x170   :  { %v3618_v30 = vadd.f32 0.2548296, %v3490_v46  ;;  %v2915_v14 = vmul.f32 %v7638_v11, %v2787_v5  ;;  %v2979_v47 = vmul.f32 %v7653_v63, %v2851_v61  ;;  %v4961_v20 = vadd.f32 1.0, %v4833_v58  ;;  %v1584_v5 = vpop.f32.mrf.mxu0 }
 0x171   :  { %5280 = vst [vmem:[#allocation7 + $0x208] sm:$0xff] %v5152_v18  ;;  %v4769_v23 = vsub.f32 0.0, %v4513_v53  ;;  %v4450_v16 = vsub.f32 1.0, %v4322_v43  ;;  %v4003_v12 = vmul.f32 %v3875_v41, %v7585_v38  ;;  %v7680_v19 = vmul.f32 0.70710677, %v7578_v33 }
 0x172   :  { %v3746_v3 = vmul.f32 %v7612_v49, %v3618_v30  ;;  %v3043_v24 = vadd.f32 1.4214138, %v2915_v14  ;;  %v3107_v13 = vadd.f32 1.4214138, %v2979_v47  ;;  %v5089_v1 = vmul.f32 %v4961_v20, %v7562_v15  ;;  %v1744_v20 = vpop.f32.mrf.mxu1 }
 0x173   :  { %v4897_v22 = vsel %vm4641_vm7, %v4513_v53, %v4769_v23  ;;  %v4706_v6 = vsub.f32 0.0, %v4450_v16  ;;  %v4199_v8 = vmul.f32 1.442695, %v4003_v12  ;;  %v1890_v49 = vmul.f32 0.5, %v7516_v56 }
 0x174   :  { %v5025_v37 = vadd.f32 1.0, %v4897_v22  ;;  %v4386_v51 = vmul.f32 %v7628_v32, %v3746_v3  ;;  %v3171_v9 = vmul.f32 %v7638_v11, %v3043_v24  ;;  %v3235_v38 = vmul.f32 %v7653_v63, %v3107_v13  ;;  %5217 = vst [vmem:[#allocation7 + $0x10] sm:$0xff] %v5089_v1 }
 0x175   :  { %v4834_v54 = vsel %vm4578_vm8, %v4450_v16, %v4706_v6  ;;  %5535 = vpow2.f32 %v4199_v8  ;;  %v2148_v15 = vand.u32 2147483647, %v7680_v19  ;;  %v7695_v56 = vmul.f32 0.70710677, %v7591_v10 }
 0x176   :  { %v5153_v27 = vmul.f32 %v5025_v37, %v7571_v17  ;;  %v4962_v59 = vadd.f32 1.0, %v4834_v54  ;;  %v4514_v57 = vsub.f32 1.0, %v4386_v51  ;;  %v3299_v42 = vadd.f32 -0.28449672, %v3171_v9 }
 0x177   :  { %v3363_v32 = vadd.f32 -0.28449672, %v3235_v38  ;;  %v2276_v2 = vmul.f32 0.3275911, %v2148_v15  ;;  %vm4642_vm9 = vcmp.ge.f32.partialorder %v7533_v25, 0.0  ;;  %v7700_v17 = vadd.f32 %v1582_v40, %v7480_v60 }
 0x178   :  { %5281 = vst [vmem:[#allocation7 + $0x210] sm:$0xff] %v5153_v27  ;;  %v5090_v4 = vmul.f32 %v4962_v59, %v1890_v49  ;;  %v4770_v62 = vsub.f32 0.0, %v4514_v57  ;;  %v3427_v36 = vmul.f32 %v7638_v11, %v3299_v42  ;;  %v2212_v55 = vand.u32 2147483647, %v7695_v56 }
 0x179   :  { %v3491_v34 = vmul.f32 %v7653_v63, %v3363_v32  ;;  %v2404_v26 = vadd.f32 1.0, %v2276_v2  ;;  %v1954_v44 = vmul.f32 0.5, %v7529_v31  ;;  %v7706_v18 = vmul.f32 0.70710677, %v7700_v17 }
 0x17a   :  { %5218 = vst [vmem:[#allocation7 + $0x18] sm:$0xff] %v5090_v4  ;;  %v4898_v45 = vsel %vm4642_vm9, %v4514_v57, %v4770_v62  ;;  %v3555_v21 = vadd.f32 0.2548296, %v3427_v36  ;;  %v2340_v25 = vmul.f32 0.3275911, %v2212_v55  ;;  %v7710_v41 = vadd.f32 %v1742_v29, %v7480_v60 }
 0x17b   :  { %v5026_v48 = vadd.f32 1.0, %v4898_v45  ;;  %v3619_v50 = vadd.f32 0.2548296, %v3491_v34  ;;  %5537 = vrcp.f32 %v2404_v26  ;;  %v2149_v58 = vand.u32 2147483647, %v7706_v18  ;;  %v1588_v45 = vpop.f32.mrf.mxu0 }
 0x17c   :  { %v3683_v46 = vmul.f32 %v7638_v11, %v3555_v21  ;;  %v2468_v43 = vadd.f32 1.0, %v2340_v25  ;;  %v7715_v30 = vadd.f32 %v1584_v5, %v7482_v0  ;;  %v1891_v11 = vmul.f32 0.5, %v7539_v28  ;;  %v1748_v21 = vpop.f32.mrf.mxu1 }
 0x17d   :  { %v5154_v61 = vmul.f32 %v5026_v48, %v1954_v44  ;;  %v3747_v31 = vmul.f32 %v7653_v63, %v3619_v50  ;;  %v3812_v47 = vsub.f32 0.0, %v2148_v15  ;;  %vm4579_vm10 = vcmp.ge.f32.partialorder %v7554_v39, 0.0 }
 0x17e   :  { %v4323_v53 = vmul.f32 %v7647_v35, %v3683_v46  ;;  %5539 = vrcp.f32 %v2468_v43  ;;  %v1955_v35 = vmul.f32 0.5, %v7557_v52  ;;  %v2277_v23 = vmul.f32 0.3275911, %v2149_v58 }
 0x17f   :  { %5282 = vst [vmem:[#allocation7 + $0x218] sm:$0xff] %v5154_v61  ;;  %v7721_v16 = vmul.f32 0.70710677, %v7710_v41  ;;  %vm4643_vm11 = vcmp.ge.f32.partialorder %v7574_v7, 0.0  ;;  %v3876_v3 = vsub.f32 0.0, %v2212_v55  ;;  %v7729_v39 = vadd.f32 %v1744_v20, %v7482_v0 }
 0x180   :  { %v4451_v14 = vsub.f32 1.0, %v4323_v53  ;;  %v7725_v24 = vmul.f32 0.70710677, %v7715_v30  ;;  %v2405_v13 = vadd.f32 1.0, %v2277_v23  ;;  %v3940_v22 = vmul.f32 %v3812_v47, %v2148_v15  ;;  %v1590_v47 = vpop.f32.mrf.mxu0 }
 0x181   :  { %v2213_v1 = vand.u32 2147483647, %v7721_v16  ;;  %v3813_v6 = vsub.f32 0.0, %v2149_v58  ;;  %v7733_v9 = vmul.f32 0.5, %v7578_v33  ;;  %v4004_v38 = vmul.f32 %v3876_v3, %v2212_v55 }
 0x182   :  { %v5536_v63 = vpop.eup %5535  ;;  %v4707_v12 = vsub.f32 0.0, %v4451_v14  ;;  %v2150_v8 = vand.u32 2147483647, %v7725_v24  ;;  %5541 = vrcp.f32 %v2405_v13  ;;  %v7736_v40 = vmul.f32 0.70710677, %v7729_v39 }
 0x183   :  { %v4387_v28 = vmul.f32 %v5536_v63, %v3747_v31  ;;  %v2341_v49 = vmul.f32 0.3275911, %v2213_v1  ;;  %v3877_v54 = vsub.f32 0.0, %v2213_v1  ;;  %v4073_v32 = vmul.f32 1.442695, %v3940_v22 }
 0x184   :  { %v4835_v52 = vsel %vm4579_vm10, %v4451_v14, %v4707_v12  ;;  %v2278_v27 = vmul.f32 0.3275911, %v2150_v8  ;;  %v3814_v42 = vsub.f32 0.0, %v2150_v8  ;;  %v3941_v2 = vmul.f32 %v3813_v6, %v2149_v58 }
 0x185   :  { %v4963_v37 = vadd.f32 1.0, %v4835_v52  ;;  %v4515_v51 = vsub.f32 1.0, %v4387_v28  ;;  %v2469_v4 = vadd.f32 1.0, %v2341_v49  ;;  %v4005_v34 = vmul.f32 %v3877_v54, %v2213_v1 }
 0x186   :  { %v2406_v62 = vadd.f32 1.0, %v2278_v27  ;;  %v2214_v26 = vand.u32 2147483647, %v7736_v40  ;;  %v7745_v44 = vmul.f32 0.5, %v7591_v10  ;;  %v4201_v48 = vmul.f32 1.442695, %v4004_v38 }
 0x187   :  { %v5091_v59 = vmul.f32 %v4963_v37, %v1891_v11  ;;  %v4771_v57 = vsub.f32 0.0, %v4515_v51  ;;  %5543 = vrcp.f32 %v2469_v4  ;;  %v3942_v29 = vmul.f32 %v3814_v42, %v2150_v8 }
 0x188   :  { %v7738_v15 = vpop.eup %5537  ;;  %5545 = vrcp.f32 %v2406_v62  ;;  %v2342_v46 = vmul.f32 0.3275911, %v2214_v26  ;;  %v4075_v7 = vmul.f32 1.442695, %v3941_v2  ;;  %v7748_v5 = vadd.f32 %v1588_v45, %v7480_v60 }
 0x189   :  { %5219 = vst [vmem:[#allocation7 + $0x20] sm:$0xff] %v5091_v59  ;;  %v4899_v33 = vsel %vm4643_vm11, %v4515_v51, %v4771_v57  ;;  %v2660_v36 = vmul.f32 1.0614054, %v7738_v15  ;;  %v7751_v61 = vadd.f32 %v1748_v21, %v7480_v60  ;;  %5547 = vpow2.f32 %v4073_v32  ;;  %v1750_v21 = vpop.f32.mrf.mxu1 }
 0x18a   :  { %v5027_v55 = vadd.f32 1.0, %v4899_v33  ;;  %v4203_v10 = vmul.f32 1.442695, %v4005_v34  ;;  %v2470_v31 = vadd.f32 1.0, %v2342_v46  ;;  %5549 = vpow2.f32 %v4201_v48 }
 0x18b   :  { %v2788_v50 = vadd.f32 -1.4531521, %v2660_v36  ;;  %v7753_v53 = vpop.eup %5539  ;;  %v3878_v11 = vsub.f32 0.0, %v2214_v26  ;;  %v7758_v14 = vmul.f32 0.70710677, %v7748_v5  ;;  %v7764_v12 = vmul.f32 0.5, %v7700_v17 }
 0x18c   :  { %v5155_v25 = vmul.f32 %v5027_v55, %v1955_v35  ;;  %v2724_v58 = vmul.f32 1.0614054, %v7753_v53  ;;  %v4077_v35 = vmul.f32 1.442695, %v3942_v29  ;;  %5551 = vrcp.f32 %v2470_v31 }
 0x18d   :  { %v2916_v43 = vmul.f32 %v7738_v15, %v2788_v50  ;;  %v7761_v23 = vmul.f32 0.70710677, %v7751_v61  ;;  %5553 = vpow2.f32 %v4075_v7  ;;  %v2151_v3 = vand.u32 2147483647, %v7758_v14 }
 0x18e   :  { %5283 = vst [vmem:[#allocation7 + $0x220] sm:$0xff] %v5155_v25  ;;  %v2852_v63 = vadd.f32 -1.4531521, %v2724_v58  ;;  %5555 = vpow2.f32 %v4203_v10  ;;  %v7770_v1 = vadd.f32 %v1590_v47, %v7482_v0  ;;  %v4006_v6 = vmul.f32 %v3878_v11, %v2214_v26 }
 0x18f   :  { %v3044_v20 = vadd.f32 1.4214138, %v2916_v43  ;;  %v2215_v13 = vand.u32 2147483647, %v7761_v23  ;;  %v7772_v52 = vpop.eup %5541  ;;  %v2279_v8 = vmul.f32 0.3275911, %v2151_v3  ;;  %5557 = vpow2.f32 %v4077_v35 }
 0x190   :  { %v2980_v22 = vmul.f32 %v7753_v53, %v2852_v63  ;;  %v3815_v37 = vsub.f32 0.0, %v2151_v3  ;;  %v2661_v51 = vmul.f32 1.0614054, %v7772_v52  ;;  %v7778_v2 = vmul.f32 0.70710677, %v7770_v1 }
 0x191   :  { %v3172_v28 = vmul.f32 %v7738_v15, %v3044_v20  ;;  %v2343_v38 = vmul.f32 0.3275911, %v2215_v13  ;;  %v2407_v54 = vadd.f32 1.0, %v2279_v8  ;;  %v3879_v59 = vsub.f32 0.0, %v2215_v13 }
 0x192   :  { %v3108_v49 = vadd.f32 1.4214138, %v2980_v22  ;;  %v3943_v27 = vmul.f32 %v3815_v37, %v2151_v3  ;;  %v2789_v42 = vadd.f32 -1.4531521, %v2661_v51  ;;  %v7782_v62 = vmul.f32 0.5, %v7710_v41 }
 0x193   :  { %v3300_v17 = vadd.f32 -0.28449672, %v3172_v28  ;;  %v2471_v32 = vadd.f32 1.0, %v2343_v38  ;;  %v4205_v33 = vmul.f32 1.442695, %v4006_v6  ;;  %5559 = vrcp.f32 %v2407_v54 }
 0x194   :  { %v3236_v4 = vmul.f32 %v7753_v53, %v3108_v49  ;;  %v7784_v36 = vpop.eup %5543  ;;  %v2917_v26 = vmul.f32 %v7772_v52, %v2789_v42  ;;  %v2152_v45 = vand.u32 2147483647, %v7778_v2  ;;  %vm4580_vm12 = vcmp.ge.f32.partialorder %v7680_v19, 0.0 }
 0x195   :  { %v3428_v57 = vmul.f32 %v7738_v15, %v3300_v17  ;;  %5561 = vrcp.f32 %v2471_v32  ;;  %v7788_v55 = vpop.eup %5545  ;;  %v2725_v50 = vmul.f32 1.0614054, %v7784_v36  ;;  %v4079_v41 = vmul.f32 1.442695, %v3943_v27 }
 0x196   :  { %v3364_v48 = vadd.f32 -0.28449672, %v3236_v4  ;;  %v4007_v29 = vmul.f32 %v3879_v59, %v2215_v13  ;;  %v3045_v25 = vadd.f32 1.4214138, %v2917_v26  ;;  %v2662_v7 = vmul.f32 1.0614054, %v7788_v55  ;;  %v5548_v10 = vpop.eup %5547 }
 0x197   :  { %v3556_v34 = vadd.f32 0.2548296, %v3428_v57  ;;  %v2280_v43 = vmul.f32 0.3275911, %v2152_v45  ;;  %v2853_v58 = vadd.f32 -1.4531521, %v2725_v50  ;;  %5563 = vpow2.f32 %v4205_v33  ;;  %v5550_v47 = vpop.eup %5549 }
 0x198   :  { %v3492_v31 = vmul.f32 %v7753_v53, %v3364_v48  ;;  %v7796_v11 = vadd.f32 %v1750_v21, %v7482_v0  ;;  %v3173_v35 = vmul.f32 %v7772_v52, %v3045_v25  ;;  %v2790_v63 = vadd.f32 -1.4531521, %v2662_v7 }
 0x199   :  { %v3684_v46 = vmul.f32 %v7738_v15, %v3556_v34  ;;  %v2408_v3 = vadd.f32 1.0, %v2280_v43  ;;  %v7799_v28 = vpop.eup %5551  ;;  %v2981_v13 = vmul.f32 %v7784_v36, %v2853_v58  ;;  %5565 = vpow2.f32 %v4079_v41 }
 0x19a   :  { %v3620_v15 = vadd.f32 0.2548296, %v3492_v31  ;;  %v4207_v22 = vmul.f32 1.442695, %v4007_v29  ;;  %v5554_v6 = vpop.eup %5553  ;;  %vm4644_vm13 = vcmp.ge.f32.partialorder %v7695_v56, 0.0  ;;  %v2918_v17 = vmul.f32 %v7788_v55, %v2790_v63 }
 0x19b   :  { %v4324_v20 = vmul.f32 %v5548_v10, %v3684_v46  ;;  %v3301_v37 = vadd.f32 -0.28449672, %v3173_v35  ;;  %v2726_v51 = vmul.f32 1.0614054, %v7799_v28  ;;  %v5556_v38 = vpop.eup %5555  ;;  %v3109_v54 = vadd.f32 1.4214138, %v2981_v13 }
 0x19c   :  { %v3748_v49 = vmul.f32 %v7753_v53, %v3620_v15  ;;  %5567 = vrcp.f32 %v2408_v3  ;;  %v3816_v27 = vsub.f32 0.0, %v2152_v45  ;;  %v3046_v42 = vadd.f32 1.4214138, %v2918_v17  ;;  %v5558_v4 = vpop.eup %5557 }
 0x19d   :  { %v4452_v8 = vsub.f32 1.0, %v4324_v20  ;;  %v3429_v57 = vmul.f32 %v7772_v52, %v3301_v37  ;;  %v2854_v32 = vadd.f32 -1.4531521, %v2726_v51  ;;  %v3237_v34 = vmul.f32 %v7784_v36, %v3109_v54 }
 0x19e   :  { %v4388_v33 = vmul.f32 %v5550_v47, %v3748_v49  ;;  %v7809_v26 = vmul.f32 0.5, %v7715_v30  ;;  %5569 = vpow2.f32 %v4207_v22  ;;  %v3174_v48 = vmul.f32 %v7788_v55, %v3046_v42 }
 0x19f   :  { %v4708_v59 = vsub.f32 0.0, %v4452_v8  ;;  %v3557_v53 = vadd.f32 0.2548296, %v3429_v57  ;;  %v2982_v50 = vmul.f32 %v7799_v28, %v2854_v32  ;;  %vm4581_vm14 = vcmp.ge.f32.partialorder %v7706_v18, 0.0 }
 0x1a0   :  { %v4516_v29 = vsub.f32 1.0, %v4388_v33  ;;  %v3365_v46 = vadd.f32 -0.28449672, %v3237_v34  ;;  %v7817_v25 = vmul.f32 0.70710677, %v7796_v11  ;;  %v7819_v7 = vpop.eup %5559  ;;  %v3944_v10 = vmul.f32 %v3816_v27, %v2152_v45 }
 0x1a1   :  { %v4836_v21 = vsel %vm4580_vm12, %v4452_v8, %v4708_v59  ;;  %v3685_v30 = vmul.f32 %v7772_v52, %v3557_v53  ;;  %v3302_v43 = vadd.f32 -0.28449672, %v3174_v48  ;;  %v3110_v19 = vadd.f32 1.4214138, %v2982_v50 }
 0x1a2   :  { %v4964_v41 = vadd.f32 1.0, %v4836_v21  ;;  %v7822_v31 = vpop.eup %5561  ;;  %v4772_v47 = vsub.f32 0.0, %v4516_v29  ;;  %v3493_v20 = vmul.f32 %v7784_v36, %v3365_v46  ;;  %v2663_v35 = vmul.f32 1.0614054, %v7819_v7 }
 0x1a3   :  { %v4325_v63 = vmul.f32 %v5554_v6, %v3685_v30  ;;  %v3430_v3 = vmul.f32 %v7788_v55, %v3302_v43  ;;  %v3238_v15 = vmul.f32 %v7799_v28, %v3110_v19  ;;  %v2727_v13 = vmul.f32 1.0614054, %v7822_v31 }
 0x1a4   :  { %v5092_v58 = vmul.f32 %v4964_v41, %v7733_v9  ;;  %v4900_v52 = vsel %vm4644_vm13, %v4516_v29, %v4772_v47  ;;  %v3621_v45 = vadd.f32 0.2548296, %v3493_v20  ;;  %v2791_v22 = vadd.f32 -1.4531521, %v2663_v35  ;;  %v5564_v8 = vpop.eup %5563  ;;  %v1592_v20 = vpop.f32.mrf.mxu0 }
 0x1a5   :  { %v7833_v9 = vand.u32 2147483647, %v7817_v25  ;;  %v5028_v37 = vadd.f32 1.0, %v4900_v52  ;;  %v4453_v17 = vsub.f32 1.0, %v4325_v63  ;;  %vm4645_vm15 = vcmp.ge.f32.partialorder %v7721_v16, 0.0 }
 0x1a6   :  { %5220 = vst [vmem:[#allocation7 + $0x28] sm:$0xff] %v5092_v58  ;;  %v3558_v6 = vadd.f32 0.2548296, %v3430_v3  ;;  %v3366_v51 = vadd.f32 -0.28449672, %v3238_v15  ;;  %v3749_v49 = vmul.f32 %v7784_v36, %v3621_v45  ;;  %vm4582_vm0 = vcmp.ge.f32.partialorder %v7725_v24, 0.0  ;;  %v5566_v59 = vpop.eup %5565 }
 0x1a7   :  { %v2919_v54 = vmul.f32 %v7819_v7, %v2791_v22  ;;  %v2855_v56 = vadd.f32 -1.4531521, %v2727_v13  ;;  %v2344_v27 = vmul.f32 0.3275911, %v7833_v9  ;;  %v5156_v57 = vmul.f32 %v5028_v37, %v7745_v44 }
 0x1a8   :  { %v4709_v42 = vsub.f32 0.0, %v4453_v17  ;;  %v3686_v32 = vmul.f32 %v7788_v55, %v3558_v6  ;;  %v3494_v33 = vmul.f32 %v7799_v28, %v3366_v51  ;;  %v4389_v34 = vmul.f32 %v5556_v38, %v3749_v49  ;;  %v1752_v49 = vpop.f32.mrf.mxu1 }
 0x1a9   :  { %v3047_v21 = vadd.f32 1.4214138, %v2919_v54  ;;  %v2983_v53 = vmul.f32 %v7822_v31, %v2855_v56  ;;  %v2472_v36 = vadd.f32 1.0, %v2344_v27  ;;  %v7844_v48 = vpop.eup %5567  ;;  %5284 = vst [vmem:[#allocation7 + $0x228] sm:$0xff] %v5156_v57  ;;  %v4081_v46 = vmul.f32 1.442695, %v3944_v10 }
 0x1aa   :  { %v4837_v50 = vsel %vm4581_vm14, %v4453_v17, %v4709_v42  ;;  %v4326_v41 = vmul.f32 %v5558_v4, %v3686_v32  ;;  %v3622_v29 = vadd.f32 0.2548296, %v3494_v33  ;;  %v4517_v30 = vsub.f32 1.0, %v4389_v34 }
 0x1ab   :  { %v4965_v44 = vadd.f32 1.0, %v4837_v50  ;;  %v3175_v55 = vmul.f32 %v7819_v7, %v3047_v21  ;;  %v3111_v43 = vadd.f32 1.4214138, %v2983_v53  ;;  %v5570_v19 = vpop.eup %5569  ;;  %v2664_v47 = vmul.f32 1.0614054, %v7844_v48 }
 0x1ac   :  { %v4454_v38 = vsub.f32 1.0, %v4326_v41  ;;  %v3750_v58 = vmul.f32 %v7799_v28, %v3622_v29  ;;  %5571 = vrcp.f32 %v2472_v36  ;;  %v4773_v18 = vsub.f32 0.0, %v4517_v30 }
 0x1ad   :  { %v5093_v35 = vmul.f32 %v4965_v44, %v7764_v12  ;;  %v3303_v63 = vadd.f32 -0.28449672, %v3175_v55  ;;  %v3239_v4 = vmul.f32 %v7822_v31, %v3111_v43  ;;  %v2792_v15 = vadd.f32 -1.4531521, %v2664_v47  ;;  %v1594_v55 = vpop.f32.mrf.mxu0 }
 0x1ae   :  { %v4710_v10 = vsub.f32 0.0, %v4454_v38  ;;  %v4390_v3 = vmul.f32 %v5564_v8, %v3750_v58  ;;  %5573 = vpow2.f32 %v4081_v46  ;;  %v4901_v13 = vsel %vm4645_vm15, %v4517_v30, %v4773_v18 }
 0x1af   :  { %5221 = vst [vmem:[#allocation7 + $0x30] sm:$0xff] %v5093_v35  ;;  %v3431_v28 = vmul.f32 %v7819_v7, %v3303_v63  ;;  %v3367_v52 = vadd.f32 -0.28449672, %v3239_v4  ;;  %v7857_v45 = vadd.f32 %v1592_v20, %v7480_v60  ;;  %v5029_v22 = vadd.f32 1.0, %v4901_v13 }
 0x1b0   :  { %v4838_v12 = vsel %vm4582_vm0, %v4454_v38, %v4710_v10  ;;  %v4518_v37 = vsub.f32 1.0, %v4390_v3  ;;  %v2920_v17 = vmul.f32 %v7844_v48, %v2792_v15  ;;  %v3880_v16 = vsub.f32 0.0, %v7833_v9  ;;  %v1754_v15 = vpop.f32.mrf.mxu1 }
 0x1b1   :  { %v4966_v8 = vadd.f32 1.0, %v4838_v12  ;;  %v3559_v6 = vadd.f32 0.2548296, %v3431_v28  ;;  %v3495_v51 = vmul.f32 %v7822_v31, %v3367_v52  ;;  %v5157_v54 = vmul.f32 %v5029_v22, %v7782_v62 }
 0x1b2   :  { %v1958_v56 = vmul.f32 0.5, %v7729_v39  ;;  %v4774_v27 = vsub.f32 0.0, %v4518_v37  ;;  %v3048_v57 = vadd.f32 1.4214138, %v2920_v17  ;;  %vm4646_vm1 = vcmp.ge.f32.partialorder %v7736_v40, 0.0 }
 0x1b3   :  { %v5094_v42 = vmul.f32 %v4966_v8, %v7809_v26  ;;  %v3687_v24 = vmul.f32 %v7819_v7, %v3559_v6  ;;  %v3623_v32 = vadd.f32 0.2548296, %v3495_v51  ;;  %5285 = vst [vmem:[#allocation7 + $0x230] sm:$0xff] %v5157_v54  ;;  %v7871_v21 = vmul.f32 0.70710677, %v7857_v45  ;;  %v1598_v51 = vpop.f32.mrf.mxu0 }
 0x1b4   :  { %v4902_v33 = vsel %vm4646_vm1, %v4518_v37, %v4774_v27  ;;  %v3176_v34 = vmul.f32 %v7844_v48, %v3048_v57  ;;  %v7874_v62 = vadd.f32 %v1752_v49, %v7480_v60  ;;  %v4008_v40 = vmul.f32 %v3880_v16, %v7833_v9 }
 0x1b5   :  { %5222 = vst [vmem:[#allocation7 + $0x38] sm:$0xff] %v5094_v42  ;;  %v5030_v39 = vadd.f32 1.0, %v4902_v33  ;;  %v4327_v53 = vmul.f32 %v5566_v59, %v3687_v24  ;;  %v3751_v26 = vmul.f32 %v7822_v31, %v3623_v32  ;;  %v2153_v7 = vand.u32 2147483647, %v7871_v21  ;;  %v1758_v24 = vpop.f32.mrf.mxu1 }
 0x1b6   :  { %v3304_v36 = vadd.f32 -0.28449672, %v3176_v34  ;;  %v7880_v46 = vmul.f32 0.70710677, %v7874_v62  ;;  %v1895_v44 = vmul.f32 0.5, %v7748_v5  ;;  %vm4583_vm2 = vcmp.ge.f32.partialorder %v7758_v14, 0.0 }
 0x1b7   :  { %v5158_v50 = vmul.f32 %v5030_v39, %v1958_v56  ;;  %v4455_v41 = vsub.f32 1.0, %v4327_v53  ;;  %v4391_v29 = vmul.f32 %v5570_v19, %v3751_v26  ;;  %v2281_v59 = vmul.f32 0.3275911, %v2153_v7 }
 0x1b8   :  { %v3432_v30 = vmul.f32 %v7844_v48, %v3304_v36  ;;  %v4209_v38 = vmul.f32 1.442695, %v4008_v40  ;;  %v2217_v58 = vand.u32 2147483647, %v7880_v46  ;;  %vm4647_vm3 = vcmp.ge.f32.partialorder %v7761_v23, 0.0 }
 0x1b9   :  { %v7885_v31 = vpop.eup %5571  ;;  %5286 = vst [vmem:[#allocation7 + $0x238] sm:$0xff] %v5158_v50  ;;  %v4711_v9 = vsub.f32 0.0, %v4455_v41  ;;  %v4519_v43 = vsub.f32 1.0, %v4391_v29  ;;  %v2409_v5 = vadd.f32 1.0, %v2281_v59  ;;  %v7891_v63 = vadd.f32 %v1594_v55, %v7482_v0  ;;  %v1600_v29 = vpop.f32.mrf.mxu0 }
 0x1ba   :  { %v3560_v19 = vadd.f32 0.2548296, %v3432_v30  ;;  %v2728_v47 = vmul.f32 1.0614054, %v7885_v31  ;;  %v2345_v18 = vmul.f32 0.3275911, %v2217_v58  ;;  %v7908_v42 = vadd.f32 %v1598_v51, %v7480_v60 }
 0x1bb   :  { %v5574_v20 = vpop.eup %5573  ;;  %v4839_v14 = vsel %vm4583_vm2, %v4455_v41, %v4711_v9  ;;  %v4775_v35 = vsub.f32 0.0, %v4519_v43  ;;  %5575 = vrcp.f32 %v2409_v5  ;;  %v1959_v13 = vmul.f32 0.5, %v7751_v61 }
 0x1bc   :  { %v4967_v4 = vadd.f32 1.0, %v4839_v14  ;;  %v3688_v10 = vmul.f32 %v7844_v48, %v3560_v19  ;;  %v2856_v3 = vadd.f32 -1.4531521, %v2728_v47  ;;  %5577 = vpow2.f32 %v4209_v38 }
 0x1bd   :  { %v4903_v23 = vsel %vm4647_vm3, %v4519_v43, %v4775_v35  ;;  %v2473_v28 = vadd.f32 1.0, %v2345_v18  ;;  %v3817_v17 = vsub.f32 0.0, %v2153_v7  ;;  %v3881_v8 = vsub.f32 0.0, %v2217_v58 }
 0x1be   :  { %v5095_v52 = vmul.f32 %v4967_v4, %v1895_v44  ;;  %v5031_v22 = vadd.f32 1.0, %v4903_v23  ;;  %v4328_v12 = vmul.f32 %v5574_v20, %v3688_v10  ;;  %v2984_v37 = vmul.f32 %v7885_v31, %v2856_v3 }
 0x1bf   :  { %v7897_v6 = vmul.f32 0.70710677, %v7891_v63  ;;  %v7900_v48 = vadd.f32 %v1754_v15, %v7482_v0  ;;  %5579 = vrcp.f32 %v2473_v28  ;;  %vm4584_vm4 = vcmp.ge.f32.partialorder %v7778_v2, 0.0 }
 0x1c0   :  { %5223 = vst [vmem:[#allocation7 + $0x40] sm:$0xff] %v5095_v52  ;;  %v5159_v16 = vmul.f32 %v5031_v22, %v1959_v13  ;;  %v4456_v61 = vsub.f32 1.0, %v4328_v12  ;;  %v3112_v49 = vadd.f32 1.4214138, %v2984_v37  ;;  %v3945_v32 = vmul.f32 %v3817_v17, %v2153_v7 }
 0x1c1   :  { %v2154_v54 = vand.u32 2147483647, %v7897_v6  ;;  %v7905_v57 = vmul.f32 0.70710677, %v7900_v48  ;;  %v4009_v33 = vmul.f32 %v3881_v8, %v2217_v58  ;;  %v1896_v40 = vmul.f32 0.5, %v7770_v1 }
 0x1c2   :  { %5287 = vst [vmem:[#allocation7 + $0x240] sm:$0xff] %v5159_v16  ;;  %v4712_v56 = vsub.f32 0.0, %v4456_v61  ;;  %v3240_v27 = vmul.f32 %v7885_v31, %v3112_v49  ;;  %v7914_v41 = vadd.f32 %v1758_v24, %v7480_v60  ;;  %v7917_v44 = vmul.f32 0.5, %v7796_v11 }
 0x1c3   :  { %v2282_v34 = vmul.f32 0.3275911, %v2154_v54  ;;  %v2218_v26 = vand.u32 2147483647, %v7905_v57  ;;  %v7921_v30 = vmul.f32 0.70710677, %v7908_v42  ;;  %v7925_v58 = vadd.f32 %v1600_v29, %v7482_v0 }
 0x1c4   :  { %v4840_v39 = vsel %vm4584_vm4, %v4456_v61, %v4712_v56  ;;  %v3368_v53 = vadd.f32 -0.28449672, %v3240_v27  ;;  %v4083_v55 = vmul.f32 1.442695, %v3945_v32  ;;  %v4211_v9 = vmul.f32 1.442695, %v4009_v33 }
 0x1c5   :  { %v4968_v36 = vadd.f32 1.0, %v4840_v39  ;;  %v2410_v50 = vadd.f32 1.0, %v2282_v34  ;;  %v2346_v7 = vmul.f32 0.3275911, %v2218_v26  ;;  %v2155_v38 = vand.u32 2147483647, %v7921_v30  ;;  %v1760_v34 = vpop.f32.mrf.mxu1  ;;  %v1602_v39 = vpop.f32.mrf.mxu0 }
 0x1c6   :  { %v3496_v2 = vmul.f32 %v7885_v31, %v3368_v53  ;;  %vm4648_vm5 = vcmp.ge.f32.partialorder %v7817_v25, 0.0  ;;  %v7931_v11 = vmul.f32 0.5, %v7857_v45  ;;  %v7934_v47 = vmul.f32 0.5, %v7874_v62 }
 0x1c7   :  { %v5096_v59 = vmul.f32 %v4968_v36, %v1896_v40  ;;  %5581 = vrcp.f32 %v2410_v50  ;;  %v2474_v43 = vadd.f32 1.0, %v2346_v7  ;;  %v3818_v5 = vsub.f32 0.0, %v2154_v54 }
 0x1c8   :  { %v3624_v1 = vadd.f32 0.2548296, %v3496_v2  ;;  %v7927_v19 = vpop.eup %5575  ;;  %v7937_v20 = vmul.f32 0.70710677, %v7914_v41  ;;  %v7942_v4 = vmul.f32 0.5, %v7891_v63  ;;  %v3882_v10 = vsub.f32 0.0, %v2218_v26 }
 0x1c9   :  { %5224 = vst [vmem:[#allocation7 + $0x48] sm:$0xff] %v5096_v59  ;;  %v5578_v14 = vpop.eup %5577  ;;  %v2665_v18 = vmul.f32 1.0614054, %v7927_v19  ;;  %5583 = vrcp.f32 %v2474_v43  ;;  %v2283_v45 = vmul.f32 0.3275911, %v2155_v38  ;;  %v3819_v52 = vsub.f32 0.0, %v2155_v38 }
 0x1ca   :  { %v3752_v35 = vmul.f32 %v7885_v31, %v3624_v1  ;;  %5585 = vpow2.f32 %v4083_v55  ;;  %v2219_v3 = vand.u32 2147483647, %v7937_v20  ;;  %v7946_v13 = vmul.f32 0.70710677, %v7925_v58 }
 0x1cb   :  { %v2793_v15 = vadd.f32 -1.4531521, %v2665_v18  ;;  %5587 = vpow2.f32 %v4211_v9  ;;  %v3946_v31 = vmul.f32 %v3818_v5, %v2154_v54  ;;  %v2411_v28 = vadd.f32 1.0, %v2283_v45 }
 0x1cc   :  { %v4392_v62 = vmul.f32 %v5578_v14, %v3752_v35  ;;  %v7948_v23 = vpop.eup %5579  ;;  %v2347_v22 = vmul.f32 0.3275911, %v2219_v3  ;;  %v2156_v17 = vand.u32 2147483647, %v7946_v13  ;;  %v4010_v8 = vmul.f32 %v3882_v10, %v2218_v26 }
 0x1cd   :  { %v2921_v12 = vmul.f32 %v7927_v19, %v2793_v15  ;;  %v2729_v37 = vmul.f32 1.0614054, %v7948_v23  ;;  %5589 = vrcp.f32 %v2411_v28  ;;  %v3883_v16 = vsub.f32 0.0, %v2219_v3 }
 0x1ce   :  { %v4520_v63 = vsub.f32 1.0, %v4392_v62  ;;  %v2475_v51 = vadd.f32 1.0, %v2347_v22  ;;  %v7954_v27 = vmul.f32 0.5, %v7900_v48  ;;  %v4085_v54 = vmul.f32 1.442695, %v3946_v31 }
 0x1cf   :  { %v3049_v49 = vadd.f32 1.4214138, %v2921_v12  ;;  %v2857_v56 = vadd.f32 -1.4531521, %v2729_v37  ;;  %v3947_v24 = vmul.f32 %v3819_v52, %v2155_v38  ;;  %v2284_v32 = vmul.f32 0.3275911, %v2156_v17 }
 0x1d0   :  { %v4776_v61 = vsub.f32 0.0, %v4520_v63  ;;  %v3820_v33 = vsub.f32 0.0, %v2156_v17  ;;  %5591 = vrcp.f32 %v2475_v51  ;;  %v4213_v50 = vmul.f32 1.442695, %v4010_v8 }
 0x1d1   :  { %v3177_v26 = vmul.f32 %v7927_v19, %v3049_v49  ;;  %v2985_v40 = vmul.f32 %v7948_v23, %v2857_v56  ;;  %v4011_v29 = vmul.f32 %v3883_v16, %v2219_v3  ;;  %v2412_v2 = vadd.f32 1.0, %v2284_v32 }
 0x1d2   :  { %v4904_v53 = vsel %vm4648_vm5, %v4520_v63, %v4776_v61  ;;  %v7963_v55 = vadd.f32 %v1760_v34, %v7482_v0  ;;  %v7966_v9 = vadd.f32 %v1602_v39, %v7480_v60  ;;  %v4087_v43 = vmul.f32 1.442695, %v3947_v24 }
 0x1d3   :  { %v5032_v36 = vadd.f32 1.0, %v4904_v53  ;;  %v3305_v7 = vadd.f32 -0.28449672, %v3177_v26  ;;  %v3113_v59 = vadd.f32 1.4214138, %v2985_v40  ;;  %5593 = vrcp.f32 %v2412_v2 }
 0x1d4   :  { %v7960_v48 = vpop.eup %5581  ;;  %v3948_v14 = vmul.f32 %v3820_v33, %v2156_v17  ;;  %v7973_v35 = vmul.f32 0.70710677, %v7963_v55  ;;  %5595 = vpow2.f32 %v4085_v54  ;;  %v4215_v45 = vmul.f32 1.442695, %v4011_v29 }
 0x1d5   :  { %v5160_v25 = vmul.f32 %v5032_v36, %v7917_v44  ;;  %v2666_v1 = vmul.f32 1.0614054, %v7960_v48  ;;  %v3433_v38 = vmul.f32 %v7927_v19, %v3305_v7  ;;  %v3241_v5 = vmul.f32 %v7948_v23, %v3113_v59 }
 0x1d6   :  { %v7975_v18 = vpop.eup %5583  ;;  %v7978_v44 = vmul.f32 0.70710677, %v7966_v9  ;;  %5597 = vpow2.f32 %v4213_v50  ;;  %vm4585_vm6 = vcmp.ge.f32.partialorder %v7871_v21, 0.0  ;;  %v2220_v22 = vand.u32 2147483647, %v7973_v35 }
 0x1d7   :  { %5288 = vst [vmem:[#allocation7 + $0x248] sm:$0xff] %v5160_v25  ;;  %v2794_v10 = vadd.f32 -1.4531521, %v2666_v1  ;;  %v5586_v3 = vpop.eup %5585  ;;  %v3561_v62 = vadd.f32 0.2548296, %v3433_v38  ;;  %5599 = vpow2.f32 %v4087_v43  ;;  %v7990_v16 = vmul.f32 0.5, %v7908_v42 }
 0x1d8   :  { %v3369_v15 = vadd.f32 -0.28449672, %v3241_v5  ;;  %v2730_v31 = vmul.f32 1.0614054, %v7975_v18  ;;  %v5588_v28 = vpop.eup %5587  ;;  %v7985_v63 = vand.u32 2147483647, %v7978_v44  ;;  %5601 = vpow2.f32 %v4215_v45 }
 0x1d9   :  { %v2922_v52 = vmul.f32 %v7960_v48, %v2794_v10  ;;  %v3689_v12 = vmul.f32 %v7927_v19, %v3561_v62  ;;  %v4089_v8 = vmul.f32 1.442695, %v3948_v14  ;;  %v2348_v61 = vmul.f32 0.3275911, %v2220_v22  ;;  %v1762_v62 = vpop.f32.mrf.mxu1 }
 0x1da   :  { %v3497_v37 = vmul.f32 %v7948_v23, %v3369_v15  ;;  %v2858_v17 = vadd.f32 -1.4531521, %v2730_v31  ;;  %v7992_v49 = vpop.eup %5589  ;;  %v2285_v32 = vmul.f32 0.3275911, %v7985_v63  ;;  %vm4649_vm7 = vcmp.ge.f32.partialorder %v7880_v46, 0.0 }
 0x1db   :  { %v3050_v51 = vadd.f32 1.4214138, %v2922_v52  ;;  %v4329_v56 = vmul.f32 %v5586_v3, %v3689_v12  ;;  %v2667_v33 = vmul.f32 1.0614054, %v7992_v49  ;;  %v2476_v34 = vadd.f32 1.0, %v2348_v61 }
 0x1dc   :  { %v3625_v54 = vadd.f32 0.2548296, %v3497_v37  ;;  %v2986_v24 = vmul.f32 %v7975_v18, %v2858_v17  ;;  %v3884_v39 = vsub.f32 0.0, %v2220_v22  ;;  %5603 = vpow2.f32 %v4089_v8 }
 0x1dd   :  { %v3178_v19 = vmul.f32 %v7960_v48, %v3050_v51  ;;  %v4457_v42 = vsub.f32 1.0, %v4329_v56  ;;  %v8000_v40 = vpop.eup %5591  ;;  %v2795_v50 = vadd.f32 -1.4531521, %v2667_v33  ;;  %5605 = vrcp.f32 %v2476_v34 }
 0x1de   :  { %v3753_v53 = vmul.f32 %v7948_v23, %v3625_v54  ;;  %v3114_v26 = vadd.f32 1.4214138, %v2986_v24  ;;  %v2413_v29 = vadd.f32 1.0, %v2285_v32  ;;  %v2731_v25 = vmul.f32 1.0614054, %v8000_v40 }
 0x1df   :  { %v3306_v36 = vadd.f32 -0.28449672, %v3178_v19  ;;  %v4713_v2 = vsub.f32 0.0, %v4457_v42  ;;  %v2923_v43 = vmul.f32 %v7992_v49, %v2795_v50  ;;  %v4012_v38 = vmul.f32 %v3884_v39, %v2220_v22 }
 0x1e0   :  { %v4393_v7 = vmul.f32 %v5588_v28, %v3753_v53  ;;  %v3242_v59 = vmul.f32 %v7975_v18, %v3114_v26  ;;  %v3821_v23 = vsub.f32 0.0, %v7985_v63  ;;  %v8007_v5 = vpop.eup %5593  ;;  %v2859_v3 = vadd.f32 -1.4531521, %v2731_v25 }
 0x1e1   :  { %v3434_v1 = vmul.f32 %v7960_v48, %v3306_v36  ;;  %v4841_v14 = vsel %vm4585_vm6, %v4457_v42, %v4713_v2  ;;  %v3051_v28 = vadd.f32 1.4214138, %v2923_v43  ;;  %5607 = vrcp.f32 %v2413_v29  ;;  %v5596_v52 = vpop.eup %5595 }
 0x1e2   :  { %v4521_v10 = vsub.f32 1.0, %v4393_v7  ;;  %v3370_v45 = vadd.f32 -0.28449672, %v3242_v59  ;;  %v4969_v15 = vadd.f32 1.0, %v4841_v14  ;;  %vm4586_vm8 = vcmp.ge.f32.partialorder %v7897_v6, 0.0 }
 0x1e3   :  { %v3562_v31 = vadd.f32 0.2548296, %v3434_v1  ;;  %v2987_v37 = vmul.f32 %v8000_v40, %v2859_v3  ;;  %v2668_v17 = vmul.f32 1.0614054, %v8007_v5  ;;  %v5598_v21 = vpop.eup %5597  ;;  %v3179_v61 = vmul.f32 %v7992_v49, %v3051_v28 }
 0x1e4   :  { %v4777_v12 = vsub.f32 0.0, %v4521_v10  ;;  %v3498_v22 = vmul.f32 %v7975_v18, %v3370_v45  ;;  %v5097_v8 = vmul.f32 %v4969_v15, %v7931_v11  ;;  %v8019_v56 = vadd.f32 %v1762_v62, %v7480_v60  ;;  %v5600_v54 = vpop.eup %5599 }
 0x1e5   :  { %v3690_v51 = vmul.f32 %v7960_v48, %v3562_v31  ;;  %v3115_v19 = vadd.f32 1.4214138, %v2987_v37  ;;  %v2796_v33 = vadd.f32 -1.4531521, %v2668_v17  ;;  %vm4650_vm9 = vcmp.ge.f32.partialorder %v7905_v57, 0.0  ;;  %v5602_v48 = vpop.eup %5601 }
 0x1e6   :  { %v4905_v24 = vsel %vm4649_vm7, %v4521_v10, %v4777_v12  ;;  %v3626_v32 = vadd.f32 0.2548296, %v3498_v22  ;;  %5225 = vst [vmem:[#allocation7 + $0x50] sm:$0xff] %v5097_v8  ;;  %v3307_v11 = vadd.f32 -0.28449672, %v3179_v61  ;;  %v3949_v46 = vmul.f32 %v3821_v23, %v7985_v63 }
 0x1e7   :  { %v5033_v34 = vadd.f32 1.0, %v4905_v24  ;;  %v4330_v39 = vmul.f32 %v5596_v52, %v3690_v51  ;;  %v4217_v42 = vmul.f32 1.442695, %v4012_v38  ;;  %v3243_v26 = vmul.f32 %v8000_v40, %v3115_v19 }
 0x1e8   :  { %v3754_v53 = vmul.f32 %v7975_v18, %v3626_v32  ;;  %v2924_v36 = vmul.f32 %v8007_v5, %v2796_v33  ;;  %v3435_v2 = vmul.f32 %v7992_v49, %v3307_v11  ;;  %v8031_v7 = vmul.f32 0.70710677, %v8019_v56 }
 0x1e9   :  { %v5161_v50 = vmul.f32 %v5033_v34, %v7934_v47  ;;  %v4458_v29 = vsub.f32 1.0, %v4330_v39  ;;  %v8034_v25 = vmul.f32 0.5, %v7914_v41  ;;  %v3371_v1 = vadd.f32 -0.28449672, %v3243_v26  ;;  %v5604_v43 = vpop.eup %5603  ;;  %v1604_v41 = vpop.f32.mrf.mxu0 }
 0x1ea   :  { %v4394_v59 = vmul.f32 %v5598_v21, %v3754_v53  ;;  %v3052_v18 = vadd.f32 1.4214138, %v2924_v36  ;;  %v3563_v14 = vadd.f32 0.2548296, %v3435_v2  ;;  %5609 = vpow2.f32 %v4217_v42  ;;  %v8039_v47 = vpop.eup %5605 }
 0x1eb   :  { %5289 = vst [vmem:[#allocation7 + $0x250] sm:$0xff] %v5161_v50  ;;  %v4714_v38 = vsub.f32 0.0, %v4458_v29  ;;  %v8037_v63 = vand.u32 2147483647, %v8031_v7  ;;  %v3499_v10 = vmul.f32 %v8000_v40, %v3371_v1  ;;  %v4091_v3 = vmul.f32 1.442695, %v3949_v46 }
 0x1ec   :  { %v4522_v23 = vsub.f32 1.0, %v4394_v59  ;;  %v3180_v45 = vmul.f32 %v8007_v5, %v3052_v18  ;;  %v3691_v15 = vmul.f32 %v7992_v49, %v3563_v14  ;;  %v2732_v31 = vmul.f32 1.0614054, %v8039_v47 }
 0x1ed   :  { %v4842_v62 = vsel %vm4586_vm8, %v4458_v29, %v4714_v38  ;;  %v2349_v28 = vmul.f32 0.3275911, %v8037_v63  ;;  %v3627_v22 = vadd.f32 0.2548296, %v3499_v10  ;;  %v8049_v51 = vadd.f32 %v1604_v41, %v7482_v0  ;;  %v1608_v38 = vpop.f32.mrf.mxu0 }
 0x1ee   :  { %v4970_v52 = vadd.f32 1.0, %v4842_v62  ;;  %v4778_v12 = vsub.f32 0.0, %v4522_v23  ;;  %v3308_v37 = vadd.f32 -0.28449672, %v3180_v45  ;;  %v4331_v17 = vmul.f32 %v5600_v54, %v3691_v15  ;;  %v8051_v61 = vpop.eup %5607 }
 0x1ef   :  { %v2860_v21 = vadd.f32 -1.4531521, %v2732_v31  ;;  %v2477_v8 = vadd.f32 1.0, %v2349_v28  ;;  %v3755_v24 = vmul.f32 %v8000_v40, %v3627_v22  ;;  %v2669_v34 = vmul.f32 1.0614054, %v8051_v61  ;;  %v1764_v40 = vpop.f32.mrf.mxu1 }
 0x1f0   :  { %v5098_v6 = vmul.f32 %v4970_v52, %v7942_v4  ;;  %v4906_v49 = vsel %vm4650_vm9, %v4522_v23, %v4778_v12  ;;  %v3436_v32 = vmul.f32 %v8007_v5, %v3308_v37  ;;  %v4459_v33 = vsub.f32 1.0, %v4331_v17 }
 0x1f1   :  { %v5034_v19 = vadd.f32 1.0, %v4906_v49  ;;  %v2988_v54 = vmul.f32 %v8039_v47, %v2860_v21  ;;  %vm4587_vm10 = vcmp.ge.f32.partialorder %v7921_v30, 0.0  ;;  %v4395_v39 = vmul.f32 %v5602_v48, %v3755_v24 }
 0x1f2   :  { %5226 = vst [vmem:[#allocation7 + $0x58] sm:$0xff] %v5098_v6  ;;  %v3564_v11 = vadd.f32 0.2548296, %v3436_v32  ;;  %5611 = vrcp.f32 %v2477_v8  ;;  %v4715_v57 = vsub.f32 0.0, %v4459_v33  ;;  %v2797_v53 = vadd.f32 -1.4531521, %v2669_v34 }
 0x1f3   :  { %v5162_v4 = vmul.f32 %v5034_v19, %v7954_v27  ;;  %v3116_v42 = vadd.f32 1.4214138, %v2988_v54  ;;  %v4523_v26 = vsub.f32 1.0, %v4395_v39  ;;  %vm4651_vm11 = vcmp.ge.f32.partialorder %v7937_v20, 0.0  ;;  %v1768_v54 = vpop.f32.mrf.mxu1 }
 0x1f4   :  { %v3692_v36 = vmul.f32 %v8007_v5, %v3564_v11  ;;  %v8065_v46 = vmul.f32 0.70710677, %v8049_v51  ;;  %v4843_v50 = vsel %vm4587_vm10, %v4459_v33, %v4715_v57  ;;  %v2925_v48 = vmul.f32 %v8051_v61, %v2797_v53 }
 0x1f5   :  { %5290 = vst [vmem:[#allocation7 + $0x258] sm:$0xff] %v5162_v4  ;;  %v3244_v30 = vmul.f32 %v8039_v47, %v3116_v42  ;;  %5613 = vpow2.f32 %v4091_v3  ;;  %v4971_v27 = vadd.f32 1.0, %v4843_v50  ;;  %v4779_v29 = vsub.f32 0.0, %v4523_v26 }
 0x1f6   :  { %v4332_v2 = vmul.f32 %v5604_v43, %v3692_v36  ;;  %v8070_v59 = vadd.f32 %v1764_v40, %v7482_v0  ;;  %v3053_v18 = vadd.f32 1.4214138, %v2925_v48  ;;  %v2158_v5 = vand.u32 2147483647, %v8065_v46 }
 0x1f7   :  { %v3372_v1 = vadd.f32 -0.28449672, %v3244_v30  ;;  %v5610_v14 = vpop.eup %5609  ;;  %v5099_v23 = vmul.f32 %v4971_v27, %v7990_v16  ;;  %v4907_v10 = vsel %vm4651_vm11, %v4523_v26, %v4779_v29  ;;  %v3885_v3 = vsub.f32 0.0, %v8037_v63  ;;  %v1610_v29 = vpop.f32.mrf.mxu0 }
 0x1f8   :  { %v4460_v45 = vsub.f32 1.0, %v4332_v2  ;;  %v5035_v41 = vadd.f32 1.0, %v4907_v10  ;;  %v3181_v62 = vmul.f32 %v8051_v61, %v3053_v18  ;;  %v2286_v15 = vmul.f32 0.3275911, %v2158_v5 }
 0x1f9   :  { %v3500_v43 = vmul.f32 %v8039_v47, %v3372_v1  ;;  %5227 = vst [vmem:[#allocation7 + $0x60] sm:$0xff] %v5099_v23  ;;  %vm4588_vm12 = vcmp.ge.f32.partialorder %v7946_v13, 0.0  ;;  %v8081_v28 = vmul.f32 0.70710677, %v8070_v59  ;;  %v8084_v16 = vadd.f32 %v1608_v38, %v7480_v60 }
 0x1fa   :  { %v4716_v31 = vsub.f32 0.0, %v4460_v45  ;;  %v5163_v20 = vmul.f32 %v5035_v41, %v8034_v25  ;;  %v3309_v12 = vadd.f32 -0.28449672, %v3181_v62  ;;  %v2414_v22 = vadd.f32 1.0, %v2286_v15  ;;  %v1770_v15 = vpop.f32.mrf.mxu1 }
 0x1fb   :  { %v3628_v52 = vadd.f32 0.2548296, %v3500_v43  ;;  %v1900_v37 = vmul.f32 0.5, %v7925_v58  ;;  %v4013_v21 = vmul.f32 %v3885_v3, %v8037_v63  ;;  %v2222_v8 = vand.u32 2147483647, %v8081_v28 }
 0x1fc   :  { %v4844_v17 = vsel %vm4588_vm12, %v4460_v45, %v4716_v31  ;;  %5291 = vst [vmem:[#allocation7 + $0x260] sm:$0xff] %v5163_v20  ;;  %v3437_v49 = vmul.f32 %v8051_v61, %v3309_v12  ;;  %5615 = vrcp.f32 %v2414_v22  ;;  %v8095_v58 = vmul.f32 0.70710677, %v8084_v16 }
 0x1fd   :  { %v4972_v13 = vadd.f32 1.0, %v4844_v17  ;;  %v3756_v6 = vmul.f32 %v8039_v47, %v3628_v52  ;;  %v2350_v24 = vmul.f32 0.3275911, %v2222_v8  ;;  %v4219_v34 = vmul.f32 1.442695, %v4013_v21 }
 0x1fe   :  { %v3565_v33 = vadd.f32 0.2548296, %v3437_v49  ;;  %v3822_v39 = vsub.f32 0.0, %v2158_v5  ;;  %v3886_v57 = vsub.f32 0.0, %v2222_v8  ;;  %v2159_v42 = vand.u32 2147483647, %v8095_v58 }
 0x1ff   :  { %v8092_v32 = vpop.eup %5611  ;;  %v5100_v25 = vmul.f32 %v4972_v13, %v1900_v37  ;;  %v4396_v19 = vmul.f32 %v5610_v14, %v3756_v6  ;;  %v2478_v11 = vadd.f32 1.0, %v2350_v24  ;;  %v8101_v26 = vadd.f32 %v1768_v54, %v7480_v60  ;;  %v1612_v24 = vpop.f32.mrf.mxu0 }
 0x200   :  { %v2733_v63 = vmul.f32 1.0614054, %v8092_v32  ;;  %v3693_v4 = vmul.f32 %v8051_v61, %v3565_v33  ;;  %vm4652_vm13 = vcmp.ge.f32.partialorder %v7973_v35, 0.0  ;;  %v2287_v30 = vmul.f32 0.3275911, %v2159_v42 }
 0x201   :  { %5228 = vst [vmem:[#allocation7 + $0x68] sm:$0xff] %v5100_v25  ;;  %v4524_v47 = vsub.f32 1.0, %v4396_v19  ;;  %5617 = vrcp.f32 %v2478_v11  ;;  %v3950_v27 = vmul.f32 %v3822_v39, %v2158_v5  ;;  %v8106_v61 = vmul.f32 0.70710677, %v8101_v26 }
 0x202   :  { %v5614_v53 = vpop.eup %5613  ;;  %v2861_v40 = vadd.f32 -1.4531521, %v2733_v63  ;;  %5619 = vpow2.f32 %v4219_v34  ;;  %v4014_v18 = vmul.f32 %v3886_v57, %v2222_v8  ;;  %v2415_v38 = vadd.f32 1.0, %v2287_v30 }
 0x203   :  { %v4780_v36 = vsub.f32 0.0, %v4524_v47  ;;  %v4333_v50 = vmul.f32 %v5614_v53, %v3693_v4  ;;  %v1964_v14 = vmul.f32 0.5, %v7963_v55  ;;  %v2223_v35 = vand.u32 2147483647, %v8106_v61 }
 0x204   :  { %v2989_v48 = vmul.f32 %v8092_v32, %v2861_v40  ;;  %v1901_v45 = vmul.f32 0.5, %v7966_v9  ;;  %5621 = vrcp.f32 %v2415_v38  ;;  %v8112_v5 = vadd.f32 %v1610_v29, %v7482_v0 }
 0x205   :  { %v4908_v2 = vsel %vm4652_vm13, %v4524_v47, %v4780_v36  ;;  %v4461_v1 = vsub.f32 1.0, %v4333_v50  ;;  %vm4589_vm14 = vcmp.ge.f32.partialorder %v7978_v44, 0.0  ;;  %v2351_v62 = vmul.f32 0.3275911, %v2223_v35 }
 0x206   :  { %v5036_v23 = vadd.f32 1.0, %v4908_v2  ;;  %v3117_v10 = vadd.f32 1.4214138, %v2989_v48  ;;  %v4093_v55 = vmul.f32 1.442695, %v3950_v27  ;;  %v3823_v37 = vsub.f32 0.0, %v2159_v42  ;;  %v1772_v2 = vpop.f32.mrf.mxu1 }
 0x207   :  { %v4717_v3 = vsub.f32 0.0, %v4461_v1  ;;  %v4221_v20 = vmul.f32 1.442695, %v4014_v18  ;;  %v8117_v52 = vmul.f32 0.70710677, %v8112_v5  ;;  %v2479_v17 = vadd.f32 1.0, %v2351_v62 }
 0x208   :  { %v5164_v41 = vmul.f32 %v5036_v23, %v1964_v14  ;;  %v3245_v43 = vmul.f32 %v8092_v32, %v3117_v10  ;;  %v8124_v8 = vadd.f32 %v1770_v15, %v7482_v0  ;;  %v8127_v6 = vmul.f32 0.5, %v8019_v56 }
 0x209   :  { %v4845_v31 = vsel %vm4589_vm14, %v4461_v1, %v4717_v3  ;;  %v8119_v12 = vpop.eup %5615  ;;  %v2160_v44 = vand.u32 2147483647, %v8117_v52  ;;  %5623 = vrcp.f32 %v2479_v17  ;;  %v8131_v25 = vmul.f32 0.5, %v8049_v51 }
 0x20a   :  { %5292 = vst [vmem:[#allocation7 + $0x268] sm:$0xff] %v5164_v41  ;;  %v4973_v9 = vadd.f32 1.0, %v4845_v31  ;;  %v3373_v22 = vadd.f32 -0.28449672, %v3245_v43  ;;  %v2670_v21 = vmul.f32 1.0614054, %v8119_v12  ;;  %5625 = vpow2.f32 %v4093_v55 }
 0x20b   :  { %v2288_v33 = vmul.f32 0.3275911, %v2160_v44  ;;  %5627 = vpow2.f32 %v4221_v20  ;;  %v3951_v63 = vmul.f32 %v3823_v37, %v2159_v42  ;;  %v8134_v34 = vmul.f32 0.70710677, %v8124_v8 }
 0x20c   :  { %v5101_v13 = vmul.f32 %v4973_v9, %v1901_v45  ;;  %v3501_v49 = vmul.f32 %v8092_v32, %v3373_v22  ;;  %v2798_v19 = vadd.f32 -1.4531521, %v2670_v21  ;;  %vm4653_vm15 = vcmp.ge.f32.partialorder %v8031_v7, 0.0 }
 0x20d   :  { %v3887_v11 = vsub.f32 0.0, %v2223_v35  ;;  %v2416_v47 = vadd.f32 1.0, %v2288_v33  ;;  %v8141_v51 = vadd.f32 %v1612_v24, %v7480_v60  ;;  %v3824_v53 = vsub.f32 0.0, %v2160_v44 }
 0x20e   :  { %5229 = vst [vmem:[#allocation7 + $0x70] sm:$0xff] %v5101_v13  ;;  %v3629_v54 = vadd.f32 0.2548296, %v3501_v49  ;;  %v8136_v39 = vpop.eup %5617  ;;  %v2926_v56 = vmul.f32 %v8119_v12, %v2798_v19  ;;  %v2224_v42 = vand.u32 2147483647, %v8134_v34  ;;  %v8147_v50 = vmul.f32 0.5, %v8070_v59  ;;  %v1614_v19 = vpop.f32.mrf.mxu0 }
 0x20f   :  { %v2734_v57 = vmul.f32 1.0614054, %v8136_v39  ;;  %v5620_v40 = vpop.eup %5619  ;;  %v8150_v30 = vmul.f32 0.5, %v8084_v16  ;;  %5629 = vrcp.f32 %v2416_v47  ;;  %v8153_v29 = vmul.f32 0.5, %v8101_v26 }
 0x210   :  { %v3757_v4 = vmul.f32 %v8092_v32, %v3629_v54  ;;  %v3054_v36 = vadd.f32 1.4214138, %v2926_v56  ;;  %v2352_v32 = vmul.f32 0.3275911, %v2224_v42  ;;  %v4095_v18 = vmul.f32 1.442695, %v3951_v63 }
 0x211   :  { %v2862_v27 = vadd.f32 -1.4531521, %v2734_v57  ;;  %v4015_v38 = vmul.f32 %v3887_v11, %v2223_v35  ;;  %v8157_v14 = vmul.f32 0.70710677, %v8141_v51  ;;  %v8159_v59 = vpop.eup %5621  ;;  %v3952_v10 = vmul.f32 %v3824_v53, %v2160_v44 }
 0x212   :  { %v4397_v48 = vmul.f32 %v5620_v40, %v3757_v4  ;;  %v3182_v1 = vmul.f32 %v8119_v12, %v3054_v36  ;;  %v2480_v45 = vadd.f32 1.0, %v2352_v32  ;;  %v2671_v26 = vmul.f32 1.0614054, %v8159_v59 }
 0x213   :  { %v2990_v16 = vmul.f32 %v8136_v39, %v2862_v27  ;;  %v2161_v41 = vand.u32 2147483647, %v8157_v14  ;;  %v8165_v43 = vadd.f32 %v1772_v2, %v7480_v60  ;;  %v3888_v15 = vsub.f32 0.0, %v2224_v42 }
 0x214   :  { %v4525_v23 = vsub.f32 1.0, %v4397_v48  ;;  %v3310_v3 = vadd.f32 -0.28449672, %v3182_v1  ;;  %5631 = vrcp.f32 %v2480_v45  ;;  %v2799_v55 = vadd.f32 -1.4531521, %v2671_v26 }
 0x215   :  { %v3118_v35 = vadd.f32 1.4214138, %v2990_v16  ;;  %5633 = vpow2.f32 %v4095_v18  ;;  %v2289_v20 = vmul.f32 0.3275911, %v2161_v41  ;;  %v4223_v37 = vmul.f32 1.442695, %v4015_v38 }
 0x216   :  { %v4781_v62 = vsub.f32 0.0, %v4525_v23  ;;  %v3438_v31 = vmul.f32 %v8119_v12, %v3310_v3  ;;  %v4097_v17 = vmul.f32 1.442695, %v3952_v10  ;;  %v8171_v21 = vpop.eup %5623  ;;  %v2927_v49 = vmul.f32 %v8159_v59, %v2799_v55 }
 0x217   :  { %v3246_v22 = vmul.f32 %v8136_v39, %v3118_v35  ;;  %v2417_v24 = vadd.f32 1.0, %v2289_v20  ;;  %v5626_v33 = vpop.eup %5625  ;;  %vm4590_vm0 = vcmp.ge.f32.partialorder %v8065_v46, 0.0  ;;  %v2735_v63 = vmul.f32 1.0614054, %v8171_v21 }
 0x218   :  { %v4909_v9 = vsel %vm4653_vm15, %v4525_v23, %v4781_v62  ;;  %v3566_v13 = vadd.f32 0.2548296, %v3438_v31  ;;  %v4016_v7 = vmul.f32 %v3888_v15, %v2224_v42  ;;  %v8177_v56 = vmul.f32 0.70710677, %v8165_v43  ;;  %v5628_v11 = vpop.eup %5627 }
 0x219   :  { %v5037_v44 = vadd.f32 1.0, %v4909_v9  ;;  %v3374_v54 = vadd.f32 -0.28449672, %v3246_v22  ;;  %v3055_v57 = vadd.f32 1.4214138, %v2927_v49  ;;  %5635 = vrcp.f32 %v2417_v24 }
 0x21a   :  { %v3694_v4 = vmul.f32 %v8119_v12, %v3566_v13  ;;  %v2863_v40 = vadd.f32 -1.4531521, %v2735_v63  ;;  %v2225_v36 = vand.u32 2147483647, %v8177_v56  ;;  %v8184_v48 = vadd.f32 %v1614_v19, %v7482_v0 }
 0x21b   :  { %v5165_v47 = vmul.f32 %v5037_v44, %v8127_v6  ;;  %v3502_v53 = vmul.f32 %v8136_v39, %v3374_v54  ;;  %v3183_v27 = vmul.f32 %v8159_v59, %v3055_v57  ;;  %5637 = vpow2.f32 %v4223_v37 }
 0x21c   :  { %v4334_v42 = vmul.f32 %v5626_v33, %v3694_v4  ;;  %v3825_v32 = vsub.f32 0.0, %v2161_v41  ;;  %v8187_v2 = vpop.eup %5629  ;;  %v2991_v12 = vmul.f32 %v8171_v21, %v2863_v40  ;;  %v4225_v1 = vmul.f32 1.442695, %v4016_v7 }
 0x21d   :  { %5293 = vst [vmem:[#allocation7 + $0x270] sm:$0xff] %v5165_v47  ;;  %v3630_v6 = vadd.f32 0.2548296, %v3502_v53  ;;  %v2353_v18 = vmul.f32 0.3275911, %v2225_v36  ;;  %vm4654_vm1 = vcmp.ge.f32.partialorder %v8081_v28, 0.0  ;;  %5639 = vpow2.f32 %v4097_v17 }
 0x21e   :  { %v4462_v38 = vsub.f32 1.0, %v4334_v42  ;;  %v3311_v23 = vadd.f32 -0.28449672, %v3183_v27  ;;  %v2672_v16 = vmul.f32 1.0614054, %v8187_v2  ;;  %v3953_v31 = vmul.f32 %v3825_v32, %v2161_v41 }
 0x21f   :  { %v3758_v10 = vmul.f32 %v8136_v39, %v3630_v6  ;;  %v3119_v45 = vadd.f32 1.4214138, %v2991_v12  ;;  %v2481_v3 = vadd.f32 1.0, %v2353_v18  ;;  %v8194_v26 = vmul.f32 0.70710677, %v8184_v48 }
 0x220   :  { %v4718_v62 = vsub.f32 0.0, %v4462_v38  ;;  %v3439_v35 = vmul.f32 %v8159_v59, %v3311_v23  ;;  %v2800_v15 = vadd.f32 -1.4531521, %v2672_v16  ;;  %v3889_v44 = vsub.f32 0.0, %v2225_v36 }
 0x221   :  { %v4398_v55 = vmul.f32 %v5628_v11, %v3758_v10  ;;  %v3247_v20 = vmul.f32 %v8171_v21, %v3119_v45  ;;  %5641 = vrcp.f32 %v2481_v3  ;;  %v8199_v9 = vand.u32 2147483647, %v8194_v26  ;;  %v8201_v22 = vpop.eup %5631 }
 0x222   :  { %v4846_v39 = vsel %vm4590_vm0, %v4462_v38, %v4718_v62  ;;  %v3567_v37 = vadd.f32 0.2548296, %v3439_v35  ;;  %v2928_v17 = vmul.f32 %v8187_v2, %v2800_v15  ;;  %v5634_v13 = vpop.eup %5633  ;;  %vm4591_vm2 = vcmp.ge.f32.partialorder %v8095_v58, 0.0  ;;  %v1774_v38 = vpop.f32.mrf.mxu1 }
 0x223   :  { %v4974_v49 = vadd.f32 1.0, %v4846_v39  ;;  %v4526_v24 = vsub.f32 1.0, %v4398_v55  ;;  %v3375_v41 = vadd.f32 -0.28449672, %v3247_v20  ;;  %v2736_v19 = vmul.f32 1.0614054, %v8201_v22  ;;  %v1618_v55 = vpop.f32.mrf.mxu0 }
 0x224   :  { %v3695_v33 = vmul.f32 %v8159_v59, %v3567_v37  ;;  %v3056_v54 = vadd.f32 1.4214138, %v2928_v17  ;;  %5643 = vpow2.f32 %v4225_v1  ;;  %v2290_v63 = vmul.f32 0.3275911, %v8199_v9 }
 0x225   :  { %v5102_v46 = vmul.f32 %v4974_v49, %v8131_v25  ;;  %v4782_v7 = vsub.f32 0.0, %v4526_v24  ;;  %v3503_v11 = vmul.f32 %v8171_v21, %v3375_v41  ;;  %v2864_v47 = vadd.f32 -1.4531521, %v2736_v19 }
 0x226   :  { %v4335_v4 = vmul.f32 %v5634_v13, %v3695_v33  ;;  %v3184_v57 = vmul.f32 %v8187_v2, %v3056_v54  ;;  %v4099_v53 = vmul.f32 1.442695, %v3953_v31  ;;  %v2418_v40 = vadd.f32 1.0, %v2290_v63  ;;  %v8213_v42 = vpop.eup %5635 }
 0x227   :  { %5230 = vst [vmem:[#allocation7 + $0x78] sm:$0xff] %v5102_v46  ;;  %v4910_v59 = vsel %vm4654_vm1, %v4526_v24, %v4782_v7  ;;  %v3631_v27 = vadd.f32 0.2548296, %v3503_v11  ;;  %v2992_v32 = vmul.f32 %v8201_v22, %v2864_v47  ;;  %v4017_v6 = vmul.f32 %v3889_v44, %v2225_v36 }
 0x228   :  { %v5038_v25 = vadd.f32 1.0, %v4910_v59  ;;  %v4463_v12 = vsub.f32 1.0, %v4335_v4  ;;  %v3312_v1 = vadd.f32 -0.28449672, %v3184_v57  ;;  %v2673_v18 = vmul.f32 1.0614054, %v8213_v42  ;;  %v5638_v23 = vpop.eup %5637 }
 0x229   :  { %v3759_v16 = vmul.f32 %v8171_v21, %v3631_v27  ;;  %vm4655_vm3 = vcmp.ge.f32.partialorder %v8106_v61, 0.0  ;;  %v3120_v10 = vadd.f32 1.4214138, %v2992_v32  ;;  %5645 = vrcp.f32 %v2418_v40 }
 0x22a   :  { %v5166_v28 = vmul.f32 %v5038_v25, %v8147_v50  ;;  %v4719_v45 = vsub.f32 0.0, %v4463_v12  ;;  %v3440_v3 = vmul.f32 %v8187_v2, %v3312_v1  ;;  %v2801_v62 = vadd.f32 -1.4531521, %v2673_v18  ;;  %v5640_v36 = vpop.eup %5639 }
 0x22b   :  { %v4399_v35 = vmul.f32 %v5638_v23, %v3759_v16  ;;  %v3248_v15 = vmul.f32 %v8201_v22, %v3120_v10  ;;  %5647 = vpow2.f32 %v4099_v53  ;;  %v8225_v31 = vadd.f32 %v1774_v38, %v7482_v0 }
 0x22c   :  { %5294 = vst [vmem:[#allocation7 + $0x278] sm:$0xff] %v5166_v28  ;;  %v4847_v21 = vsel %vm4591_vm2, %v4463_v12, %v4719_v45  ;;  %v3568_v20 = vadd.f32 0.2548296, %v3440_v3  ;;  %v2929_v50 = vmul.f32 %v8213_v42, %v2801_v62  ;;  %v4227_v39 = vmul.f32 1.442695, %v4017_v6 }
 0x22d   :  { %v4975_v37 = vadd.f32 1.0, %v4847_v21  ;;  %v4527_v17 = vsub.f32 1.0, %v4399_v35  ;;  %v3376_v44 = vadd.f32 -0.28449672, %v3248_v15  ;;  %v3826_v13 = vsub.f32 0.0, %v8199_v9 }
 0x22e   :  { %v8231_v49 = vpop.eup %5641  ;;  %v3696_v24 = vmul.f32 %v8187_v2, %v3568_v20  ;;  %v3057_v41 = vadd.f32 1.4214138, %v2929_v50  ;;  %v8235_v19 = vmul.f32 0.70710677, %v8225_v31  ;;  %v8238_v58 = vadd.f32 %v1618_v55, %v7480_v60  ;;  %v1778_v55 = vpop.f32.mrf.mxu1 }
 0x22f   :  { %v5103_v33 = vmul.f32 %v4975_v37, %v8150_v30  ;;  %v4783_v54 = vsub.f32 0.0, %v4527_v17  ;;  %v3504_v63 = vmul.f32 %v8201_v22, %v3376_v44  ;;  %v2737_v46 = vmul.f32 1.0614054, %v8231_v49 }
 0x230   :  { %v1904_v7 = vmul.f32 0.5, %v8112_v5  ;;  %v4336_v11 = vmul.f32 %v5640_v36, %v3696_v24  ;;  %v3185_v47 = vmul.f32 %v8213_v42, %v3057_v41  ;;  %v8246_v2 = vand.u32 2147483647, %v8235_v19 }
 0x231   :  { %v5644_v4 = vpop.eup %5643  ;;  %5231 = vst [vmem:[#allocation7 + $0x80] sm:$0xff] %v5103_v33  ;;  %v4911_v57 = vsel %vm4655_vm3, %v4527_v17, %v4783_v54  ;;  %v3632_v53 = vadd.f32 0.2548296, %v3504_v63  ;;  %v2865_v30 = vadd.f32 -1.4531521, %v2737_v46  ;;  %v3954_v40 = vmul.f32 %v3826_v13, %v8199_v9  ;;  %v1620_v13 = vpop.f32.mrf.mxu0 }
 0x232   :  { %v5039_v59 = vadd.f32 1.0, %v4911_v57  ;;  %v4464_v27 = vsub.f32 1.0, %v4336_v11  ;;  %v3313_v32 = vadd.f32 -0.28449672, %v3185_v47  ;;  %v2354_v5 = vmul.f32 0.3275911, %v8246_v2 }
 0x233   :  { %v3760_v6 = vmul.f32 %v8201_v22, %v3632_v53  ;;  %v2993_v25 = vmul.f32 %v8231_v49, %v2865_v30  ;;  %5649 = vpow2.f32 %v4227_v39  ;;  %v8255_v12 = vmul.f32 0.70710677, %v8238_v58 }
 0x234   :  { %v5167_v61 = vmul.f32 %v5039_v59, %v8153_v29  ;;  %v4720_v1 = vsub.f32 0.0, %v4464_v27  ;;  %v3441_v18 = vmul.f32 %v8213_v42, %v3313_v32  ;;  %v2482_v38 = vadd.f32 1.0, %v2354_v5 }
 0x235   :  { %vm4592_vm4 = vcmp.ge.f32.partialorder %v8117_v52, 0.0  ;;  %v4400_v9 = vmul.f32 %v5644_v4, %v3760_v6  ;;  %v3121_v23 = vadd.f32 1.4214138, %v2993_v25  ;;  %v8261_v16 = vand.u32 2147483647, %v8255_v12  ;;  %v1780_v4 = vpop.f32.mrf.mxu1 }
 0x236   :  { %v8263_v22 = vpop.eup %5645  ;;  %5295 = vst [vmem:[#allocation7 + $0x280] sm:$0xff] %v5167_v61  ;;  %v4848_v10 = vsel %vm4592_vm4, %v4464_v27, %v4720_v1  ;;  %v3569_v28 = vadd.f32 0.2548296, %v3441_v18  ;;  %v4101_v45 = vmul.f32 1.442695, %v3954_v40  ;;  %5651 = vrcp.f32 %v2482_v38 }
 0x237   :  { %v4976_v3 = vadd.f32 1.0, %v4848_v10  ;;  %v4528_v29 = vsub.f32 1.0, %v4400_v9  ;;  %v3249_v62 = vmul.f32 %v8231_v49, %v3121_v23  ;;  %v2674_v36 = vmul.f32 1.0614054, %v8263_v22 }
 0x238   :  { %v5648_v35 = vpop.eup %5647  ;;  %vm4656_vm5 = vcmp.ge.f32.partialorder %v8134_v34, 0.0  ;;  %v3697_v52 = vmul.f32 %v8213_v42, %v3569_v28  ;;  %v2291_v15 = vmul.f32 0.3275911, %v8261_v16  ;;  %5653 = vpow2.f32 %v4101_v45 }
 0x239   :  { %v5104_v21 = vmul.f32 %v4976_v3, %v1904_v7  ;;  %v4784_v20 = vsub.f32 0.0, %v4528_v29  ;;  %v3377_v50 = vadd.f32 -0.28449672, %v3249_v62  ;;  %v2802_v39 = vadd.f32 -1.4531521, %v2674_v36 }
 0x23a   :  { %v4337_v37 = vmul.f32 %v5648_v35, %v3697_v52  ;;  %v3890_v17 = vsub.f32 0.0, %v8246_v2  ;;  %v2419_v44 = vadd.f32 1.0, %v2291_v15  ;;  %v8274_v42 = vadd.f32 %v1778_v55, %v7480_v60 }
 0x23b   :  { %5232 = vst [vmem:[#allocation7 + $0x88] sm:$0xff] %v5104_v21  ;;  %v4912_v24 = vsel %vm4656_vm5, %v4528_v29, %v4784_v20  ;;  %v3505_v41 = vmul.f32 %v8231_v49, %v3377_v50  ;;  %v2930_v34 = vmul.f32 %v8263_v22, %v2802_v39  ;;  %v1968_v33 = vmul.f32 0.5, %v8124_v8  ;;  %v1622_v20 = vpop.f32.mrf.mxu0 }
 0x23c   :  { %v5040_v54 = vadd.f32 1.0, %v4912_v24  ;;  %v4465_v63 = vsub.f32 1.0, %v4337_v37  ;;  %5655 = vrcp.f32 %v2419_v44  ;;  %v1905_v46 = vmul.f32 0.5, %v8141_v51 }
 0x23d   :  { %v3633_v7 = vadd.f32 0.2548296, %v3505_v41  ;;  %v3058_v11 = vadd.f32 1.4214138, %v2930_v34  ;;  %v8279_v47 = vadd.f32 %v1620_v13, %v7482_v0  ;;  %vm4593_vm6 = vcmp.ge.f32.partialorder %v8157_v14, 0.0 }
 0x23e   :  { %v5168_v57 = vmul.f32 %v5040_v54, %v1968_v33  ;;  %v4721_v53 = vsub.f32 0.0, %v4465_v63  ;;  %v8283_v30 = vmul.f32 0.70710677, %v8274_v42  ;;  %v4018_v59 = vmul.f32 %v3890_v17, %v8246_v2  ;;  %v1782_v54 = vpop.f32.mrf.mxu1 }
 0x23f   :  { %v3761_v8 = vmul.f32 %v8231_v49, %v3633_v7  ;;  %v3186_v40 = vmul.f32 %v8263_v22, %v3058_v11  ;;  %v8289_v51 = vmul.f32 0.70710677, %v8279_v47  ;;  %v3827_v5 = vsub.f32 0.0, %v8261_v16  ;;  %v1624_v7 = vpop.f32.mrf.mxu0 }
 0x240   :  { %v5650_v27 = vpop.eup %5649  ;;  %5296 = vst [vmem:[#allocation7 + $0x288] sm:$0xff] %v5168_v57  ;;  %v4849_v32 = vsel %vm4593_vm6, %v4465_v63, %v4721_v53  ;;  %v2227_v14 = vand.u32 2147483647, %v8283_v30  ;;  %v8294_v6 = vadd.f32 %v1780_v4, %v7482_v0  ;;  %vm4657_vm7 = vcmp.ge.f32.partialorder %v8177_v56, 0.0 }
 0x241   :  { %v4977_v25 = vadd.f32 1.0, %v4849_v32  ;;  %v4401_v61 = vmul.f32 %v5650_v27, %v3761_v8  ;;  %v3314_v49 = vadd.f32 -0.28449672, %v3186_v40  ;;  %v2164_v1 = vand.u32 2147483647, %v8289_v51 }
 0x242   :  { %v2355_v2 = vmul.f32 0.3275911, %v2227_v14  ;;  %v4229_v45 = vmul.f32 1.442695, %v4018_v59  ;;  %v3955_v3 = vmul.f32 %v3827_v5, %v8261_v16  ;;  %v8304_v52 = vmul.f32 0.70710677, %v8294_v6 }
 0x243   :  { %v8298_v18 = vpop.eup %5651  ;;  %v5105_v38 = vmul.f32 %v4977_v25, %v1905_v46  ;;  %v4529_v9 = vsub.f32 1.0, %v4401_v61  ;;  %v3442_v23 = vmul.f32 %v8263_v22, %v3314_v49  ;;  %v2292_v10 = vmul.f32 0.3275911, %v2164_v1 }
 0x244   :  { %v2738_v28 = vmul.f32 1.0614054, %v8298_v18  ;;  %v2483_v29 = vadd.f32 1.0, %v2355_v2  ;;  %v3891_v55 = vsub.f32 0.0, %v2227_v14  ;;  %v3828_v21 = vsub.f32 0.0, %v2164_v1 }
 0x245   :  { %5233 = vst [vmem:[#allocation7 + $0x90] sm:$0xff] %v5105_v38  ;;  %v4785_v62 = vsub.f32 0.0, %v4529_v9  ;;  %v3570_v36 = vadd.f32 0.2548296, %v3442_v23  ;;  %v2420_v35 = vadd.f32 1.0, %v2292_v10  ;;  %v5654_v50 = vpop.eup %5653  ;;  %v1969_v17 = vmul.f32 0.5, %v8165_v43 }
 0x246   :  { %v2866_v15 = vadd.f32 -1.4531521, %v2738_v28  ;;  %5657 = vrcp.f32 %v2483_v29  ;;  %v2228_v16 = vand.u32 2147483647, %v8304_v52  ;;  %v4103_v34 = vmul.f32 1.442695, %v3955_v3 }
 0x247   :  { %v4913_v39 = vsel %vm4657_vm7, %v4529_v9, %v4785_v62  ;;  %v3698_v37 = vmul.f32 %v8263_v22, %v3570_v36  ;;  %5659 = vrcp.f32 %v2420_v35  ;;  %v4019_v22 = vmul.f32 %v3891_v55, %v2227_v14 }
 0x248   :  { %v5041_v44 = vadd.f32 1.0, %v4913_v39  ;;  %v2994_v13 = vmul.f32 %v8298_v18, %v2866_v15  ;;  %5661 = vpow2.f32 %v4229_v45  ;;  %v2356_v33 = vmul.f32 0.3275911, %v2228_v16 }
 0x249   :  { %v8312_v24 = vpop.eup %5655  ;;  %v4338_v41 = vmul.f32 %v5654_v50, %v3698_v37  ;;  %v3956_v4 = vmul.f32 %v3828_v21, %v2164_v1  ;;  %v8316_v43 = vadd.f32 %v1622_v20, %v7480_v60  ;;  %v1906_v53 = vmul.f32 0.5, %v8184_v48 }
 0x24a   :  { %v5169_v63 = vmul.f32 %v5041_v44, %v1969_v17  ;;  %v3122_v56 = vadd.f32 1.4214138, %v2994_v13  ;;  %v2675_v46 = vmul.f32 1.0614054, %v8312_v24  ;;  %v2484_v57 = vadd.f32 1.0, %v2356_v33 }
 0x24b   :  { %v4466_v11 = vsub.f32 1.0, %v4338_v41  ;;  %v8321_v59 = vadd.f32 %v1782_v54, %v7480_v60  ;;  %vm4594_vm8 = vcmp.ge.f32.partialorder %v8194_v26, 0.0  ;;  %v8325_v32 = vadd.f32 %v1624_v7, %v7482_v0 }
 0x24c   :  { %5297 = vst [vmem:[#allocation7 + $0x290] sm:$0xff] %v5169_v63  ;;  %v3250_v8 = vmul.f32 %v8298_v18, %v3122_v56  ;;  %v2803_v40 = vadd.f32 -1.4531521, %v2675_v46  ;;  %5663 = vrcp.f32 %v2484_v57  ;;  %v8329_v25 = vmul.f32 0.70710677, %v8316_v43 }
 0x24d   :  { %v4722_v27 = vsub.f32 0.0, %v4466_v11  ;;  %5665 = vpow2.f32 %v4103_v34  ;;  %v4231_v61 = vmul.f32 1.442695, %v4019_v22  ;;  %v4105_v49 = vmul.f32 1.442695, %v3956_v4 }
 0x24e   :  { %v3378_v5 = vadd.f32 -0.28449672, %v3250_v8  ;;  %v2931_v14 = vmul.f32 %v8312_v24, %v2803_v40  ;;  %v8332_v1 = vmul.f32 0.70710677, %v8321_v59  ;;  %v2165_v9 = vand.u32 2147483647, %v8329_v25 }
 0x24f   :  { %v4850_v48 = vsel %vm4594_vm8, %v4466_v11, %v4722_v27  ;;  %v8337_v23 = vmul.f32 0.5, %v8225_v31  ;;  %v3892_v10 = vsub.f32 0.0, %v2228_v16  ;;  %v8341_v45 = vmul.f32 0.70710677, %v8325_v32 }
 0x250   :  { %v4978_v2 = vadd.f32 1.0, %v4850_v48  ;;  %v3506_v26 = vmul.f32 %v8298_v18, %v3378_v5  ;;  %v3059_v38 = vadd.f32 1.4214138, %v2931_v14  ;;  %v2229_v28 = vand.u32 2147483647, %v8332_v1 }
 0x251   :  { %v2293_v36 = vmul.f32 0.3275911, %v2165_v9  ;;  %vm4658_vm9 = vcmp.ge.f32.partialorder %v8235_v19, 0.0  ;;  %5667 = vpow2.f32 %v4231_v61  ;;  %v3829_v15 = vsub.f32 0.0, %v2165_v9 }
 0x252   :  { %v5106_v3 = vmul.f32 %v4978_v2, %v1906_v53  ;;  %v3634_v29 = vadd.f32 0.2548296, %v3506_v26  ;;  %v3187_v62 = vmul.f32 %v8312_v24, %v3059_v38  ;;  %v2357_v55 = vmul.f32 0.3275911, %v2229_v28 }
 0x253   :  { %v8344_v35 = vpop.eup %5657  ;;  %v8348_v31 = vand.u32 2147483647, %v8341_v45  ;;  %v2421_v37 = vadd.f32 1.0, %v2293_v36  ;;  %v4020_v13 = vmul.f32 %v3892_v10, %v2228_v16  ;;  %v3957_v41 = vmul.f32 %v3829_v15, %v2165_v9 }
 0x254   :  { %v8350_v21 = vpop.eup %5659  ;;  %5234 = vst [vmem:[#allocation7 + $0x98] sm:$0xff] %v5106_v3  ;;  %v3762_v20 = vmul.f32 %v8298_v18, %v3634_v29  ;;  %v3315_v50 = vadd.f32 -0.28449672, %v3187_v62  ;;  %v2739_v39 = vmul.f32 1.0614054, %v8344_v35  ;;  %v2485_v34 = vadd.f32 1.0, %v2357_v55  ;;  %v1628_v62 = vpop.f32.mrf.mxu0 }
 0x255   :  { %v5662_v17 = vpop.eup %5661  ;;  %v2676_v44 = vmul.f32 1.0614054, %v8350_v21  ;;  %5669 = vrcp.f32 %v2421_v37  ;;  %v8357_v56 = vmul.f32 0.5, %v8238_v58  ;;  %v3893_v18 = vsub.f32 0.0, %v2229_v28  ;;  %v1784_v58 = vpop.f32.mrf.mxu1 }
 0x256   :  { %v4402_v33 = vmul.f32 %v5662_v17, %v3762_v20  ;;  %v3443_v54 = vmul.f32 %v8312_v24, %v3315_v50  ;;  %v2867_v63 = vadd.f32 -1.4531521, %v2739_v39  ;;  %5671 = vrcp.f32 %v2485_v34 }
 0x257   :  { %v2804_v46 = vadd.f32 -1.4531521, %v2676_v44  ;;  %v2294_v4 = vmul.f32 0.3275911, %v8348_v31  ;;  %vm4595_vm10 = vcmp.ge.f32.partialorder %v8255_v12, 0.0  ;;  %v8363_v16 = vmul.f32 0.5, %v8274_v42 }
 0x258   :  { %v4530_v22 = vsub.f32 1.0, %v4402_v33  ;;  %v3571_v7 = vadd.f32 0.2548296, %v3443_v54  ;;  %v2995_v11 = vmul.f32 %v8344_v35, %v2867_v63  ;;  %5673 = vpow2.f32 %v4105_v49 }
 0x259   :  { %v2932_v57 = vmul.f32 %v8350_v21, %v2804_v46  ;;  %v4233_v53 = vmul.f32 1.442695, %v4020_v13  ;;  %v8366_v8 = vpop.eup %5663  ;;  %v4107_v14 = vmul.f32 1.442695, %v3957_v41  ;;  %v4021_v26 = vmul.f32 %v3893_v18, %v2229_v28 }
 0x25a   :  { %v4786_v40 = vsub.f32 0.0, %v4530_v22  ;;  %v3699_v27 = vmul.f32 %v8312_v24, %v3571_v7  ;;  %v3123_v5 = vadd.f32 1.4214138, %v2995_v11  ;;  %v5666_v48 = vpop.eup %5665  ;;  %v2740_v2 = vmul.f32 1.0614054, %v8366_v8 }
 0x25b   :  { %v3060_v61 = vadd.f32 1.4214138, %v2932_v57  ;;  %v2422_v38 = vadd.f32 1.0, %v2294_v4  ;;  %v8374_v10 = vadd.f32 %v1784_v58, %v7482_v0  ;;  %v8378_v28 = vmul.f32 0.5, %v8279_v47 }
 0x25c   :  { %v4914_v42 = vsel %vm4658_vm9, %v4530_v22, %v4786_v40  ;;  %v4339_v9 = vmul.f32 %v5666_v48, %v3699_v27  ;;  %v3251_v49 = vmul.f32 %v8344_v35, %v3123_v5  ;;  %v2868_v29 = vadd.f32 -1.4531521, %v2740_v2 }
 0x25d   :  { %v5042_v3 = vadd.f32 1.0, %v4914_v42  ;;  %v3188_v24 = vmul.f32 %v8350_v21, %v3060_v61  ;;  %5675 = vrcp.f32 %v2422_v38  ;;  %v8383_v50 = vmul.f32 0.70710677, %v8374_v10 }
 0x25e   :  { %v4467_v36 = vsub.f32 1.0, %v4339_v9  ;;  %v3379_v15 = vadd.f32 -0.28449672, %v3251_v49  ;;  %5677 = vpow2.f32 %v4233_v53  ;;  %v2996_v20 = vmul.f32 %v8366_v8, %v2868_v29  ;;  %v5668_v39 = vpop.eup %5667 }
 0x25f   :  { %v5170_v19 = vmul.f32 %v5042_v3, %v8337_v23  ;;  %v3316_v55 = vadd.f32 -0.28449672, %v3188_v24  ;;  %v4235_v44 = vmul.f32 1.442695, %v4021_v26  ;;  %v8387_v13 = vadd.f32 %v1628_v62, %v7480_v60 }
 0x260   :  { %v4723_v37 = vsub.f32 0.0, %v4467_v36  ;;  %v3507_v17 = vmul.f32 %v8344_v35, %v3379_v15  ;;  %v3124_v41 = vadd.f32 1.4214138, %v2996_v20  ;;  %5679 = vpow2.f32 %v4107_v14 }
 0x261   :  { %5298 = vst [vmem:[#allocation7 + $0x298] sm:$0xff] %v5170_v19  ;;  %v3444_v47 = vmul.f32 %v8350_v21, %v3316_v55  ;;  %v8391_v23 = vand.u32 2147483647, %v8383_v50  ;;  %v3830_v54 = vsub.f32 0.0, %v8348_v31  ;;  %v8397_v63 = vmul.f32 0.70710677, %v8387_v13 }
 0x262   :  { %v4851_v34 = vsel %vm4595_vm10, %v4467_v36, %v4723_v37  ;;  %v3635_v33 = vadd.f32 0.2548296, %v3507_v17  ;;  %v8399_v46 = vpop.eup %5669  ;;  %vm4659_vm11 = vcmp.ge.f32.partialorder %v8283_v30, 0.0  ;;  %v3252_v7 = vmul.f32 %v8366_v8, %v3124_v41  ;;  %v1630_v30 = vpop.f32.mrf.mxu0 }
 0x263   :  { %v4979_v18 = vadd.f32 1.0, %v4851_v34  ;;  %v3572_v22 = vadd.f32 0.2548296, %v3444_v47  ;;  %v2358_v11 = vmul.f32 0.3275911, %v8391_v23  ;;  %v8404_v4 = vpop.eup %5671  ;;  %vm4596_vm12 = vcmp.ge.f32.partialorder %v8289_v51, 0.0 }
 0x264   :  { %v3763_v12 = vmul.f32 %v8344_v35, %v3635_v33  ;;  %v2677_v57 = vmul.f32 1.0614054, %v8399_v46  ;;  %5681 = vpow2.f32 %v4235_v44  ;;  %v8410_v53 = vand.u32 2147483647, %v8397_v63 }
 0x265   :  { %v5107_v58 = vmul.f32 %v4979_v18, %v8357_v56  ;;  %v3700_v40 = vmul.f32 %v8350_v21, %v3572_v22  ;;  %v3380_v27 = vadd.f32 -0.28449672, %v3252_v7  ;;  %v2741_v5 = vmul.f32 1.0614054, %v8404_v4  ;;  %v5674_v14 = vpop.eup %5673  ;;  %v1788_v18 = vpop.f32.mrf.mxu1 }
 0x266   :  { %v4403_v48 = vmul.f32 %v5668_v39, %v3763_v12  ;;  %v2805_v61 = vadd.f32 -1.4531521, %v2677_v57  ;;  %v3958_v35 = vmul.f32 %v3830_v54, %v8348_v31  ;;  %v2486_v2 = vadd.f32 1.0, %v2358_v11 }
 0x267   :  { %5235 = vst [vmem:[#allocation7 + $0xa0] sm:$0xff] %v5107_v58  ;;  %v4340_v26 = vmul.f32 %v5674_v14, %v3700_v40  ;;  %v3508_v38 = vmul.f32 %v8366_v8, %v3380_v27  ;;  %v2869_v42 = vadd.f32 -1.4531521, %v2741_v5  ;;  %v2295_v9 = vmul.f32 0.3275911, %v8410_v53 }
 0x268   :  { %v4531_v49 = vsub.f32 1.0, %v4403_v48  ;;  %v8419_v56 = vmul.f32 0.5, %v8294_v6  ;;  %v2933_v21 = vmul.f32 %v8399_v46, %v2805_v61  ;;  %5683 = vrcp.f32 %v2486_v2 }
 0x269   :  { %v4468_v3 = vsub.f32 1.0, %v4340_v26  ;;  %v3636_v24 = vadd.f32 0.2548296, %v3508_v38  ;;  %v2997_v29 = vmul.f32 %v8404_v4, %v2869_v42  ;;  %v2423_v31 = vadd.f32 1.0, %v2295_v9 }
 0x26a   :  { %v8423_v62 = vpop.eup %5675  ;;  %v4787_v36 = vsub.f32 0.0, %v4531_v49  ;;  %v3061_v15 = vadd.f32 1.4214138, %v2933_v21  ;;  %v4109_v19 = vmul.f32 1.442695, %v3958_v35  ;;  %v3894_v55 = vsub.f32 0.0, %v8391_v23 }
 0x26b   :  { %v5678_v20 = vpop.eup %5677  ;;  %v4724_v39 = vsub.f32 0.0, %v4468_v3  ;;  %v3764_v6 = vmul.f32 %v8366_v8, %v3636_v24  ;;  %v3125_v37 = vadd.f32 1.4214138, %v2997_v29  ;;  %v2678_v17 = vmul.f32 1.0614054, %v8423_v62 }
 0x26c   :  { %v4915_v44 = vsel %vm4659_vm11, %v4531_v49, %v4787_v36  ;;  %vm4660_vm13 = vcmp.ge.f32.partialorder %v8304_v52, 0.0  ;;  %v3189_v47 = vmul.f32 %v8399_v46, %v3061_v15  ;;  %5685 = vrcp.f32 %v2423_v31 }
 0x26d   :  { %v5043_v41 = vadd.f32 1.0, %v4915_v44  ;;  %v4852_v34 = vsel %vm4596_vm12, %v4468_v3, %v4724_v39  ;;  %v4404_v33 = vmul.f32 %v5678_v20, %v3764_v6  ;;  %v3253_v54 = vmul.f32 %v8404_v4, %v3125_v37  ;;  %v5680_v8 = vpop.eup %5679 }
 0x26e   :  { %v4980_v22 = vadd.f32 1.0, %v4852_v34  ;;  %v3317_v7 = vadd.f32 -0.28449672, %v3189_v47  ;;  %v2806_v11 = vadd.f32 -1.4531521, %v2678_v17  ;;  %5687 = vpow2.f32 %v4109_v19  ;;  %v1790_v17 = vpop.f32.mrf.mxu1 }
 0x26f   :  { %v5171_v12 = vmul.f32 %v5043_v41, %v8363_v16  ;;  %v4532_v57 = vsub.f32 1.0, %v4404_v33  ;;  %v3381_v58 = vadd.f32 -0.28449672, %v3253_v54  ;;  %v4022_v40 = vmul.f32 %v3894_v55, %v8391_v23 }
 0x270   :  { %v5108_v27 = vmul.f32 %v4980_v22, %v8378_v28  ;;  %v3445_v51 = vmul.f32 %v8399_v46, %v3317_v7  ;;  %v2934_v5 = vmul.f32 %v8423_v62, %v2806_v11  ;;  %v8441_v14 = vadd.f32 %v1788_v18, %v7480_v60 }
 0x271   :  { %v5682_v48 = vpop.eup %5681  ;;  %5299 = vst [vmem:[#allocation7 + $0x2a0] sm:$0xff] %v5171_v12  ;;  %v4788_v61 = vsub.f32 0.0, %v4532_v57  ;;  %v3509_v35 = vmul.f32 %v8404_v4, %v3381_v58  ;;  %v3831_v16 = vsub.f32 0.0, %v8410_v53  ;;  %v8446_v2 = vadd.f32 %v1630_v30, %v7482_v0 }
 0x272   :  { %5236 = vst [vmem:[#allocation7 + $0xa8] sm:$0xff] %v5108_v27  ;;  %v1909_v28 = vmul.f32 0.5, %v8316_v43  ;;  %v3573_v23 = vadd.f32 0.2548296, %v3445_v51  ;;  %v1973_v26 = vmul.f32 0.5, %v8321_v59  ;;  %vm4597_vm14 = vcmp.ge.f32.partialorder %v8329_v25, 0.0 }
 0x273   :  { %v3062_v38 = vadd.f32 1.4214138, %v2934_v5  ;;  %v4916_v42 = vsel %vm4660_vm13, %v4532_v57, %v4788_v61  ;;  %v3637_v9 = vadd.f32 0.2548296, %v3509_v35  ;;  %v4237_v49 = vmul.f32 1.442695, %v4022_v40 }
 0x274   :  { %v8453_v21 = vmul.f32 0.70710677, %v8441_v14  ;;  %v5044_v3 = vadd.f32 1.0, %v4916_v42  ;;  %v3701_v24 = vmul.f32 %v8399_v46, %v3573_v23  ;;  %v8458_v31 = vmul.f32 0.70710677, %v8446_v2  ;;  %v1632_v23 = vpop.f32.mrf.mxu0 }
 0x275   :  { %v3190_v29 = vmul.f32 %v8423_v62, %v3062_v38  ;;  %v8460_v43 = vpop.eup %5683  ;;  %v3765_v52 = vmul.f32 %v8404_v4, %v3637_v9  ;;  %v3959_v59 = vmul.f32 %v3831_v16, %v8410_v53  ;;  %vm4661_vm15 = vcmp.ge.f32.partialorder %v8332_v1, 0.0  ;;  %v1792_v1 = vpop.f32.mrf.mxu1 }
 0x276   :  { %v2231_v36 = vand.u32 2147483647, %v8453_v21  ;;  %v5172_v15 = vmul.f32 %v5044_v3, %v8419_v56  ;;  %v4341_v19 = vmul.f32 %v5680_v8, %v3701_v24  ;;  %v2742_v46 = vmul.f32 1.0614054, %v8460_v43 }
 0x277   :  { %v3318_v55 = vadd.f32 -0.28449672, %v3190_v29  ;;  %v4405_v20 = vmul.f32 %v5682_v48, %v3765_v52  ;;  %v8470_v6 = vand.u32 2147483647, %v8458_v31  ;;  %5689 = vpow2.f32 %v4237_v49 }
 0x278   :  { %v2359_v39 = vmul.f32 0.3275911, %v2231_v36  ;;  %5300 = vst [vmem:[#allocation7 + $0x2a8] sm:$0xff] %v5172_v15  ;;  %v4469_v37 = vsub.f32 1.0, %v4341_v19  ;;  %v2870_v53 = vadd.f32 -1.4531521, %v2742_v46  ;;  %v8479_v30 = vadd.f32 %v1790_v17, %v7482_v0 }
 0x279   :  { %v3446_v4 = vmul.f32 %v8423_v62, %v3318_v55  ;;  %v8473_v44 = vpop.eup %5685  ;;  %v4533_v56 = vsub.f32 1.0, %v4405_v20  ;;  %v4111_v47 = vmul.f32 1.442695, %v3959_v59  ;;  %v2296_v34 = vmul.f32 0.3275911, %v8470_v6 }
 0x27a   :  { %v2487_v41 = vadd.f32 1.0, %v2359_v39  ;;  %v4725_v33 = vsub.f32 0.0, %v4469_v37  ;;  %v2998_v18 = vmul.f32 %v8460_v43, %v2870_v53  ;;  %v2679_v8 = vmul.f32 1.0614054, %v8473_v44 }
 0x27b   :  { %v3574_v54 = vadd.f32 0.2548296, %v3446_v4  ;;  %v5688_v22 = vpop.eup %5687  ;;  %v4789_v7 = vsub.f32 0.0, %v4533_v56  ;;  %v2424_v11 = vadd.f32 1.0, %v2296_v34  ;;  %v3895_v5 = vsub.f32 0.0, %v2231_v36 }
 0x27c   :  { %5691 = vrcp.f32 %v2487_v41  ;;  %v4853_v12 = vsel %vm4597_vm14, %v4469_v37, %v4725_v33  ;;  %v3126_v58 = vadd.f32 1.4214138, %v2998_v18  ;;  %v2807_v40 = vadd.f32 -1.4531521, %v2679_v8 }
 0x27d   :  { %v3702_v57 = vmul.f32 %v8423_v62, %v3574_v54  ;;  %v4981_v27 = vadd.f32 1.0, %v4853_v12  ;;  %v4917_v51 = vsel %vm4661_vm15, %v4533_v56, %v4789_v7  ;;  %5693 = vpow2.f32 %v4111_v47 }
 0x27e   :  { %v5045_v48 = vadd.f32 1.0, %v4917_v51  ;;  %v3254_v35 = vmul.f32 %v8460_v43, %v3126_v58  ;;  %v2935_v16 = vmul.f32 %v8473_v44, %v2807_v40  ;;  %5695 = vrcp.f32 %v2424_v11 }
 0x27f   :  { %v4342_v61 = vmul.f32 %v5688_v22, %v3702_v57  ;;  %v5109_v38 = vmul.f32 %v4981_v27, %v1909_v28  ;;  %v8489_v25 = vmul.f32 0.70710677, %v8479_v30  ;;  %v8493_v24 = vadd.f32 %v1632_v23, %v7480_v60 }
 0x280   :  { %v5173_v62 = vmul.f32 %v5045_v48, %v1973_v26  ;;  %v3382_v9 = vadd.f32 -0.28449672, %v3254_v35  ;;  %v3063_v49 = vadd.f32 1.4214138, %v2935_v16  ;;  %v4023_v59 = vmul.f32 %v3895_v5, %v2231_v36 }
 0x281   :  { %v4470_v42 = vsub.f32 1.0, %v4342_v61  ;;  %5237 = vst [vmem:[#allocation7 + $0xb0] sm:$0xff] %v5109_v38  ;;  %v2232_v3 = vand.u32 2147483647, %v8489_v25  ;;  %vm4598_vm0 = vcmp.ge.f32.partialorder %v8341_v45, 0.0  ;;  %v3832_v26 = vsub.f32 0.0, %v8470_v6 }
 0x282   :  { %5301 = vst [vmem:[#allocation7 + $0x2b0] sm:$0xff] %v5173_v62  ;;  %v3510_v52 = vmul.f32 %v8460_v43, %v3382_v9  ;;  %v3191_v28 = vmul.f32 %v8473_v44, %v3063_v49  ;;  %v8500_v19 = vadd.f32 %v1792_v1, %v7480_v60  ;;  %v8503_v39 = vmul.f32 0.70710677, %v8493_v24 }
 0x283   :  { %v4726_v29 = vsub.f32 0.0, %v4470_v42  ;;  %v2360_v15 = vmul.f32 0.3275911, %v2232_v3  ;;  %v1910_v4 = vmul.f32 0.5, %v8325_v32  ;;  %v4239_v56 = vmul.f32 1.442695, %v4023_v59 }
 0x284   :  { %v3638_v46 = vadd.f32 0.2548296, %v3510_v52  ;;  %v3319_v20 = vadd.f32 -0.28449672, %v3191_v28  ;;  %v5690_v37 = vpop.eup %5689  ;;  %v2169_v47 = vand.u32 2147483647, %v8503_v39  ;;  %v3960_v34 = vmul.f32 %v3832_v26, %v8470_v6  ;;  %v1634_v6 = vpop.f32.mrf.mxu0 }
 0x285   :  { %v4854_v55 = vsel %vm4598_vm0, %v4470_v42, %v4726_v29  ;;  %v2488_v17 = vadd.f32 1.0, %v2360_v15  ;;  %v8511_v33 = vmul.f32 0.70710677, %v8500_v19  ;;  %v1974_v32 = vmul.f32 0.5, %v8374_v10 }
 0x286   :  { %v4982_v53 = vadd.f32 1.0, %v4854_v55  ;;  %v3766_v36 = vmul.f32 %v8460_v43, %v3638_v46  ;;  %v3447_v45 = vmul.f32 %v8473_v44, %v3319_v20  ;;  %v2297_v22 = vmul.f32 0.3275911, %v2169_v47 }
 0x287   :  { %5697 = vrcp.f32 %v2488_v17  ;;  %vm4662_vm1 = vcmp.ge.f32.partialorder %v8383_v50, 0.0  ;;  %v3896_v7 = vsub.f32 0.0, %v2232_v3  ;;  %v2233_v11 = vand.u32 2147483647, %v8511_v33 }
 0x288   :  { %v5110_v41 = vmul.f32 %v4982_v53, %v1910_v4  ;;  %v4406_v18 = vmul.f32 %v5690_v37, %v3766_v36  ;;  %v3575_v8 = vadd.f32 0.2548296, %v3447_v45  ;;  %v1911_v58 = vmul.f32 0.5, %v8387_v13 }
 0x289   :  { %v8513_v54 = vpop.eup %5691  ;;  %v2425_v27 = vadd.f32 1.0, %v2297_v22  ;;  %5699 = vpow2.f32 %v4239_v56  ;;  %v4113_v51 = vmul.f32 1.442695, %v3960_v34  ;;  %v2361_v5 = vmul.f32 0.3275911, %v2233_v11 }
 0x28a   :  { %5238 = vst [vmem:[#allocation7 + $0xb8] sm:$0xff] %v5110_v41  ;;  %v2743_v43 = vmul.f32 1.0614054, %v8513_v54  ;;  %v5694_v12 = vpop.eup %5693  ;;  %v4534_v57 = vsub.f32 1.0, %v4406_v18  ;;  %v3703_v40 = vmul.f32 %v8473_v44, %v3575_v8  ;;  %v8524_v16 = vadd.f32 %v1634_v6, %v7482_v0  ;;  %v1794_v44 = vpop.f32.mrf.mxu1 }
 0x28b   :  { %v8521_v48 = vpop.eup %5695  ;;  %5701 = vrcp.f32 %v2425_v27  ;;  %v4024_v13 = vmul.f32 %v3896_v7, %v2232_v3  ;;  %v2489_v62 = vadd.f32 1.0, %v2361_v5  ;;  %vm4599_vm2 = vcmp.ge.f32.partialorder %v8397_v63, 0.0  ;;  %v1638_v63 = vpop.f32.mrf.mxu0 }
 0x28c   :  { %v2871_v10 = vadd.f32 -1.4531521, %v2743_v43  ;;  %v4790_v61 = vsub.f32 0.0, %v4534_v57  ;;  %v4343_v35 = vmul.f32 %v5694_v12, %v3703_v40  ;;  %v2680_v38 = vmul.f32 1.0614054, %v8521_v48 }
 0x28d   :  { %v3833_v49 = vsub.f32 0.0, %v2169_v47  ;;  %5703 = vrcp.f32 %v2489_v62  ;;  %v8532_v59 = vmul.f32 0.70710677, %v8524_v16  ;;  %v8535_v3 = vadd.f32 %v1794_v44, %v7482_v0 }
 0x28e   :  { %v2999_v23 = vmul.f32 %v8513_v54, %v2871_v10  ;;  %v4918_v42 = vsel %vm4662_vm1, %v4534_v57, %v4790_v61  ;;  %v4471_v9 = vsub.f32 1.0, %v4343_v35  ;;  %v2808_v52 = vadd.f32 -1.4531521, %v2680_v38 }
 0x28f   :  { %v5046_v1 = vadd.f32 1.0, %v4918_v42  ;;  %5705 = vpow2.f32 %v4113_v51  ;;  %v4241_v55 = vmul.f32 1.442695, %v4024_v13  ;;  %v3961_v20 = vmul.f32 %v3833_v49, %v2169_v47  ;;  %v1798_v49 = vpop.f32.mrf.mxu1 }
 0x290   :  { %v3127_v29 = vadd.f32 1.4214138, %v2999_v23  ;;  %v4727_v28 = vsub.f32 0.0, %v4471_v9  ;;  %v2936_v15 = vmul.f32 %v8521_v48, %v2808_v52  ;;  %v3897_v37 = vsub.f32 0.0, %v2233_v11 }
 0x291   :  { %v5174_v26 = vmul.f32 %v5046_v1, %v1974_v32  ;;  %v2170_v4 = vand.u32 2147483647, %v8532_v59  ;;  %v8541_v17 = vmul.f32 0.5, %v8441_v14  ;;  %v8546_v41 = vmul.f32 0.5, %v8446_v2 }
 0x292   :  { %v3255_v50 = vmul.f32 %v8513_v54, %v3127_v29  ;;  %v4855_v46 = vsel %vm4599_vm2, %v4471_v9, %v4727_v28  ;;  %v3064_v45 = vadd.f32 1.4214138, %v2936_v15  ;;  %v8549_v32 = vmul.f32 0.70710677, %v8535_v3 }
 0x293   :  { %5302 = vst [vmem:[#allocation7 + $0x2b8] sm:$0xff] %v5174_v26  ;;  %v4983_v53 = vadd.f32 1.0, %v4855_v46  ;;  %v2298_v34 = vmul.f32 0.3275911, %v2170_v4  ;;  %v8552_v47 = vadd.f32 %v1638_v63, %v7480_v60  ;;  %v4115_v43 = vmul.f32 1.442695, %v3961_v20 }
 0x294   :  { %v3383_v36 = vadd.f32 -0.28449672, %v3255_v50  ;;  %v8543_v56 = vpop.eup %5697  ;;  %v3192_v14 = vmul.f32 %v8521_v48, %v3064_v45  ;;  %v4025_v7 = vmul.f32 %v3897_v37, %v2233_v11  ;;  %v8558_v2 = vand.u32 2147483647, %v8549_v32 }
 0x295   :  { %v5111_v18 = vmul.f32 %v4983_v53, %v1911_v58  ;;  %v2744_v22 = vmul.f32 1.0614054, %v8543_v56  ;;  %v2426_v6 = vadd.f32 1.0, %v2298_v34  ;;  %5707 = vpow2.f32 %v4241_v55 }
 0x296   :  { %v3511_v8 = vmul.f32 %v8513_v54, %v3383_v36  ;;  %v3320_v57 = vadd.f32 -0.28449672, %v3192_v14  ;;  %v5700_v27 = vpop.eup %5699  ;;  %vm4663_vm3 = vcmp.ge.f32.partialorder %v8453_v21, 0.0  ;;  %v8562_v58 = vmul.f32 0.5, %v8479_v30 }
 0x297   :  { %5239 = vst [vmem:[#allocation7 + $0xc0] sm:$0xff] %v5111_v18  ;;  %v2872_v40 = vadd.f32 -1.4531521, %v2744_v22  ;;  %5709 = vrcp.f32 %v2426_v6  ;;  %v3834_v10 = vsub.f32 0.0, %v2170_v4  ;;  %v2362_v51 = vmul.f32 0.3275911, %v8558_v2  ;;  %v1640_v18 = vpop.f32.mrf.mxu0 }
 0x298   :  { %v3639_v12 = vadd.f32 0.2548296, %v3511_v8  ;;  %v8565_v11 = vpop.eup %5701  ;;  %v3448_v61 = vmul.f32 %v8521_v48, %v3320_v57  ;;  %v8571_v23 = vmul.f32 0.70710677, %v8552_v47  ;;  %5711 = vpow2.f32 %v4115_v43 }
 0x299   :  { %v3000_v35 = vmul.f32 %v8543_v56, %v2872_v40  ;;  %v2681_v38 = vmul.f32 1.0614054, %v8565_v11  ;;  %v4243_v30 = vmul.f32 1.442695, %v4025_v7  ;;  %v2490_v13 = vadd.f32 1.0, %v2362_v51 }
 0x29a   :  { %v3767_v5 = vmul.f32 %v8513_v54, %v3639_v12  ;;  %v3576_v44 = vadd.f32 0.2548296, %v3448_v61  ;;  %v8575_v9 = vand.u32 2147483647, %v8571_v23  ;;  %v8577_v54 = vpop.eup %5703  ;;  %vm4600_vm4 = vcmp.ge.f32.partialorder %v8458_v31, 0.0 }
 0x29b   :  { %v3128_v42 = vadd.f32 1.4214138, %v3000_v35  ;;  %v8581_v1 = vmul.f32 0.5, %v8493_v24  ;;  %v2809_v29 = vadd.f32 -1.4531521, %v2681_v38  ;;  %v3962_v52 = vmul.f32 %v3834_v10, %v2170_v4 }
 0x29c   :  { %v4407_v62 = vmul.f32 %v5700_v27, %v3767_v5  ;;  %5713 = vrcp.f32 %v2490_v13  ;;  %v5706_v28 = vpop.eup %5705  ;;  %v3704_v50 = vmul.f32 %v8521_v48, %v3576_v44  ;;  %v2745_v55 = vmul.f32 1.0614054, %v8577_v54 }
 0x29d   :  { %v3256_v15 = vmul.f32 %v8543_v56, %v3128_v42  ;;  %v2937_v63 = vmul.f32 %v8565_v11, %v2809_v29  ;;  %5715 = vpow2.f32 %v4243_v30  ;;  %v2299_v46 = vmul.f32 0.3275911, %v8575_v9 }
 0x29e   :  { %v4535_v26 = vsub.f32 1.0, %v4407_v62  ;;  %v8589_v20 = vadd.f32 %v1798_v49, %v7480_v60  ;;  %v4344_v37 = vmul.f32 %v5706_v28, %v3704_v50  ;;  %v2873_v53 = vadd.f32 -1.4531521, %v2745_v55 }
 0x29f   :  { %v3384_v4 = vadd.f32 -0.28449672, %v3256_v15  ;;  %v3065_v36 = vadd.f32 1.4214138, %v2937_v63  ;;  %v4117_v45 = vmul.f32 1.442695, %v3962_v52  ;;  %v8601_v10 = vadd.f32 %v1640_v18, %v7482_v0 }
 0x2a0   :  { %v4791_v24 = vsub.f32 0.0, %v4535_v26  ;;  %v3898_v48 = vsub.f32 0.0, %v8558_v2  ;;  %v2427_v34 = vadd.f32 1.0, %v2299_v46  ;;  %v4472_v14 = vsub.f32 1.0, %v4344_v37 }
 0x2a1   :  { %v3512_v22 = vmul.f32 %v8543_v56, %v3384_v4  ;;  %v3001_v43 = vmul.f32 %v8577_v54, %v2873_v53  ;;  %v3193_v6 = vmul.f32 %v8565_v11, %v3065_v36  ;;  %v8598_v12 = vmul.f32 0.5, %v8500_v19 }
 0x2a2   :  { %v4919_v8 = vsel %vm4663_vm3, %v4535_v26, %v4791_v24  ;;  %5717 = vrcp.f32 %v2427_v34  ;;  %v4728_v57 = vsub.f32 0.0, %v4472_v14  ;;  %v5708_v21 = vpop.eup %5707  ;;  %vm4664_vm5 = vcmp.ge.f32.partialorder %v8489_v25, 0.0 }
 0x2a3   :  { %v5047_v7 = vadd.f32 1.0, %v4919_v8  ;;  %v3640_v40 = vadd.f32 0.2548296, %v3512_v22  ;;  %v3129_v27 = vadd.f32 1.4214138, %v3001_v43  ;;  %5719 = vpow2.f32 %v4117_v45 }
 0x2a4   :  { %v3321_v5 = vadd.f32 -0.28449672, %v3193_v6  ;;  %v8606_v61 = vmul.f32 0.70710677, %v8589_v20  ;;  %v8608_v35 = vpop.eup %5709  ;;  %v4856_v19 = vsel %vm4600_vm4, %v4472_v14, %v4728_v57  ;;  %v4026_v13 = vmul.f32 %v3898_v48, %v8558_v2 }
 0x2a5   :  { %v5175_v51 = vmul.f32 %v5047_v7, %v8541_v17  ;;  %v3768_v38 = vmul.f32 %v8543_v56, %v3640_v40  ;;  %v3257_v30 = vmul.f32 %v8577_v54, %v3129_v27  ;;  %v4984_v17 = vadd.f32 1.0, %v4856_v19  ;;  %v5712_v49 = vpop.eup %5711  ;;  %v1800_v19 = vpop.f32.mrf.mxu1 }
 0x2a6   :  { %v3449_v62 = vmul.f32 %v8565_v11, %v3321_v5  ;;  %v2682_v44 = vmul.f32 1.0614054, %v8608_v35  ;;  %v2235_v42 = vand.u32 2147483647, %v8606_v61  ;;  %v3835_v31 = vsub.f32 0.0, %v8575_v9 }
 0x2a7   :  { %5303 = vst [vmem:[#allocation7 + $0x2c0] sm:$0xff] %v5175_v51  ;;  %v4408_v29 = vmul.f32 %v5708_v21, %v3768_v38  ;;  %v3385_v52 = vadd.f32 -0.28449672, %v3257_v30  ;;  %v8620_v28 = vmul.f32 0.70710677, %v8601_v10  ;;  %v5112_v56 = vmul.f32 %v4984_v17, %v8546_v41 }
 0x2a8   :  { %v3577_v26 = vadd.f32 0.2548296, %v3449_v62  ;;  %v2810_v2 = vadd.f32 -1.4531521, %v2682_v44  ;;  %v2363_v50 = vmul.f32 0.3275911, %v2235_v42  ;;  %v3963_v34 = vmul.f32 %v3835_v31, %v8575_v9  ;;  %v1642_v44 = vpop.f32.mrf.mxu0 }
 0x2a9   :  { %v8623_v15 = vpop.eup %5713  ;;  %v4536_v55 = vsub.f32 1.0, %v4408_v29  ;;  %v3513_v63 = vmul.f32 %v8577_v54, %v3385_v52  ;;  %v4245_v46 = vmul.f32 1.442695, %v4026_v13  ;;  %v8627_v24 = vand.u32 2147483647, %v8620_v28  ;;  %5240 = vst [vmem:[#allocation7 + $0xc8] sm:$0xff] %v5112_v56 }
 0x2aa   :  { %v3705_v37 = vmul.f32 %v8565_v11, %v3577_v26  ;;  %v2938_v4 = vmul.f32 %v8608_v35, %v2810_v2  ;;  %v2746_v53 = vmul.f32 1.0614054, %v8623_v15  ;;  %v2491_v41 = vadd.f32 1.0, %v2363_v50  ;;  %v5716_v36 = vpop.eup %5715 }
 0x2ab   :  { %v4792_v45 = vsub.f32 0.0, %v4536_v55  ;;  %v3641_v48 = vadd.f32 0.2548296, %v3513_v63  ;;  %v2300_v18 = vmul.f32 0.3275911, %v8627_v24  ;;  %vm4601_vm6 = vcmp.ge.f32.partialorder %v8503_v39, 0.0 }
 0x2ac   :  { %v4345_v8 = vmul.f32 %v5712_v49, %v3705_v37  ;;  %v3066_v14 = vadd.f32 1.4214138, %v2938_v4  ;;  %v2874_v22 = vadd.f32 -1.4531521, %v2746_v53  ;;  %5721 = vrcp.f32 %v2491_v41 }
 0x2ad   :  { %v4920_v43 = vsel %vm4664_vm5, %v4536_v55, %v4792_v45  ;;  %v3769_v11 = vmul.f32 %v8577_v54, %v3641_v48  ;;  %5723 = vpow2.f32 %v4245_v46  ;;  %v2428_v7 = vadd.f32 1.0, %v2300_v18 }
 0x2ae   :  { %v5048_v6 = vadd.f32 1.0, %v4920_v43  ;;  %v4473_v57 = vsub.f32 1.0, %v4345_v8  ;;  %v3194_v40 = vmul.f32 %v8608_v35, %v3066_v14  ;;  %v3002_v27 = vmul.f32 %v8623_v15, %v2874_v22 }
 0x2af   :  { %v8639_v9 = vpop.eup %5717  ;;  %v4409_v21 = vmul.f32 %v5716_v36, %v3769_v11  ;;  %v4119_v51 = vmul.f32 1.442695, %v3963_v34  ;;  %v3899_v5 = vsub.f32 0.0, %v2235_v42  ;;  %vm4665_vm7 = vcmp.ge.f32.partialorder %v8511_v33, 0.0 }
 0x2b0   :  { %v5176_v25 = vmul.f32 %v5048_v6, %v8562_v58  ;;  %v4729_v38 = vsub.f32 0.0, %v4473_v57  ;;  %v3322_v54 = vadd.f32 -0.28449672, %v3194_v40  ;;  %v3130_v30 = vadd.f32 1.4214138, %v3002_v27  ;;  %v5720_v13 = vpop.eup %5719  ;;  %v1802_v27 = vpop.f32.mrf.mxu1 }
 0x2b1   :  { %v4537_v17 = vsub.f32 1.0, %v4409_v21  ;;  %v2683_v62 = vmul.f32 1.0614054, %v8639_v9  ;;  %5725 = vrcp.f32 %v2428_v7  ;;  %v8650_v58 = vadd.f32 %v1800_v19, %v7482_v0 }
 0x2b2   :  { %5304 = vst [vmem:[#allocation7 + $0x2c8] sm:$0xff] %v5176_v25  ;;  %v4857_v49 = vsel %vm4601_vm6, %v4473_v57, %v4729_v38  ;;  %v3450_v29 = vmul.f32 %v8608_v35, %v3322_v54  ;;  %v3258_v52 = vmul.f32 %v8623_v15, %v3130_v30  ;;  %v4027_v2 = vmul.f32 %v3899_v5, %v2235_v42 }
 0x2b3   :  { %v4985_v31 = vadd.f32 1.0, %v4857_v49  ;;  %v4793_v56 = vsub.f32 0.0, %v4537_v17  ;;  %v2811_v26 = vadd.f32 -1.4531521, %v2683_v62  ;;  %5727 = vpow2.f32 %v4119_v51 }
 0x2b4   :  { %v3578_v50 = vadd.f32 0.2548296, %v3450_v29  ;;  %v3386_v55 = vadd.f32 -0.28449672, %v3258_v52  ;;  %v8653_v63 = vadd.f32 %v1642_v44, %v7480_v60  ;;  %v3836_v4 = vsub.f32 0.0, %v8627_v24 }
 0x2b5   :  { %v5113_v39 = vmul.f32 %v4985_v31, %v8581_v1  ;;  %v4921_v46 = vsel %vm4665_vm7, %v4537_v17, %v4793_v56  ;;  %v2939_v37 = vmul.f32 %v8639_v9, %v2811_v26  ;;  %v8663_v36 = vmul.f32 0.70710677, %v8650_v58 }
 0x2b6   :  { %v5049_v53 = vadd.f32 1.0, %v4921_v46  ;;  %v3706_v41 = vmul.f32 %v8608_v35, %v3578_v50  ;;  %v3514_v42 = vmul.f32 %v8623_v15, %v3386_v55  ;;  %v4247_v48 = vmul.f32 1.442695, %v4027_v2  ;;  %v1644_v55 = vpop.f32.mrf.mxu0 }
 0x2b7   :  { %5241 = vst [vmem:[#allocation7 + $0xd0] sm:$0xff] %v5113_v39  ;;  %v3067_v45 = vadd.f32 1.4214138, %v2939_v37  ;;  %v8666_v1 = vmul.f32 0.70710677, %v8653_v63  ;;  %v1914_v35 = vmul.f32 0.5, %v8524_v16  ;;  %v3964_v43 = vmul.f32 %v3836_v4, %v8627_v24  ;;  %v1804_v4 = vpop.f32.mrf.mxu1 }
 0x2b8   :  { %v5177_v33 = vmul.f32 %v5049_v53, %v8598_v12  ;;  %v4346_v34 = vmul.f32 %v5720_v13, %v3706_v41  ;;  %v3642_v18 = vadd.f32 0.2548296, %v3514_v42  ;;  %v8670_v8 = vand.u32 2147483647, %v8663_v36 }
 0x2b9   :  { %v8672_v14 = vpop.eup %5721  ;;  %v3195_v22 = vmul.f32 %v8639_v9, %v3067_v45  ;;  %v8678_v11 = vand.u32 2147483647, %v8666_v1  ;;  %vm4602_vm8 = vcmp.ge.f32.partialorder %v8532_v59, 0.0  ;;  %5729 = vpow2.f32 %v4247_v48 }
 0x2ba   :  { %v5724_v7 = vpop.eup %5723  ;;  %5305 = vst [vmem:[#allocation7 + $0x2d0] sm:$0xff] %v5177_v33  ;;  %v4474_v6 = vsub.f32 1.0, %v4346_v34  ;;  %v3770_v12 = vmul.f32 %v8623_v15, %v3642_v18  ;;  %v2747_v57 = vmul.f32 1.0614054, %v8672_v14  ;;  %v2364_v40 = vmul.f32 0.3275911, %v8670_v8 }
 0x2bb   :  { %v3323_v16 = vadd.f32 -0.28449672, %v3195_v22  ;;  %v2301_v21 = vmul.f32 0.3275911, %v8678_v11  ;;  %v4121_v38 = vmul.f32 1.442695, %v3964_v43  ;;  %v8687_v15 = vadd.f32 %v1802_v27, %v7480_v60 }
 0x2bc   :  { %v4730_v24 = vsub.f32 0.0, %v4474_v6  ;;  %v4410_v51 = vmul.f32 %v5724_v7, %v3770_v12  ;;  %v2875_v5 = vadd.f32 -1.4531521, %v2747_v57  ;;  %v2492_v19 = vadd.f32 1.0, %v2364_v40 }
 0x2bd   :  { %v3451_v25 = vmul.f32 %v8639_v9, %v3323_v16  ;;  %v2429_v54 = vadd.f32 1.0, %v2301_v21  ;;  %v1978_v29 = vmul.f32 0.5, %v8535_v3  ;;  %vm4666_vm9 = vcmp.ge.f32.partialorder %v8549_v32, 0.0 }
 0x2be   :  { %v8689_v30 = vpop.eup %5725  ;;  %v4858_v13 = vsel %vm4602_vm8, %v4474_v6, %v4730_v24  ;;  %v4538_v17 = vsub.f32 1.0, %v4410_v51  ;;  %v3003_v59 = vmul.f32 %v8672_v14, %v2875_v5  ;;  %5731 = vrcp.f32 %v2492_v19 }
 0x2bf   :  { %v4986_v62 = vadd.f32 1.0, %v4858_v13  ;;  %v3579_v44 = vadd.f32 0.2548296, %v3451_v25  ;;  %v2684_v49 = vmul.f32 1.0614054, %v8689_v30  ;;  %5733 = vrcp.f32 %v2429_v54 }
 0x2c0   :  { %v4794_v52 = vsub.f32 0.0, %v4538_v17  ;;  %v3131_v31 = vadd.f32 1.4214138, %v3003_v59  ;;  %v5728_v56 = vpop.eup %5727  ;;  %5735 = vpow2.f32 %v4121_v38  ;;  %v8698_v37 = vmul.f32 0.70710677, %v8687_v15 }
 0x2c1   :  { %v5114_v26 = vmul.f32 %v4986_v62, %v1914_v35  ;;  %v3707_v2 = vmul.f32 %v8639_v9, %v3579_v44  ;;  %v2812_v50 = vadd.f32 -1.4531521, %v2684_v49  ;;  %v3900_v42 = vsub.f32 0.0, %v8670_v8 }
 0x2c2   :  { %v4922_v39 = vsel %vm4666_vm9, %v4538_v17, %v4794_v52  ;;  %v3259_v46 = vmul.f32 %v8672_v14, %v3131_v31  ;;  %v3837_v9 = vsub.f32 0.0, %v8678_v11  ;;  %v2237_v45 = vand.u32 2147483647, %v8698_v37 }
 0x2c3   :  { %5242 = vst [vmem:[#allocation7 + $0xd8] sm:$0xff] %v5114_v26  ;;  %v5050_v3 = vadd.f32 1.0, %v4922_v39  ;;  %v4347_v53 = vmul.f32 %v5728_v56, %v3707_v2  ;;  %v2940_v41 = vmul.f32 %v8689_v30, %v2812_v50  ;;  %v8705_v48 = vadd.f32 %v1644_v55, %v7482_v0  ;;  %v1648_v55 = vpop.f32.mrf.mxu0 }
 0x2c4   :  { %v3387_v32 = vadd.f32 -0.28449672, %v3259_v46  ;;  %v8708_v35 = vadd.f32 %v1804_v4, %v7482_v0  ;;  %vm4603_vm10 = vcmp.ge.f32.partialorder %v8571_v23, 0.0  ;;  %v2365_v43 = vmul.f32 0.3275911, %v2237_v45 }
 0x2c5   :  { %v5178_v33 = vmul.f32 %v5050_v3, %v1978_v29  ;;  %v4475_v34 = vsub.f32 1.0, %v4347_v53  ;;  %v3068_v18 = vadd.f32 1.4214138, %v2940_v41  ;;  %v4028_v12 = vmul.f32 %v3900_v42, %v8670_v8 }
 0x2c6   :  { %v3515_v22 = vmul.f32 %v8672_v14, %v3387_v32  ;;  %v8715_v57 = vmul.f32 0.70710677, %v8705_v48  ;;  %v5730_v40 = vpop.eup %5729  ;;  %v3965_v16 = vmul.f32 %v3837_v9, %v8678_v11  ;;  %v2493_v21 = vadd.f32 1.0, %v2365_v43  ;;  %v1808_v9 = vpop.f32.mrf.mxu1 }
 0x2c7   :  { %5306 = vst [vmem:[#allocation7 + $0x2d8] sm:$0xff] %v5178_v33  ;;  %v4731_v7 = vsub.f32 0.0, %v4475_v34  ;;  %v3196_v6 = vmul.f32 %v8689_v30, %v3068_v18  ;;  %v8719_v24 = vmul.f32 0.70710677, %v8708_v35  ;;  %v1915_v23 = vmul.f32 0.5, %v8552_v47 }
 0x2c8   :  { %v3643_v27 = vadd.f32 0.2548296, %v3515_v22  ;;  %v2174_v19 = vand.u32 2147483647, %v8715_v57  ;;  %v1979_v8 = vmul.f32 0.5, %v8589_v20  ;;  %5737 = vrcp.f32 %v2493_v21 }
 0x2c9   :  { %v4859_v51 = vsel %vm4603_vm10, %v4475_v34, %v4731_v7  ;;  %v3324_v5 = vadd.f32 -0.28449672, %v3196_v6  ;;  %v4249_v13 = vmul.f32 1.442695, %v4028_v12  ;;  %v8729_v59 = vand.u32 2147483647, %v8719_v24 }
 0x2ca   :  { %v4987_v25 = vadd.f32 1.0, %v4859_v51  ;;  %v3771_v38 = vmul.f32 %v8672_v14, %v3643_v27  ;;  %v2302_v17 = vmul.f32 0.3275911, %v2174_v19  ;;  %v4123_v29 = vmul.f32 1.442695, %v3965_v16 }
 0x2cb   :  { %v8725_v54 = vpop.eup %5731  ;;  %v3452_v11 = vmul.f32 %v8689_v30, %v3324_v5  ;;  %v3901_v52 = vsub.f32 0.0, %v2237_v45  ;;  %v1916_v26 = vmul.f32 0.5, %v8601_v10  ;;  %v2366_v50 = vmul.f32 0.3275911, %v8729_v59 }
 0x2cc   :  { %v8731_v47 = vpop.eup %5733  ;;  %v5115_v62 = vmul.f32 %v4987_v25, %v1915_v23  ;;  %v4411_v44 = vmul.f32 %v5730_v40, %v3771_v38  ;;  %v2748_v49 = vmul.f32 1.0614054, %v8725_v54  ;;  %v2430_v31 = vadd.f32 1.0, %v2302_v17 }
 0x2cd   :  { %v3580_v20 = vadd.f32 0.2548296, %v3452_v11  ;;  %v2685_v14 = vmul.f32 1.0614054, %v8731_v47  ;;  %v5736_v39 = vpop.eup %5735  ;;  %vm4667_vm11 = vcmp.ge.f32.partialorder %v8606_v61, 0.0  ;;  %v2494_v41 = vadd.f32 1.0, %v2366_v50  ;;  %v1650_v61 = vpop.f32.mrf.mxu0 }
 0x2ce   :  { %5243 = vst [vmem:[#allocation7 + $0xe0] sm:$0xff] %v5115_v62  ;;  %v4539_v56 = vsub.f32 1.0, %v4411_v44  ;;  %v2876_v2 = vadd.f32 -1.4531521, %v2748_v49  ;;  %5739 = vrcp.f32 %v2430_v31  ;;  %v4029_v10 = vmul.f32 %v3901_v52, %v2237_v45 }
 0x2cf   :  { %v3708_v46 = vmul.f32 %v8689_v30, %v3580_v20  ;;  %v2813_v4 = vadd.f32 -1.4531521, %v2685_v14  ;;  %5741 = vpow2.f32 %v4249_v13  ;;  %v3838_v18 = vsub.f32 0.0, %v2174_v19 }
 0x2d0   :  { %v4795_v3 = vsub.f32 0.0, %v4539_v56  ;;  %v3004_v53 = vmul.f32 %v8725_v54, %v2876_v2  ;;  %5743 = vpow2.f32 %v4123_v29  ;;  %v8742_v7 = vadd.f32 %v1648_v55, %v7480_v60 }
 0x2d1   :  { %v4348_v42 = vmul.f32 %v5736_v39, %v3708_v46  ;;  %v2941_v32 = vmul.f32 %v8731_v47, %v2813_v4  ;;  %5745 = vrcp.f32 %v2494_v41  ;;  %vm4604_vm12 = vcmp.ge.f32.partialorder %v8620_v28, 0.0 }
 0x2d2   :  { %v4923_v33 = vsel %vm4667_vm11, %v4539_v56, %v4795_v3  ;;  %v3132_v34 = vadd.f32 1.4214138, %v3004_v53  ;;  %v8746_v6 = vmul.f32 0.5, %v8650_v58  ;;  %v8750_v45 = vadd.f32 %v1808_v9, %v7480_v60 }
 0x2d3   :  { %v5051_v22 = vadd.f32 1.0, %v4923_v33  ;;  %v4476_v30 = vsub.f32 1.0, %v4348_v42  ;;  %v3069_v43 = vadd.f32 1.4214138, %v2941_v32  ;;  %v8754_v21 = vadd.f32 %v1650_v61, %v7482_v0 }
 0x2d4   :  { %v3260_v12 = vmul.f32 %v8725_v54, %v3132_v34  ;;  %v4251_v51 = vmul.f32 1.442695, %v4029_v10  ;;  %v3966_v5 = vmul.f32 %v3838_v18, %v2174_v19  ;;  %v8757_v28 = vmul.f32 0.70710677, %v8742_v7 }
 0x2d5   :  { %v5179_v40 = vmul.f32 %v5051_v22, %v1979_v8  ;;  %v4732_v27 = vsub.f32 0.0, %v4476_v30  ;;  %v3197_v16 = vmul.f32 %v8731_v47, %v3069_v43  ;;  %v8759_v58 = vpop.eup %5737  ;;  %v3902_v11 = vsub.f32 0.0, %v8729_v59 }
 0x2d6   :  { %v3388_v23 = vadd.f32 -0.28449672, %v3260_v12  ;;  %v8763_v8 = vmul.f32 0.70710677, %v8750_v45  ;;  %v2749_v62 = vmul.f32 1.0614054, %v8759_v58  ;;  %5747 = vpow2.f32 %v4251_v51 }
 0x2d7   :  { %5307 = vst [vmem:[#allocation7 + $0x2e0] sm:$0xff] %v5179_v40  ;;  %v4860_v25 = vsel %vm4604_vm12, %v4476_v30, %v4732_v27  ;;  %v3325_v38 = vadd.f32 -0.28449672, %v3197_v16  ;;  %v2175_v19 = vand.u32 2147483647, %v8757_v28  ;;  %v8769_v44 = vmul.f32 0.5, %v8653_v63 }
 0x2d8   :  { %v4988_v13 = vadd.f32 1.0, %v4860_v25  ;;  %v3516_v17 = vmul.f32 %v8725_v54, %v3388_v23  ;;  %v2239_v29 = vand.u32 2147483647, %v8763_v8  ;;  %v8774_v20 = vmul.f32 0.70710677, %v8754_v21 }
 0x2d9   :  { %v3453_v49 = vmul.f32 %v8731_v47, %v3325_v38  ;;  %v2877_v31 = vadd.f32 -1.4531521, %v2749_v62  ;;  %v2303_v56 = vmul.f32 0.3275911, %v2175_v19  ;;  %vm4668_vm13 = vcmp.ge.f32.partialorder %v8663_v36, 0.0 }
 0x2da   :  { %v5116_v14 = vmul.f32 %v4988_v13, %v1916_v26  ;;  %v3644_v52 = vadd.f32 0.2548296, %v3516_v17  ;;  %v4030_v50 = vmul.f32 %v3902_v11, %v8729_v59  ;;  %v2367_v55 = vmul.f32 0.3275911, %v2239_v29 }
 0x2db   :  { %v3581_v2 = vadd.f32 0.2548296, %v3453_v49  ;;  %v8778_v63 = vpop.eup %5739  ;;  %vm4605_vm14 = vcmp.ge.f32.partialorder %v8666_v1, 0.0  ;;  %v3005_v46 = vmul.f32 %v8759_v58, %v2877_v31  ;;  %v4125_v26 = vmul.f32 1.442695, %v3966_v5  ;;  %v1810_v49 = vpop.f32.mrf.mxu1 }
 0x2dc   :  { %5244 = vst [vmem:[#allocation7 + $0xe8] sm:$0xff] %v5116_v14  ;;  %v3772_v39 = vmul.f32 %v8725_v54, %v3644_v52  ;;  %v2431_v4 = vadd.f32 1.0, %v2303_v56  ;;  %v5742_v3 = vpop.eup %5741  ;;  %v2686_v41 = vmul.f32 1.0614054, %v8778_v63  ;;  %v2495_v42 = vadd.f32 1.0, %v2367_v55  ;;  %v1652_v14 = vpop.f32.mrf.mxu0 }
 0x2dd   :  { %v3709_v53 = vmul.f32 %v8731_v47, %v3581_v2  ;;  %v8786_v59 = vand.u32 2147483647, %v8774_v20  ;;  %v5744_v32 = vpop.eup %5743  ;;  %v8789_v9 = vmul.f32 0.5, %v8687_v15  ;;  %v3133_v54 = vadd.f32 1.4214138, %v3005_v46 }
 0x2de   :  { %v4412_v10 = vmul.f32 %v5742_v3, %v3772_v39  ;;  %5749 = vrcp.f32 %v2431_v4  ;;  %v8791_v33 = vpop.eup %5745  ;;  %v2814_v18 = vadd.f32 -1.4531521, %v2686_v41  ;;  %v4253_v61 = vmul.f32 1.442695, %v4030_v50 }
 0x2df   :  { %v4349_v34 = vmul.f32 %v5744_v32, %v3709_v53  ;;  %5751 = vrcp.f32 %v2495_v42  ;;  %v3261_v22 = vmul.f32 %v8759_v58, %v3133_v54  ;;  %v2750_v30 = vmul.f32 1.0614054, %v8791_v33 }
 0x2e0   :  { %v4540_v47 = vsub.f32 1.0, %v4412_v10  ;;  %v3839_v43 = vsub.f32 0.0, %v2175_v19  ;;  %v2942_v40 = vmul.f32 %v8778_v63, %v2814_v18  ;;  %5753 = vpow2.f32 %v4125_v26 }
 0x2e1   :  { %v4477_v12 = vsub.f32 1.0, %v4349_v34  ;;  %v2304_v15 = vmul.f32 0.3275911, %v8786_v59  ;;  %v3389_v16 = vadd.f32 -0.28449672, %v3261_v22  ;;  %v3903_v51 = vsub.f32 0.0, %v2239_v29 }
 0x2e2   :  { %v4796_v27 = vsub.f32 0.0, %v4540_v47  ;;  %v2878_v23 = vadd.f32 -1.4531521, %v2750_v30  ;;  %v3070_v25 = vadd.f32 1.4214138, %v2942_v40  ;;  %5755 = vpow2.f32 %v4253_v61 }
 0x2e3   :  { %v4733_v5 = vsub.f32 0.0, %v4477_v12  ;;  %v2432_v38 = vadd.f32 1.0, %v2304_v15  ;;  %v3517_v13 = vmul.f32 %v8759_v58, %v3389_v16  ;;  %v3967_v62 = vmul.f32 %v3839_v43, %v2175_v19  ;;  %v5748_v4 = vpop.eup %5747 }
 0x2e4   :  { %v4924_v11 = vsel %vm4668_vm13, %v4540_v47, %v4796_v27  ;;  %v3006_v17 = vmul.f32 %v8791_v33, %v2878_v23  ;;  %v3198_v56 = vmul.f32 %v8778_v63, %v3070_v25  ;;  %v4031_v39 = vmul.f32 %v3903_v51, %v2239_v29 }
 0x2e5   :  { %v5052_v52 = vadd.f32 1.0, %v4924_v11  ;;  %v4861_v31 = vsel %vm4605_vm14, %v4477_v12, %v4733_v5  ;;  %5757 = vrcp.f32 %v2432_v38  ;;  %v3645_v50 = vadd.f32 0.2548296, %v3517_v13 }
 0x2e6   :  { %v4989_v2 = vadd.f32 1.0, %v4861_v31  ;;  %v3134_v55 = vadd.f32 1.4214138, %v3006_v17  ;;  %v3326_v46 = vadd.f32 -0.28449672, %v3198_v56  ;;  %v8806_v26 = vadd.f32 %v1810_v49, %v7482_v0 }
 0x2e7   :  { %v5180_v36 = vmul.f32 %v5052_v52, %v8746_v6  ;;  %v8809_v19 = vadd.f32 %v1652_v14, %v7480_v60  ;;  %v3773_v3 = vmul.f32 %v8759_v58, %v3645_v50  ;;  %vm4669_vm15 = vcmp.ge.f32.partialorder %v8698_v37, 0.0 }
 0x2e8   :  { %v5117_v1 = vmul.f32 %v4989_v2, %v8769_v44  ;;  %v3262_v53 = vmul.f32 %v8791_v33, %v3134_v55  ;;  %v8816_v29 = vmul.f32 0.5, %v8705_v48  ;;  %v3454_v6 = vmul.f32 %v8778_v63, %v3326_v46 }
 0x2e9   :  { %5308 = vst [vmem:[#allocation7 + $0x2e8] sm:$0xff] %v5180_v36  ;;  %v4127_v41 = vmul.f32 1.442695, %v3967_v62  ;;  %v8820_v42 = vmul.f32 0.70710677, %v8806_v26  ;;  %v4413_v32 = vmul.f32 %v5748_v4, %v3773_v3  ;;  %v3840_v44 = vsub.f32 0.0, %v8786_v59 }
 0x2ea   :  { %5245 = vst [vmem:[#allocation7 + $0xf0] sm:$0xff] %v5117_v1  ;;  %v3390_v10 = vadd.f32 -0.28449672, %v3262_v53  ;;  %v8824_v58 = vmul.f32 0.70710677, %v8809_v19  ;;  %vm4606_vm0 = vcmp.ge.f32.partialorder %v8715_v57, 0.0 }
 0x2eb   :  { %v8826_v54 = vpop.eup %5749  ;;  %v3582_v34 = vadd.f32 0.2548296, %v3454_v6  ;;  %v4255_v18 = vmul.f32 1.442695, %v4031_v39  ;;  %v2240_v48 = vand.u32 2147483647, %v8820_v42  ;;  %5759 = vpow2.f32 %v4127_v41 }
 0x2ec   :  { %v8829_v61 = vpop.eup %5751  ;;  %v4541_v47 = vsub.f32 1.0, %v4413_v32  ;;  %v3518_v22 = vmul.f32 %v8791_v33, %v3390_v10  ;;  %v2687_v30 = vmul.f32 1.0614054, %v8826_v54  ;;  %v8835_v43 = vand.u32 2147483647, %v8824_v58 }
 0x2ed   :  { %v3710_v12 = vmul.f32 %v8778_v63, %v3582_v34  ;;  %v2751_v40 = vmul.f32 1.0614054, %v8829_v61  ;;  %v2368_v15 = vmul.f32 0.3275911, %v2240_v48  ;;  %v5754_v27 = vpop.eup %5753  ;;  %v3968_v5 = vmul.f32 %v3840_v44, %v8786_v59  ;;  %v1812_v59 = vpop.f32.mrf.mxu1 }
 0x2ee   :  { %v4797_v16 = vsub.f32 0.0, %v4541_v47  ;;  %v3646_v23 = vadd.f32 0.2548296, %v3518_v22  ;;  %v2815_v51 = vadd.f32 -1.4531521, %v2687_v30  ;;  %5761 = vpow2.f32 %v4255_v18  ;;  %v1654_v22 = vpop.f32.mrf.mxu0 }
 0x2ef   :  { %v4350_v25 = vmul.f32 %v5754_v27, %v3710_v12  ;;  %v2879_v38 = vadd.f32 -1.4531521, %v2751_v40  ;;  %v2496_v11 = vadd.f32 1.0, %v2368_v15  ;;  %v5756_v13 = vpop.eup %5755  ;;  %v2305_v49 = vmul.f32 0.3275911, %v8835_v43 }
 0x2f0   :  { %v4925_v17 = vsel %vm4669_vm15, %v4541_v47, %v4797_v16  ;;  %v3774_v63 = vmul.f32 %v8791_v33, %v3646_v23  ;;  %v2943_v62 = vmul.f32 %v8826_v54, %v2815_v51  ;;  %v4129_v55 = vmul.f32 1.442695, %v3968_v5 }
 0x2f1   :  { %v5053_v14 = vadd.f32 1.0, %v4925_v17  ;;  %v4478_v52 = vsub.f32 1.0, %v4350_v25  ;;  %v3007_v31 = vmul.f32 %v8829_v61, %v2879_v38  ;;  %5763 = vrcp.f32 %v2496_v11 }
 0x2f2   :  { %v8846_v56 = vpop.eup %5757  ;;  %v4414_v2 = vmul.f32 %v5756_v13, %v3774_v63  ;;  %v3071_v50 = vadd.f32 1.4214138, %v2943_v62  ;;  %v2433_v39 = vadd.f32 1.0, %v2305_v49  ;;  %v3904_v3 = vsub.f32 0.0, %v2240_v48 }
 0x2f3   :  { %v5181_v37 = vmul.f32 %v5053_v14, %v8789_v9  ;;  %v4734_v36 = vsub.f32 0.0, %v4478_v52  ;;  %v3135_v33 = vadd.f32 1.4214138, %v3007_v31  ;;  %v2688_v46 = vmul.f32 1.0614054, %v8846_v56  ;;  %v1814_v31 = vpop.f32.mrf.mxu1 }
 0x2f4   :  { %v4542_v4 = vsub.f32 1.0, %v4414_v2  ;;  %v3199_v1 = vmul.f32 %v8826_v54, %v3071_v50  ;;  %v8852_v53 = vadd.f32 %v1812_v59, %v7480_v60  ;;  %5765 = vrcp.f32 %v2433_v39 }
 0x2f5   :  { %5309 = vst [vmem:[#allocation7 + $0x2f0] sm:$0xff] %v5181_v37  ;;  %v4862_v6 = vsel %vm4606_vm0, %v4478_v52, %v4734_v36  ;;  %v3263_v41 = vmul.f32 %v8829_v61, %v3135_v33  ;;  %v2816_v32 = vadd.f32 -1.4531521, %v2688_v46  ;;  %v1982_v10 = vmul.f32 0.5, %v8708_v35  ;;  %v1658_v36 = vpop.f32.mrf.mxu0 }
 0x2f6   :  { %v4990_v9 = vadd.f32 1.0, %v4862_v6  ;;  %v4798_v44 = vsub.f32 0.0, %v4542_v4  ;;  %v3327_v34 = vadd.f32 -0.28449672, %v3199_v1  ;;  %vm4670_vm1 = vcmp.ge.f32.partialorder %v8719_v24, 0.0 }
 0x2f7   :  { %v3391_v18 = vadd.f32 -0.28449672, %v3263_v41  ;;  %v2944_v47 = vmul.f32 %v8846_v56, %v2816_v32  ;;  %5767 = vpow2.f32 %v4129_v55  ;;  %v4032_v40 = vmul.f32 %v3904_v3, %v2240_v48 }
 0x2f8   :  { %v5118_v30 = vmul.f32 %v4990_v9, %v8816_v29  ;;  %v4926_v57 = vsel %vm4670_vm1, %v4542_v4, %v4798_v44  ;;  %v3455_v12 = vmul.f32 %v8826_v54, %v3327_v34  ;;  %v8864_v35 = vmul.f32 0.70710677, %v8852_v53  ;;  %v5760_v23 = vpop.eup %5759 }
 0x2f9   :  { %v5054_v15 = vadd.f32 1.0, %v4926_v57  ;;  %v3519_v27 = vmul.f32 %v8829_v61, %v3391_v18  ;;  %v3072_v16 = vadd.f32 1.4214138, %v2944_v47  ;;  %v1919_v24 = vmul.f32 0.5, %v8742_v7 }
 0x2fa   :  { %5246 = vst [vmem:[#allocation7 + $0xf8] sm:$0xff] %v5118_v30  ;;  %v3583_v51 = vadd.f32 0.2548296, %v3455_v12  ;;  %v3841_v5 = vsub.f32 0.0, %v8835_v43  ;;  %v8869_v29 = vadd.f32 %v1654_v22, %v7482_v0  ;;  %v2241_v11 = vand.u32 2147483647, %v8864_v35 }
 0x2fb   :  { %v5182_v25 = vmul.f32 %v5054_v15, %v1982_v10  ;;  %v3647_v38 = vadd.f32 0.2548296, %v3519_v27  ;;  %v3200_v48 = vmul.f32 %v8846_v56, %v3072_v16  ;;  %v5762_v13 = vpop.eup %5761  ;;  %v1983_v63 = vmul.f32 0.5, %v8750_v45 }
 0x2fc   :  { %v3711_v17 = vmul.f32 %v8826_v54, %v3583_v51  ;;  %v4257_v62 = vmul.f32 1.442695, %v4032_v40  ;;  %v8876_v7 = vmul.f32 0.70710677, %v8869_v29  ;;  %vm4607_vm2 = vcmp.ge.f32.partialorder %v8757_v28, 0.0 }
 0x2fd   :  { %5310 = vst [vmem:[#allocation7 + $0x2f8] sm:$0xff] %v5182_v25  ;;  %v3775_v49 = vmul.f32 %v8829_v61, %v3647_v38  ;;  %v3328_v14 = vadd.f32 -0.28449672, %v3200_v48  ;;  %v2369_v52 = vmul.f32 0.3275911, %v2241_v11  ;;  %vm4671_vm3 = vcmp.ge.f32.partialorder %v8763_v8, 0.0 }
 0x2fe   :  { %v8880_v59 = vpop.eup %5763  ;;  %v4351_v2 = vmul.f32 %v5760_v23, %v3711_v17  ;;  %v3969_v54 = vmul.f32 %v3841_v5, %v8835_v43  ;;  %v2178_v45 = vand.u32 2147483647, %v8876_v7  ;;  %5769 = vpow2.f32 %v4257_v62  ;;  %v1818_v62 = vpop.f32.mrf.mxu1 }
 0x2ff   :  { %v4415_v50 = vmul.f32 %v5762_v13, %v3775_v49  ;;  %v3456_v55 = vmul.f32 %v8846_v56, %v3328_v14  ;;  %v2752_v39 = vmul.f32 1.0614054, %v8880_v59  ;;  %v2497_v37 = vadd.f32 1.0, %v2369_v52 }
 0x300   :  { %v4479_v61 = vsub.f32 1.0, %v4351_v2  ;;  %v2306_v33 = vmul.f32 0.3275911, %v2178_v45  ;;  %v8888_v46 = vadd.f32 %v1814_v31, %v7482_v0  ;;  %v4131_v41 = vmul.f32 1.442695, %v3969_v54 }
 0x301   :  { %v4543_v4 = vsub.f32 1.0, %v4415_v50  ;;  %v3584_v1 = vadd.f32 0.2548296, %v3456_v55  ;;  %v2880_v3 = vadd.f32 -1.4531521, %v2752_v39  ;;  %5771 = vrcp.f32 %v2497_v37  ;;  %v8890_v43 = vpop.eup %5765 }
 0x302   :  { %v4735_v6 = vsub.f32 0.0, %v4479_v61  ;;  %v2434_v32 = vadd.f32 1.0, %v2306_v33  ;;  %v8893_v9 = vadd.f32 %v1658_v36, %v7480_v60  ;;  %v2689_v18 = vmul.f32 1.0614054, %v8890_v43 }
 0x303   :  { %v4799_v10 = vsub.f32 0.0, %v4543_v4  ;;  %v3712_v44 = vmul.f32 %v8846_v56, %v3584_v1  ;;  %v3008_v34 = vmul.f32 %v8880_v59, %v2880_v3  ;;  %v3905_v30 = vsub.f32 0.0, %v2241_v11  ;;  %v1660_v3 = vpop.f32.mrf.mxu0 }
 0x304   :  { %v5768_v47 = vpop.eup %5767  ;;  %v4863_v22 = vsel %vm4607_vm2, %v4479_v61, %v4735_v6  ;;  %v3842_v57 = vsub.f32 0.0, %v2178_v45  ;;  %v8901_v12 = vmul.f32 0.70710677, %v8888_v46  ;;  %v2817_v23 = vadd.f32 -1.4531521, %v2689_v18 }
 0x305   :  { %v4991_v40 = vadd.f32 1.0, %v4863_v22  ;;  %v4927_v15 = vsel %vm4671_vm3, %v4543_v4, %v4799_v10  ;;  %v4352_v27 = vmul.f32 %v5768_v47, %v3712_v44  ;;  %v3136_v16 = vadd.f32 1.4214138, %v3008_v34 }
 0x306   :  { %v5055_v56 = vadd.f32 1.0, %v4927_v15  ;;  %5773 = vrcp.f32 %v2434_v32  ;;  %v2242_v51 = vand.u32 2147483647, %v8901_v12  ;;  %v2945_v48 = vmul.f32 %v8890_v43, %v2817_v23 }
 0x307   :  { %v5119_v5 = vmul.f32 %v4991_v40, %v1919_v24  ;;  %v4480_v25 = vsub.f32 1.0, %v4352_v27  ;;  %v3264_v28 = vmul.f32 %v8880_v59, %v3136_v16  ;;  %5775 = vpow2.f32 %v4131_v41 }
 0x308   :  { %v5183_v38 = vmul.f32 %v5055_v56, %v1983_v63  ;;  %v4033_v13 = vmul.f32 %v3905_v30, %v2241_v11  ;;  %v2370_v17 = vmul.f32 0.3275911, %v2242_v51  ;;  %vm4608_vm4 = vcmp.ge.f32.partialorder %v8774_v20, 0.0 }
 0x309   :  { %5247 = vst [vmem:[#allocation7 + $0x100] sm:$0xff] %v5119_v5  ;;  %v4736_v8 = vsub.f32 0.0, %v4480_v25  ;;  %v3392_v49 = vadd.f32 -0.28449672, %v3264_v28  ;;  %v3073_v14 = vadd.f32 1.4214138, %v2945_v48  ;;  %v3970_v52 = vmul.f32 %v3842_v57, %v2178_v45 }
 0x30a   :  { %5311 = vst [vmem:[#allocation7 + $0x300] sm:$0xff] %v5183_v38  ;;  %v2498_v31 = vadd.f32 1.0, %v2370_v17  ;;  %v8910_v24 = vmul.f32 0.70710677, %v8893_v9  ;;  %v1920_v2 = vmul.f32 0.5, %v8754_v21  ;;  %v8915_v11 = vadd.f32 %v1818_v62, %v7480_v60 }
 0x30b   :  { %v4864_v63 = vsel %vm4608_vm4, %v4480_v25, %v4736_v8  ;;  %v3520_v54 = vmul.f32 %v8880_v59, %v3392_v49  ;;  %v3201_v20 = vmul.f32 %v8890_v43, %v3073_v14  ;;  %v4259_v55 = vmul.f32 1.442695, %v4033_v13  ;;  %v5770_v39 = vpop.eup %5769  ;;  %v1820_v25 = vpop.f32.mrf.mxu1 }
 0x30c   :  { %v4992_v50 = vadd.f32 1.0, %v4864_v63  ;;  %5777 = vrcp.f32 %v2498_v31  ;;  %v1984_v45 = vmul.f32 0.5, %v8806_v26  ;;  %v2179_v36 = vand.u32 2147483647, %v8910_v24 }
 0x30d   :  { %v3648_v37 = vadd.f32 0.2548296, %v3520_v54  ;;  %v3329_v33 = vadd.f32 -0.28449672, %v3201_v20  ;;  %v4133_v4 = vmul.f32 1.442695, %v3970_v52  ;;  %5779 = vpow2.f32 %v4259_v55 }
 0x30e   :  { %v8920_v61 = vpop.eup %5771  ;;  %v5120_v21 = vmul.f32 %v4992_v50, %v1920_v2  ;;  %v8923_v1 = vmul.f32 0.70710677, %v8915_v11  ;;  %v8927_v41 = vmul.f32 0.5, %v8809_v19  ;;  %v2307_v26 = vmul.f32 0.3275911, %v2179_v36 }
 0x30f   :  { %v3776_v6 = vmul.f32 %v8880_v59, %v3648_v37  ;;  %v2753_v32 = vmul.f32 1.0614054, %v8920_v61  ;;  %v3457_v10 = vmul.f32 %v8890_v43, %v3329_v33  ;;  %v3906_v44 = vsub.f32 0.0, %v2242_v51 }
 0x310   :  { %5248 = vst [vmem:[#allocation7 + $0x108] sm:$0xff] %v5120_v21  ;;  %v2243_v34 = vand.u32 2147483647, %v8923_v1  ;;  %v2435_v22 = vadd.f32 1.0, %v2307_v26  ;;  %v8933_v30 = vadd.f32 %v1660_v3, %v7482_v0  ;;  %vm4672_vm5 = vcmp.ge.f32.partialorder %v8820_v42, 0.0 }
 0x311   :  { %v4416_v18 = vmul.f32 %v5770_v39, %v3776_v6  ;;  %v2881_v47 = vadd.f32 -1.4531521, %v2753_v32  ;;  %v3585_v19 = vadd.f32 0.2548296, %v3457_v10  ;;  %5781 = vpow2.f32 %v4133_v4  ;;  %v1662_v4 = vpop.f32.mrf.mxu0 }
 0x312   :  { %v2371_v59 = vmul.f32 0.3275911, %v2243_v34  ;;  %vm4609_vm6 = vcmp.ge.f32.partialorder %v8824_v58, 0.0  ;;  %5783 = vrcp.f32 %v2435_v22  ;;  %v4034_v23 = vmul.f32 %v3906_v44, %v2242_v51 }
 0x313   :  { %v8936_v57 = vpop.eup %5773  ;;  %v4544_v40 = vsub.f32 1.0, %v4416_v18  ;;  %v3009_v15 = vmul.f32 %v8920_v61, %v2881_v47  ;;  %v3713_v16 = vmul.f32 %v8890_v43, %v3585_v19  ;;  %v3843_v48 = vsub.f32 0.0, %v2179_v36 }
 0x314   :  { %v5776_v27 = vpop.eup %5775  ;;  %v2690_v56 = vmul.f32 1.0614054, %v8936_v57  ;;  %v2499_v5 = vadd.f32 1.0, %v2371_v59  ;;  %v8943_v13 = vmul.f32 0.70710677, %v8933_v30  ;;  %v3907_v8 = vsub.f32 0.0, %v2243_v34 }
 0x315   :  { %v4800_v28 = vsub.f32 0.0, %v4544_v40  ;;  %v3137_v38 = vadd.f32 1.4214138, %v3009_v15  ;;  %v4353_v17 = vmul.f32 %v5776_v27, %v3713_v16  ;;  %v8952_v51 = vadd.f32 %v1820_v25, %v7482_v0 }
 0x316   :  { %v2818_v62 = vadd.f32 -1.4531521, %v2690_v56  ;;  %5785 = vrcp.f32 %v2499_v5  ;;  %v8949_v14 = vand.u32 2147483647, %v8943_v13  ;;  %v4261_v63 = vmul.f32 1.442695, %v4034_v23 }
 0x317   :  { %v4928_v49 = vsel %vm4672_vm5, %v4544_v40, %v4800_v28  ;;  %v3265_v43 = vmul.f32 %v8920_v61, %v3137_v38  ;;  %v4481_v31 = vsub.f32 1.0, %v4353_v17  ;;  %v8958_v50 = vmul.f32 0.5, %v8852_v53 }
 0x318   :  { %v5056_v52 = vadd.f32 1.0, %v4928_v49  ;;  %v2946_v2 = vmul.f32 %v8936_v57, %v2818_v62  ;;  %v3971_v20 = vmul.f32 %v3843_v48, %v2179_v36  ;;  %v2308_v55 = vmul.f32 0.3275911, %v8949_v14 }
 0x319   :  { %v8955_v54 = vpop.eup %5777  ;;  %v3393_v42 = vadd.f32 -0.28449672, %v3265_v43  ;;  %v4737_v37 = vsub.f32 0.0, %v4481_v31  ;;  %v4035_v6 = vmul.f32 %v3907_v8, %v2243_v34  ;;  %v8964_v26 = vmul.f32 0.70710677, %v8952_v51 }
 0x31a   :  { %v5184_v39 = vmul.f32 %v5056_v52, %v1984_v45  ;;  %v3074_v21 = vadd.f32 1.4214138, %v2946_v2  ;;  %v2754_v33 = vmul.f32 1.0614054, %v8955_v54  ;;  %v2436_v32 = vadd.f32 1.0, %v2308_v55  ;;  %v5780_v45 = vpop.eup %5779 }
 0x31b   :  { %v3521_v3 = vmul.f32 %v8920_v61, %v3393_v42  ;;  %v4865_v53 = vsel %vm4609_vm6, %v4481_v31, %v4737_v37  ;;  %5787 = vpow2.f32 %v4261_v63  ;;  %v8970_v47 = vadd.f32 %v1662_v4, %v7480_v60  ;;  %v1822_v63 = vpop.f32.mrf.mxu1 }
 0x31c   :  { %5312 = vst [vmem:[#allocation7 + $0x308] sm:$0xff] %v5184_v39  ;;  %v3202_v36 = vmul.f32 %v8936_v57, %v3074_v21  ;;  %v2882_v10 = vadd.f32 -1.4531521, %v2754_v33  ;;  %v4993_v44 = vadd.f32 1.0, %v4865_v53  ;;  %5789 = vrcp.f32 %v2436_v32 }
 0x31d   :  { %v3649_v18 = vadd.f32 0.2548296, %v3521_v3  ;;  %vm4673_vm7 = vcmp.ge.f32.partialorder %v8864_v35, 0.0  ;;  %v4135_v19 = vmul.f32 1.442695, %v3971_v20  ;;  %v8978_v27 = vmul.f32 0.5, %v8869_v29 }
 0x31e   :  { %v3330_v34 = vadd.f32 -0.28449672, %v3202_v36  ;;  %v3010_v22 = vmul.f32 %v8955_v54, %v2882_v10  ;;  %v2244_v58 = vand.u32 2147483647, %v8964_v26  ;;  %v5782_v59 = vpop.eup %5781  ;;  %v5121_v40 = vmul.f32 %v4993_v44, %v8927_v41 }
 0x31f   :  { %v3777_v15 = vmul.f32 %v8920_v61, %v3649_v18  ;;  %v4263_v16 = vmul.f32 1.442695, %v4035_v6  ;;  %v8980_v56 = vpop.eup %5783  ;;  %v8984_v5 = vmul.f32 0.5, %v8888_v46  ;;  %v3844_v41 = vsub.f32 0.0, %v8949_v14 }
 0x320   :  { %v3458_v23 = vmul.f32 %v8936_v57, %v3330_v34  ;;  %v3138_v25 = vadd.f32 1.4214138, %v3010_v22  ;;  %v2372_v28 = vmul.f32 0.3275911, %v2244_v58  ;;  %5249 = vst [vmem:[#allocation7 + $0x110] sm:$0xff] %v5121_v40  ;;  %5791 = vpow2.f32 %v4135_v19  ;;  %v1664_v40 = vpop.f32.mrf.mxu0 }
 0x321   :  { %v4417_v38 = vmul.f32 %v5780_v45, %v3777_v15  ;;  %v2691_v48 = vmul.f32 1.0614054, %v8980_v56  ;;  %v8989_v61 = vmul.f32 0.70710677, %v8970_v47  ;;  %vm4610_vm8 = vcmp.ge.f32.partialorder %v8876_v7, 0.0 }
 0x322   :  { %v3586_v29 = vadd.f32 0.2548296, %v3458_v23  ;;  %v3266_v17 = vmul.f32 %v8955_v54, %v3138_v25  ;;  %v2500_v62 = vadd.f32 1.0, %v2372_v28  ;;  %5793 = vpow2.f32 %v4263_v16 }
 0x323   :  { %v8992_v8 = vpop.eup %5785  ;;  %v4545_v46 = vsub.f32 1.0, %v4417_v38  ;;  %v2819_v49 = vadd.f32 -1.4531521, %v2691_v48  ;;  %v8996_v43 = vand.u32 2147483647, %v8989_v61  ;;  %v3972_v55 = vmul.f32 %v3844_v41, %v8949_v14 }
 0x324   :  { %v3714_v52 = vmul.f32 %v8936_v57, %v3586_v29  ;;  %v3394_v31 = vadd.f32 -0.28449672, %v3266_v17  ;;  %v2755_v2 = vmul.f32 1.0614054, %v8992_v8  ;;  %5795 = vrcp.f32 %v2500_v62 }
 0x325   :  { %v4801_v42 = vsub.f32 0.0, %v4545_v46  ;;  %v2947_v20 = vmul.f32 %v8980_v56, %v2819_v49  ;;  %v2309_v39 = vmul.f32 0.3275911, %v8996_v43  ;;  %v3908_v4 = vsub.f32 0.0, %v2244_v58 }
 0x326   :  { %v4354_v37 = vmul.f32 %v5782_v59, %v3714_v52  ;;  %v3522_v21 = vmul.f32 %v8955_v54, %v3394_v31  ;;  %v2883_v33 = vadd.f32 -1.4531521, %v2755_v2  ;;  %v9007_v32 = vadd.f32 %v1822_v63, %v7480_v60 }
 0x327   :  { %v4929_v57 = vsel %vm4673_vm7, %v4545_v46, %v4801_v42  ;;  %v3075_v3 = vadd.f32 1.4214138, %v2947_v20  ;;  %v2437_v6 = vadd.f32 1.0, %v2309_v39  ;;  %vm4674_vm9 = vcmp.ge.f32.partialorder %v8901_v12, 0.0 }
 0x328   :  { %v5057_v53 = vadd.f32 1.0, %v4929_v57  ;;  %v4482_v36 = vsub.f32 1.0, %v4354_v37  ;;  %v3650_v10 = vadd.f32 0.2548296, %v3522_v21  ;;  %v3011_v14 = vmul.f32 %v8992_v8, %v2883_v33  ;;  %v5788_v45 = vpop.eup %5787 }
 0x329   :  { %v3203_v44 = vmul.f32 %v8980_v56, %v3075_v3  ;;  %v4137_v18 = vmul.f32 1.442695, %v3972_v55  ;;  %5797 = vrcp.f32 %v2437_v6  ;;  %v9012_v34 = vpop.eup %5789  ;;  %v4036_v23 = vmul.f32 %v3908_v4, %v2244_v58 }
 0x32a   :  { %v5185_v35 = vmul.f32 %v5057_v53, %v8958_v50  ;;  %v4738_v22 = vsub.f32 0.0, %v4482_v36  ;;  %v3778_v19 = vmul.f32 %v8955_v54, %v3650_v10  ;;  %v3139_v59 = vadd.f32 1.4214138, %v3011_v14 }
 0x32b   :  { %v3331_v15 = vadd.f32 -0.28449672, %v3203_v44  ;;  %v2692_v16 = vmul.f32 1.0614054, %v9012_v34  ;;  %v3845_v25 = vsub.f32 0.0, %v8996_v43  ;;  %v9026_v17 = vadd.f32 %v1664_v40, %v7482_v0 }
 0x32c   :  { %5313 = vst [vmem:[#allocation7 + $0x310] sm:$0xff] %v5185_v35  ;;  %v4866_v28 = vsel %vm4610_vm8, %v4482_v36, %v4738_v22  ;;  %v4418_v38 = vmul.f32 %v5788_v45, %v3778_v19  ;;  %v3267_v48 = vmul.f32 %v8992_v8, %v3139_v59  ;;  %v9022_v50 = vmul.f32 0.70710677, %v9007_v32 }
 0x32d   :  { %v4994_v41 = vadd.f32 1.0, %v4866_v28  ;;  %v3459_v54 = vmul.f32 %v8980_v56, %v3331_v15  ;;  %v2820_v29 = vadd.f32 -1.4531521, %v2692_v16  ;;  %v9029_v62 = vmul.f32 0.5, %v8893_v9  ;;  %v5792_v49 = vpop.eup %5791 }
 0x32e   :  { %v4546_v58 = vsub.f32 1.0, %v4418_v38  ;;  %v3395_v46 = vadd.f32 -0.28449672, %v3267_v48  ;;  %v2245_v7 = vand.u32 2147483647, %v9022_v50  ;;  %5799 = vpow2.f32 %v4137_v18  ;;  %v1824_v18 = vpop.f32.mrf.mxu1 }
 0x32f   :  { %v5122_v52 = vmul.f32 %v4994_v41, %v8978_v27  ;;  %v3587_v31 = vadd.f32 0.2548296, %v3459_v54  ;;  %v2948_v2 = vmul.f32 %v9012_v34, %v2820_v29  ;;  %v5794_v63 = vpop.eup %5793  ;;  %v4265_v55 = vmul.f32 1.442695, %v4036_v23 }
 0x330   :  { %v4802_v42 = vsub.f32 0.0, %v4546_v58  ;;  %v3523_v20 = vmul.f32 %v8992_v8, %v3395_v46  ;;  %v2373_v39 = vmul.f32 0.3275911, %v2245_v7  ;;  %v3973_v33 = vmul.f32 %v3845_v25, %v8996_v43 }
 0x331   :  { %v9035_v37 = vpop.eup %5795  ;;  %5250 = vst [vmem:[#allocation7 + $0x118] sm:$0xff] %v5122_v52  ;;  %v3715_v9 = vmul.f32 %v8980_v56, %v3587_v31  ;;  %v3076_v21 = vadd.f32 1.4214138, %v2948_v2  ;;  %v9040_v27 = vmul.f32 0.70710677, %v9026_v17  ;;  %vm4611_vm10 = vcmp.ge.f32.partialorder %v8910_v24, 0.0  ;;  %v1668_v2 = vpop.f32.mrf.mxu0 }
 0x332   :  { %v4930_v4 = vsel %vm4674_vm9, %v4546_v58, %v4802_v42  ;;  %v3651_v57 = vadd.f32 0.2548296, %v3523_v20  ;;  %v2756_v3 = vmul.f32 1.0614054, %v9035_v37  ;;  %v2501_v6 = vadd.f32 1.0, %v2373_v39 }
 0x333   :  { %v5058_v53 = vadd.f32 1.0, %v4930_v4  ;;  %v4355_v36 = vmul.f32 %v5792_v49, %v3715_v9  ;;  %v3204_v10 = vmul.f32 %v9012_v34, %v3076_v21  ;;  %v9049_v43 = vand.u32 2147483647, %v9040_v27 }
 0x334   :  { %v3779_v56 = vmul.f32 %v8992_v8, %v3651_v57  ;;  %v2884_v14 = vadd.f32 -1.4531521, %v2756_v3  ;;  %5801 = vrcp.f32 %v2501_v6  ;;  %v4139_v59 = vmul.f32 1.442695, %v3973_v33 }
 0x335   :  { %v5186_v12 = vmul.f32 %v5058_v53, %v8984_v5  ;;  %v4483_v45 = vsub.f32 1.0, %v4355_v36  ;;  %v3332_v44 = vadd.f32 -0.28449672, %v3204_v10  ;;  %5803 = vpow2.f32 %v4265_v55  ;;  %v1828_v10 = vpop.f32.mrf.mxu1 }
 0x336   :  { %v9052_v35 = vpop.eup %5797  ;;  %v4419_v22 = vmul.f32 %v5794_v63, %v3779_v56  ;;  %v3012_v19 = vmul.f32 %v9035_v37, %v2884_v14  ;;  %v2310_v40 = vmul.f32 0.3275911, %v9049_v43  ;;  %v3909_v23 = vsub.f32 0.0, %v2245_v7 }
 0x337   :  { %5314 = vst [vmem:[#allocation7 + $0x318] sm:$0xff] %v5186_v12  ;;  %v4739_v8 = vsub.f32 0.0, %v4483_v45  ;;  %v3460_v15 = vmul.f32 %v9012_v34, %v3332_v44  ;;  %v2693_v16 = vmul.f32 1.0614054, %v9052_v35  ;;  %v9059_v38 = vadd.f32 %v1824_v18, %v7482_v0 }
 0x338   :  { %v4547_v5 = vsub.f32 1.0, %v4419_v22  ;;  %v3140_v25 = vadd.f32 1.4214138, %v3012_v19  ;;  %v2438_v28 = vadd.f32 1.0, %v2310_v40  ;;  %vm4675_vm11 = vcmp.ge.f32.partialorder %v8923_v1, 0.0 }
 0x339   :  { %v4867_v48 = vsel %vm4611_vm10, %v4483_v45, %v4739_v8  ;;  %v3588_v41 = vadd.f32 0.2548296, %v3460_v15  ;;  %v2821_v54 = vadd.f32 -1.4531521, %v2693_v16  ;;  %v4037_v31 = vmul.f32 %v3909_v23, %v2245_v7 }
 0x33a   :  { %v4995_v29 = vadd.f32 1.0, %v4867_v48  ;;  %v4803_v58 = vsub.f32 0.0, %v4547_v5  ;;  %v3268_v46 = vmul.f32 %v9035_v37, %v3140_v25  ;;  %5805 = vrcp.f32 %v2438_v28 }
 0x33b   :  { %v3716_v49 = vmul.f32 %v9012_v34, %v3588_v41  ;;  %v2949_v52 = vmul.f32 %v9052_v35, %v2821_v54  ;;  %5807 = vpow2.f32 %v4139_v59  ;;  %v5800_v63 = vpop.eup %5799  ;;  %v9069_v1 = vmul.f32 0.70710677, %v9059_v38 }
 0x33c   :  { %v5123_v24 = vmul.f32 %v4995_v29, %v9029_v62  ;;  %v4931_v42 = vsel %vm4675_vm11, %v4547_v5, %v4803_v58  ;;  %v3396_v20 = vadd.f32 -0.28449672, %v3268_v46  ;;  %v1987_v55 = vmul.f32 0.5, %v8915_v11 }
 0x33d   :  { %v5059_v39 = vadd.f32 1.0, %v4931_v42  ;;  %v4356_v9 = vmul.f32 %v5800_v63, %v3716_v49  ;;  %v3077_v21 = vadd.f32 1.4214138, %v2949_v52  ;;  %v3846_v33 = vsub.f32 0.0, %v9049_v43  ;;  %v1670_v49 = vpop.f32.mrf.mxu0 }
 0x33e   :  { %5251 = vst [vmem:[#allocation7 + $0x120] sm:$0xff] %v5123_v24  ;;  %v3524_v34 = vmul.f32 %v9035_v37, %v3396_v20  ;;  %v9075_v7 = vand.u32 2147483647, %v9069_v1  ;;  %v9078_v62 = vadd.f32 %v1668_v2, %v7480_v60  ;;  %v1924_v57 = vmul.f32 0.5, %v8933_v30 }
 0x33f   :  { %v5187_v4 = vmul.f32 %v5059_v39, %v1987_v55  ;;  %v4484_v3 = vsub.f32 1.0, %v4356_v9  ;;  %v3205_v11 = vmul.f32 %v9052_v35, %v3077_v21  ;;  %v4267_v53 = vmul.f32 1.442695, %v4037_v31 }
 0x340   :  { %v3652_v6 = vadd.f32 0.2548296, %v3524_v34  ;;  %v2374_v36 = vmul.f32 0.3275911, %v9075_v7  ;;  %vm4612_vm12 = vcmp.ge.f32.partialorder %v8943_v13, 0.0  ;;  %v3974_v22 = vmul.f32 %v3846_v33, %v9049_v43  ;;  %v1830_v33 = vpop.f32.mrf.mxu1 }
 0x341   :  { %v9083_v56 = vpop.eup %5801  ;;  %5315 = vst [vmem:[#allocation7 + $0x320] sm:$0xff] %v5187_v4  ;;  %v4740_v14 = vsub.f32 0.0, %v4484_v3  ;;  %v3333_v12 = vadd.f32 -0.28449672, %v3205_v11  ;;  %v9087_v45 = vmul.f32 0.70710677, %v9078_v62  ;;  %v9095_v13 = vadd.f32 %v1828_v10, %v7480_v60 }
 0x342   :  { %v5804_v44 = vpop.eup %5803  ;;  %v3780_v30 = vmul.f32 %v9035_v37, %v3652_v6  ;;  %v2757_v18 = vmul.f32 1.0614054, %v9083_v56  ;;  %v2502_v19 = vadd.f32 1.0, %v2374_v36  ;;  %v1988_v5 = vmul.f32 0.5, %v8952_v51 }
 0x343   :  { %v4868_v59 = vsel %vm4612_vm12, %v4484_v3, %v4740_v14  ;;  %v3461_v40 = vmul.f32 %v9052_v35, %v3333_v12  ;;  %v2183_v8 = vand.u32 2147483647, %v9087_v45  ;;  %v4141_v29 = vmul.f32 1.442695, %v3974_v22 }
 0x344   :  { %v4996_v15 = vadd.f32 1.0, %v4868_v59  ;;  %v4420_v16 = vmul.f32 %v5804_v44, %v3780_v30  ;;  %v2885_v23 = vadd.f32 -1.4531521, %v2757_v18  ;;  %5809 = vrcp.f32 %v2502_v19  ;;  %v1672_v44 = vpop.f32.mrf.mxu0 }
 0x345   :  { %v3589_v37 = vadd.f32 0.2548296, %v3461_v40  ;;  %v2311_v25 = vmul.f32 0.3275911, %v2183_v8  ;;  %5811 = vpow2.f32 %v4267_v53  ;;  %v9103_v46 = vmul.f32 0.70710677, %v9095_v13 }
 0x346   :  { %v5124_v28 = vmul.f32 %v4996_v15, %v1924_v57  ;;  %v4548_v48 = vsub.f32 1.0, %v4420_v16  ;;  %v3013_v43 = vmul.f32 %v9083_v56, %v2885_v23  ;;  %v3910_v63 = vsub.f32 0.0, %v9075_v7 }
 0x347   :  { %v9099_v41 = vpop.eup %5805  ;;  %v3717_v54 = vmul.f32 %v9052_v35, %v3589_v37  ;;  %v2439_v58 = vadd.f32 1.0, %v2311_v25  ;;  %vm4676_vm13 = vcmp.ge.f32.partialorder %v8964_v26, 0.0  ;;  %v2247_v35 = vand.u32 2147483647, %v9103_v46 }
 0x348   :  { %v5808_v52 = vpop.eup %5807  ;;  %5252 = vst [vmem:[#allocation7 + $0x128] sm:$0xff] %v5124_v28  ;;  %v4804_v51 = vsub.f32 0.0, %v4548_v48  ;;  %v3141_v31 = vadd.f32 1.4214138, %v3013_v43  ;;  %v2694_v2 = vmul.f32 1.0614054, %v9099_v41  ;;  %v9111_v39 = vadd.f32 %v1670_v49, %v7482_v0 }
 0x349   :  { %v4357_v24 = vmul.f32 %v5808_v52, %v3717_v54  ;;  %5813 = vrcp.f32 %v2439_v58  ;;  %vm4613_vm14 = vcmp.ge.f32.partialorder %v8989_v61, 0.0  ;;  %v2375_v34 = vmul.f32 0.3275911, %v2247_v35 }
 0x34a   :  { %v4932_v42 = vsel %vm4676_vm13, %v4548_v48, %v4804_v51  ;;  %v3269_v20 = vmul.f32 %v9083_v56, %v3141_v31  ;;  %v2822_v55 = vadd.f32 -1.4531521, %v2694_v2  ;;  %5815 = vpow2.f32 %v4141_v29 }
 0x34b   :  { %v5060_v9 = vadd.f32 1.0, %v4932_v42  ;;  %v4485_v21 = vsub.f32 1.0, %v4357_v24  ;;  %v4038_v57 = vmul.f32 %v3910_v63, %v9075_v7  ;;  %v3847_v6 = vsub.f32 0.0, %v2183_v8 }
 0x34c   :  { %v3397_v4 = vadd.f32 -0.28449672, %v3269_v20  ;;  %v2950_v26 = vmul.f32 %v9099_v41, %v2822_v55  ;;  %v2503_v53 = vadd.f32 1.0, %v2375_v34  ;;  %v9118_v14 = vmul.f32 0.70710677, %v9111_v39 }
 0x34d   :  { %v5188_v3 = vmul.f32 %v5060_v9, %v1988_v5  ;;  %v4741_v11 = vsub.f32 0.0, %v4485_v21  ;;  %v9121_v12 = vadd.f32 %v1830_v33, %v7482_v0  ;;  %v1925_v30 = vmul.f32 0.5, %v8970_v47 }
 0x34e   :  { %v3525_v36 = vmul.f32 %v9083_v56, %v3397_v4  ;;  %v3078_v10 = vadd.f32 1.4214138, %v2950_v26  ;;  %v1989_v18 = vmul.f32 0.5, %v9007_v32  ;;  %5817 = vrcp.f32 %v2503_v53 }
 0x34f   :  { %5316 = vst [vmem:[#allocation7 + $0x328] sm:$0xff] %v5188_v3  ;;  %v4869_v7 = vsel %vm4613_vm14, %v4485_v21, %v4741_v11  ;;  %v9129_v40 = vand.u32 2147483647, %v9118_v14  ;;  %v4269_v16 = vmul.f32 1.442695, %v4038_v57  ;;  %v3975_v23 = vmul.f32 %v3847_v6, %v2183_v8  ;;  %v1832_v3 = vpop.f32.mrf.mxu1 }
 0x350   :  { %v4997_v22 = vadd.f32 1.0, %v4869_v7  ;;  %v3653_v19 = vadd.f32 0.2548296, %v3525_v36  ;;  %v3206_v59 = vmul.f32 %v9099_v41, %v3078_v10  ;;  %v9134_v5 = vmul.f32 0.70710677, %v9121_v12 }
 0x351   :  { %v9131_v15 = vpop.eup %5809  ;;  %v9137_v47 = vadd.f32 %v1672_v44, %v7480_v60  ;;  %vm4677_vm15 = vcmp.ge.f32.partialorder %v9022_v50, 0.0  ;;  %v3911_v48 = vsub.f32 0.0, %v2247_v35  ;;  %v2312_v43 = vmul.f32 0.3275911, %v9129_v40 }
 0x352   :  { %v5125_v61 = vmul.f32 %v4997_v22, %v1925_v30  ;;  %v3781_v32 = vmul.f32 %v9083_v56, %v3653_v19  ;;  %v3334_v37 = vadd.f32 -0.28449672, %v3206_v59  ;;  %v2758_v25 = vmul.f32 1.0614054, %v9131_v15  ;;  %v5812_v28 = vpop.eup %5811 }
 0x353   :  { %v9144_v8 = vand.u32 2147483647, %v9134_v5  ;;  %v9147_v29 = vmul.f32 0.5, %v9026_v17  ;;  %5819 = vpow2.f32 %v4269_v16  ;;  %v4143_v49 = vmul.f32 1.442695, %v3975_v23 }
 0x354   :  { %5253 = vst [vmem:[#allocation7 + $0x130] sm:$0xff] %v5125_v61  ;;  %v4421_v54 = vmul.f32 %v5812_v28, %v3781_v32  ;;  %v3462_v58 = vmul.f32 %v9099_v41, %v3334_v37  ;;  %v2886_v56 = vadd.f32 -1.4531521, %v2758_v25  ;;  %v2440_v52 = vadd.f32 1.0, %v2312_v43 }
 0x355   :  { %v2376_v51 = vmul.f32 0.3275911, %v9144_v8  ;;  %v9155_v42 = vmul.f32 0.70710677, %v9137_v47  ;;  %v4039_v20 = vmul.f32 %v3911_v48, %v2247_v35  ;;  %vm4614_vm0 = vcmp.ge.f32.partialorder %v9040_v27, 0.0 }
 0x356   :  { %v9151_v31 = vpop.eup %5813  ;;  %v4549_v2 = vsub.f32 1.0, %v4421_v54  ;;  %v3590_v63 = vadd.f32 0.2548296, %v3462_v58  ;;  %v3014_v24 = vmul.f32 %v9131_v15, %v2886_v56  ;;  %5821 = vrcp.f32 %v2440_v52 }
 0x357   :  { %v2695_v17 = vmul.f32 1.0614054, %v9151_v31  ;;  %v2504_v55 = vadd.f32 1.0, %v2376_v51  ;;  %v5816_v33 = vpop.eup %5815  ;;  %v9161_v4 = vmul.f32 0.5, %v9059_v38  ;;  %5823 = vpow2.f32 %v4143_v49 }
 0x358   :  { %v4805_v9 = vsub.f32 0.0, %v4549_v2  ;;  %v3718_v21 = vmul.f32 %v9099_v41, %v3590_v63  ;;  %v3142_v34 = vadd.f32 1.4214138, %v3014_v24  ;;  %v9164_v57 = vand.u32 2147483647, %v9155_v42 }
 0x359   :  { %v2823_v26 = vadd.f32 -1.4531521, %v2695_v17  ;;  %5825 = vrcp.f32 %v2504_v55  ;;  %v4271_v36 = vmul.f32 1.442695, %v4039_v20  ;;  %v3848_v7 = vsub.f32 0.0, %v9129_v40 }
 0x35a   :  { %v4933_v35 = vsel %vm4677_vm15, %v4549_v2, %v4805_v9  ;;  %v4358_v11 = vmul.f32 %v5816_v33, %v3718_v21  ;;  %v3270_v6 = vmul.f32 %v9131_v15, %v3142_v34  ;;  %v2313_v38 = vmul.f32 0.3275911, %v9164_v57 }
 0x35b   :  { %v5061_v41 = vadd.f32 1.0, %v4933_v35  ;;  %v2951_v53 = vmul.f32 %v9151_v31, %v2823_v26  ;;  %v9171_v10 = vpop.eup %5817  ;;  %v9175_v22 = vadd.f32 %v1832_v3, %v7480_v60  ;;  %v9178_v19 = vmul.f32 0.5, %v9078_v62 }
 0x35c   :  { %v4486_v44 = vsub.f32 1.0, %v4358_v11  ;;  %v3398_v30 = vadd.f32 -0.28449672, %v3270_v6  ;;  %v2759_v16 = vmul.f32 1.0614054, %v9171_v10  ;;  %v3912_v32 = vsub.f32 0.0, %v9144_v8 }
 0x35d   :  { %v5189_v50 = vmul.f32 %v5061_v41, %v1989_v18  ;;  %v3079_v59 = vadd.f32 1.4214138, %v2951_v53  ;;  %v2441_v37 = vadd.f32 1.0, %v2313_v38  ;;  %5827 = vpow2.f32 %v4271_v36  ;;  %v1674_v18 = vpop.f32.mrf.mxu0 }
 0x35e   :  { %v4742_v23 = vsub.f32 0.0, %v4486_v44  ;;  %v3526_v61 = vmul.f32 %v9131_v15, %v3398_v30  ;;  %v2887_v28 = vadd.f32 -1.4531521, %v2759_v16  ;;  %v9185_v48 = vmul.f32 0.70710677, %v9175_v22 }
 0x35f   :  { %5317 = vst [vmem:[#allocation7 + $0x330] sm:$0xff] %v5189_v50  ;;  %v3207_v25 = vmul.f32 %v9151_v31, %v3079_v59  ;;  %v3976_v54 = vmul.f32 %v3848_v7, %v9129_v40  ;;  %5829 = vrcp.f32 %v2441_v37  ;;  %vm4678_vm1 = vcmp.ge.f32.partialorder %v9069_v1, 0.0 }
 0x360   :  { %v4870_v62 = vsel %vm4614_vm0, %v4486_v44, %v4742_v23  ;;  %v3654_v43 = vadd.f32 0.2548296, %v3526_v61  ;;  %v3015_v49 = vmul.f32 %v9171_v10, %v2887_v28  ;;  %v2249_v52 = vand.u32 2147483647, %v9185_v48  ;;  %v5820_v51 = vpop.eup %5819  ;;  %v1834_v61 = vpop.f32.mrf.mxu1 }
 0x361   :  { %v4998_v58 = vadd.f32 1.0, %v4870_v62  ;;  %v3335_v56 = vadd.f32 -0.28449672, %v3207_v25  ;;  %v9195_v63 = vmul.f32 0.5, %v9095_v13  ;;  %v4040_v27 = vmul.f32 %v3912_v32, %v9144_v8 }
 0x362   :  { %v3782_v2 = vmul.f32 %v9131_v15, %v3654_v43  ;;  %v9199_v24 = vadd.f32 %v1674_v18, %v7482_v0  ;;  %v3143_v20 = vadd.f32 1.4214138, %v3015_v49  ;;  %v2377_v55 = vmul.f32 0.3275911, %v2249_v52 }
 0x363   :  { %v5126_v40 = vmul.f32 %v4998_v58, %v9147_v29  ;;  %v3463_v17 = vmul.f32 %v9151_v31, %v3335_v56  ;;  %v9203_v9 = vpop.eup %5821  ;;  %v4145_v34 = vmul.f32 1.442695, %v3976_v54  ;;  %v3849_v15 = vsub.f32 0.0, %v9164_v57 }
 0x364   :  { %v4422_v21 = vmul.f32 %v5820_v51, %v3782_v2  ;;  %v9207_v13 = vmul.f32 0.70710677, %v9199_v24  ;;  %v3271_v33 = vmul.f32 %v9171_v10, %v3143_v20  ;;  %v2696_v26 = vmul.f32 1.0614054, %v9203_v9  ;;  %v5824_v3 = vpop.eup %5823 }
 0x365   :  { %5254 = vst [vmem:[#allocation7 + $0x138] sm:$0xff] %v5126_v40  ;;  %v3591_v8 = vadd.f32 0.2548296, %v3463_v17  ;;  %v2505_v29 = vadd.f32 1.0, %v2377_v55  ;;  %vm4615_vm2 = vcmp.ge.f32.partialorder %v9087_v45, 0.0  ;;  %v3977_v7 = vmul.f32 %v3849_v15, %v9164_v57  ;;  %v1678_v55 = vpop.f32.mrf.mxu0 }
 0x366   :  { %v4550_v35 = vsub.f32 1.0, %v4422_v21  ;;  %v4273_v11 = vmul.f32 1.442695, %v4040_v27  ;;  %v2186_v6 = vand.u32 2147483647, %v9207_v13  ;;  %v9213_v41 = vpop.eup %5825  ;;  %v3913_v37 = vsub.f32 0.0, %v2249_v52 }
 0x367   :  { %v3719_v53 = vmul.f32 %v9151_v31, %v3591_v8  ;;  %v3399_v36 = vadd.f32 -0.28449672, %v3271_v33  ;;  %v2824_v38 = vadd.f32 -1.4531521, %v2696_v26  ;;  %5831 = vrcp.f32 %v2505_v29 }
 0x368   :  { %v4806_v44 = vsub.f32 0.0, %v4550_v35  ;;  %5833 = vpow2.f32 %v4145_v34  ;;  %v2760_v30 = vmul.f32 1.0614054, %v9213_v41  ;;  %v2314_v23 = vmul.f32 0.3275911, %v2186_v6 }
 0x369   :  { %v4359_v50 = vmul.f32 %v5824_v3, %v3719_v53  ;;  %v3527_v59 = vmul.f32 %v9171_v10, %v3399_v36  ;;  %v2952_v16 = vmul.f32 %v9203_v9, %v2824_v38  ;;  %5835 = vpow2.f32 %v4273_v11 }
 0x36a   :  { %v4934_v32 = vsel %vm4678_vm1, %v4550_v35, %v4806_v44  ;;  %v2888_v31 = vadd.f32 -1.4531521, %v2760_v30  ;;  %v5828_v43 = vpop.eup %5827  ;;  %vm4679_vm3 = vcmp.ge.f32.partialorder %v9103_v46, 0.0  ;;  %v4147_v54 = vmul.f32 1.442695, %v3977_v7  ;;  %v1838_v46 = vpop.f32.mrf.mxu1 }
 0x36b   :  { %v5062_v25 = vadd.f32 1.0, %v4934_v32  ;;  %v4487_v28 = vsub.f32 1.0, %v4359_v50  ;;  %v3655_v18 = vadd.f32 0.2548296, %v3527_v59  ;;  %v3080_v62 = vadd.f32 1.4214138, %v2952_v16 }
 0x36c   :  { %v3016_v57 = vmul.f32 %v9213_v41, %v2888_v31  ;;  %v2442_v58 = vadd.f32 1.0, %v2314_v23  ;;  %v9225_v56 = vadd.f32 %v1834_v61, %v7482_v0  ;;  %v9227_v49 = vpop.eup %5829  ;;  %v4041_v20 = vmul.f32 %v3913_v37, %v2249_v52 }
 0x36d   :  { %v5190_v1 = vmul.f32 %v5062_v25, %v9161_v4  ;;  %v4743_v51 = vsub.f32 0.0, %v4487_v28  ;;  %v3783_v2 = vmul.f32 %v9171_v10, %v3655_v18  ;;  %v3208_v27 = vmul.f32 %v9203_v9, %v3080_v62 }
 0x36e   :  { %v3144_v40 = vadd.f32 1.4214138, %v3016_v57  ;;  %v2697_v17 = vmul.f32 1.0614054, %v9227_v49  ;;  %5837 = vrcp.f32 %v2442_v58  ;;  %v3850_v8 = vsub.f32 0.0, %v2186_v6 }
 0x36f   :  { %5318 = vst [vmem:[#allocation7 + $0x338] sm:$0xff] %v5190_v1  ;;  %v4871_v21 = vsel %vm4615_vm2, %v4487_v28, %v4743_v51  ;;  %v4423_v34 = vmul.f32 %v5828_v43, %v3783_v2  ;;  %v3336_v15 = vadd.f32 -0.28449672, %v3208_v27  ;;  %v9237_v10 = vmul.f32 0.70710677, %v9225_v56 }
 0x370   :  { %v4999_v33 = vadd.f32 1.0, %v4871_v21  ;;  %v3272_v4 = vmul.f32 %v9213_v41, %v3144_v40  ;;  %v2825_v26 = vadd.f32 -1.4531521, %v2697_v17  ;;  %5839 = vpow2.f32 %v4147_v54 }
 0x371   :  { %v4551_v29 = vsub.f32 1.0, %v4423_v34  ;;  %v3464_v3 = vmul.f32 %v9203_v9, %v3336_v15  ;;  %v9241_v52 = vadd.f32 %v1678_v55, %v7480_v60  ;;  %v2250_v53 = vand.u32 2147483647, %v9237_v10 }
 0x372   :  { %v5127_v45 = vmul.f32 %v4999_v33, %v9178_v19  ;;  %v3400_v35 = vadd.f32 -0.28449672, %v3272_v4  ;;  %v2953_v11 = vmul.f32 %v9227_v49, %v2825_v26  ;;  %v1928_v38 = vmul.f32 0.5, %v9111_v39  ;;  %v1680_v26 = vpop.f32.mrf.mxu0 }
 0x373   :  { %v4807_v36 = vsub.f32 0.0, %v4551_v29  ;;  %v3592_v44 = vadd.f32 0.2548296, %v3464_v3  ;;  %v3978_v30 = vmul.f32 %v3850_v8, %v2186_v6  ;;  %vm4616_vm4 = vcmp.ge.f32.partialorder %v9118_v14, 0.0 }
 0x374   :  { %v9247_v7 = vpop.eup %5831  ;;  %5255 = vst [vmem:[#allocation7 + $0x140] sm:$0xff] %v5127_v45  ;;  %v3528_v50 = vmul.f32 %v9213_v41, %v3400_v35  ;;  %v3081_v59 = vadd.f32 1.4214138, %v2953_v11  ;;  %v4275_v16 = vmul.f32 1.442695, %v4041_v20  ;;  %v1992_v40 = vmul.f32 0.5, %v9121_v12 }
 0x375   :  { %v2378_v19 = vmul.f32 0.3275911, %v2250_v53  ;;  %v5834_v23 = vpop.eup %5833  ;;  %v4935_v61 = vsel %vm4679_vm3, %v4551_v29, %v4807_v36  ;;  %v3720_v32 = vmul.f32 %v9203_v9, %v3592_v44  ;;  %v2761_v39 = vmul.f32 1.0614054, %v9247_v7 }
 0x376   :  { %v9256_v6 = vmul.f32 0.70710677, %v9241_v52  ;;  %v5063_v31 = vadd.f32 1.0, %v4935_v61  ;;  %v3656_v37 = vadd.f32 0.2548296, %v3528_v50  ;;  %v3209_v25 = vmul.f32 %v9227_v49, %v3081_v59  ;;  %v5836_v18 = vpop.eup %5835 }
 0x377   :  { %v2506_v28 = vadd.f32 1.0, %v2378_v19  ;;  %v4360_v62 = vmul.f32 %v5834_v23, %v3720_v32  ;;  %v2889_v43 = vadd.f32 -1.4531521, %v2761_v39  ;;  %v4149_v57 = vmul.f32 1.442695, %v3978_v30 }
 0x378   :  { %v2187_v54 = vand.u32 2147483647, %v9256_v6  ;;  %v5191_v58 = vmul.f32 %v5063_v31, %v9195_v63  ;;  %v3784_v9 = vmul.f32 %v9213_v41, %v3656_v37  ;;  %v3337_v1 = vadd.f32 -0.28449672, %v3209_v25 }
 0x379   :  { %5841 = vrcp.f32 %v2506_v28  ;;  %v4488_v51 = vsub.f32 1.0, %v4360_v62  ;;  %v3017_v2 = vmul.f32 %v9247_v7, %v2889_v43  ;;  %v9266_v55 = vadd.f32 %v1838_v46, %v7480_v60  ;;  %v1840_v43 = vpop.f32.mrf.mxu1 }
 0x37a   :  { %5843 = vpow2.f32 %v4275_v16  ;;  %v2315_v27 = vmul.f32 0.3275911, %v2187_v54  ;;  %5319 = vst [vmem:[#allocation7 + $0x340] sm:$0xff] %v5191_v58  ;;  %v4424_v17 = vmul.f32 %v5836_v18, %v3784_v9  ;;  %v3465_v20 = vmul.f32 %v9227_v49, %v3337_v1 }
 0x37b   :  { %v9268_v21 = vpop.eup %5837  ;;  %v4744_v63 = vsub.f32 0.0, %v4488_v51  ;;  %v3145_v41 = vadd.f32 1.4214138, %v3017_v2  ;;  %v3914_v34 = vsub.f32 0.0, %v2250_v53  ;;  %5845 = vpow2.f32 %v4149_v57 }
 0x37c   :  { %v2443_v15 = vadd.f32 1.0, %v2315_v27  ;;  %v4552_v8 = vsub.f32 1.0, %v4424_v17  ;;  %v3593_v33 = vadd.f32 0.2548296, %v3465_v20  ;;  %v2698_v4 = vmul.f32 1.0614054, %v9268_v21 }
 0x37d   :  { %v4872_v12 = vsel %vm4616_vm4, %v4488_v51, %v4744_v63  ;;  %vm4680_vm5 = vcmp.ge.f32.partialorder %v9134_v5, 0.0  ;;  %v3273_v29 = vmul.f32 %v9247_v7, %v3145_v41  ;;  %v5840_v3 = vpop.eup %5839  ;;  %v4042_v30 = vmul.f32 %v3914_v34, %v2250_v53 }
 0x37e   :  { %5847 = vrcp.f32 %v2443_v15  ;;  %v5000_v45 = vadd.f32 1.0, %v4872_v12  ;;  %v4808_v35 = vsub.f32 0.0, %v4552_v8  ;;  %v3721_v11 = vmul.f32 %v9227_v49, %v3593_v33 }
 0x37f   :  { %v2826_v36 = vadd.f32 -1.4531521, %v2698_v4  ;;  %v3401_v44 = vadd.f32 -0.28449672, %v3273_v29  ;;  %v9277_v50 = vmul.f32 0.70710677, %v9266_v55  ;;  %v9280_v59 = vadd.f32 %v1680_v26, %v7482_v0 }
 0x380   :  { %v5128_v14 = vmul.f32 %v5000_v45, %v1928_v38  ;;  %v4936_v16 = vsel %vm4680_vm5, %v4552_v8, %v4808_v35  ;;  %v4361_v5 = vmul.f32 %v5840_v3, %v3721_v11  ;;  %v3851_v32 = vsub.f32 0.0, %v2187_v54  ;;  %v1682_v8 = vpop.f32.mrf.mxu0 }
 0x381   :  { %v2954_v19 = vmul.f32 %v9268_v21, %v2826_v36  ;;  %v5064_v23 = vadd.f32 1.0, %v4936_v16  ;;  %v3529_v61 = vmul.f32 %v9247_v7, %v3401_v44  ;;  %v2251_v49 = vand.u32 2147483647, %v9277_v50 }
 0x382   :  { %5256 = vst [vmem:[#allocation7 + $0x148] sm:$0xff] %v5128_v14  ;;  %v4489_v39 = vsub.f32 1.0, %v4361_v5  ;;  %v1929_v37 = vmul.f32 0.5, %v9137_v47  ;;  %vm4617_vm6 = vcmp.ge.f32.partialorder %v9155_v42, 0.0  ;;  %v9289_v62 = vmul.f32 0.70710677, %v9280_v59 }
 0x383   :  { %v3082_v53 = vadd.f32 1.4214138, %v2954_v19  ;;  %v5192_v31 = vmul.f32 %v5064_v23, %v1992_v40  ;;  %v3657_v25 = vadd.f32 0.2548296, %v3529_v61  ;;  %v2379_v28 = vmul.f32 0.3275911, %v2251_v49 }
 0x384   :  { %v4745_v38 = vsub.f32 0.0, %v4489_v39  ;;  %v4277_v58 = vmul.f32 1.442695, %v4042_v30  ;;  %v3979_v9 = vmul.f32 %v3851_v32, %v2187_v54  ;;  %v9296_v27 = vand.u32 2147483647, %v9289_v62 }
 0x385   :  { %v3210_v18 = vmul.f32 %v9268_v21, %v3082_v53  ;;  %5320 = vst [vmem:[#allocation7 + $0x348] sm:$0xff] %v5192_v31  ;;  %v3785_v46 = vmul.f32 %v9247_v7, %v3657_v25  ;;  %v2507_v1 = vadd.f32 1.0, %v2379_v28  ;;  %v9299_v20 = vadd.f32 %v1840_v43, %v7482_v0 }
 0x386   :  { %v9291_v57 = vpop.eup %5841  ;;  %v4873_v51 = vsel %vm4617_vm6, %v4489_v39, %v4745_v38  ;;  %v2316_v54 = vmul.f32 0.3275911, %v9296_v27  ;;  %vm4681_vm7 = vcmp.ge.f32.partialorder %v9185_v48, 0.0  ;;  %v4151_v12 = vmul.f32 1.442695, %v3979_v9 }
 0x387   :  { %v5844_v47 = vpop.eup %5843  ;;  %v3338_v2 = vadd.f32 -0.28449672, %v3210_v18  ;;  %v2762_v42 = vmul.f32 1.0614054, %v9291_v57  ;;  %v5001_v40 = vadd.f32 1.0, %v4873_v51  ;;  %5849 = vrcp.f32 %v2507_v1 }
 0x388   :  { %v4425_v17 = vmul.f32 %v5844_v47, %v3785_v46  ;;  %v5846_v41 = vpop.eup %5845  ;;  %5851 = vpow2.f32 %v4277_v58  ;;  %v2444_v29 = vadd.f32 1.0, %v2316_v54  ;;  %v3915_v35 = vsub.f32 0.0, %v2251_v49 }
 0x389   :  { %v3466_v63 = vmul.f32 %v9268_v21, %v3338_v2  ;;  %v2890_v7 = vadd.f32 -1.4531521, %v2762_v42  ;;  %v5129_v34 = vmul.f32 %v5001_v40, %v1929_v37  ;;  %v9309_v11 = vmul.f32 0.70710677, %v9299_v20  ;;  %v1842_v37 = vpop.f32.mrf.mxu1 }
 0x38a   :  { %v4553_v15 = vsub.f32 1.0, %v4425_v17  ;;  %5853 = vrcp.f32 %v2444_v29  ;;  %v9313_v30 = vadd.f32 %v1682_v8, %v7480_v60  ;;  %v1993_v14 = vmul.f32 0.5, %v9175_v22  ;;  %v1684_v17 = vpop.f32.mrf.mxu0 }
 0x38b   :  { %v9304_v33 = vpop.eup %5847  ;;  %v3594_v4 = vadd.f32 0.2548296, %v3466_v63  ;;  %v3018_v26 = vmul.f32 %v9291_v57, %v2890_v7  ;;  %5257 = vst [vmem:[#allocation7 + $0x150] sm:$0xff] %v5129_v34  ;;  %v2252_v19 = vand.u32 2147483647, %v9309_v11  ;;  %v1930_v61 = vmul.f32 0.5, %v9199_v24 }
 0x38c   :  { %v4809_v3 = vsub.f32 0.0, %v4553_v15  ;;  %v2699_v45 = vmul.f32 1.0614054, %v9304_v33  ;;  %5855 = vpow2.f32 %v4151_v12  ;;  %v4043_v53 = vmul.f32 %v3915_v35, %v2251_v49 }
 0x38d   :  { %v3722_v36 = vmul.f32 %v9268_v21, %v3594_v4  ;;  %v3146_v44 = vadd.f32 1.4214138, %v3018_v26  ;;  %v2380_v31 = vmul.f32 0.3275911, %v2252_v19  ;;  %v9323_v48 = vmul.f32 0.70710677, %v9313_v30 }
 0x38e   :  { %v4937_v16 = vsel %vm4681_vm7, %v4553_v15, %v4809_v3  ;;  %v2827_v5 = vadd.f32 -1.4531521, %v2699_v45  ;;  %vm4618_vm8 = vcmp.ge.f32.partialorder %v9207_v13, 0.0  ;;  %v3852_v24 = vsub.f32 0.0, %v9296_v27 }
 0x38f   :  { %v5065_v23 = vadd.f32 1.0, %v4937_v16  ;;  %v4362_v32 = vmul.f32 %v5846_v41, %v3722_v36  ;;  %v3274_v39 = vmul.f32 %v9291_v57, %v3146_v44  ;;  %v2508_v18 = vadd.f32 1.0, %v2380_v31 }
 0x390   :  { %v2955_v21 = vmul.f32 %v9304_v33, %v2827_v5  ;;  %v9329_v49 = vand.u32 2147483647, %v9323_v48  ;;  %v9332_v58 = vadd.f32 %v1842_v37, %v7480_v60  ;;  %v9335_v9 = vmul.f32 0.5, %v9225_v56 }
 0x391   :  { %v5193_v25 = vmul.f32 %v5065_v23, %v1993_v14  ;;  %v4490_v22 = vsub.f32 1.0, %v4362_v32  ;;  %v3402_v28 = vadd.f32 -0.28449672, %v3274_v39  ;;  %v4279_v13 = vmul.f32 1.442695, %v4043_v53 }
 0x392   :  { %v3083_v38 = vadd.f32 1.4214138, %v2955_v21  ;;  %5857 = vrcp.f32 %v2508_v18  ;;  %v3916_v42 = vsub.f32 0.0, %v2252_v19  ;;  %v2317_v40 = vmul.f32 0.3275911, %v9329_v49 }
 0x393   :  { %5321 = vst [vmem:[#allocation7 + $0x350] sm:$0xff] %v5193_v25  ;;  %v4746_v43 = vsub.f32 0.0, %v4490_v22  ;;  %v3530_v46 = vmul.f32 %v9291_v57, %v3402_v28  ;;  %vm4682_vm9 = vcmp.ge.f32.partialorder %v9237_v10, 0.0  ;;  %v3980_v56 = vmul.f32 %v3852_v24, %v9296_v27  ;;  %v1844_v25 = vpop.f32.mrf.mxu1 }
 0x394   :  { %v3211_v1 = vmul.f32 %v9304_v33, %v3083_v38  ;;  %v9338_v47 = vpop.eup %5849  ;;  %v9346_v15 = vmul.f32 0.5, %v9241_v52  ;;  %v2445_v8 = vadd.f32 1.0, %v2317_v40  ;;  %v9349_v4 = vmul.f32 0.70710677, %v9332_v58 }
 0x395   :  { %v4874_v51 = vsel %vm4618_vm8, %v4490_v22, %v4746_v43  ;;  %v3658_v2 = vadd.f32 0.2548296, %v3530_v46  ;;  %v2763_v54 = vmul.f32 1.0614054, %v9338_v47  ;;  %v5852_v41 = vpop.eup %5851  ;;  %v9353_v3 = vadd.f32 %v1684_v17, %v7482_v0 }
 0x396   :  { %v5002_v63 = vadd.f32 1.0, %v4874_v51  ;;  %v3339_v7 = vadd.f32 -0.28449672, %v3211_v1  ;;  %v4044_v35 = vmul.f32 %v3916_v42, %v2252_v19  ;;  %5859 = vrcp.f32 %v2445_v8 }
 0x397   :  { %v3786_v34 = vmul.f32 %v9291_v57, %v3658_v2  ;;  %v2891_v29 = vadd.f32 -1.4531521, %v2763_v54  ;;  %v2253_v27 = vand.u32 2147483647, %v9349_v4  ;;  %v9356_v57 = vpop.eup %5853  ;;  %5861 = vpow2.f32 %v4279_v13 }
 0x398   :  { %v5130_v26 = vmul.f32 %v5002_v63, %v1930_v61  ;;  %v3467_v12 = vmul.f32 %v9304_v33, %v3339_v7  ;;  %v4153_v44 = vmul.f32 1.442695, %v3980_v56  ;;  %vm4619_vm10 = vcmp.ge.f32.partialorder %v9256_v6, 0.0 }
 0x399   :  { %v4426_v45 = vmul.f32 %v5852_v41, %v3786_v34  ;;  %v3019_v36 = vmul.f32 %v9338_v47, %v2891_v29  ;;  %v2700_v16 = vmul.f32 1.0614054, %v9356_v57  ;;  %v2381_v5 = vmul.f32 0.3275911, %v2253_v27  ;;  %v5856_v39 = vpop.eup %5855 }
 0x39a   :  { %5258 = vst [vmem:[#allocation7 + $0x158] sm:$0xff] %v5130_v26  ;;  %v3595_v52 = vadd.f32 0.2548296, %v3467_v12  ;;  %v9363_v19 = vmul.f32 0.5, %v9266_v55  ;;  %v9366_v32 = vmul.f32 0.70710677, %v9353_v3  ;;  %5863 = vpow2.f32 %v4153_v44 }
 0x39b   :  { %v4554_v14 = vsub.f32 1.0, %v4426_v45  ;;  %v3147_v61 = vadd.f32 1.4214138, %v3019_v36  ;;  %v2828_v53 = vadd.f32 -1.4531521, %v2700_v16  ;;  %v2509_v37 = vadd.f32 1.0, %v2381_v5  ;;  %v1688_v36 = vpop.f32.mrf.mxu0 }
 0x39c   :  { %v3723_v23 = vmul.f32 %v9304_v33, %v3595_v52  ;;  %v4281_v31 = vmul.f32 1.442695, %v4044_v35  ;;  %v2190_v38 = vand.u32 2147483647, %v9366_v32  ;;  %v3853_v24 = vsub.f32 0.0, %v9329_v49 }
 0x39d   :  { %v4810_v21 = vsub.f32 0.0, %v4554_v14  ;;  %v3275_v28 = vmul.f32 %v9338_v47, %v3147_v61  ;;  %v2956_v33 = vmul.f32 %v9356_v57, %v2828_v53  ;;  %5865 = vrcp.f32 %v2509_v37 }
 0x39e   :  { %v4363_v22 = vmul.f32 %v5856_v39, %v3723_v23  ;;  %v9375_v1 = vadd.f32 %v1844_v25, %v7482_v0  ;;  %5867 = vpow2.f32 %v4281_v31  ;;  %v3917_v2 = vsub.f32 0.0, %v2253_v27 }
 0x39f   :  { %v4938_v55 = vsel %vm4682_vm9, %v4554_v14, %v4810_v21  ;;  %v3403_v46 = vadd.f32 -0.28449672, %v3275_v28  ;;  %v9377_v13 = vpop.eup %5857  ;;  %v3084_v51 = vadd.f32 1.4214138, %v2956_v33  ;;  %v2318_v42 = vmul.f32 0.3275911, %v2190_v38 }
 0x3a0   :  { %v5066_v18 = vadd.f32 1.0, %v4938_v55  ;;  %v4491_v43 = vsub.f32 1.0, %v4363_v22  ;;  %v2764_v63 = vmul.f32 1.0614054, %v9377_v13  ;;  %v3981_v54 = vmul.f32 %v3853_v24, %v9329_v49 }
 0x3a1   :  { %v3531_v17 = vmul.f32 %v9338_v47, %v3403_v46  ;;  %v3212_v7 = vmul.f32 %v9356_v57, %v3084_v51  ;;  %v2446_v56 = vadd.f32 1.0, %v2318_v42  ;;  %v3854_v41 = vsub.f32 0.0, %v2190_v38 }
 0x3a2   :  { %v5194_v10 = vmul.f32 %v5066_v18, %v9335_v9  ;;  %v4747_v40 = vsub.f32 0.0, %v4491_v43  ;;  %v2892_v26 = vadd.f32 -1.4531521, %v2764_v63  ;;  %v9387_v12 = vmul.f32 0.70710677, %v9375_v1 }
 0x3a3   :  { %v3659_v8 = vadd.f32 0.2548296, %v3531_v17  ;;  %vm4683_vm11 = vcmp.ge.f32.partialorder %v9277_v50, 0.0  ;;  %v3340_v29 = vadd.f32 -0.28449672, %v3212_v7  ;;  %5869 = vrcp.f32 %v2446_v56  ;;  %v9390_v45 = vpop.eup %5859 }
 0x3a4   :  { %5322 = vst [vmem:[#allocation7 + $0x358] sm:$0xff] %v5194_v10  ;;  %v4875_v34 = vsel %vm4619_vm10, %v4491_v43, %v4747_v40  ;;  %v3020_v35 = vmul.f32 %v9377_v13, %v2892_v26  ;;  %v4045_v52 = vmul.f32 %v3917_v2, %v2253_v27  ;;  %v9395_v6 = vand.u32 2147483647, %v9387_v12  ;;  %v5862_v44 = vpop.eup %5861 }
 0x3a5   :  { %v5003_v9 = vadd.f32 1.0, %v4875_v34  ;;  %v3787_v49 = vmul.f32 %v9338_v47, %v3659_v8  ;;  %v3468_v16 = vmul.f32 %v9356_v57, %v3340_v29  ;;  %v2701_v5 = vmul.f32 1.0614054, %v9390_v45 }
 0x3a6   :  { %v4155_v23 = vmul.f32 1.442695, %v3981_v54  ;;  %v3148_v39 = vadd.f32 1.4214138, %v3020_v35  ;;  %v3982_v21 = vmul.f32 %v3854_v41, %v2190_v38  ;;  %v2382_v47 = vmul.f32 0.3275911, %v9395_v6 }
 0x3a7   :  { %v5131_v14 = vmul.f32 %v5003_v9, %v9346_v15  ;;  %v4427_v61 = vmul.f32 %v5862_v44, %v3787_v49  ;;  %v1932_v27 = vmul.f32 0.5, %v9280_v59  ;;  %v3596_v53 = vadd.f32 0.2548296, %v3468_v16  ;;  %v5864_v55 = vpop.eup %5863  ;;  %v1848_v59 = vpop.f32.mrf.mxu1 }
 0x3a8   :  { %v2829_v31 = vadd.f32 -1.4531521, %v2701_v5  ;;  %v9403_v37 = vadd.f32 %v1688_v36, %v7480_v60  ;;  %v3276_v15 = vmul.f32 %v9377_v13, %v3148_v39  ;;  %v4283_v22 = vmul.f32 1.442695, %v4045_v52 }
 0x3a9   :  { %5259 = vst [vmem:[#allocation7 + $0x160] sm:$0xff] %v5131_v14  ;;  %v4555_v25 = vsub.f32 1.0, %v4427_v61  ;;  %v2510_v28 = vadd.f32 1.0, %v2382_v47  ;;  %v3724_v33 = vmul.f32 %v9356_v57, %v3596_v53  ;;  %5871 = vpow2.f32 %v4155_v23 }
 0x3aa   :  { %v2957_v38 = vmul.f32 %v9390_v45, %v2829_v31  ;;  %v9409_v24 = vmul.f32 0.70710677, %v9403_v37  ;;  %v9411_v18 = vpop.eup %5865  ;;  %v3404_v46 = vadd.f32 -0.28449672, %v3276_v15  ;;  %v4157_v51 = vmul.f32 1.442695, %v3982_v21  ;;  %v1690_v31 = vpop.f32.mrf.mxu0 }
 0x3ab   :  { %v4811_v43 = vsub.f32 0.0, %v4555_v25  ;;  %5873 = vrcp.f32 %v2510_v28  ;;  %v4364_v2 = vmul.f32 %v5864_v55, %v3724_v33  ;;  %v2765_v10 = vmul.f32 1.0614054, %v9411_v18  ;;  %v5868_v57 = vpop.eup %5867 }
 0x3ac   :  { %v3085_v42 = vadd.f32 1.4214138, %v2957_v38  ;;  %v2191_v40 = vand.u32 2147483647, %v9409_v24  ;;  %v3532_v63 = vmul.f32 %v9377_v13, %v3404_v46  ;;  %5875 = vpow2.f32 %v4283_v22 }
 0x3ad   :  { %v4939_v17 = vsel %vm4683_vm11, %v4555_v25, %v4811_v43  ;;  %v9419_v7 = vadd.f32 %v1848_v59, %v7480_v60  ;;  %v4492_v56 = vsub.f32 1.0, %v4364_v2  ;;  %v2893_v34 = vadd.f32 -1.4531521, %v2765_v10  ;;  %v1850_v10 = vpop.f32.mrf.mxu1 }
 0x3ae   :  { %v5067_v54 = vadd.f32 1.0, %v4939_v17  ;;  %v3213_v41 = vmul.f32 %v9390_v45, %v3085_v42  ;;  %vm4620_vm12 = vcmp.ge.f32.partialorder %v9289_v62, 0.0  ;;  %v3660_v8 = vadd.f32 0.2548296, %v3532_v63 }
 0x3af   :  { %5877 = vpow2.f32 %v4157_v51  ;;  %v2319_v26 = vmul.f32 0.3275911, %v2191_v40  ;;  %v4748_v50 = vsub.f32 0.0, %v4492_v56  ;;  %v3021_v49 = vmul.f32 %v9411_v18, %v2893_v34 }
 0x3b0   :  { %v5195_v9 = vmul.f32 %v5067_v54, %v9363_v19  ;;  %v3341_v29 = vadd.f32 -0.28449672, %v3213_v41  ;;  %v9425_v35 = vpop.eup %5869  ;;  %v3788_v52 = vmul.f32 %v9377_v13, %v3660_v8  ;;  %v3918_v36 = vsub.f32 0.0, %v9395_v6 }
 0x3b1   :  { %v2447_v44 = vadd.f32 1.0, %v2319_v26  ;;  %v9430_v14 = vmul.f32 0.70710677, %v9419_v7  ;;  %v4876_v62 = vsel %vm4620_vm12, %v4492_v56, %v4748_v50  ;;  %v3149_v5 = vadd.f32 1.4214138, %v3021_v49 }
 0x3b2   :  { %5323 = vst [vmem:[#allocation7 + $0x360] sm:$0xff] %v5195_v9  ;;  %v3469_v16 = vmul.f32 %v9390_v45, %v3341_v29  ;;  %v2702_v19 = vmul.f32 1.0614054, %v9425_v35  ;;  %v5004_v23 = vadd.f32 1.0, %v4876_v62  ;;  %v1996_v61 = vmul.f32 0.5, %v9299_v20 }
 0x3b3   :  { %v4428_v39 = vmul.f32 %v5868_v57, %v3788_v52  ;;  %5879 = vrcp.f32 %v2447_v44  ;;  %v3277_v13 = vmul.f32 %v9411_v18, %v3149_v5  ;;  %v9437_v53 = vand.u32 2147483647, %v9430_v14 }
 0x3b4   :  { %v3597_v21 = vadd.f32 0.2548296, %v3469_v16  ;;  %v2830_v47 = vadd.f32 -1.4531521, %v2702_v19  ;;  %v5132_v25 = vmul.f32 %v5004_v23, %v1932_v27  ;;  %v4046_v22 = vmul.f32 %v3918_v36, %v9395_v6 }
 0x3b5   :  { %v4556_v15 = vsub.f32 1.0, %v4428_v39  ;;  %v3855_v28 = vsub.f32 0.0, %v2191_v40  ;;  %v3405_v33 = vadd.f32 -0.28449672, %v3277_v13  ;;  %v2383_v38 = vmul.f32 0.3275911, %v9437_v53 }
 0x3b6   :  { %v3725_v55 = vmul.f32 %v9390_v45, %v3597_v21  ;;  %v2958_v20 = vmul.f32 %v9425_v35, %v2830_v47  ;;  %v5872_v59 = vpop.eup %5871  ;;  %5260 = vst [vmem:[#allocation7 + $0x168] sm:$0xff] %v5132_v25  ;;  %vm4684_vm13 = vcmp.ge.f32.partialorder %v9309_v11, 0.0  ;;  %v1933_v46 = vmul.f32 0.5, %v9313_v30 }
 0x3b7   :  { %v4812_v43 = vsub.f32 0.0, %v4556_v15  ;;  %v9446_v27 = vadd.f32 %v1690_v31, %v7482_v0  ;;  %v3533_v45 = vmul.f32 %v9411_v18, %v3405_v33  ;;  %v2511_v42 = vadd.f32 1.0, %v2383_v38 }
 0x3b8   :  { %v9448_v51 = vpop.eup %5873  ;;  %v4365_v6 = vmul.f32 %v5872_v59, %v3725_v55  ;;  %v3086_v2 = vadd.f32 1.4214138, %v2958_v20  ;;  %v4285_v63 = vmul.f32 1.442695, %v4046_v22  ;;  %v3983_v54 = vmul.f32 %v3855_v28, %v2191_v40  ;;  %v1692_v55 = vpop.f32.mrf.mxu0 }
 0x3b9   :  { %v4940_v57 = vsel %vm4684_vm13, %v4556_v15, %v4812_v43  ;;  %v2766_v17 = vmul.f32 1.0614054, %v9448_v51  ;;  %v5876_v11 = vpop.eup %5875  ;;  %v3661_v30 = vadd.f32 0.2548296, %v3533_v45  ;;  %5881 = vrcp.f32 %v2511_v42 }
 0x3ba   :  { %v5068_v56 = vadd.f32 1.0, %v4940_v57  ;;  %v4493_v41 = vsub.f32 1.0, %v4365_v6  ;;  %v3214_v34 = vmul.f32 %v9425_v35, %v3086_v2  ;;  %v9454_v26 = vmul.f32 0.70710677, %v9446_v27 }
 0x3bb   :  { %v2894_v8 = vadd.f32 -1.4531521, %v2766_v17  ;;  %v9457_v9 = vadd.f32 %v1850_v10, %v7482_v0  ;;  %v3789_v52 = vmul.f32 %v9411_v18, %v3661_v30  ;;  %vm4621_vm14 = vcmp.ge.f32.partialorder %v9323_v48, 0.0 }
 0x3bc   :  { %v5878_v50 = vpop.eup %5877  ;;  %v5196_v29 = vmul.f32 %v5068_v56, %v1996_v61  ;;  %v4749_v49 = vsub.f32 0.0, %v4493_v41  ;;  %v3342_v40 = vadd.f32 -0.28449672, %v3214_v34  ;;  %5883 = vpow2.f32 %v4285_v63 }
 0x3bd   :  { %v3022_v36 = vmul.f32 %v9448_v51, %v2894_v8  ;;  %v2192_v44 = vand.u32 2147483647, %v9454_v26  ;;  %v4429_v16 = vmul.f32 %v5876_v11, %v3789_v52  ;;  %v4159_v19 = vmul.f32 1.442695, %v3983_v54 }
 0x3be   :  { %5324 = vst [vmem:[#allocation7 + $0x368] sm:$0xff] %v5196_v29  ;;  %v4877_v62 = vsel %vm4621_vm14, %v4493_v41, %v4749_v49  ;;  %v3470_v5 = vmul.f32 %v9425_v35, %v3342_v40  ;;  %v3919_v61 = vsub.f32 0.0, %v9437_v53  ;;  %v1997_v48 = vmul.f32 0.5, %v9332_v58 }
 0x3bf   :  { %v5005_v23 = vadd.f32 1.0, %v4877_v62  ;;  %v3150_v39 = vadd.f32 1.4214138, %v3022_v36  ;;  %v2320_v21 = vmul.f32 0.3275911, %v2192_v44  ;;  %v4557_v13 = vsub.f32 1.0, %v4429_v16 }
 0x3c0   :  { %v9465_v18 = vpop.eup %5879  ;;  %v3598_v47 = vadd.f32 0.2548296, %v3470_v5  ;;  %v9469_v31 = vmul.f32 0.70710677, %v9457_v9  ;;  %vm4685_vm15 = vcmp.ge.f32.partialorder %v9349_v4, 0.0  ;;  %v4047_v43 = vmul.f32 %v3919_v61, %v9437_v53 }
 0x3c1   :  { %v5133_v25 = vmul.f32 %v5005_v23, %v1933_v46  ;;  %v3278_v15 = vmul.f32 %v9448_v51, %v3150_v39  ;;  %v2703_v22 = vmul.f32 1.0614054, %v9465_v18  ;;  %v2448_v28 = vadd.f32 1.0, %v2320_v21 }
 0x3c2   :  { %v4813_v33 = vsub.f32 0.0, %v4557_v13  ;;  %v3726_v20 = vmul.f32 %v9425_v35, %v3598_v47  ;;  %v2256_v38 = vand.u32 2147483647, %v9469_v31  ;;  %v9478_v2 = vadd.f32 %v1692_v55, %v7480_v60  ;;  %v1852_v35 = vpop.f32.mrf.mxu1  ;;  %v1694_v47 = vpop.f32.mrf.mxu0 }
 0x3c3   :  { %5261 = vst [vmem:[#allocation7 + $0x170] sm:$0xff] %v5133_v25  ;;  %v3406_v58 = vadd.f32 -0.28449672, %v3278_v15  ;;  %v2831_v59 = vadd.f32 -1.4531521, %v2703_v22  ;;  %5885 = vrcp.f32 %v2448_v28  ;;  %v3856_v17 = vsub.f32 0.0, %v2192_v44 }
 0x3c4   :  { %v4941_v46 = vsel %vm4685_vm15, %v4557_v13, %v4813_v33  ;;  %v4366_v6 = vmul.f32 %v5878_v50, %v3726_v20  ;;  %v2384_v45 = vmul.f32 0.3275911, %v2256_v38  ;;  %5887 = vpow2.f32 %v4159_v19 }
 0x3c5   :  { %v5069_v42 = vadd.f32 1.0, %v4941_v46  ;;  %v3534_v4 = vmul.f32 %v9448_v51, %v3406_v58  ;;  %v2959_v10 = vmul.f32 %v9465_v18, %v2831_v59  ;;  %v4287_v56 = vmul.f32 1.442695, %v4047_v43 }
 0x3c6   :  { %v4494_v57 = vsub.f32 1.0, %v4366_v6  ;;  %v2512_v63 = vadd.f32 1.0, %v2384_v45  ;;  %v9482_v41 = vpop.eup %5881  ;;  %v9485_v34 = vmul.f32 0.70710677, %v9478_v2  ;;  %v9488_v8 = vadd.f32 %v1852_v35, %v7480_v60  ;;  %v1854_v35 = vpop.f32.mrf.mxu1 }
 0x3c7   :  { %v5197_v54 = vmul.f32 %v5069_v42, %v1997_v48  ;;  %v3662_v11 = vadd.f32 0.2548296, %v3534_v4  ;;  %v3087_v53 = vadd.f32 1.4214138, %v2959_v10  ;;  %vm4622_vm0 = vcmp.ge.f32.partialorder %v9366_v32, 0.0 }
 0x3c8   :  { %v4750_v30 = vsub.f32 0.0, %v4494_v57  ;;  %5889 = vrcp.f32 %v2512_v63  ;;  %v2767_v49 = vmul.f32 1.0614054, %v9482_v41  ;;  %v1934_v40 = vmul.f32 0.5, %v9353_v3 }
 0x3c9   :  { %5325 = vst [vmem:[#allocation7 + $0x370] sm:$0xff] %v5197_v54  ;;  %v3790_v50 = vmul.f32 %v9448_v51, %v3662_v11  ;;  %v3215_v29 = vmul.f32 %v9465_v18, %v3087_v53  ;;  %v5884_v52 = vpop.eup %5883  ;;  %v3984_v62 = vmul.f32 %v3856_v17, %v2192_v44  ;;  %v2193_v16 = vand.u32 2147483647, %v9485_v34 }
 0x3ca   :  { %v4878_v36 = vsel %vm4622_vm0, %v4494_v57, %v4750_v30  ;;  %v2895_v39 = vadd.f32 -1.4531521, %v2767_v49  ;;  %5891 = vpow2.f32 %v4287_v56  ;;  %v3920_v61 = vsub.f32 0.0, %v2256_v38 }
 0x3cb   :  { %v5006_v5 = vadd.f32 1.0, %v4878_v36  ;;  %v4430_v19 = vmul.f32 %v5884_v52, %v3790_v50  ;;  %v3343_v23 = vadd.f32 -0.28449672, %v3215_v29  ;;  %v2321_v32 = vmul.f32 0.3275911, %v2193_v16 }
 0x3cc   :  { %v9497_v51 = vmul.f32 0.70710677, %v9488_v8  ;;  %v3023_v3 = vmul.f32 %v9482_v41, %v2895_v39  ;;  %v1998_v44 = vmul.f32 0.5, %v9375_v1  ;;  %v4161_v25 = vmul.f32 1.442695, %v3984_v62 }
 0x3cd   :  { %v5134_v21 = vmul.f32 %v5006_v5, %v1934_v40  ;;  %v4558_v48 = vsub.f32 1.0, %v4430_v19  ;;  %v3471_v13 = vmul.f32 %v9465_v18, %v3343_v23  ;;  %v2449_v15 = vadd.f32 1.0, %v2321_v32 }
 0x3ce   :  { %v2257_v22 = vand.u32 2147483647, %v9497_v51  ;;  %vm4686_vm1 = vcmp.ge.f32.partialorder %v9387_v12, 0.0  ;;  %v3151_v33 = vadd.f32 1.4214138, %v3023_v3  ;;  %v4048_v58 = vmul.f32 %v3920_v61, %v2256_v38 }
 0x3cf   :  { %5262 = vst [vmem:[#allocation7 + $0x178] sm:$0xff] %v5134_v21  ;;  %v4814_v28 = vsub.f32 0.0, %v4558_v48  ;;  %v3599_v55 = vadd.f32 0.2548296, %v3471_v13  ;;  %5893 = vrcp.f32 %v2449_v15  ;;  %v9507_v43 = vadd.f32 %v1694_v47, %v7482_v0  ;;  %v1698_v13 = vpop.f32.mrf.mxu0 }
 0x3d0   :  { %v9504_v20 = vpop.eup %5885  ;;  %v2385_v59 = vmul.f32 0.3275911, %v2257_v22  ;;  %v3279_v6 = vmul.f32 %v9482_v41, %v3151_v33  ;;  %v1935_v4 = vmul.f32 0.5, %v9403_v37  ;;  %5895 = vpow2.f32 %v4161_v25 }
 0x3d1   :  { %v4942_v46 = vsel %vm4686_vm1, %v4558_v48, %v4814_v28  ;;  %v3727_v1 = vmul.f32 %v9465_v18, %v3599_v55  ;;  %v2704_v45 = vmul.f32 1.0614054, %v9504_v20  ;;  %v5888_v42 = vpop.eup %5887  ;;  %v3857_v63 = vsub.f32 0.0, %v2193_v16 }
 0x3d2   :  { %v5070_v12 = vadd.f32 1.0, %v4942_v46  ;;  %v2513_v10 = vadd.f32 1.0, %v2385_v59  ;;  %v3407_v57 = vadd.f32 -0.28449672, %v3279_v6  ;;  %v4289_v11 = vmul.f32 1.442695, %v4048_v58 }
 0x3d3   :  { %v4367_v38 = vmul.f32 %v5888_v42, %v3727_v1  ;;  %v2832_v17 = vadd.f32 -1.4531521, %v2704_v45  ;;  %v9514_v18 = vmul.f32 0.70710677, %v9507_v43  ;;  %v9521_v50 = vadd.f32 %v1854_v35, %v7482_v0 }
 0x3d4   :  { %v5198_v54 = vmul.f32 %v5070_v12, %v1998_v44  ;;  %5897 = vrcp.f32 %v2513_v10  ;;  %v3535_v30 = vmul.f32 %v9482_v41, %v3407_v57  ;;  %vm4623_vm2 = vcmp.ge.f32.partialorder %v9409_v24, 0.0  ;;  %v1858_v12 = vpop.f32.mrf.mxu1 }
 0x3d5   :  { %v9516_v53 = vpop.eup %5889  ;;  %v4495_v56 = vsub.f32 1.0, %v4367_v38  ;;  %v2960_v37 = vmul.f32 %v9504_v20, %v2832_v17  ;;  %v3921_v49 = vsub.f32 0.0, %v2257_v22  ;;  %v2194_v52 = vand.u32 2147483647, %v9514_v18 }
 0x3d6   :  { %5326 = vst [vmem:[#allocation7 + $0x378] sm:$0xff] %v5198_v54  ;;  %v2768_v29 = vmul.f32 1.0614054, %v9516_v53  ;;  %v3663_v36 = vadd.f32 0.2548296, %v3535_v30  ;;  %v3985_v5 = vmul.f32 %v3857_v63, %v2193_v16  ;;  %v1999_v19 = vmul.f32 0.5, %v9419_v7 }
 0x3d7   :  { %v4751_v40 = vsub.f32 0.0, %v4495_v56  ;;  %v3088_v62 = vadd.f32 1.4214138, %v2960_v37  ;;  %5899 = vpow2.f32 %v4289_v11  ;;  %v2322_v39 = vmul.f32 0.3275911, %v2194_v52  ;;  %v5892_v61 = vpop.eup %5891 }
 0x3d8   :  { %v2896_v23 = vadd.f32 -1.4531521, %v2768_v29  ;;  %v3791_v21 = vmul.f32 %v9482_v41, %v3663_v36  ;;  %v9530_v48 = vmul.f32 0.70710677, %v9521_v50  ;;  %v4049_v44 = vmul.f32 %v3921_v49, %v2257_v22 }
 0x3d9   :  { %v4879_v32 = vsel %vm4623_vm2, %v4495_v56, %v4751_v40  ;;  %v3216_v24 = vmul.f32 %v9504_v20, %v3088_v62  ;;  %v2450_v16 = vadd.f32 1.0, %v2322_v39  ;;  %v4163_v15 = vmul.f32 1.442695, %v3985_v5 }
 0x3da   :  { %v5007_v3 = vadd.f32 1.0, %v4879_v32  ;;  %v3024_v47 = vmul.f32 %v9516_v53, %v2896_v23  ;;  %v4431_v25 = vmul.f32 %v5892_v61, %v3791_v21  ;;  %v9534_v28 = vand.u32 2147483647, %v9530_v48 }
 0x3db   :  { %v3344_v7 = vadd.f32 -0.28449672, %v3216_v24  ;;  %5901 = vrcp.f32 %v2450_v16  ;;  %v9537_v41 = vadd.f32 %v1698_v13, %v7480_v60  ;;  %vm4687_vm3 = vcmp.ge.f32.partialorder %v9430_v14, 0.0 }
 0x3dc   :  { %v5135_v55 = vmul.f32 %v5007_v3, %v1935_v4  ;;  %v3152_v33 = vadd.f32 1.4214138, %v3024_v47  ;;  %v9539_v58 = vpop.eup %5893  ;;  %v4559_v59 = vsub.f32 1.0, %v4431_v25  ;;  %v2386_v46 = vmul.f32 0.3275911, %v9534_v28 }
 0x3dd   :  { %v3472_v22 = vmul.f32 %v9504_v20, %v3344_v7  ;;  %v9545_v1 = vmul.f32 0.5, %v9446_v27  ;;  %v2705_v45 = vmul.f32 1.0614054, %v9539_v58  ;;  %v4291_v42 = vmul.f32 1.442695, %v4049_v44  ;;  %v5896_v4 = vpop.eup %5895 }
 0x3de   :  { %5263 = vst [vmem:[#allocation7 + $0x180] sm:$0xff] %v5135_v55  ;;  %v3280_v6 = vmul.f32 %v9516_v53, %v3152_v33  ;;  %v4815_v10 = vsub.f32 0.0, %v4559_v59  ;;  %v3858_v38 = vsub.f32 0.0, %v2194_v52  ;;  %v2514_v57 = vadd.f32 1.0, %v2386_v46 }
 0x3df   :  { %v3600_v35 = vadd.f32 0.2548296, %v3472_v22  ;;  %vm4624_vm4 = vcmp.ge.f32.partialorder %v9454_v26, 0.0  ;;  %v2833_v63 = vadd.f32 -1.4531521, %v2705_v45  ;;  %5903 = vpow2.f32 %v4163_v15 }
 0x3e0   :  { %v3408_v17 = vadd.f32 -0.28449672, %v3280_v6  ;;  %v9551_v54 = vmul.f32 0.70710677, %v9537_v41  ;;  %v4943_v11 = vsel %vm4687_vm3, %v4559_v59, %v4815_v10  ;;  %5905 = vrcp.f32 %v2514_v57 }
 0x3e1   :  { %v9553_v27 = vpop.eup %5897  ;;  %v3728_v56 = vmul.f32 %v9504_v20, %v3600_v35  ;;  %v9559_v30 = vadd.f32 %v1858_v12, %v7480_v60  ;;  %v5071_v37 = vadd.f32 1.0, %v4943_v11  ;;  %v2961_v49 = vmul.f32 %v9539_v58, %v2833_v63 }
 0x3e2   :  { %v3536_v29 = vmul.f32 %v9516_v53, %v3408_v17  ;;  %v2769_v40 = vmul.f32 1.0614054, %v9553_v27  ;;  %v9565_v62 = vmul.f32 0.5, %v9457_v9  ;;  %v3986_v5 = vmul.f32 %v3858_v38, %v2194_v52 }
 0x3e3   :  { %v4368_v36 = vmul.f32 %v5896_v4, %v3728_v56  ;;  %v9568_v14 = vand.u32 2147483647, %v9551_v54  ;;  %v5199_v20 = vmul.f32 %v5071_v37, %v1999_v19  ;;  %v3089_v39 = vadd.f32 1.4214138, %v2961_v49  ;;  %v1700_v19 = vpop.f32.mrf.mxu0 }
 0x3e4   :  { %v3664_v23 = vadd.f32 0.2548296, %v3536_v29  ;;  %v2897_v61 = vadd.f32 -1.4531521, %v2769_v40  ;;  %v5900_v32 = vpop.eup %5899  ;;  %5907 = vpow2.f32 %v4291_v42  ;;  %v3922_v24 = vsub.f32 0.0, %v9534_v28 }
 0x3e5   :  { %v4496_v21 = vsub.f32 1.0, %v4368_v36  ;;  %v2323_v13 = vmul.f32 0.3275911, %v9568_v14  ;;  %5327 = vst [vmem:[#allocation7 + $0x380] sm:$0xff] %v5199_v20  ;;  %v3217_v9 = vmul.f32 %v9539_v58, %v3089_v39  ;;  %v9576_v47 = vmul.f32 0.70710677, %v9559_v30 }
 0x3e6   :  { %v3792_v3 = vmul.f32 %v9516_v53, %v3664_v23  ;;  %v3025_v52 = vmul.f32 %v9553_v27, %v2897_v61  ;;  %vm4688_vm5 = vcmp.ge.f32.partialorder %v9469_v31, 0.0  ;;  %v4165_v16 = vmul.f32 1.442695, %v3986_v5 }
 0x3e7   :  { %v4752_v44 = vsub.f32 0.0, %v4496_v21  ;;  %v2451_v25 = vadd.f32 1.0, %v2323_v13  ;;  %v3345_v15 = vadd.f32 -0.28449672, %v3217_v9  ;;  %v9580_v33 = vand.u32 2147483647, %v9576_v47 }
 0x3e8   :  { %v4432_v7 = vmul.f32 %v5900_v32, %v3792_v3  ;;  %v3153_v55 = vadd.f32 1.4214138, %v3025_v52  ;;  %v9582_v53 = vpop.eup %5901  ;;  %v4050_v22 = vmul.f32 %v3922_v24, %v9534_v28  ;;  %v9588_v46 = vadd.f32 %v1700_v19, %v7482_v0  ;;  %v1860_v32 = vpop.f32.mrf.mxu1 }
 0x3e9   :  { %v4880_v59 = vsel %vm4624_vm4, %v4496_v21, %v4752_v44  ;;  %5909 = vrcp.f32 %v2451_v25  ;;  %v3473_v42 = vmul.f32 %v9539_v58, %v3345_v15  ;;  %v9593_v4 = vmul.f32 0.5, %v9478_v2 }
 0x3ea   :  { %v5008_v6 = vadd.f32 1.0, %v4880_v59  ;;  %v4560_v45 = vsub.f32 1.0, %v4432_v7  ;;  %v3281_v12 = vmul.f32 %v9553_v27, %v3153_v55  ;;  %v2706_v10 = vmul.f32 1.0614054, %v9582_v53 }
 0x3eb   :  { %5911 = vpow2.f32 %v4165_v16  ;;  %v2387_v26 = vmul.f32 0.3275911, %v9580_v33  ;;  %v3601_v38 = vadd.f32 0.2548296, %v3473_v42  ;;  %vm4625_vm6 = vcmp.ge.f32.partialorder %v9485_v34, 0.0 }
 0x3ec   :  { %v5136_v28 = vmul.f32 %v5008_v6, %v9545_v1  ;;  %v4816_v35 = vsub.f32 0.0, %v4560_v45  ;;  %v3409_v57 = vadd.f32 -0.28449672, %v3281_v12  ;;  %v5904_v17 = vpop.eup %5903  ;;  %v2834_v63 = vadd.f32 -1.4531521, %v2706_v10 }
 0x3ed   :  { %v4293_v11 = vmul.f32 1.442695, %v4050_v22  ;;  %v3859_v56 = vsub.f32 0.0, %v9568_v14  ;;  %v2515_v37 = vadd.f32 1.0, %v2387_v26  ;;  %v9600_v2 = vpop.eup %5905  ;;  %v3729_v49 = vmul.f32 %v9539_v58, %v3601_v38 }
 0x3ee   :  { %5264 = vst [vmem:[#allocation7 + $0x188] sm:$0xff] %v5136_v28  ;;  %v4944_v29 = vsel %vm4688_vm5, %v4560_v45, %v4816_v35  ;;  %v3537_v1 = vmul.f32 %v9553_v27, %v3409_v57  ;;  %v9607_v40 = vmul.f32 0.70710677, %v9588_v46  ;;  %v2962_v5 = vmul.f32 %v9582_v53, %v2834_v63 }
 0x3ef   :  { %v5072_v36 = vadd.f32 1.0, %v4944_v29  ;;  %v2770_v20 = vmul.f32 1.0614054, %v9600_v2  ;;  %5913 = vrcp.f32 %v2515_v37  ;;  %v4369_v23 = vmul.f32 %v5904_v17, %v3729_v49 }
 0x3f0   :  { %v2001_v39 = vmul.f32 0.5, %v9488_v8  ;;  %v3665_v61 = vadd.f32 0.2548296, %v3537_v1  ;;  %v2196_v31 = vand.u32 2147483647, %v9607_v40  ;;  %vm4689_vm7 = vcmp.ge.f32.partialorder %v9497_v51, 0.0 }
 0x3f1   :  { %v5200_v58 = vmul.f32 %v5072_v36, %v9565_v62  ;;  %v3090_v21 = vadd.f32 1.4214138, %v2962_v5  ;;  %v2898_v24 = vadd.f32 -1.4531521, %v2770_v20  ;;  %v3987_v13 = vmul.f32 %v3859_v56, %v9568_v14  ;;  %v5908_v3 = vpop.eup %5907 }
 0x3f2   :  { %v4497_v9 = vsub.f32 1.0, %v4369_v23  ;;  %v3793_v52 = vmul.f32 %v9553_v27, %v3665_v61  ;;  %v9618_v19 = vmul.f32 0.5, %v9507_v43  ;;  %v2324_v8 = vmul.f32 0.3275911, %v2196_v31  ;;  %v1702_v43 = vpop.f32.mrf.mxu0 }
 0x3f3   :  { %5328 = vst [vmem:[#allocation7 + $0x388] sm:$0xff] %v5200_v58  ;;  %v3218_v44 = vmul.f32 %v9582_v53, %v3090_v21  ;;  %v3026_v16 = vmul.f32 %v9600_v2, %v2898_v24  ;;  %5915 = vpow2.f32 %v4293_v11  ;;  %v9623_v62 = vadd.f32 %v1860_v32, %v7482_v0 }
 0x3f4   :  { %v4753_v25 = vsub.f32 0.0, %v4497_v9  ;;  %v4433_v7 = vmul.f32 %v5908_v3, %v3793_v52  ;;  %v3923_v14 = vsub.f32 0.0, %v9580_v33  ;;  %v2452_v15 = vadd.f32 1.0, %v2324_v8 }
 0x3f5   :  { %v3346_v55 = vadd.f32 -0.28449672, %v3218_v44  ;;  %v3154_v27 = vadd.f32 1.4214138, %v3026_v16  ;;  %v4167_v59 = vmul.f32 1.442695, %v3987_v13  ;;  %v9639_v34 = vadd.f32 %v1702_v43, %v7480_v60  ;;  %v1862_v16 = vpop.f32.mrf.mxu1 }
 0x3f6   :  { %v9626_v22 = vpop.eup %5909  ;;  %v4881_v6 = vsel %vm4625_vm6, %v4497_v9, %v4753_v25  ;;  %v4561_v45 = vsub.f32 1.0, %v4433_v7  ;;  %5917 = vrcp.f32 %v2452_v15  ;;  %v9631_v42 = vmul.f32 0.70710677, %v9623_v62  ;;  %v1704_v7 = vpop.f32.mrf.mxu0 }
 0x3f7   :  { %v5009_v12 = vadd.f32 1.0, %v4881_v6  ;;  %v3474_v10 = vmul.f32 %v9582_v53, %v3346_v55  ;;  %v3282_v26 = vmul.f32 %v9600_v2, %v3154_v27  ;;  %v2707_v28 = vmul.f32 1.0614054, %v9626_v22 }
 0x3f8   :  { %v5912_v35 = vpop.eup %5911  ;;  %v4817_v38 = vsub.f32 0.0, %v4561_v45  ;;  %v4051_v57 = vmul.f32 %v3923_v14, %v9580_v33  ;;  %v2260_v17 = vand.u32 2147483647, %v9631_v42  ;;  %5919 = vpow2.f32 %v4167_v59 }
 0x3f9   :  { %v5137_v63 = vmul.f32 %v5009_v12, %v9593_v4  ;;  %v3602_v11 = vadd.f32 0.2548296, %v3474_v10  ;;  %v3410_v56 = vadd.f32 -0.28449672, %v3282_v26  ;;  %v2835_v37 = vadd.f32 -1.4531521, %v2707_v28 }
 0x3fa   :  { %v4945_v29 = vsel %vm4689_vm7, %v4561_v45, %v4817_v38  ;;  %v3860_v49 = vsub.f32 0.0, %v2196_v31  ;;  %v2388_v1 = vmul.f32 0.3275911, %v2260_v17  ;;  %vm4626_vm8 = vcmp.ge.f32.partialorder %v9514_v18, 0.0 }
 0x3fb   :  { %5265 = vst [vmem:[#allocation7 + $0x190] sm:$0xff] %v5137_v63  ;;  %v5073_v36 = vadd.f32 1.0, %v4945_v29  ;;  %v3730_v33 = vmul.f32 %v9582_v53, %v3602_v11  ;;  %v3538_v5 = vmul.f32 %v9600_v2, %v3410_v56  ;;  %v2963_v20 = vmul.f32 %v9626_v22, %v2835_v37 }
 0x3fc   :  { %v9647_v23 = vpop.eup %5913  ;;  %v4295_v4 = vmul.f32 1.442695, %v4051_v57  ;;  %v2516_v61 = vadd.f32 1.0, %v2388_v1  ;;  %v9651_v51 = vmul.f32 0.70710677, %v9639_v34  ;;  %v3988_v53 = vmul.f32 %v3860_v49, %v2196_v31 }
 0x3fd   :  { %v5201_v32 = vmul.f32 %v5073_v36, %v2001_v39  ;;  %v4370_v58 = vmul.f32 %v5912_v35, %v3730_v33  ;;  %v3666_v21 = vadd.f32 0.2548296, %v3538_v5  ;;  %v3091_v24 = vadd.f32 1.4214138, %v2963_v20 }
 0x3fe   :  { %v2771_v13 = vmul.f32 1.0614054, %v9647_v23  ;;  %5921 = vrcp.f32 %v2516_v61  ;;  %v9655_v3 = vand.u32 2147483647, %v9651_v51  ;;  %v2002_v52 = vmul.f32 0.5, %v9521_v50 }
 0x3ff   :  { %5329 = vst [vmem:[#allocation7 + $0x390] sm:$0xff] %v5201_v32  ;;  %v4498_v9 = vsub.f32 1.0, %v4370_v58  ;;  %v3794_v8 = vmul.f32 %v9600_v2, %v3666_v21  ;;  %v3219_v44 = vmul.f32 %v9626_v22, %v3091_v24  ;;  %vm4690_vm9 = vcmp.ge.f32.partialorder %v9530_v48, 0.0 }
 0x400   :  { %v5916_v39 = vpop.eup %5915  ;;  %v2899_v25 = vadd.f32 -1.4531521, %v2771_v13  ;;  %5923 = vpow2.f32 %v4295_v4  ;;  %v2325_v31 = vmul.f32 0.3275911, %v9655_v3  ;;  %v3924_v27 = vsub.f32 0.0, %v2260_v17 }
 0x401   :  { %v4754_v14 = vsub.f32 0.0, %v4498_v9  ;;  %v4434_v15 = vmul.f32 %v5916_v39, %v3794_v8  ;;  %v3347_v55 = vadd.f32 -0.28449672, %v3219_v44  ;;  %v4169_v50 = vmul.f32 1.442695, %v3988_v53 }
 0x402   :  { %v3027_v59 = vmul.f32 %v9647_v23, %v2899_v25  ;;  %v2453_v43 = vadd.f32 1.0, %v2325_v31  ;;  %v9664_v2 = vadd.f32 %v1862_v16, %v7480_v60  ;;  %v9672_v26 = vadd.f32 %v1704_v7, %v7482_v0 }
 0x403   :  { %v9666_v6 = vpop.eup %5917  ;;  %v4882_v45 = vsel %vm4626_vm8, %v4498_v9, %v4754_v14  ;;  %v4562_v12 = vsub.f32 1.0, %v4434_v15  ;;  %v3475_v10 = vmul.f32 %v9626_v22, %v3347_v55  ;;  %v1939_v63 = vmul.f32 0.5, %v9537_v41 }
 0x404   :  { %v5010_v28 = vadd.f32 1.0, %v4882_v45  ;;  %v3155_v35 = vadd.f32 1.4214138, %v3027_v59  ;;  %v2708_v38 = vmul.f32 1.0614054, %v9666_v6  ;;  %5925 = vrcp.f32 %v2453_v43  ;;  %v1708_v59 = vpop.f32.mrf.mxu0 }
 0x405   :  { %v4818_v57 = vsub.f32 0.0, %v4562_v12  ;;  %v3603_v11 = vadd.f32 0.2548296, %v3475_v10  ;;  %v4052_v56 = vmul.f32 %v3924_v27, %v2260_v17  ;;  %v9679_v49 = vmul.f32 0.70710677, %v9664_v2  ;;  %v5920_v1 = vpop.eup %5919 }
 0x406   :  { %v5138_v37 = vmul.f32 %v5010_v28, %v9618_v19  ;;  %v3283_v18 = vmul.f32 %v9647_v23, %v3155_v35  ;;  %v2836_v29 = vadd.f32 -1.4531521, %v2708_v38  ;;  %5927 = vpow2.f32 %v4169_v50 }
 0x407   :  { %v4946_v36 = vsel %vm4690_vm9, %v4562_v12, %v4818_v57  ;;  %v3731_v33 = vmul.f32 %v9626_v22, %v3603_v11  ;;  %v9685_v5 = vmul.f32 0.70710677, %v9672_v26  ;;  %v2261_v20 = vand.u32 2147483647, %v9679_v49 }
 0x408   :  { %5266 = vst [vmem:[#allocation7 + $0x198] sm:$0xff] %v5138_v37  ;;  %v5074_v41 = vadd.f32 1.0, %v4946_v36  ;;  %v3411_v17 = vadd.f32 -0.28449672, %v3283_v18  ;;  %v2964_v19 = vmul.f32 %v9666_v6, %v2836_v29  ;;  %v4297_v61 = vmul.f32 1.442695, %v4052_v56 }
 0x409   :  { %v4371_v4 = vmul.f32 %v5920_v1, %v3731_v33  ;;  %v3861_v32 = vsub.f32 0.0, %v9655_v3  ;;  %v2198_v48 = vand.u32 2147483647, %v9685_v5  ;;  %v2389_v24 = vmul.f32 0.3275911, %v2261_v20 }
 0x40a   :  { %v5202_v58 = vmul.f32 %v5074_v41, %v2002_v52  ;;  %v3539_v22 = vmul.f32 %v9647_v23, %v3411_v17  ;;  %v3092_v21 = vadd.f32 1.4214138, %v2964_v19  ;;  %vm4627_vm10 = vcmp.ge.f32.partialorder %v9551_v54, 0.0 }
 0x40b   :  { %v9692_v13 = vpop.eup %5921  ;;  %v4499_v53 = vsub.f32 1.0, %v4371_v4  ;;  %v2003_v9 = vmul.f32 0.5, %v9559_v30  ;;  %v2326_v8 = vmul.f32 0.3275911, %v2198_v48  ;;  %v2517_v25 = vadd.f32 1.0, %v2389_v24  ;;  %v1864_v30 = vpop.f32.mrf.mxu1 }
 0x40c   :  { %5330 = vst [vmem:[#allocation7 + $0x398] sm:$0xff] %v5202_v58  ;;  %v3667_v44 = vadd.f32 0.2548296, %v3539_v22  ;;  %v3220_v16 = vmul.f32 %v9666_v6, %v3092_v21  ;;  %v2772_v39 = vmul.f32 1.0614054, %v9692_v13  ;;  %5929 = vpow2.f32 %v4297_v61 }
 0x40d   :  { %v5924_v52 = vpop.eup %5923  ;;  %v4755_v31 = vsub.f32 0.0, %v4499_v53  ;;  %v3989_v7 = vmul.f32 %v3861_v32, %v9655_v3  ;;  %v2454_v14 = vadd.f32 1.0, %v2326_v8  ;;  %5931 = vrcp.f32 %v2517_v25  ;;  %v1868_v19 = vpop.f32.mrf.mxu1 }
 0x40e   :  { %v3795_v15 = vmul.f32 %v9647_v23, %v3667_v44  ;;  %v3348_v55 = vadd.f32 -0.28449672, %v3220_v16  ;;  %v2900_v27 = vadd.f32 -1.4531521, %v2772_v39  ;;  %vm4691_vm11 = vcmp.ge.f32.partialorder %v9576_v47, 0.0 }
 0x40f   :  { %v4883_v50 = vsel %vm4627_vm10, %v4499_v53, %v4755_v31  ;;  %v3925_v43 = vsub.f32 0.0, %v2261_v20  ;;  %5933 = vrcp.f32 %v2454_v14  ;;  %v4171_v23 = vmul.f32 1.442695, %v3989_v7 }
 0x410   :  { %v5011_v45 = vadd.f32 1.0, %v4883_v50  ;;  %v4435_v12 = vmul.f32 %v5924_v52, %v3795_v15  ;;  %v3476_v10 = vmul.f32 %v9666_v6, %v3348_v55  ;;  %v3028_v3 = vmul.f32 %v9692_v13, %v2900_v27 }
 0x411   :  { %v9705_v28 = vpop.eup %5925  ;;  %v3862_v35 = vsub.f32 0.0, %v2198_v48  ;;  %v9708_v38 = vadd.f32 %v1864_v30, %v7482_v0  ;;  %v9711_v54 = vadd.f32 %v1708_v59, %v7480_v60  ;;  %v1940_v18 = vmul.f32 0.5, %v9588_v46 }
 0x412   :  { %v5139_v57 = vmul.f32 %v5011_v45, %v1939_v63  ;;  %v4563_v11 = vsub.f32 1.0, %v4435_v12  ;;  %v3604_v56 = vadd.f32 0.2548296, %v3476_v10  ;;  %v3156_v37 = vadd.f32 1.4214138, %v3028_v3 }
 0x413   :  { %vm4628_vm12 = vcmp.ge.f32.partialorder %v9607_v40, 0.0  ;;  %v2709_v29 = vmul.f32 1.0614054, %v9705_v28  ;;  %v9717_v1 = vmul.f32 0.70710677, %v9708_v38  ;;  %v5928_v36 = vpop.eup %5927  ;;  %v4053_v63 = vmul.f32 %v3925_v43, %v2261_v20 }
 0x414   :  { %5267 = vst [vmem:[#allocation7 + $0x1a0] sm:$0xff] %v5139_v57  ;;  %v4819_v33 = vsub.f32 0.0, %v4563_v11  ;;  %v3732_v41 = vmul.f32 %v9666_v6, %v3604_v56  ;;  %v3284_v17 = vmul.f32 %v9692_v13, %v3156_v37  ;;  %5935 = vpow2.f32 %v4171_v23 }
 0x415   :  { %v2837_v4 = vadd.f32 -1.4531521, %v2709_v29  ;;  %v3990_v61 = vmul.f32 %v3862_v35, %v2198_v48  ;;  %v2262_v46 = vand.u32 2147483647, %v9717_v1  ;;  %v9725_v21 = vmul.f32 0.70710677, %v9711_v54  ;;  %v1710_v29 = vpop.f32.mrf.mxu0 }
 0x416   :  { %v4947_v32 = vsel %vm4691_vm11, %v4563_v11, %v4819_v33  ;;  %v4372_v58 = vmul.f32 %v5928_v36, %v3732_v41  ;;  %v3412_v22 = vadd.f32 -0.28449672, %v3284_v17  ;;  %v9729_v20 = vadd.f32 %v1868_v19, %v7480_v60 }
 0x417   :  { %v5075_v24 = vadd.f32 1.0, %v4947_v32  ;;  %v2965_v6 = vmul.f32 %v9705_v28, %v2837_v4  ;;  %v2390_v53 = vmul.f32 0.3275911, %v2262_v46  ;;  %v4299_v44 = vmul.f32 1.442695, %v4053_v63 }
 0x418   :  { %v4500_v8 = vsub.f32 1.0, %v4372_v58  ;;  %v3540_v48 = vmul.f32 %v9692_v13, %v3412_v22  ;;  %v9733_v16 = vand.u32 2147483647, %v9725_v21  ;;  %v4173_v25 = vmul.f32 1.442695, %v3990_v61 }
 0x419   :  { %v5203_v47 = vmul.f32 %v5075_v24, %v2003_v9  ;;  %v3093_v39 = vadd.f32 1.4214138, %v2965_v6  ;;  %v2518_v52 = vadd.f32 1.0, %v2390_v53  ;;  %v5930_v31 = vpop.eup %5929  ;;  %v2004_v14 = vmul.f32 0.5, %v9623_v62  ;;  %v1870_v24 = vpop.f32.mrf.mxu1 }
 0x41a   :  { %v4756_v7 = vsub.f32 0.0, %v4500_v8  ;;  %v3668_v15 = vadd.f32 0.2548296, %v3540_v48  ;;  %v2327_v55 = vmul.f32 0.3275911, %v9733_v16  ;;  %v9737_v27 = vpop.eup %5931  ;;  %v3926_v59 = vsub.f32 0.0, %v2262_v46 }
 0x41b   :  { %5331 = vst [vmem:[#allocation7 + $0x3a0] sm:$0xff] %v5203_v47  ;;  %v3221_v30 = vmul.f32 %v9705_v28, %v3093_v39  ;;  %5937 = vrcp.f32 %v2518_v52  ;;  %v9741_v50 = vmul.f32 0.70710677, %v9729_v20  ;;  %v2773_v45 = vmul.f32 1.0614054, %v9737_v27 }
 0x41c   :  { %v9743_v9 = vpop.eup %5933  ;;  %v4884_v43 = vsel %vm4628_vm12, %v4500_v8, %v4756_v7  ;;  %v3796_v62 = vmul.f32 %v9692_v13, %v3668_v15  ;;  %v2455_v12 = vadd.f32 1.0, %v2327_v55  ;;  %vm4692_vm13 = vcmp.ge.f32.partialorder %v9631_v42, 0.0 }
 0x41d   :  { %v5012_v10 = vadd.f32 1.0, %v4884_v43  ;;  %v3349_v3 = vadd.f32 -0.28449672, %v3221_v30  ;;  %v2710_v23 = vmul.f32 1.0614054, %v9743_v9  ;;  %v9752_v57 = vmul.f32 0.5, %v9639_v34 }
 0x41e   :  { %v4436_v35 = vmul.f32 %v5930_v31, %v3796_v62  ;;  %v2901_v11 = vadd.f32 -1.4531521, %v2773_v45  ;;  %5939 = vrcp.f32 %v2455_v12  ;;  %v2263_v13 = vand.u32 2147483647, %v9741_v50 }
 0x41f   :  { %v5140_v56 = vmul.f32 %v5012_v10, %v1940_v18  ;;  %v3477_v40 = vmul.f32 %v9705_v28, %v3349_v3  ;;  %v2838_v37 = vadd.f32 -1.4531521, %v2710_v23  ;;  %5941 = vpow2.f32 %v4299_v44 }
 0x420   :  { %v4564_v36 = vsub.f32 1.0, %v4436_v35  ;;  %v3029_v33 = vmul.f32 %v9737_v27, %v2901_v11  ;;  %v4054_v41 = vmul.f32 %v3926_v59, %v2262_v46  ;;  %5943 = vpow2.f32 %v4173_v25  ;;  %v1712_v35 = vpop.f32.mrf.mxu0 }
 0x421   :  { %5268 = vst [vmem:[#allocation7 + $0x1a8] sm:$0xff] %v5140_v56  ;;  %v3605_v17 = vadd.f32 0.2548296, %v3477_v40  ;;  %v2966_v63 = vmul.f32 %v9743_v9, %v2838_v37  ;;  %v2391_v34 = vmul.f32 0.3275911, %v2263_v13  ;;  %v5936_v19 = vpop.eup %5935  ;;  %vm4629_vm14 = vcmp.ge.f32.partialorder %v9651_v51, 0.0 }
 0x422   :  { %v4820_v4 = vsub.f32 0.0, %v4564_v36  ;;  %v3157_v18 = vadd.f32 1.4214138, %v3029_v33  ;;  %v9760_v61 = vadd.f32 %v1710_v29, %v7482_v0  ;;  %v3863_v22 = vsub.f32 0.0, %v9733_v16 }
 0x423   :  { %v3733_v32 = vmul.f32 %v9705_v28, %v3605_v17  ;;  %v3094_v58 = vadd.f32 1.4214138, %v2966_v63  ;;  %v2519_v46 = vadd.f32 1.0, %v2391_v34  ;;  %v4301_v8 = vmul.f32 1.442695, %v4054_v41 }
 0x424   :  { %v4948_v6 = vsel %vm4692_vm13, %v4564_v36, %v4820_v4  ;;  %v3285_v53 = vmul.f32 %v9737_v27, %v3157_v18  ;;  %v9768_v48 = vmul.f32 0.70710677, %v9760_v61  ;;  %v3927_v25 = vsub.f32 0.0, %v2263_v13 }
 0x425   :  { %v5076_v44 = vadd.f32 1.0, %v4948_v6  ;;  %v4373_v47 = vmul.f32 %v5936_v19, %v3733_v32  ;;  %v3222_v39 = vmul.f32 %v9743_v9, %v3094_v58  ;;  %5945 = vrcp.f32 %v2519_v46 }
 0x426   :  { %v3413_v28 = vadd.f32 -0.28449672, %v3285_v53  ;;  %v9772_v52 = vand.u32 2147483647, %v9768_v48  ;;  %v9775_v31 = vadd.f32 %v1870_v24, %v7482_v0  ;;  %v3991_v55 = vmul.f32 %v3863_v22, %v9733_v16 }
 0x427   :  { %v5204_v42 = vmul.f32 %v5076_v44, %v2004_v14  ;;  %v4501_v7 = vsub.f32 1.0, %v4373_v47  ;;  %v3350_v15 = vadd.f32 -0.28449672, %v3222_v39  ;;  %v9781_v59 = vmul.f32 0.5, %v9664_v2 }
 0x428   :  { %v9778_v30 = vpop.eup %5937  ;;  %v3541_v43 = vmul.f32 %v9737_v27, %v3413_v28  ;;  %v9785_v62 = vmul.f32 0.5, %v9672_v26  ;;  %v2328_v45 = vmul.f32 0.3275911, %v9772_v52  ;;  %5947 = vpow2.f32 %v4301_v8 }
 0x429   :  { %5332 = vst [vmem:[#allocation7 + $0x3a8] sm:$0xff] %v5204_v42  ;;  %v4757_v12 = vsub.f32 0.0, %v4501_v7  ;;  %v3478_v14 = vmul.f32 %v9743_v9, %v3350_v15  ;;  %v2774_v10 = vmul.f32 1.0614054, %v9778_v30  ;;  %v4055_v3 = vmul.f32 %v3927_v25, %v2263_v13 }
 0x42a   :  { %v3669_v16 = vadd.f32 0.2548296, %v3541_v43  ;;  %v2456_v23 = vadd.f32 1.0, %v2328_v45  ;;  %v9791_v2 = vmul.f32 0.70710677, %v9775_v31  ;;  %v9805_v51 = vadd.f32 %v1712_v35, %v7480_v60 }
 0x42b   :  { %v9793_v11 = vpop.eup %5939  ;;  %v4885_v26 = vsel %vm4629_vm14, %v4501_v7, %v4757_v12  ;;  %v3606_v56 = vadd.f32 0.2548296, %v3478_v14  ;;  %v2902_v40 = vadd.f32 -1.4531521, %v2774_v10  ;;  %v4175_v37 = vmul.f32 1.442695, %v3991_v55  ;;  %v1872_v7 = vpop.f32.mrf.mxu1 }
 0x42c   :  { %v5013_v29 = vadd.f32 1.0, %v4885_v26  ;;  %v3797_v36 = vmul.f32 %v9737_v27, %v3669_v16  ;;  %v2711_v33 = vmul.f32 1.0614054, %v9793_v11  ;;  %5949 = vrcp.f32 %v2456_v23  ;;  %v5942_v13 = vpop.eup %5941 }
 0x42d   :  { %v3734_v41 = vmul.f32 %v9743_v9, %v3606_v56  ;;  %v3030_v17 = vmul.f32 %v9778_v30, %v2902_v40  ;;  %v9802_v63 = vand.u32 2147483647, %v9791_v2  ;;  %v5944_v34 = vpop.eup %5943  ;;  %v4303_v27 = vmul.f32 1.442695, %v4055_v3 }
 0x42e   :  { %v5141_v19 = vmul.f32 %v5013_v29, %v9752_v57  ;;  %v4437_v4 = vmul.f32 %v5942_v13, %v3797_v36  ;;  %v2839_v18 = vadd.f32 -1.4531521, %v2711_v33  ;;  %vm4693_vm15 = vcmp.ge.f32.partialorder %v9679_v49, 0.0 }
 0x42f   :  { %v4374_v32 = vmul.f32 %v5944_v34, %v3734_v41  ;;  %v3158_v58 = vadd.f32 1.4214138, %v3030_v17  ;;  %v2392_v9 = vmul.f32 0.3275911, %v9802_v63  ;;  %5951 = vpow2.f32 %v4175_v37 }
 0x430   :  { %5269 = vst [vmem:[#allocation7 + $0x1b0] sm:$0xff] %v5141_v19  ;;  %v4565_v22 = vsub.f32 1.0, %v4437_v4  ;;  %v2967_v46 = vmul.f32 %v9793_v11, %v2839_v18  ;;  %v3864_v24 = vsub.f32 0.0, %v9772_v52  ;;  %v9814_v8 = vmul.f32 0.70710677, %v9805_v51 }
 0x431   :  { %v4502_v6 = vsub.f32 1.0, %v4374_v32  ;;  %v3286_v53 = vmul.f32 %v9778_v30, %v3158_v58  ;;  %v2520_v57 = vadd.f32 1.0, %v2392_v9  ;;  %vm4630_vm0 = vcmp.ge.f32.partialorder %v9685_v5, 0.0 }
 0x432   :  { %v9816_v44 = vpop.eup %5945  ;;  %v4821_v47 = vsub.f32 0.0, %v4565_v22  ;;  %v3095_v39 = vadd.f32 1.4214138, %v2967_v46  ;;  %5953 = vpow2.f32 %v4303_v27  ;;  %v3992_v43 = vmul.f32 %v3864_v24, %v9772_v52 }
 0x433   :  { %v4758_v28 = vsub.f32 0.0, %v4502_v6  ;;  %v3414_v25 = vadd.f32 -0.28449672, %v3286_v53  ;;  %v2775_v42 = vmul.f32 1.0614054, %v9816_v44  ;;  %5955 = vrcp.f32 %v2520_v57 }
 0x434   :  { %v4949_v15 = vsel %vm4693_vm15, %v4565_v22, %v4821_v47  ;;  %v3223_v55 = vmul.f32 %v9793_v11, %v3095_v39  ;;  %v9825_v45 = vand.u32 2147483647, %v9814_v8 }
 0x435   :  { %6101 = shalt.err (!%p6098_p0)
}
 0x436   :  { %s6143_s29 = smov 256   ;;  %s6144_s30 = smov 16   ;;  %v5077_v49 = vadd.f32 1.0, %v4949_v15  ;;  %v4886_v52 = vsel %vm4630_vm0, %v4502_v6, %v4758_v28  ;;  %v3542_v12 = vmul.f32 %v9778_v30, %v3414_v25  ;;  %v2903_v14 = vadd.f32 -1.4531521, %v2775_v42  ;;  %v5948_v10 = vpop.eup %5947  ;;  %v1714_v33 = vpop.f32.mrf.mxu0 }
 0x437   :  { %5366 = dma.vmem_to_hbm [thread:$0]  %s5361_s27, 16384, %s10090_s4, [#allocation9], %s6143_s29, %s6143_s29, %s6144_s30   ;;  %v5014_v16 = vadd.f32 1.0, %v4886_v52  ;;  %v3351_v3 = vadd.f32 -0.28449672, %v3223_v55  ;;  %v9838_v35 = vadd.f32 %v1872_v7, %v7480_v60  ;;  %v3928_v37 = vsub.f32 0.0, %v9802_v63 }
 0x438   :  { %v2329_v23 = vmul.f32 0.3275911, %v9825_v45  ;;  %v5205_v26 = vmul.f32 %v5077_v49, %v9781_v59  ;;  %v3670_v56 = vadd.f32 0.2548296, %v3542_v12  ;;  %v3031_v40 = vmul.f32 %v9816_v44, %v2903_v14  ;;  %s6145_s4 = smov [#allocation7]  }
 0x439   :  { %v5142_v5 = vmul.f32 %v5014_v16, %v9785_v62  ;;  %v3479_v29 = vmul.f32 %v9793_v11, %v3351_v3  ;;  %v9845_v13 = vpop.eup %5949  ;;  %v2006_v41 = vmul.f32 0.5, %v9708_v38  ;;  %v4177_v59 = vmul.f32 1.442695, %v3992_v43  ;;  %v1874_v3 = vpop.f32.mrf.mxu1  ;;  %s5348_s7 = sshll.u32 %s6145_s4, 4  ;;  %s5349_s7 = int_to_ptr.vmem [resolvable:$true] %s5348_s7 }
 0x43a   :  { %v2457_v36 = vadd.f32 1.0, %v2329_v23  ;;  %5333 = vst [vmem:[#allocation7 + $0x3b0] sm:$0xff] %v5205_v26  ;;  %v3798_v17 = vmul.f32 %v9778_v30, %v3670_v56  ;;  %v3159_v34 = vadd.f32 1.4214138, %v3031_v40  ;;  %v2712_v4 = vmul.f32 1.0614054, %v9845_v13  ;;  %p6115_p2 = scmp.lt.s32.totalorder %s5349_s7, %s5349_s7 }
 0x43b   :  { %5270 = vst [vmem:[#allocation7 + $0x1b8] sm:$0xff] %v5142_v5  ;;  %v3607_v19 = vadd.f32 0.2548296, %v3479_v29  ;;  %v9851_v62 = vmul.f32 0.70710677, %v9838_v35  ;;  %v4056_v32 = vmul.f32 %v3928_v37, %v9802_v63  ;;  %v9856_v58 = vadd.f32 %v1714_v33, %v7482_v0  ;;  %s6110_s8 = scalar_lea.vmem %s5349_s7, 16384 }
 0x43c   :  { %5957 = vrcp.f32 %v2457_v36  ;;  %v4438_v18 = vmul.f32 %v5948_v10, %v3798_v17  ;;  %v3287_v27 = vmul.f32 %v9816_v44, %v3159_v34  ;;  %v1943_v38 = vmul.f32 0.5, %v9711_v54  ;;  %v5952_v46 = vpop.eup %5951  ;;  %p6111_p1 = scmp.ne.s32.totalorder %s5349_s7, %s6110_s8  ;;  %p6116_p3 = scmp.lt.s32.totalorder %s6110_s8, %s6110_s8 }
 0x43d   :  { %v3735_v30 = vmul.f32 %v9793_v11, %v3607_v19  ;;  %v2840_v9 = vadd.f32 -1.4531521, %v2712_v4  ;;  %v9861_v22 = vand.u32 2147483647, %v9851_v62  ;;  %vm4694_vm1 = vcmp.ge.f32.partialorder %v9717_v1, 0.0 }
 0x43e   :  { %v4566_v24 = vsub.f32 1.0, %v4438_v18  ;;  %vm4631_vm2 = vcmp.ge.f32.partialorder %v9725_v21, 0.0  ;;  %v3415_v6 = vadd.f32 -0.28449672, %v3287_v27  ;;  %5959 = vpow2.f32 %v4177_v59  ;;  %v1718_v21 = vpop.f32.mrf.mxu0  ;;  %p6117_p4 = por %p6116_p3, %p6115_p2 }
 0x43f   :  { %v4375_v53 = vmul.f32 %v5952_v46, %v3735_v30  ;;  %v2968_v63 = vmul.f32 %v9845_v13, %v2840_v9  ;;  %v2393_v57 = vmul.f32 0.3275911, %v9861_v22  ;;  %v5954_v54 = vpop.eup %5953  ;;  %v4305_v39 = vmul.f32 1.442695, %v4056_v32 }
 0x440   :  { %v4822_v47 = vsub.f32 0.0, %v4566_v24  ;;  %v3543_v11 = vmul.f32 %v9816_v44, %v3415_v6  ;;  %v9869_v28 = vmul.f32 0.70710677, %v9856_v58  ;;  %v9871_v25 = vpop.eup %5955  ;;  %v3865_v15 = vsub.f32 0.0, %v9825_v45  ;;  %p6118_p5 = pnand %p6117_p4, %p6111_p1 }
 0x441   :  { %v4503_v42 = vsub.f32 1.0, %v4375_v53  ;;  %v3096_v7 = vadd.f32 1.4214138, %v2968_v63  ;;  %v2521_v55 = vadd.f32 1.0, %v2393_v57  ;;  %v2776_v52 = vmul.f32 1.0614054, %v9871_v25 }
 0x442   :  { %v4950_v43 = vsel %vm4694_vm1, %v4566_v24, %v4822_v47  ;;  %v3671_v49 = vadd.f32 0.2548296, %v3543_v11  ;;  %v2202_v12 = vand.u32 2147483647, %v9869_v28  ;;  %v3993_v5 = vmul.f32 %v3865_v15, %v9825_v45 }
 0x443   :  { %v5078_v14 = vadd.f32 1.0, %v4950_v43  ;;  %v4759_v10 = vsub.f32 0.0, %v4503_v42  ;;  %v3224_v16 = vmul.f32 %v9845_v13, %v3096_v7  ;;  %5961 = vrcp.f32 %v2521_v55  ;;  %v1878_v55 = vpop.f32.mrf.mxu1 }
 0x444   :  { %v3799_v23 = vmul.f32 %v9816_v44, %v3671_v49  ;;  %v2904_v26 = vadd.f32 -1.4531521, %v2776_v52  ;;  %5963 = vpow2.f32 %v4305_v39  ;;  %v2330_v56 = vmul.f32 0.3275911, %v2202_v12 }
 0x445   :  { %v5206_v40 = vmul.f32 %v5078_v14, %v2006_v41  ;;  %v4887_v1 = vsel %vm4631_vm2, %v4503_v42, %v4759_v10  ;;  %v3352_v37 = vadd.f32 -0.28449672, %v3224_v16  ;;  %v9885_v17 = vadd.f32 %v1874_v3, %v7482_v0 }
 0x446   :  { %v5015_v29 = vadd.f32 1.0, %v4887_v1  ;;  %v4439_v36 = vmul.f32 %v5954_v54, %v3799_v23  ;;  %v3032_v33 = vmul.f32 %v9871_v25, %v2904_v26  ;;  %v2007_v44 = vmul.f32 0.5, %v9729_v20 }
 0x447   :  { %5334 = vst [vmem:[#allocation7 + $0x3b8] sm:$0xff] %v5206_v40  ;;  %v3480_v34 = vmul.f32 %v9845_v13, %v3352_v37  ;;  %v3929_v41 = vsub.f32 0.0, %v9861_v22  ;;  %v2458_v59 = vadd.f32 1.0, %v2330_v56  ;;  %vm4695_vm3 = vcmp.ge.f32.partialorder %v9741_v50, 0.0 }
 0x448   :  { %v5143_v4 = vmul.f32 %v5015_v29, %v1943_v38  ;;  %v4567_v45 = vsub.f32 1.0, %v4439_v36  ;;  %v3160_v18 = vadd.f32 1.4214138, %v3032_v33  ;;  %v4179_v30 = vmul.f32 1.442695, %v3993_v5 }
 0x449   :  { %v9890_v19 = vpop.eup %5957  ;;  %v3608_v27 = vadd.f32 0.2548296, %v3480_v34  ;;  %5965 = vrcp.f32 %v2458_v59  ;;  %v9896_v46 = vmul.f32 0.70710677, %v9885_v17  ;;  %v9899_v24 = vadd.f32 %v1718_v21, %v7480_v60 }
 0x44a   :  { %v2713_v32 = vmul.f32 1.0614054, %v9890_v19  ;;  %5271 = vst [vmem:[#allocation7 + $0x1c0] sm:$0xff] %v5143_v4  ;;  %v4823_v20 = vsub.f32 0.0, %v4567_v45  ;;  %v3288_v9 = vmul.f32 %v9871_v25, %v3160_v18  ;;  %v1944_v38 = vmul.f32 0.5, %v9760_v61 }
 0x44b   :  { %v3736_v6 = vmul.f32 %v9845_v13, %v3608_v27  ;;  %v4057_v63 = vmul.f32 %v3929_v41, %v9861_v22  ;;  %v5960_v57 = vpop.eup %5959  ;;  %v3866_v11 = vsub.f32 0.0, %v2202_v12  ;;  %v2266_v39 = vand.u32 2147483647, %v9896_v46 }
 0x44c   :  { %v2841_v53 = vadd.f32 -1.4531521, %v2713_v32  ;;  %v4951_v54 = vsel %vm4695_vm3, %v4567_v45, %v4823_v20  ;;  %v3416_v47 = vadd.f32 -0.28449672, %v3288_v9  ;;  %5967 = vpow2.f32 %v4179_v30 }
 0x44d   :  { %v5079_v42 = vadd.f32 1.0, %v4951_v54  ;;  %v4376_v7 = vmul.f32 %v5960_v57, %v3736_v6  ;;  %vm4632_vm4 = vcmp.ge.f32.partialorder %v9768_v48, 0.0  ;;  %v2394_v13 = vmul.f32 0.3275911, %v2266_v39  ;;  %v1880_v6 = vpop.f32.mrf.mxu1 }
 0x44e   :  { %v2969_v15 = vmul.f32 %v9890_v19, %v2841_v53  ;;  %v3544_v61 = vmul.f32 %v9871_v25, %v3416_v47  ;;  %v9911_v22 = vmul.f32 0.70710677, %v9899_v24  ;;  %v4307_v52 = vmul.f32 1.442695, %v4057_v63 }
 0x44f   :  { %v5207_v50 = vmul.f32 %v5079_v42, %v2007_v44  ;;  %v4504_v43 = vsub.f32 1.0, %v4376_v7  ;;  %v3994_v16 = vmul.f32 %v3866_v11, %v2202_v12  ;;  %v2522_v3 = vadd.f32 1.0, %v2394_v13 }
 0x450   :  { %v3097_v49 = vadd.f32 1.4214138, %v2969_v15  ;;  %v9913_v14 = vpop.eup %5961  ;;  %v3672_v10 = vadd.f32 0.2548296, %v3544_v61  ;;  %v2203_v23 = vand.u32 2147483647, %v9911_v22  ;;  %v9919_v37 = vadd.f32 %v1878_v55, %v7480_v60 }
 0x451   :  { %v5964_v26 = vpop.eup %5963  ;;  %5335 = vst [vmem:[#allocation7 + $0x3c0] sm:$0xff] %v5207_v50  ;;  %v4760_v56 = vsub.f32 0.0, %v4504_v43  ;;  %v2777_v1 = vmul.f32 1.0614054, %v9913_v14  ;;  %v2008_v5 = vmul.f32 0.5, %v9775_v31  ;;  %5969 = vrcp.f32 %v2522_v3 }
 0x452   :  { %v3225_v40 = vmul.f32 %v9890_v19, %v3097_v49  ;;  %v3800_v29 = vmul.f32 %v9871_v25, %v3672_v10  ;;  %v2331_v36 = vmul.f32 0.3275911, %v2203_v23  ;;  %5971 = vpow2.f32 %v4307_v52  ;;  %v1720_v25 = vpop.f32.mrf.mxu0 }
 0x453   :  { %v4888_v12 = vsel %vm4632_vm4, %v4504_v43, %v4760_v56  ;;  %v2905_v44 = vadd.f32 -1.4531521, %v2777_v1  ;;  %v3930_v59 = vsub.f32 0.0, %v2266_v39  ;;  %v4181_v18 = vmul.f32 1.442695, %v3994_v16 }
 0x454   :  { %v3353_v33 = vadd.f32 -0.28449672, %v3225_v40  ;;  %v5016_v34 = vadd.f32 1.0, %v4888_v12  ;;  %v4440_v41 = vmul.f32 %v5964_v26, %v3800_v29  ;;  %v2459_v21 = vadd.f32 1.0, %v2331_v36 }
 0x455   :  { %v3033_v45 = vmul.f32 %v9913_v14, %v2905_v44  ;;  %v9928_v31 = vmul.f32 0.70710677, %v9919_v37  ;;  %vm4696_vm5 = vcmp.ge.f32.partialorder %v9791_v2, 0.0  ;;  %v4058_v63 = vmul.f32 %v3930_v59, %v2266_v39 }
 0x456   :  { %v3481_v4 = vmul.f32 %v9890_v19, %v3353_v33  ;;  %v9930_v27 = vpop.eup %5965  ;;  %v5144_v48 = vmul.f32 %v5016_v34, %v1944_v38  ;;  %v4568_v32 = vsub.f32 1.0, %v4440_v41  ;;  %5973 = vrcp.f32 %v2459_v21 }
 0x457   :  { %v3161_v20 = vadd.f32 1.4214138, %v3033_v45  ;;  %v2714_v9 = vmul.f32 1.0614054, %v9930_v27  ;;  %v2267_v57 = vand.u32 2147483647, %v9928_v31  ;;  %v9936_v54 = vadd.f32 %v1720_v25, %v7482_v0 }
 0x458   :  { %v3609_v30 = vadd.f32 0.2548296, %v3481_v4  ;;  %5272 = vst [vmem:[#allocation7 + $0x1c8] sm:$0xff] %v5144_v48  ;;  %v4824_v53 = vsub.f32 0.0, %v4568_v32  ;;  %5975 = vpow2.f32 %v4181_v18  ;;  %v3867_v15 = vsub.f32 0.0, %v2203_v23 }
 0x459   :  { %v3289_v38 = vmul.f32 %v9913_v14, %v3161_v20  ;;  %v2842_v11 = vadd.f32 -1.4531521, %v2714_v9  ;;  %v5968_v42 = vpop.eup %5967  ;;  %v2395_v61 = vmul.f32 0.3275911, %v2267_v57  ;;  %v9943_v13 = vadd.f32 %v1880_v6, %v7482_v0 }
 0x45a   :  { %v3737_v47 = vmul.f32 %v9890_v19, %v3609_v30  ;;  %v4952_v7 = vsel %vm4696_vm5, %v4568_v32, %v4824_v53  ;;  %v1945_v19 = vmul.f32 0.5, %v9805_v51  ;;  %v4309_v49 = vmul.f32 1.442695, %v4058_v63  ;;  %v1722_v53 = vpop.f32.mrf.mxu0 }
 0x45b   :  { %v5080_v39 = vadd.f32 1.0, %v4952_v7  ;;  %v3417_v50 = vadd.f32 -0.28449672, %v3289_v38  ;;  %v2970_v43 = vmul.f32 %v9930_v27, %v2842_v11  ;;  %v2523_v52 = vadd.f32 1.0, %v2395_v61 }
 0x45c   :  { %v4377_v55 = vmul.f32 %v5968_v42, %v3737_v47  ;;  %v9948_v10 = vmul.f32 0.70710677, %v9936_v54  ;;  %v3995_v56 = vmul.f32 %v3867_v15, %v2203_v23  ;;  %v3931_v40 = vsub.f32 0.0, %v2267_v57 }
 0x45d   :  { %v5208_v16 = vmul.f32 %v5080_v39, %v2008_v5  ;;  %v3545_v3 = vmul.f32 %v9913_v14, %v3417_v50  ;;  %v3098_v26 = vadd.f32 1.4214138, %v2970_v43  ;;  %5977 = vrcp.f32 %v2523_v52 }
 0x45e   :  { %v4505_v2 = vsub.f32 1.0, %v4377_v55  ;;  %v9952_v1 = vand.u32 2147483647, %v9948_v10  ;;  %v9954_v29 = vpop.eup %5969  ;;  %v9958_v33 = vmul.f32 0.70710677, %v9943_v13  ;;  %vm4633_vm6 = vcmp.ge.f32.partialorder %v9814_v8, 0.0 }
 0x45f   :  { %5336 = vst [vmem:[#allocation7 + $0x3c8] sm:$0xff] %v5208_v16  ;;  %v3673_v36 = vadd.f32 0.2548296, %v3545_v3  ;;  %v3226_v12 = vmul.f32 %v9930_v27, %v3098_v26  ;;  %v5972_v5 = vpop.eup %5971  ;;  %v2778_v23 = vmul.f32 1.0614054, %v9954_v29  ;;  %5979 = vpow2.f32 %v4309_v49 }
 0x460   :  { %v4761_v51 = vsub.f32 0.0, %v4505_v2  ;;  %v2332_v44 = vmul.f32 0.3275911, %v9952_v1  ;;  %v9965_v21 = vand.u32 2147483647, %v9958_v33  ;;  %v4059_v30 = vmul.f32 %v3931_v40, %v2267_v57 }
 0x461   :  { %v3801_v41 = vmul.f32 %v9913_v14, %v3673_v36  ;;  %v3354_v59 = vadd.f32 -0.28449672, %v3226_v12  ;;  %v2906_v45 = vadd.f32 -1.4531521, %v2778_v23  ;;  %v4183_v18 = vmul.f32 1.442695, %v3995_v56 }
 0x462   :  { %v4889_v34 = vsel %vm4633_vm6, %v4505_v2, %v4761_v51  ;;  %v2460_v25 = vadd.f32 1.0, %v2332_v44  ;;  %v2396_v20 = vmul.f32 0.3275911, %v9965_v21  ;;  %v2009_v63 = vmul.f32 0.5, %v9838_v35 }
 0x463   :  { %v5017_v4 = vadd.f32 1.0, %v4889_v34  ;;  %v9967_v48 = vpop.eup %5973  ;;  %v4441_v32 = vmul.f32 %v5972_v5, %v3801_v41  ;;  %v3482_v8 = vmul.f32 %v9930_v27, %v3354_v59  ;;  %v3034_v6 = vmul.f32 %v9954_v29, %v2906_v45 }
 0x464   :  { %v2715_v14 = vmul.f32 1.0614054, %v9967_v48  ;;  %5981 = vrcp.f32 %v2460_v25  ;;  %v2524_v11 = vadd.f32 1.0, %v2396_v20  ;;  %vm4697_vm7 = vcmp.ge.f32.partialorder %v9851_v62, 0.0  ;;  %v1724_v25 = vpop.f32.mrf.mxu0 }
 0x465   :  { %v5145_v9 = vmul.f32 %v5017_v4, %v1945_v19  ;;  %v4569_v47 = vsub.f32 1.0, %v4441_v32  ;;  %v3610_v38 = vadd.f32 0.2548296, %v3482_v8  ;;  %v5976_v42 = vpop.eup %5975  ;;  %v1946_v57 = vmul.f32 0.5, %v9856_v58  ;;  %v1882_v19 = vpop.f32.mrf.mxu1 }
 0x466   :  { %v3162_v7 = vadd.f32 1.4214138, %v3034_v6  ;;  %v2843_v15 = vadd.f32 -1.4531521, %v2715_v14  ;;  %5983 = vpow2.f32 %v4183_v18  ;;  %v9978_v55 = vadd.f32 %v1722_v53, %v7480_v60 }
 0x467   :  { %5273 = vst [vmem:[#allocation7 + $0x1d0] sm:$0xff] %v5145_v9  ;;  %v4825_v61 = vsub.f32 0.0, %v4569_v47  ;;  %v3738_v39 = vmul.f32 %v9930_v27, %v3610_v38  ;;  %v4311_v43 = vmul.f32 1.442695, %v4059_v30  ;;  %5985 = vrcp.f32 %v2524_v11 }
 0x468   :  { %v3290_v35 = vmul.f32 %v9954_v29, %v3162_v7  ;;  %v2971_v50 = vmul.f32 %v9967_v48, %v2843_v15  ;;  %v3868_v58 = vsub.f32 0.0, %v9952_v1  ;;  %v9984_v52 = vmul.f32 0.70710677, %v9978_v55 }
 0x469   :  { %v4953_v49 = vsel %vm4697_vm7, %v4569_v47, %v4825_v61  ;;  %v4378_v62 = vmul.f32 %v5976_v42, %v3738_v39  ;;  %vm4634_vm8 = vcmp.ge.f32.partialorder %v9869_v28, 0.0  ;;  %v3932_v56 = vsub.f32 0.0, %v9965_v21 }
 0x46a   :  { %v5081_v16 = vadd.f32 1.0, %v4953_v49  ;;  %v3418_v27 = vadd.f32 -0.28449672, %v3290_v35  ;;  %v3099_v2 = vadd.f32 1.4214138, %v2971_v50  ;;  %v9987_v3 = vpop.eup %5977  ;;  %v9994_v51 = vadd.f32 %v1882_v19, %v7480_v60 }
 0x46b   :  { %v4506_v26 = vsub.f32 1.0, %v4378_v62  ;;  %v9991_v40 = vand.u32 2147483647, %v9984_v52  ;;  %v2779_v23 = vmul.f32 1.0614054, %v9987_v3  ;;  %v10000_v41 = vmul.f32 0.5, %v9885_v17 }
 0x46c   :  { %v5209_v36 = vmul.f32 %v5081_v16, %v2009_v63  ;;  %v3546_v12 = vmul.f32 %v9954_v29, %v3418_v27  ;;  %v3227_v5 = vmul.f32 %v9967_v48, %v3099_v2  ;;  %v5980_v44 = vpop.eup %5979  ;;  %v3996_v59 = vmul.f32 %v3868_v58, %v9952_v1 }
 0x46d   :  { %v4762_v34 = vsub.f32 0.0, %v4506_v26  ;;  %v2333_v4 = vmul.f32 0.3275911, %v9991_v40  ;;  %v2907_v18 = vadd.f32 -1.4531521, %v2779_v23  ;;  %5987 = vpow2.f32 %v4311_v43 }
 0x46e   :  { %5337 = vst [vmem:[#allocation7 + $0x3d0] sm:$0xff] %v5209_v36  ;;  %v3674_v45 = vadd.f32 0.2548296, %v3546_v12  ;;  %v3355_v60 = vadd.f32 -0.28449672, %v3227_v5  ;;  %v4060_v8 = vmul.f32 %v3932_v56, %v9965_v21  ;;  %v10019_v21 = vadd.f32 %v1724_v25, %v7482_v0 }
 0x46f   :  { %v4890_v32 = vsel %vm4634_vm8, %v4506_v26, %v4762_v34  ;;  %v2461_v30 = vadd.f32 1.0, %v2333_v4  ;;  %v10008_v20 = vmul.f32 0.70710677, %v9994_v51  ;;  %v3035_v6 = vmul.f32 %v9987_v3, %v2907_v18 }
 0x470   :  { %v5018_v17 = vadd.f32 1.0, %v4890_v32  ;;  %v3802_v1 = vmul.f32 %v9954_v29, %v3674_v45  ;;  %v3483_v9 = vmul.f32 %v9967_v48, %v3355_v60  ;;  %v4185_v53 = vmul.f32 1.442695, %v3996_v59  ;;  %v1884_v45 = vpop.f32.mrf.mxu1 }
 0x471   :  { %v10013_v14 = vpop.eup %5981  ;;  %5989 = vrcp.f32 %v2461_v30  ;;  %v10016_v28 = vand.u32 2147483647, %v10008_v20  ;;  %v3163_v11 = vadd.f32 1.4214138, %v3035_v6  ;;  %vm4698_vm9 = vcmp.ge.f32.partialorder %v9896_v46, 0.0 }
 0x472   :  { %v5146_v63 = vmul.f32 %v5018_v17, %v1946_v57  ;;  %v4442_v47 = vmul.f32 %v5980_v44, %v3802_v1  ;;  %v3611_v38 = vadd.f32 0.2548296, %v3483_v9  ;;  %v1947_v29 = vmul.f32 0.5, %v9899_v24 }
 0x473   :  { %v2716_v42 = vmul.f32 1.0614054, %v10013_v14  ;;  %v2397_v7 = vmul.f32 0.3275911, %v10016_v28  ;;  %v5984_v15 = vpop.eup %5983  ;;  %v3291_v35 = vmul.f32 %v9987_v3, %v3163_v11  ;;  %v4313_v50 = vmul.f32 1.442695, %v4060_v8 }
 0x474   :  { %5274 = vst [vmem:[#allocation7 + $0x1d8] sm:$0xff] %v5146_v63  ;;  %v4570_v61 = vsub.f32 1.0, %v4442_v47  ;;  %v3739_v39 = vmul.f32 %v9967_v48, %v3611_v38  ;;  %v10027_v57 = vpop.eup %5985  ;;  %5991 = vpow2.f32 %v4185_v53  ;;  %v10030_v49 = vmul.f32 0.70710677, %v10019_v21 }
 0x475   :  { %v2844_v43 = vadd.f32 -1.4531521, %v2716_v42  ;;  %v2525_v19 = vadd.f32 1.0, %v2397_v7  ;;  %v3419_v58 = vadd.f32 -0.28449672, %v3291_v35  ;;  %v3869_v48 = vsub.f32 0.0, %v9991_v40 }
 0x476   :  { %v4826_v24 = vsub.f32 0.0, %v4570_v61  ;;  %v4379_v62 = vmul.f32 %v5984_v15, %v3739_v39  ;;  %v2780_v16 = vmul.f32 1.0614054, %v10027_v57  ;;  %v2206_v2 = vand.u32 2147483647, %v10030_v49 }
 0x477   :  { %v2972_v27 = vmul.f32 %v10013_v14, %v2844_v43  ;;  %5993 = vrcp.f32 %v2525_v19  ;;  %v3547_v36 = vmul.f32 %v9987_v3, %v3419_v58  ;;  %vm4635_vm10 = vcmp.ge.f32.partialorder %v9911_v22, 0.0 }
 0x478   :  { %v4954_v26 = vsel %vm4698_vm9, %v4570_v61, %v4826_v24  ;;  %v4507_v56 = vsub.f32 1.0, %v4379_v62  ;;  %v2908_v12 = vadd.f32 -1.4531521, %v2780_v16  ;;  %v2334_v44 = vmul.f32 0.3275911, %v2206_v2 }
 0x479   :  { %v5082_v5 = vadd.f32 1.0, %v4954_v26  ;;  %v3100_v23 = vadd.f32 1.4214138, %v2972_v27  ;;  %v3675_v59 = vadd.f32 0.2548296, %v3547_v36  ;;  %5995 = vpow2.f32 %v4313_v50 }
 0x47a   :  { %v4763_v34 = vsub.f32 0.0, %v4507_v56  ;;  %v3036_v4 = vmul.f32 %v10027_v57, %v2908_v12  ;;  %v5988_v60 = vpop.eup %5987  ;;  %v3997_v25 = vmul.f32 %v3869_v48, %v9991_v40  ;;  %v2462_v32 = vadd.f32 1.0, %v2334_v44 }
 0x47b   :  { %v5210_v18 = vmul.f32 %v5082_v5, %v10000_v41  ;;  %v3228_v46 = vmul.f32 %v10013_v14, %v3100_v23  ;;  %v3803_v30 = vmul.f32 %v9987_v3, %v3675_v59  ;;  %v3933_v17 = vsub.f32 0.0, %v10016_v28 }
 0x47c   :  { %v4891_v8 = vsel %vm4635_vm10, %v4507_v56, %v4763_v34  ;;  %v3164_v22 = vadd.f32 1.4214138, %v3036_v4  ;;  %5997 = vrcp.f32 %v2462_v32  ;;  %v10047_v6 = vadd.f32 %v1884_v45, %v7482_v0 }
 0x47d   :  { %5338 = vst [vmem:[#allocation7 + $0x3d8] sm:$0xff] %v5210_v18  ;;  %v5019_v1 = vadd.f32 1.0, %v4891_v8  ;;  %v3356_v9 = vadd.f32 -0.28449672, %v3228_v46  ;;  %v4443_v41 = vmul.f32 %v5988_v60, %v3803_v30  ;;  %v4187_v38 = vmul.f32 1.442695, %v3997_v25 }
 0x47e   :  { %v10049_v53 = vpop.eup %5989  ;;  %v3292_v63 = vmul.f32 %v10027_v57, %v3164_v22  ;;  %v4061_v7 = vmul.f32 %v3933_v17, %v10016_v28  ;;  %v10056_v15 = vmul.f32 0.70710677, %v10047_v6  ;;  %v2011_v0 = vmul.f32 0.5, %v9919_v37 }
 0x47f   :  { %v5147_v40 = vmul.f32 %v5019_v1, %v1947_v29  ;;  %v3484_v47 = vmul.f32 %v10013_v14, %v3356_v9  ;;  %v2717_v3 = vmul.f32 1.0614054, %v10049_v53  ;;  %v4571_v11 = vsub.f32 1.0, %v4443_v41 }
 0x480   :  { %v3420_v42 = vadd.f32 -0.28449672, %v3292_v63  ;;  %v3870_v43 = vsub.f32 0.0, %v2206_v2  ;;  %v2270_v19 = vand.u32 2147483647, %v10056_v15  ;;  %vm4699_vm11 = vcmp.ge.f32.partialorder %v9928_v31, 0.0 }
 0x481   :  { %5275 = vst [vmem:[#allocation7 + $0x1e0] sm:$0xff] %v5147_v40  ;;  %v3612_v61 = vadd.f32 0.2548296, %v3484_v47  ;;  %v2845_v39 = vadd.f32 -1.4531521, %v2717_v3  ;;  %v5992_v35 = vpop.eup %5991  ;;  %v4827_v50 = vsub.f32 0.0, %v4571_v11  ;;  %5999 = vpow2.f32 %v4187_v38 }
 0x482   :  { %v3548_v29 = vmul.f32 %v10027_v57, %v3420_v42  ;;  %v4315_v37 = vmul.f32 1.442695, %v4061_v7  ;;  %v2398_v27 = vmul.f32 0.3275911, %v2270_v19  ;;  %v3998_v5 = vmul.f32 %v3870_v43, %v2206_v2 }
 0x483   :  { %v3740_v24 = vmul.f32 %v10013_v14, %v3612_v61  ;;  %v2973_v28 = vmul.f32 %v10049_v53, %v2845_v39  ;;  %v4955_v58 = vsel %vm4699_vm11, %v4571_v11, %v4827_v50  ;;  %vm4636_vm12 = vcmp.ge.f32.partialorder %v9948_v10, 0.0 }
 0x484   :  { %v5994_v62 = vpop.eup %5993  ;;  %v3676_v16 = vadd.f32 0.2548296, %v3548_v29  ;;  %v5083_v48 = vadd.f32 1.0, %v4955_v58  ;;  %v2526_v23 = vadd.f32 1.0, %v2398_v27  ;;  %v1948_v22 = vmul.f32 0.5, %v9936_v54 }
 0x485   :  { %v4380_v26 = vmul.f32 %v5992_v35, %v3740_v24  ;;  %v3101_v56 = vadd.f32 1.4214138, %v2973_v28  ;;  %v2781_v36 = vmul.f32 1.0614054, %v5994_v62  ;;  %v2012_v1 = vmul.f32 0.5, %v9943_v13 }
 0x486   :  { %v3804_v12 = vmul.f32 %v10027_v57, %v3676_v16  ;;  %v5996_v44 = vpop.eup %5995  ;;  %v5211_v31 = vmul.f32 %v5083_v48, %v2011_v0  ;;  %6001 = vrcp.f32 %v2526_v23  ;;  %v4189_v57 = vmul.f32 1.442695, %v3998_v5 }
 0x487   :  { %v4508_v34 = vsub.f32 1.0, %v4380_v26  ;;  %v3229_v14 = vmul.f32 %v10049_v53, %v3101_v56  ;;  %v2909_v59 = vadd.f32 -1.4531521, %v2781_v36  ;;  %6003 = vpow2.f32 %v4315_v37 }
 0x488   :  { %v4444_v4 = vmul.f32 %v5996_v44, %v3804_v12  ;;  %5339 = vst [vmem:[#allocation7 + $0x3e0] sm:$0xff] %v5211_v31  ;;  %vm4700_vm13 = vcmp.ge.f32.partialorder %v9958_v33, 0.0  ;;  %6005 = vpow2.f32 %v4189_v57  ;;  %v3934_v3 = vsub.f32 0.0, %v2270_v19 }
 0x489   :  { %v4764_v45 = vsub.f32 0.0, %v4508_v34  ;;  %v3357_v60 = vadd.f32 -0.28449672, %v3229_v14  ;;  %v3037_v18 = vmul.f32 %v5994_v62, %v2909_v59  ;;  %v5998_v46 = vpop.eup %5997  ;;  %vm4637_vm14 = vcmp.ge.f32.partialorder %v9984_v52, 0.0 }
 0x48a   :  { %v4572_v25 = vsub.f32 1.0, %v4444_v4  ;;  %v2718_v30 = vmul.f32 1.0614054, %v5998_v46  ;;  %v4062_v35 = vmul.f32 %v3934_v3, %v2270_v19  ;;  %v1949_v56 = vmul.f32 0.5, %v9978_v55 }
 0x48b   :  { %v4892_v2 = vsel %vm4636_vm12, %v4508_v34, %v4764_v45  ;;  %v3485_v32 = vmul.f32 %v10049_v53, %v3357_v60  ;;  %v3165_v8 = vadd.f32 1.4214138, %v3037_v18  ;;  %vm4701_vm15 = vcmp.ge.f32.partialorder %v10008_v20, 0.0 }
 0x48c   :  { %v5020_v17 = vadd.f32 1.0, %v4892_v2  ;;  %v4828_v9 = vsub.f32 0.0, %v4572_v25  ;;  %v2846_v40 = vadd.f32 -1.4531521, %v2718_v30  ;;  %v4317_v37 = vmul.f32 1.442695, %v4062_v35 }
 0x48d   :  { %v3613_v41 = vadd.f32 0.2548296, %v3485_v32  ;;  %v3293_v63 = vmul.f32 %v5994_v62, %v3165_v8  ;;  %v2013_v4 = vmul.f32 0.5, %v9994_v51  ;;  %vm4638_vm0 = vcmp.ge.f32.partialorder %v10030_v49, 0.0 }
 0x48e   :  { %v5148_v47 = vmul.f32 %v5020_v17, %v1948_v22  ;;  %v4956_v10 = vsel %vm4700_vm13, %v4572_v25, %v4828_v9  ;;  %v2974_v7 = vmul.f32 %v5998_v46, %v2846_v40  ;;  %v6000_v0 = vpop.eup %5999  ;;  %6007 = vpow2.f32 %v4317_v37 }
 0x48f   :  { %v5084_v38 = vadd.f32 1.0, %v4956_v10  ;;  %v3741_v11 = vmul.f32 %v10049_v53, %v3613_v41  ;;  %v3421_v42 = vadd.f32 -0.28449672, %v3293_v63  ;;  %vm4702_vm1 = vcmp.ge.f32.partialorder %v10056_v15, 0.0 }
 0x490   :  { %5276 = vst [vmem:[#allocation7 + $0x1e8] sm:$0xff] %v5148_v47  ;;  %v3102_v39 = vadd.f32 1.4214138, %v2974_v7  ;;  %v2014_v49 = vmul.f32 0.5, %v10047_v6 }
 0x491   :  { %v5212_v54 = vmul.f32 %v5084_v38, %v2012_v1  ;;  %v4381_v61 = vmul.f32 %v6000_v0, %v3741_v11  ;;  %v3549_v13 = vmul.f32 %v5994_v62, %v3421_v42 }
 0x492   :  { %v3230_v29 = vmul.f32 %v5998_v46, %v3102_v39 }
 0x493   :  { %5340 = vst [vmem:[#allocation7 + $0x3e8] sm:$0xff] %v5212_v54  ;;  %v4509_v33 = vsub.f32 1.0, %v4381_v61  ;;  %v3677_v50 = vadd.f32 0.2548296, %v3549_v13  ;;  %v6002_v43 = vpop.eup %6001 }
 0x494   :  { %v3358_v58 = vadd.f32 -0.28449672, %v3230_v29  ;;  %v6004_v16 = vpop.eup %6003  ;;  %v2782_v53 = vmul.f32 1.0614054, %v6002_v43 }
 0x495   :  { %v4765_v24 = vsub.f32 0.0, %v4509_v33  ;;  %v3805_v28 = vmul.f32 %v5994_v62, %v3677_v50  ;;  %v6006_v31 = vpop.eup %6005 }
 0x496   :  { %v3486_v26 = vmul.f32 %v5998_v46, %v3358_v58  ;;  %v2910_v19 = vadd.f32 -1.4531521, %v2782_v53 }
 0x497   :  { %v4893_v27 = vsel %vm4637_vm14, %v4509_v33, %v4765_v24  ;;  %v4445_v48 = vmul.f32 %v6004_v16, %v3805_v28 }
 0x498   :  { %v5021_v36 = vadd.f32 1.0, %v4893_v27  ;;  %v3614_v5 = vadd.f32 0.2548296, %v3486_v26  ;;  %v3038_v44 = vmul.f32 %v6002_v43, %v2910_v19 }
 0x499   :  { %v4573_v12 = vsub.f32 1.0, %v4445_v48 }
 0x49a   :  { %v5149_v23 = vmul.f32 %v5021_v36, %v1949_v56  ;;  %v3742_v34 = vmul.f32 %v5998_v46, %v3614_v5  ;;  %v3166_v52 = vadd.f32 1.4214138, %v3038_v44  ;;  %v1950_v46 = vmul.f32 0.5, %v10019_v21 }
 0x49b   :  { %v4829_v62 = vsub.f32 0.0, %v4573_v12  ;;  %v6008_v17 = vpop.eup %6007 }
 0x49c   :  { %5277 = vst [vmem:[#allocation7 + $0x1f0] sm:$0xff] %v5149_v23  ;;  %v4382_v59 = vmul.f32 %v6006_v31, %v3742_v34  ;;  %v3294_v55 = vmul.f32 %v6002_v43, %v3166_v52 }
 0x49d   :  { %v4957_v14 = vsel %vm4701_vm15, %v4573_v12, %v4829_v62 }
 0x49e   :  { %v5085_v45 = vadd.f32 1.0, %v4957_v14  ;;  %v4510_v60 = vsub.f32 1.0, %v4382_v59  ;;  %v3422_v25 = vadd.f32 -0.28449672, %v3294_v55 }
 0x4a0   :  { %v5213_v18 = vmul.f32 %v5085_v45, %v2013_v4  ;;  %v4766_v57 = vsub.f32 0.0, %v4510_v60  ;;  %v3550_v2 = vmul.f32 %v6002_v43, %v3422_v25 }
 0x4a2   :  { %5341 = vst [vmem:[#allocation7 + $0x3f0] sm:$0xff] %v5213_v18  ;;  %v4894_v32 = vsel %vm4638_vm0, %v4510_v60, %v4766_v57  ;;  %v3678_v20 = vadd.f32 0.2548296, %v3550_v2 }
 0x4a3   :  { %v5022_v8 = vadd.f32 1.0, %v4894_v32 }
 0x4a4   :  { %v3806_v22 = vmul.f32 %v6002_v43, %v3678_v20 }
 0x4a5   :  { %v5150_v30 = vmul.f32 %v5022_v8, %v1950_v46 }
 0x4a6   :  { %v4446_v51 = vmul.f32 %v6008_v17, %v3806_v22 }
 0x4a7   :  { %5278 = vst [vmem:[#allocation7 + $0x1f8] sm:$0xff] %v5150_v30 }
 0x4a8   :  { %v4574_v1 = vsub.f32 1.0, %v4446_v51 }
 0x4aa   :  { %v4830_v9 = vsub.f32 0.0, %v4574_v1 }
 0x4ac   :  { %v4958_v41 = vsel %vm4702_vm1, %v4574_v1, %v4830_v9 }
 0x4ad   :  { %v5086_v63 = vadd.f32 1.0, %v4958_v41 }
 0x4af   :  { %v5214_v40 = vmul.f32 %v5086_v63, %v2014_v49 }
 0x4b1   :  { %5342 = vst [vmem:[#allocation7 + $0x3f8] sm:$0xff] %v5214_v40 }
 0x4b2   :  { %6121 = shalt.err (!%p6118_p5)
}
 0x4b3   :  { %5354 = dma.vmem_to_hbm [thread:$0]  %s5349_s7, 16384, %s10089_s3, [#allocation4], %s6143_s29, %s6143_s29, %s6144_s30  }
 0x4b4   :  { %6134 = dma.done.wait [#allocation4], 16384  }
 0x4b5   :  { %6135 = vsyncadd [#allocation4], 4294950912 }
 0x4b6   :  { %6136 = dma.done.wait [#allocation9], 16384  }
 0x4b7   :  { %6137 = vsyncadd [#allocation9], 4294950912 }
 0x4b8   :  { %5373 = vsyncpa [#allocation3], 1 }
 0x4b9   :  { %5374 = vsyncpa [#allocation6], 1 }
 0x4ba   :  { %5375 = vsyncpa [#allocation4], 1 }
 0x4bb   :  { %5376 = vsyncpa [#allocation9], 1 }

</bundles_post_ra>
